<compile_context>
chip_gen: v5e
topology: v5e:2x2
jax: 0.10.0
libtpu: 0.0.40
codegen_flags: <defaults>
</compile_context>

<pallas_src>
import jax
import jax.numpy as jnp
from jax.experimental import pallas as pl
from jax.experimental.pallas import tpu as pltpu

CONV_CH = 16      # conv_channels
HIDDEN = 32       # lstm_hidden_size
KSIZE = 5
PAD = 2
BN_EPS = 1e-5


def _mish(x):
    return x * jnp.tanh(jax.nn.softplus(x))


# ---------------------------------------------------------------------------
# Fused kernel: conv1 -> mish -> conv2 -> mish -> BN(eval) -> fc_small -> mish
#               -> 2-layer bidirectional LSTM (length-masked) -> final fc.
# Rows of all (T*B, ...) tensors are time-major: row = t*B + b.
# ---------------------------------------------------------------------------
def cnn_bilstm_kernel(xcols_ref, len_ref,
                      w1_ref, b1_ref, w2_ref, b2_ref, bns_ref, bnb_ref,
                      wfs_ref, bfs_ref,
                      wih0_ref, whh0_ref, b0_ref,
                      wih1_ref, whh1_ref, b1l_ref,
                      wfc_ref, bfc_ref,
                      out_ref):
    TB = xcols_ref.shape[0]           # T * B
    B = len_ref.shape[0]
    T = TB // B
    C = w1_ref.shape[1]
    H = HIDDEN
    G = 4 * H
    f32 = jnp.float32

    lens = len_ref[...]               # (B, 1) int32

    # ------------------------- CNN stage (one shot, off the serial path) --------
    # conv1 (in_channels=1, K=5): 5 broadcast MACs on the VPU (K too small for MXU).
    xc = xcols_ref[...]                                                  # (TB, K)
    w1 = w1_ref[...]                                                     # (K, C)
    h1 = jnp.zeros((TB, C), f32) + b1_ref[...]
    for k in range(KSIZE):
        h1 = h1 + xc[:, k:k + 1] * w1[k:k + 1, :]
    h1 = _mish(h1)                                                       # (TB, C)

    # conv2: accumulate 5 shifted-tap matmuls (no wide lane-concat im2col buffer).
    # Rows are time-major, so a +k timestep tap is a row shift of k*B in the
    # zero-padded buffer.
    zpad = jnp.zeros((PAD * B, C), f32)
    h1p = jnp.concatenate([zpad, h1, zpad], axis=0)                      # ((T+4)*B, C)
    acc2 = jnp.zeros((TB, C), f32)
    for k in range(KSIZE):
        tap = h1p[k * B:k * B + TB, :]
        acc2 = acc2 + jnp.dot(tap, w2_ref[k], preferred_element_type=f32)
    h2 = _mish(acc2 + b2_ref[...])                                       # (TB, C)

    # BatchNorm1d (eval) folded to per-channel scale/shift.
    h3 = h2 * bns_ref[...] + bnb_ref[...]

    # fc_small + mish
    feats = _mish(jnp.dot(h3, wfs_ref[...], preferred_element_type=f32)
                  + bfs_ref[...])                                        # (TB, C)

    # ------------------------- hoisted LSTM input projection (layer 0) ----------
    # Columns [0:4H] = fwd gates, [4H:8H] = bwd gates; gate order [i, f, o, g].
    zin0 = jnp.dot(feats, wih0_ref[...], preferred_element_type=f32) + b0_ref[...]

    # ------------------------- constants hoisted out of both recurrences --------
    B2 = 2 * B
    row2 = jax.lax.broadcasted_iota(jnp.int32, (B2, 1), 0)
    rows_is_fwd = row2 < B                                               # (2B, 1)
    lens2 = jnp.concatenate([lens, lens], axis=0)                        # (2B, 1)
    lensm1 = lens - 1
    rbd = jax.lax.broadcasted_iota(jnp.int32, (B2, 2 * H), 0)
    cbd = jax.lax.broadcasted_iota(jnp.int32, (B2, 2 * H), 1)
    bd_sel = (rbd < B) == (cbd < H)        # block-diagonal selector [[hf,0],[0,hb]]

    step_mask = []                         # (2B,1): fwd rows t<len, bwd rows t<len
    cap_mask = []                          # (B,1):  backward capture at t == len-1
    for s in range(T):
        tf, tb = s, T - 1 - s
        t_stk = jnp.where(rows_is_fwd, tf, tb)
        step_mask.append(t_stk < lens2)
        cap_mask.append(tb == lensm1)

    zero_bd = jnp.zeros((B2, 2 * H), f32)
    zeros_st = jnp.zeros((B2, H), f32)

    def gates(z, c):
        # gate order [i, f, o, g]: one sigmoid push over 3H lanes, one tanh(g).
        sg = jax.nn.sigmoid(z[:, 0:3 * H])
        ig = sg[:, 0:H]
        fg = sg[:, H:2 * H]
        og = sg[:, 2 * H:3 * H]
        gg = jnp.tanh(z[:, 3 * H:4 * H])
        c_new = fg * c + ig * gg
        h_new = og * jnp.tanh(c_new)
        return h_new, c_new

    def run_layer(zin, whh, capture):
        # zin: (TB, 8H) [fwd | bwd] gate pre-activations; whh: (2H, 4H) = [Wf ; Wb].
        # State stacked on sublanes: rows [0:B] = fwd, rows [B:2B] = bwd.
        h_st = zeros_st
        c_st = zeros_st
        rec_b = jnp.zeros((B, H), f32)
        outs = []
        for s in range(T):
            tf, tb = s, T - 1 - s
            # block-diagonal state -> ONE shared recurrent matmul for both dirs
            h_bd = jnp.where(bd_sel,
                             jnp.concatenate([h_st, h_st], axis=-1), zero_bd)
            zh = jnp.dot(h_bd, whh, preferred_element_type=f32)         # (2B, 4H)
            # per-step input slab: independent of state -> off the serial chain
            z_in = jnp.concatenate([zin[tf * B:(tf + 1) * B, 0:G],
                                    zin[tb * B:(tb + 1) * B, G:2 * G]], axis=0)
            h_new, c_new = gates(zh + z_in, c_st)
            m = step_mask[s]
            h_st = jnp.where(m, h_new, h_st)    # packed-seq masking (both dirs)
            c_st = jnp.where(m, c_new, c_st)
            if capture:
                # backward output at t = len-1 (its first valid step).
                rec_b = jnp.where(cap_mask[s], h_st[B:, :], rec_b)
            else:
                outs.append(h_st)               # register-resident, no VMEM stores
        return h_st, rec_b, outs

    # ------------------------- LSTM layer 0 -------------------------------------
    _, _, outs0 = run_layer(zin0, whh0_ref[...], capture=False)
    # Assemble the layer-1 input (time-major rows, lanes [fwd | bwd] at same t).
    # (fwd values at t >= len are stale but masked out of layer 1.)
    h0f = jnp.concatenate([outs0[t][0:B, :] for t in range(T)], axis=0)          # (TB, H)
    h0b = jnp.concatenate([outs0[T - 1 - t][B:, :] for t in range(T)], axis=0)   # (TB, H)
    h0cat = jnp.concatenate([h0f, h0b], axis=-1)                                 # (TB, 2H)

    # ------------------------- LSTM layer 1 -------------------------------------
    zin1 = jnp.dot(h0cat, wih1_ref[...], preferred_element_type=f32) + b1l_ref[...]
    h_fin, rec_b, _ = run_layer(zin1, whh1_ref[...], capture=True)
    hf_last = h_fin[0:B, :]                     # forward hidden at t = len-1

    # Dropout: identity in eval mode.
    hcat = jnp.concatenate([hf_last, rec_b], axis=-1)                            # (B, 2H)
    # final fc as VPU multiply + lane reduction (avoid an N=1 MXU push).
    out_ref[...] = jnp.sum(hcat * wfc_ref[...], axis=-1, keepdims=True) + bfc_ref[...]


# ---------------------------------------------------------------------------
# Wrapper: tiny plain-JAX preprocessing (conv1 im2col, lengths reshape) and one
# fused pallas_call with everything resident in VMEM (total footprint << 1 MiB).
# ---------------------------------------------------------------------------
def cnn_bilstm_forward(x, lengths, params):
    B, T = x.shape
    x_pad = jnp.pad(x.astype(jnp.float32), ((0, 0), (PAD, PAD)))         # (B, T+4)
    # conv1 im2col, time-major flat rows (row = t*B + b): (T*B, K)
    xcols = jnp.stack([x_pad[:, k:k + T] for k in range(KSIZE)], axis=-1)  # (B, T, K)
    xcols = jnp.transpose(xcols, (1, 0, 2)).reshape(T * B, KSIZE)
    lens = lengths.reshape(B, 1).astype(jnp.int32)

    args = (xcols, lens,
            params['w1'], params['b1'], params['w2'], params['b2'],
            params['bn_scale'], params['bn_shift'],
            params['w_fc_small'], params['b_fc_small'],
            params['wih0'], params['whh0'], params['b0'],
            params['wih1'], params['whh1'], params['b1l'],
            params['w_fc'], params['b_fc'])

    return pl.pallas_call(
        cnn_bilstm_kernel,
        in_specs=[pl.BlockSpec(memory_space=pltpu.MemorySpace.VMEM) for _ in args],
        out_specs=pl.BlockSpec(memory_space=pltpu.MemorySpace.VMEM),
        out_shape=jax.ShapeDtypeStruct((B, 1), jnp.float32),
    )(*args)


# ---------------------------------------------------------------------------
# Deterministic parameter init (PyTorch default-init shapes/bounds), pre-packed
# into the fused kernel layouts:
#   - LSTM gate rows reordered torch [i,f,g,o] -> kernel [i,f,o,g]
#   - wih*: (in, 8H) columns [fwd gates | bwd gates]
#   - whh*: (2H, 4H) rows [Whh_fwd ; Whh_bwd] (sublane-stacked directions)
# ---------------------------------------------------------------------------
def init_params(key):
    C, H = CONV_CH, HIDDEN
    keys = list(jax.random.split(key, 32))
    it = iter(keys)

    def u(shape, bound):
        return jax.random.uniform(next(it), shape, jnp.float32, -bound, bound)

    def reorder(w):
        # torch gate order [i, f, g, o] -> kernel order [i, f, o, g] (axis 0)
        return jnp.concatenate([w[0:H], w[H:2 * H], w[3 * H:4 * H], w[2 * H:3 * H]],
                               axis=0)

    # conv1: torch weight (C, 1, K)
    b1w = 1.0 / (1 * KSIZE) ** 0.5
    conv1_w = u((C, 1, KSIZE), b1w)
    conv1_b = u((C,), b1w)
    # conv2: torch weight (C, C, K)
    b2w = 1.0 / (C * KSIZE) ** 0.5
    conv2_w = u((C, C, KSIZE), b2w)
    conv2_b = u((C,), b2w)
    # BatchNorm1d default init, eval mode -> folded scale/shift
    gamma = jnp.ones((C,), jnp.float32)
    beta = jnp.zeros((C,), jnp.float32)
    r_mean = jnp.zeros((C,), jnp.float32)
    r_var = jnp.ones((C,), jnp.float32)
    bn_scale = gamma / jnp.sqrt(r_var + BN_EPS)
    bn_shift = beta - r_mean * bn_scale
    # fc_small: torch weight (C, C)
    bfs = 1.0 / C ** 0.5
    fcs_w = u((C, C), bfs)
    fcs_b = u((C,), bfs)

    # LSTM (2 layers, bidirectional): torch weights (4H, in), (4H, H), biases (4H,)
    bl = 1.0 / H ** 0.5

    def lstm_dir(in_size):
        wih = reorder(u((4 * H, in_size), bl))
        whh = reorder(u((4 * H, H), bl))
        bih = reorder(u((4 * H,), bl))
        bhh = reorder(u((4 * H,), bl))
        return wih.T, whh.T, (bih + bhh)         # (in, 4H), (H, 4H), (4H,)

    wih0f, whh0f, b0f = lstm_dir(C)
    wih0b, whh0b, b0b = lstm_dir(C)
    wih1f, whh1f, b1f = lstm_dir(2 * H)
    wih1b, whh1b, b1b = lstm_dir(2 * H)
    # final fc: torch weight (1, 2H)
    bfw = 1.0 / (2 * H) ** 0.5
    fc_w = u((1, 2 * H), bfw)
    fc_b = u((1,), bfw)

    return dict(
        w1=jnp.transpose(conv1_w, (2, 1, 0))[:, 0, :],                  # (K, C)
        b1=conv1_b.reshape(1, C),
        w2=jnp.transpose(conv2_w, (2, 1, 0)),                           # (K, Cin, Cout)
        b2=conv2_b.reshape(1, C),
        bn_scale=bn_scale.reshape(1, C),
        bn_shift=bn_shift.reshape(1, C),
        w_fc_small=fcs_w.T,                                             # (C, C): x @ W^T
        b_fc_small=fcs_b.reshape(1, C),
        # layer 0
        wih0=jnp.concatenate([wih0f, wih0b], axis=1),                   # (C, 8H)
        whh0=jnp.concatenate([whh0f, whh0b], axis=0),                   # (2H, 4H)
        b0=jnp.concatenate([b0f, b0b]).reshape(1, 8 * H),
        # layer 1: input is concat([fwd, bwd]) of layer-0 outputs
        wih1=jnp.concatenate([wih1f, wih1b], axis=1),                   # (2H, 8H)
        whh1=jnp.concatenate([whh1f, whh1b], axis=0),                   # (2H, 4H)
        b1l=jnp.concatenate([b1f, b1b]).reshape(1, 8 * H),
        w_fc=fc_w,                                                      # (1, 2H)
        b_fc=fc_b.reshape(1, 1),
    )


if __name__ == "__main__":
    B, T = 2, 16
    key = jax.random.PRNGKey(0)
    kx, kp = jax.random.split(key)
    x = jax.random.normal(kx, (B, T), jnp.float32)        # [batch, T] padded sequences
    lengths = jnp.array([16, 11], dtype=jnp.int32)        # original lengths (<= T)
    params = init_params(kp)

    out = jax.jit(cnn_bilstm_forward)(x, lengths, params)
    out = jax.block_until_ready(out)
    assert out.shape == (B, 1)
    assert bool(jnp.all(jnp.isfinite(out)))
    print("KERNEL_OK")
</pallas_src>

<mosaic_0001>
module attributes {stable_mosaic.version = 11 : i64} {
  func.func @cnn_bilstm_kernel(%arg0: memref<32x5xf32, #tpu.memory_space<vmem>>, %arg1: memref<2x1xi32, #tpu.memory_space<vmem>>, %arg2: memref<5x16xf32, #tpu.memory_space<vmem>>, %arg3: memref<1x16xf32, #tpu.memory_space<vmem>>, %arg4: memref<5x16x16xf32, #tpu.memory_space<vmem>>, %arg5: memref<1x16xf32, #tpu.memory_space<vmem>>, %arg6: memref<1x16xf32, #tpu.memory_space<vmem>>, %arg7: memref<1x16xf32, #tpu.memory_space<vmem>>, %arg8: memref<16x16xf32, #tpu.memory_space<vmem>>, %arg9: memref<1x16xf32, #tpu.memory_space<vmem>>, %arg10: memref<16x256xf32, #tpu.memory_space<vmem>>, %arg11: memref<64x128xf32, #tpu.memory_space<vmem>>, %arg12: memref<1x256xf32, #tpu.memory_space<vmem>>, %arg13: memref<64x256xf32, #tpu.memory_space<vmem>>, %arg14: memref<64x128xf32, #tpu.memory_space<vmem>>, %arg15: memref<1x256xf32, #tpu.memory_space<vmem>>, %arg16: memref<1x64xf32, #tpu.memory_space<vmem>>, %arg17: memref<1x1xf32, #tpu.memory_space<vmem>>, %arg18: memref<2x1xf32, #tpu.memory_space<vmem>>) attributes {dimension_semantics = [], scalar_prefetch = 0 : i64, scratch_operands = 0 : i64, tpu.core_type = #tpu.core_type<tc>} {
    %c0 = arith.constant 0 : index
    %c0_0 = arith.constant 0 : index
    %0 = vector.load %arg1[%c0, %c0_0] : memref<2x1xi32, #tpu.memory_space<vmem>>, vector<2x1xi32>
    %c0_1 = arith.constant 0 : index
    %c0_2 = arith.constant 0 : index
    %1 = vector.load %arg0[%c0_1, %c0_2] : memref<32x5xf32, #tpu.memory_space<vmem>>, vector<32x5xf32>
    %c0_3 = arith.constant 0 : index
    %c0_4 = arith.constant 0 : index
    %2 = vector.load %arg2[%c0_3, %c0_4] : memref<5x16xf32, #tpu.memory_space<vmem>>, vector<5x16xf32>
    %cst = arith.constant 0.000000e+00 : f32
    %3 = vector.broadcast %cst : f32 to vector<32x16xf32>
    %c0_5 = arith.constant 0 : index
    %c0_6 = arith.constant 0 : index
    %4 = vector.load %arg3[%c0_5, %c0_6] : memref<1x16xf32, #tpu.memory_space<vmem>>, vector<1x16xf32>
    %5 = vector.broadcast %4 : vector<1x16xf32> to vector<32x16xf32>
    %6 = arith.addf %3, %5 : vector<32x16xf32>
    %7 = vector.extract_strided_slice %1 {offsets = [0, 0], sizes = [32, 1], strides = [1, 1]} : vector<32x5xf32> to vector<32x1xf32>
    %8 = vector.extract_strided_slice %2 {offsets = [0, 0], sizes = [1, 16], strides = [1, 1]} : vector<5x16xf32> to vector<1x16xf32>
    %9 = vector.broadcast %7 : vector<32x1xf32> to vector<32x16xf32>
    %10 = vector.broadcast %8 : vector<1x16xf32> to vector<32x16xf32>
    %11 = arith.mulf %9, %10 : vector<32x16xf32>
    %12 = arith.addf %6, %11 : vector<32x16xf32>
    %13 = vector.extract_strided_slice %1 {offsets = [0, 1], sizes = [32, 1], strides = [1, 1]} : vector<32x5xf32> to vector<32x1xf32>
    %14 = vector.extract_strided_slice %2 {offsets = [1, 0], sizes = [1, 16], strides = [1, 1]} : vector<5x16xf32> to vector<1x16xf32>
    %15 = vector.broadcast %13 : vector<32x1xf32> to vector<32x16xf32>
    %16 = vector.broadcast %14 : vector<1x16xf32> to vector<32x16xf32>
    %17 = arith.mulf %15, %16 : vector<32x16xf32>
    %18 = arith.addf %12, %17 : vector<32x16xf32>
    %19 = vector.extract_strided_slice %1 {offsets = [0, 2], sizes = [32, 1], strides = [1, 1]} : vector<32x5xf32> to vector<32x1xf32>
    %20 = vector.extract_strided_slice %2 {offsets = [2, 0], sizes = [1, 16], strides = [1, 1]} : vector<5x16xf32> to vector<1x16xf32>
    %21 = vector.broadcast %19 : vector<32x1xf32> to vector<32x16xf32>
    %22 = vector.broadcast %20 : vector<1x16xf32> to vector<32x16xf32>
    %23 = arith.mulf %21, %22 : vector<32x16xf32>
    %24 = arith.addf %18, %23 : vector<32x16xf32>
    %25 = vector.extract_strided_slice %1 {offsets = [0, 3], sizes = [32, 1], strides = [1, 1]} : vector<32x5xf32> to vector<32x1xf32>
    %26 = vector.extract_strided_slice %2 {offsets = [3, 0], sizes = [1, 16], strides = [1, 1]} : vector<5x16xf32> to vector<1x16xf32>
    %27 = vector.broadcast %25 : vector<32x1xf32> to vector<32x16xf32>
    %28 = vector.broadcast %26 : vector<1x16xf32> to vector<32x16xf32>
    %29 = arith.mulf %27, %28 : vector<32x16xf32>
    %30 = arith.addf %24, %29 : vector<32x16xf32>
    %31 = vector.extract_strided_slice %1 {offsets = [0, 4], sizes = [32, 1], strides = [1, 1]} : vector<32x5xf32> to vector<32x1xf32>
    %32 = vector.extract_strided_slice %2 {offsets = [4, 0], sizes = [1, 16], strides = [1, 1]} : vector<5x16xf32> to vector<1x16xf32>
    %33 = vector.broadcast %31 : vector<32x1xf32> to vector<32x16xf32>
    %34 = vector.broadcast %32 : vector<1x16xf32> to vector<32x16xf32>
    %35 = arith.mulf %33, %34 : vector<32x16xf32>
    %36 = arith.addf %30, %35 : vector<32x16xf32>
    %cst_7 = arith.constant 0.000000e+00 : f32
    %37 = vector.broadcast %cst_7 : f32 to vector<32x16xf32>
    %38 = arith.maximumf %36, %37 : vector<32x16xf32>
    %39 = vector.broadcast %cst_7 : f32 to vector<32x16xf32>
    %40 = arith.subf %36, %39 : vector<32x16xf32>
    %41 = arith.cmpf one, %40, %40 : vector<32x16xf32>
    %42 = vector.broadcast %cst_7 : f32 to vector<32x16xf32>
    %43 = arith.addf %36, %42 : vector<32x16xf32>
    %44 = math.absf %40 : vector<32x16xf32>
    %cst_8 = arith.constant 0.000000e+00 : f32
    %45 = vector.broadcast %cst_8 : f32 to vector<32x16xf32>
    %46 = arith.subf %45, %44 : vector<32x16xf32>
    %47 = math.exp %46 : vector<32x16xf32>
    %48 = math.log1p %47 : vector<32x16xf32>
    %49 = arith.addf %38, %48 : vector<32x16xf32>
    %50 = arith.select %41, %43, %49 : vector<32x16xi1>, vector<32x16xf32>
    %51 = math.tanh %50 : vector<32x16xf32>
    %52 = arith.mulf %36, %51 : vector<32x16xf32>
    %cst_9 = arith.constant 0.000000e+00 : f32
    %53 = vector.broadcast %cst_9 : f32 to vector<4x16xf32>
    %54 = tpu.concatenate %53, %52, %53 in 0 : vector<4x16xf32>, vector<32x16xf32>, vector<4x16xf32> -> vector<40x16xf32>
    %cst_10 = arith.constant 0.000000e+00 : f32
    %55 = vector.broadcast %cst_10 : f32 to vector<32x16xf32>
    %56 = vector.extract_strided_slice %54 {offsets = [0, 0], sizes = [32, 16], strides = [1, 1]} : vector<40x16xf32> to vector<32x16xf32>
    %c0_11 = arith.constant 0 : index
    %c0_12 = arith.constant 0 : index
    %c0_13 = arith.constant 0 : index
    %57 = vector.load %arg4[%c0_11, %c0_12, %c0_13] : memref<5x16x16xf32, #tpu.memory_space<vmem>>, vector<1x16x16xf32>
    %58 = vector.shape_cast %57 : vector<1x16x16xf32> to vector<16x16xf32>
    %cst_14 = arith.constant dense<0.000000e+00> : vector<32x16xf32>
    %59 = tpu.matmul %56, %58, %cst_14 {dimension_numbers = #tpu.dot_dimension_numbers<[1], [0], [0], [1], [0, 0, 1, 1], [], []>} : vector<32x16xf32>, vector<16x16xf32>, vector<32x16xf32> -> vector<32x16xf32>
    %60 = arith.addf %55, %59 : vector<32x16xf32>
    %61 = vector.extract_strided_slice %54 {offsets = [2, 0], sizes = [32, 16], strides = [1, 1]} : vector<40x16xf32> to vector<32x16xf32>
    %c1 = arith.constant 1 : index
    %c0_15 = arith.constant 0 : index
    %c0_16 = arith.constant 0 : index
    %62 = vector.load %arg4[%c1, %c0_15, %c0_16] : memref<5x16x16xf32, #tpu.memory_space<vmem>>, vector<1x16x16xf32>
    %63 = vector.shape_cast %62 : vector<1x16x16xf32> to vector<16x16xf32>
    %cst_17 = arith.constant dense<0.000000e+00> : vector<32x16xf32>
    %64 = tpu.matmul %61, %63, %cst_17 {dimension_numbers = #tpu.dot_dimension_numbers<[1], [0], [0], [1], [0, 0, 1, 1], [], []>} : vector<32x16xf32>, vector<16x16xf32>, vector<32x16xf32> -> vector<32x16xf32>
    %65 = arith.addf %60, %64 : vector<32x16xf32>
    %66 = vector.extract_strided_slice %54 {offsets = [4, 0], sizes = [32, 16], strides = [1, 1]} : vector<40x16xf32> to vector<32x16xf32>
    %c2 = arith.constant 2 : index
    %c0_18 = arith.constant 0 : index
    %c0_19 = arith.constant 0 : index
    %67 = vector.load %arg4[%c2, %c0_18, %c0_19] : memref<5x16x16xf32, #tpu.memory_space<vmem>>, vector<1x16x16xf32>
    %68 = vector.shape_cast %67 : vector<1x16x16xf32> to vector<16x16xf32>
    %cst_20 = arith.constant dense<0.000000e+00> : vector<32x16xf32>
    %69 = tpu.matmul %66, %68, %cst_20 {dimension_numbers = #tpu.dot_dimension_numbers<[1], [0], [0], [1], [0, 0, 1, 1], [], []>} : vector<32x16xf32>, vector<16x16xf32>, vector<32x16xf32> -> vector<32x16xf32>
    %70 = arith.addf %65, %69 : vector<32x16xf32>
    %71 = vector.extract_strided_slice %54 {offsets = [6, 0], sizes = [32, 16], strides = [1, 1]} : vector<40x16xf32> to vector<32x16xf32>
    %c3 = arith.constant 3 : index
    %c0_21 = arith.constant 0 : index
    %c0_22 = arith.constant 0 : index
    %72 = vector.load %arg4[%c3, %c0_21, %c0_22] : memref<5x16x16xf32, #tpu.memory_space<vmem>>, vector<1x16x16xf32>
    %73 = vector.shape_cast %72 : vector<1x16x16xf32> to vector<16x16xf32>
    %cst_23 = arith.constant dense<0.000000e+00> : vector<32x16xf32>
    %74 = tpu.matmul %71, %73, %cst_23 {dimension_numbers = #tpu.dot_dimension_numbers<[1], [0], [0], [1], [0, 0, 1, 1], [], []>} : vector<32x16xf32>, vector<16x16xf32>, vector<32x16xf32> -> vector<32x16xf32>
    %75 = arith.addf %70, %74 : vector<32x16xf32>
    %76 = vector.extract_strided_slice %54 {offsets = [8, 0], sizes = [32, 16], strides = [1, 1]} : vector<40x16xf32> to vector<32x16xf32>
    %c4 = arith.constant 4 : index
    %c0_24 = arith.constant 0 : index
    %c0_25 = arith.constant 0 : index
    %77 = vector.load %arg4[%c4, %c0_24, %c0_25] : memref<5x16x16xf32, #tpu.memory_space<vmem>>, vector<1x16x16xf32>
    %78 = vector.shape_cast %77 : vector<1x16x16xf32> to vector<16x16xf32>
    %cst_26 = arith.constant dense<0.000000e+00> : vector<32x16xf32>
    %79 = tpu.matmul %76, %78, %cst_26 {dimension_numbers = #tpu.dot_dimension_numbers<[1], [0], [0], [1], [0, 0, 1, 1], [], []>} : vector<32x16xf32>, vector<16x16xf32>, vector<32x16xf32> -> vector<32x16xf32>
    %80 = arith.addf %75, %79 : vector<32x16xf32>
    %c0_27 = arith.constant 0 : index
    %c0_28 = arith.constant 0 : index
    %81 = vector.load %arg5[%c0_27, %c0_28] : memref<1x16xf32, #tpu.memory_space<vmem>>, vector<1x16xf32>
    %82 = vector.broadcast %81 : vector<1x16xf32> to vector<32x16xf32>
    %83 = arith.addf %80, %82 : vector<32x16xf32>
    %cst_29 = arith.constant 0.000000e+00 : f32
    %84 = vector.broadcast %cst_29 : f32 to vector<32x16xf32>
    %85 = arith.maximumf %83, %84 : vector<32x16xf32>
    %86 = vector.broadcast %cst_29 : f32 to vector<32x16xf32>
    %87 = arith.subf %83, %86 : vector<32x16xf32>
    %88 = arith.cmpf one, %87, %87 : vector<32x16xf32>
    %89 = vector.broadcast %cst_29 : f32 to vector<32x16xf32>
    %90 = arith.addf %83, %89 : vector<32x16xf32>
    %91 = math.absf %87 : vector<32x16xf32>
    %cst_30 = arith.constant 0.000000e+00 : f32
    %92 = vector.broadcast %cst_30 : f32 to vector<32x16xf32>
    %93 = arith.subf %92, %91 : vector<32x16xf32>
    %94 = math.exp %93 : vector<32x16xf32>
    %95 = math.log1p %94 : vector<32x16xf32>
    %96 = arith.addf %85, %95 : vector<32x16xf32>
    %97 = arith.select %88, %90, %96 : vector<32x16xi1>, vector<32x16xf32>
    %98 = math.tanh %97 : vector<32x16xf32>
    %99 = arith.mulf %83, %98 : vector<32x16xf32>
    %c0_31 = arith.constant 0 : index
    %c0_32 = arith.constant 0 : index
    %100 = vector.load %arg6[%c0_31, %c0_32] : memref<1x16xf32, #tpu.memory_space<vmem>>, vector<1x16xf32>
    %101 = vector.broadcast %100 : vector<1x16xf32> to vector<32x16xf32>
    %102 = arith.mulf %99, %101 : vector<32x16xf32>
    %c0_33 = arith.constant 0 : index
    %c0_34 = arith.constant 0 : index
    %103 = vector.load %arg7[%c0_33, %c0_34] : memref<1x16xf32, #tpu.memory_space<vmem>>, vector<1x16xf32>
    %104 = vector.broadcast %103 : vector<1x16xf32> to vector<32x16xf32>
    %105 = arith.addf %102, %104 : vector<32x16xf32>
    %c0_35 = arith.constant 0 : index
    %c0_36 = arith.constant 0 : index
    %106 = vector.load %arg8[%c0_35, %c0_36] : memref<16x16xf32, #tpu.memory_space<vmem>>, vector<16x16xf32>
    %cst_37 = arith.constant dense<0.000000e+00> : vector<32x16xf32>
    %107 = tpu.matmul %105, %106, %cst_37 {dimension_numbers = #tpu.dot_dimension_numbers<[1], [0], [0], [1], [0, 0, 1, 1], [], []>} : vector<32x16xf32>, vector<16x16xf32>, vector<32x16xf32> -> vector<32x16xf32>
    %c0_38 = arith.constant 0 : index
    %c0_39 = arith.constant 0 : index
    %108 = vector.load %arg9[%c0_38, %c0_39] : memref<1x16xf32, #tpu.memory_space<vmem>>, vector<1x16xf32>
    %109 = vector.broadcast %108 : vector<1x16xf32> to vector<32x16xf32>
    %110 = arith.addf %107, %109 : vector<32x16xf32>
    %cst_40 = arith.constant 0.000000e+00 : f32
    %111 = vector.broadcast %cst_40 : f32 to vector<32x16xf32>
    %112 = arith.maximumf %110, %111 : vector<32x16xf32>
    %113 = vector.broadcast %cst_40 : f32 to vector<32x16xf32>
    %114 = arith.subf %110, %113 : vector<32x16xf32>
    %115 = arith.cmpf one, %114, %114 : vector<32x16xf32>
    %116 = vector.broadcast %cst_40 : f32 to vector<32x16xf32>
    %117 = arith.addf %110, %116 : vector<32x16xf32>
    %118 = math.absf %114 : vector<32x16xf32>
    %cst_41 = arith.constant 0.000000e+00 : f32
    %119 = vector.broadcast %cst_41 : f32 to vector<32x16xf32>
    %120 = arith.subf %119, %118 : vector<32x16xf32>
    %121 = math.exp %120 : vector<32x16xf32>
    %122 = math.log1p %121 : vector<32x16xf32>
    %123 = arith.addf %112, %122 : vector<32x16xf32>
    %124 = arith.select %115, %117, %123 : vector<32x16xi1>, vector<32x16xf32>
    %125 = math.tanh %124 : vector<32x16xf32>
    %126 = arith.mulf %110, %125 : vector<32x16xf32>
    %c0_42 = arith.constant 0 : index
    %c0_43 = arith.constant 0 : index
    %127 = vector.load %arg10[%c0_42, %c0_43] : memref<16x256xf32, #tpu.memory_space<vmem>>, vector<16x256xf32>
    %cst_44 = arith.constant dense<0.000000e+00> : vector<32x256xf32>
    %128 = tpu.matmul %126, %127, %cst_44 {dimension_numbers = #tpu.dot_dimension_numbers<[1], [0], [0], [1], [0, 0, 1, 1], [], []>} : vector<32x16xf32>, vector<16x256xf32>, vector<32x256xf32> -> vector<32x256xf32>
    %c0_45 = arith.constant 0 : index
    %c0_46 = arith.constant 0 : index
    %129 = vector.load %arg12[%c0_45, %c0_46] : memref<1x256xf32, #tpu.memory_space<vmem>>, vector<1x256xf32>
    %130 = vector.broadcast %129 : vector<1x256xf32> to vector<32x256xf32>
    %131 = arith.addf %128, %130 : vector<32x256xf32>
    %132 = tpu.iota {dimensions = array<i32: 0>} : vector<4x1xi32>
    %c2_i32 = arith.constant 2 : i32
    %133 = vector.broadcast %c2_i32 : i32 to vector<4x1xi32>
    %134 = arith.cmpi slt, %132, %133 : vector<4x1xi32>
    %135 = tpu.concatenate %0, %0 in 0 : vector<2x1xi32>, vector<2x1xi32> -> vector<4x1xi32>
    %c1_i32 = arith.constant 1 : i32
    %136 = vector.broadcast %c1_i32 : i32 to vector<2x1xi32>
    %137 = arith.subi %0, %136 : vector<2x1xi32>
    %138 = tpu.iota {dimensions = array<i32: 0>} : vector<4x64xi32>
    %139 = tpu.iota {dimensions = array<i32: 1>} : vector<4x64xi32>
    %c2_i32_47 = arith.constant 2 : i32
    %140 = vector.broadcast %c2_i32_47 : i32 to vector<4x64xi32>
    %141 = arith.cmpi slt, %138, %140 : vector<4x64xi32>
    %c32_i32 = arith.constant 32 : i32
    %142 = vector.broadcast %c32_i32 : i32 to vector<4x64xi32>
    %143 = arith.cmpi slt, %139, %142 : vector<4x64xi32>
    %144 = arith.xori %141, %143 : vector<4x64xi1>
    %cst_48 = arith.constant dense<true> : vector<4x64xi1>
    %145 = arith.xori %144, %cst_48 : vector<4x64xi1>
    %c0_i32 = arith.constant 0 : i32
    %c15_i32 = arith.constant 15 : i32
    %146 = vector.broadcast %c0_i32 : i32 to vector<4x1xi32>
    %147 = vector.broadcast %c15_i32 : i32 to vector<4x1xi32>
    %148 = arith.select %134, %146, %147 : vector<4x1xi1>, vector<4x1xi32>
    %149 = arith.cmpi slt, %148, %135 : vector<4x1xi32>
    %c15_i32_49 = arith.constant 15 : i32
    %150 = vector.broadcast %c15_i32_49 : i32 to vector<2x1xi32>
    %151 = arith.cmpi eq, %137, %150 : vector<2x1xi32>
    %c1_i32_50 = arith.constant 1 : i32
    %c14_i32 = arith.constant 14 : i32
    %152 = vector.broadcast %c1_i32_50 : i32 to vector<4x1xi32>
    %153 = vector.broadcast %c14_i32 : i32 to vector<4x1xi32>
    %154 = arith.select %134, %152, %153 : vector<4x1xi1>, vector<4x1xi32>
    %155 = arith.cmpi slt, %154, %135 : vector<4x1xi32>
    %c14_i32_51 = arith.constant 14 : i32
    %156 = vector.broadcast %c14_i32_51 : i32 to vector<2x1xi32>
    %157 = arith.cmpi eq, %137, %156 : vector<2x1xi32>
    %c2_i32_52 = arith.constant 2 : i32
    %c13_i32 = arith.constant 13 : i32
    %158 = vector.broadcast %c2_i32_52 : i32 to vector<4x1xi32>
    %159 = vector.broadcast %c13_i32 : i32 to vector<4x1xi32>
    %160 = arith.select %134, %158, %159 : vector<4x1xi1>, vector<4x1xi32>
    %161 = arith.cmpi slt, %160, %135 : vector<4x1xi32>
    %c13_i32_53 = arith.constant 13 : i32
    %162 = vector.broadcast %c13_i32_53 : i32 to vector<2x1xi32>
    %163 = arith.cmpi eq, %137, %162 : vector<2x1xi32>
    %c3_i32 = arith.constant 3 : i32
    %c12_i32 = arith.constant 12 : i32
    %164 = vector.broadcast %c3_i32 : i32 to vector<4x1xi32>
    %165 = vector.broadcast %c12_i32 : i32 to vector<4x1xi32>
    %166 = arith.select %134, %164, %165 : vector<4x1xi1>, vector<4x1xi32>
    %167 = arith.cmpi slt, %166, %135 : vector<4x1xi32>
    %c12_i32_54 = arith.constant 12 : i32
    %168 = vector.broadcast %c12_i32_54 : i32 to vector<2x1xi32>
    %169 = arith.cmpi eq, %137, %168 : vector<2x1xi32>
    %c4_i32 = arith.constant 4 : i32
    %c11_i32 = arith.constant 11 : i32
    %170 = vector.broadcast %c4_i32 : i32 to vector<4x1xi32>
    %171 = vector.broadcast %c11_i32 : i32 to vector<4x1xi32>
    %172 = arith.select %134, %170, %171 : vector<4x1xi1>, vector<4x1xi32>
    %173 = arith.cmpi slt, %172, %135 : vector<4x1xi32>
    %c11_i32_55 = arith.constant 11 : i32
    %174 = vector.broadcast %c11_i32_55 : i32 to vector<2x1xi32>
    %175 = arith.cmpi eq, %137, %174 : vector<2x1xi32>
    %c5_i32 = arith.constant 5 : i32
    %c10_i32 = arith.constant 10 : i32
    %176 = vector.broadcast %c5_i32 : i32 to vector<4x1xi32>
    %177 = vector.broadcast %c10_i32 : i32 to vector<4x1xi32>
    %178 = arith.select %134, %176, %177 : vector<4x1xi1>, vector<4x1xi32>
    %179 = arith.cmpi slt, %178, %135 : vector<4x1xi32>
    %c10_i32_56 = arith.constant 10 : i32
    %180 = vector.broadcast %c10_i32_56 : i32 to vector<2x1xi32>
    %181 = arith.cmpi eq, %137, %180 : vector<2x1xi32>
    %c6_i32 = arith.constant 6 : i32
    %c9_i32 = arith.constant 9 : i32
    %182 = vector.broadcast %c6_i32 : i32 to vector<4x1xi32>
    %183 = vector.broadcast %c9_i32 : i32 to vector<4x1xi32>
    %184 = arith.select %134, %182, %183 : vector<4x1xi1>, vector<4x1xi32>
    %185 = arith.cmpi slt, %184, %135 : vector<4x1xi32>
    %c9_i32_57 = arith.constant 9 : i32
    %186 = vector.broadcast %c9_i32_57 : i32 to vector<2x1xi32>
    %187 = arith.cmpi eq, %137, %186 : vector<2x1xi32>
    %c7_i32 = arith.constant 7 : i32
    %c8_i32 = arith.constant 8 : i32
    %188 = vector.broadcast %c7_i32 : i32 to vector<4x1xi32>
    %189 = vector.broadcast %c8_i32 : i32 to vector<4x1xi32>
    %190 = arith.select %134, %188, %189 : vector<4x1xi1>, vector<4x1xi32>
    %191 = arith.cmpi slt, %190, %135 : vector<4x1xi32>
    %c8_i32_58 = arith.constant 8 : i32
    %192 = vector.broadcast %c8_i32_58 : i32 to vector<2x1xi32>
    %193 = arith.cmpi eq, %137, %192 : vector<2x1xi32>
    %c8_i32_59 = arith.constant 8 : i32
    %c7_i32_60 = arith.constant 7 : i32
    %194 = vector.broadcast %c8_i32_59 : i32 to vector<4x1xi32>
    %195 = vector.broadcast %c7_i32_60 : i32 to vector<4x1xi32>
    %196 = arith.select %134, %194, %195 : vector<4x1xi1>, vector<4x1xi32>
    %197 = arith.cmpi slt, %196, %135 : vector<4x1xi32>
    %c7_i32_61 = arith.constant 7 : i32
    %198 = vector.broadcast %c7_i32_61 : i32 to vector<2x1xi32>
    %199 = arith.cmpi eq, %137, %198 : vector<2x1xi32>
    %c9_i32_62 = arith.constant 9 : i32
    %c6_i32_63 = arith.constant 6 : i32
    %200 = vector.broadcast %c9_i32_62 : i32 to vector<4x1xi32>
    %201 = vector.broadcast %c6_i32_63 : i32 to vector<4x1xi32>
    %202 = arith.select %134, %200, %201 : vector<4x1xi1>, vector<4x1xi32>
    %203 = arith.cmpi slt, %202, %135 : vector<4x1xi32>
    %c6_i32_64 = arith.constant 6 : i32
    %204 = vector.broadcast %c6_i32_64 : i32 to vector<2x1xi32>
    %205 = arith.cmpi eq, %137, %204 : vector<2x1xi32>
    %c10_i32_65 = arith.constant 10 : i32
    %c5_i32_66 = arith.constant 5 : i32
    %206 = vector.broadcast %c10_i32_65 : i32 to vector<4x1xi32>
    %207 = vector.broadcast %c5_i32_66 : i32 to vector<4x1xi32>
    %208 = arith.select %134, %206, %207 : vector<4x1xi1>, vector<4x1xi32>
    %209 = arith.cmpi slt, %208, %135 : vector<4x1xi32>
    %c5_i32_67 = arith.constant 5 : i32
    %210 = vector.broadcast %c5_i32_67 : i32 to vector<2x1xi32>
    %211 = arith.cmpi eq, %137, %210 : vector<2x1xi32>
    %c11_i32_68 = arith.constant 11 : i32
    %c4_i32_69 = arith.constant 4 : i32
    %212 = vector.broadcast %c11_i32_68 : i32 to vector<4x1xi32>
    %213 = vector.broadcast %c4_i32_69 : i32 to vector<4x1xi32>
    %214 = arith.select %134, %212, %213 : vector<4x1xi1>, vector<4x1xi32>
    %215 = arith.cmpi slt, %214, %135 : vector<4x1xi32>
    %c4_i32_70 = arith.constant 4 : i32
    %216 = vector.broadcast %c4_i32_70 : i32 to vector<2x1xi32>
    %217 = arith.cmpi eq, %137, %216 : vector<2x1xi32>
    %c12_i32_71 = arith.constant 12 : i32
    %c3_i32_72 = arith.constant 3 : i32
    %218 = vector.broadcast %c12_i32_71 : i32 to vector<4x1xi32>
    %219 = vector.broadcast %c3_i32_72 : i32 to vector<4x1xi32>
    %220 = arith.select %134, %218, %219 : vector<4x1xi1>, vector<4x1xi32>
    %221 = arith.cmpi slt, %220, %135 : vector<4x1xi32>
    %c3_i32_73 = arith.constant 3 : i32
    %222 = vector.broadcast %c3_i32_73 : i32 to vector<2x1xi32>
    %223 = arith.cmpi eq, %137, %222 : vector<2x1xi32>
    %c13_i32_74 = arith.constant 13 : i32
    %c2_i32_75 = arith.constant 2 : i32
    %224 = vector.broadcast %c13_i32_74 : i32 to vector<4x1xi32>
    %225 = vector.broadcast %c2_i32_75 : i32 to vector<4x1xi32>
    %226 = arith.select %134, %224, %225 : vector<4x1xi1>, vector<4x1xi32>
    %227 = arith.cmpi slt, %226, %135 : vector<4x1xi32>
    %c2_i32_76 = arith.constant 2 : i32
    %228 = vector.broadcast %c2_i32_76 : i32 to vector<2x1xi32>
    %229 = arith.cmpi eq, %137, %228 : vector<2x1xi32>
    %c14_i32_77 = arith.constant 14 : i32
    %c1_i32_78 = arith.constant 1 : i32
    %230 = vector.broadcast %c14_i32_77 : i32 to vector<4x1xi32>
    %231 = vector.broadcast %c1_i32_78 : i32 to vector<4x1xi32>
    %232 = arith.select %134, %230, %231 : vector<4x1xi1>, vector<4x1xi32>
    %233 = arith.cmpi slt, %232, %135 : vector<4x1xi32>
    %c1_i32_79 = arith.constant 1 : i32
    %234 = vector.broadcast %c1_i32_79 : i32 to vector<2x1xi32>
    %235 = arith.cmpi eq, %137, %234 : vector<2x1xi32>
    %c15_i32_80 = arith.constant 15 : i32
    %c0_i32_81 = arith.constant 0 : i32
    %236 = vector.broadcast %c15_i32_80 : i32 to vector<4x1xi32>
    %237 = vector.broadcast %c0_i32_81 : i32 to vector<4x1xi32>
    %238 = arith.select %134, %236, %237 : vector<4x1xi1>, vector<4x1xi32>
    %239 = arith.cmpi slt, %238, %135 : vector<4x1xi32>
    %c0_i32_82 = arith.constant 0 : i32
    %240 = vector.broadcast %c0_i32_82 : i32 to vector<2x1xi32>
    %241 = arith.cmpi eq, %137, %240 : vector<2x1xi32>
    %cst_83 = arith.constant 0.000000e+00 : f32
    %242 = vector.broadcast %cst_83 : f32 to vector<4x64xf32>
    %cst_84 = arith.constant 0.000000e+00 : f32
    %243 = vector.broadcast %cst_84 : f32 to vector<4x32xf32>
    %c0_85 = arith.constant 0 : index
    %c0_86 = arith.constant 0 : index
    %244 = vector.load %arg11[%c0_85, %c0_86] : memref<64x128xf32, #tpu.memory_space<vmem>>, vector<64x128xf32>
    %245 = tpu.concatenate %243, %243 in 1 : vector<4x32xf32>, vector<4x32xf32> -> vector<4x64xf32>
    %246 = arith.select %145, %245, %242 : vector<4x64xi1>, vector<4x64xf32>
    %cst_87 = arith.constant dense<0.000000e+00> : vector<4x128xf32>
    %247 = tpu.matmul %246, %244, %cst_87 {dimension_numbers = #tpu.dot_dimension_numbers<[1], [0], [0], [1], [0, 0, 1, 1], [], []>} : vector<4x64xf32>, vector<64x128xf32>, vector<4x128xf32> -> vector<4x128xf32>
    %248 = vector.extract_strided_slice %131 {offsets = [0, 0], sizes = [2, 128], strides = [1, 1]} : vector<32x256xf32> to vector<2x128xf32>
    %249 = vector.extract_strided_slice %131 {offsets = [30, 128], sizes = [2, 128], strides = [1, 1]} : vector<32x256xf32> to vector<2x128xf32>
    %250 = tpu.concatenate %248, %249 in 0 : vector<2x128xf32>, vector<2x128xf32> -> vector<4x128xf32>
    %251 = arith.addf %247, %250 : vector<4x128xf32>
    %252 = vector.extract_strided_slice %251 {offsets = [0, 0], sizes = [4, 96], strides = [1, 1]} : vector<4x128xf32> to vector<4x96xf32>
    %253 = arith.negf %252 : vector<4x96xf32>
    %254 = math.exp %253 : vector<4x96xf32>
    %cst_88 = arith.constant 1.000000e+00 : f32
    %255 = vector.broadcast %cst_88 : f32 to vector<4x96xf32>
    %256 = arith.addf %255, %254 : vector<4x96xf32>
    %257 = arith.divf %255, %256 : vector<4x96xf32>
    %258 = vector.extract_strided_slice %257 {offsets = [0, 0], sizes = [4, 32], strides = [1, 1]} : vector<4x96xf32> to vector<4x32xf32>
    %259 = vector.extract_strided_slice %257 {offsets = [0, 32], sizes = [4, 32], strides = [1, 1]} : vector<4x96xf32> to vector<4x32xf32>
    %260 = vector.extract_strided_slice %257 {offsets = [0, 64], sizes = [4, 32], strides = [1, 1]} : vector<4x96xf32> to vector<4x32xf32>
    %261 = vector.extract_strided_slice %251 {offsets = [0, 96], sizes = [4, 32], strides = [1, 1]} : vector<4x128xf32> to vector<4x32xf32>
    %262 = math.tanh %261 : vector<4x32xf32>
    %263 = arith.mulf %259, %243 : vector<4x32xf32>
    %264 = arith.mulf %258, %262 : vector<4x32xf32>
    %265 = arith.addf %263, %264 : vector<4x32xf32>
    %266 = math.tanh %265 : vector<4x32xf32>
    %267 = arith.mulf %260, %266 : vector<4x32xf32>
    %268 = vector.shape_cast %149 : vector<4x1xi1> to vector<4x1xi1>
    %269 = vector.broadcast %268 : vector<4x1xi1> to vector<4x32xi1>
    %270 = arith.select %269, %267, %243 : vector<4x32xi1>, vector<4x32xf32>
    %271 = vector.shape_cast %149 : vector<4x1xi1> to vector<4x1xi1>
    %272 = vector.broadcast %271 : vector<4x1xi1> to vector<4x32xi1>
    %273 = arith.select %272, %265, %243 : vector<4x32xi1>, vector<4x32xf32>
    %274 = tpu.concatenate %270, %270 in 1 : vector<4x32xf32>, vector<4x32xf32> -> vector<4x64xf32>
    %275 = arith.select %145, %274, %242 : vector<4x64xi1>, vector<4x64xf32>
    %cst_89 = arith.constant dense<0.000000e+00> : vector<4x128xf32>
    %276 = tpu.matmul %275, %244, %cst_89 {dimension_numbers = #tpu.dot_dimension_numbers<[1], [0], [0], [1], [0, 0, 1, 1], [], []>} : vector<4x64xf32>, vector<64x128xf32>, vector<4x128xf32> -> vector<4x128xf32>
    %277 = vector.extract_strided_slice %131 {offsets = [2, 0], sizes = [2, 128], strides = [1, 1]} : vector<32x256xf32> to vector<2x128xf32>
    %278 = vector.extract_strided_slice %131 {offsets = [28, 128], sizes = [2, 128], strides = [1, 1]} : vector<32x256xf32> to vector<2x128xf32>
    %279 = tpu.concatenate %277, %278 in 0 : vector<2x128xf32>, vector<2x128xf32> -> vector<4x128xf32>
    %280 = arith.addf %276, %279 : vector<4x128xf32>
    %281 = vector.extract_strided_slice %280 {offsets = [0, 0], sizes = [4, 96], strides = [1, 1]} : vector<4x128xf32> to vector<4x96xf32>
    %282 = arith.negf %281 : vector<4x96xf32>
    %283 = math.exp %282 : vector<4x96xf32>
    %cst_90 = arith.constant 1.000000e+00 : f32
    %284 = vector.broadcast %cst_90 : f32 to vector<4x96xf32>
    %285 = arith.addf %284, %283 : vector<4x96xf32>
    %286 = arith.divf %284, %285 : vector<4x96xf32>
    %287 = vector.extract_strided_slice %286 {offsets = [0, 0], sizes = [4, 32], strides = [1, 1]} : vector<4x96xf32> to vector<4x32xf32>
    %288 = vector.extract_strided_slice %286 {offsets = [0, 32], sizes = [4, 32], strides = [1, 1]} : vector<4x96xf32> to vector<4x32xf32>
    %289 = vector.extract_strided_slice %286 {offsets = [0, 64], sizes = [4, 32], strides = [1, 1]} : vector<4x96xf32> to vector<4x32xf32>
    %290 = vector.extract_strided_slice %280 {offsets = [0, 96], sizes = [4, 32], strides = [1, 1]} : vector<4x128xf32> to vector<4x32xf32>
    %291 = math.tanh %290 : vector<4x32xf32>
    %292 = arith.mulf %288, %273 : vector<4x32xf32>
    %293 = arith.mulf %287, %291 : vector<4x32xf32>
    %294 = arith.addf %292, %293 : vector<4x32xf32>
    %295 = math.tanh %294 : vector<4x32xf32>
    %296 = arith.mulf %289, %295 : vector<4x32xf32>
    %297 = vector.shape_cast %155 : vector<4x1xi1> to vector<4x1xi1>
    %298 = vector.broadcast %297 : vector<4x1xi1> to vector<4x32xi1>
    %299 = arith.select %298, %296, %270 : vector<4x32xi1>, vector<4x32xf32>
    %300 = vector.shape_cast %155 : vector<4x1xi1> to vector<4x1xi1>
    %301 = vector.broadcast %300 : vector<4x1xi1> to vector<4x32xi1>
    %302 = arith.select %301, %294, %273 : vector<4x32xi1>, vector<4x32xf32>
    %303 = tpu.concatenate %299, %299 in 1 : vector<4x32xf32>, vector<4x32xf32> -> vector<4x64xf32>
    %304 = arith.select %145, %303, %242 : vector<4x64xi1>, vector<4x64xf32>
    %cst_91 = arith.constant dense<0.000000e+00> : vector<4x128xf32>
    %305 = tpu.matmul %304, %244, %cst_91 {dimension_numbers = #tpu.dot_dimension_numbers<[1], [0], [0], [1], [0, 0, 1, 1], [], []>} : vector<4x64xf32>, vector<64x128xf32>, vector<4x128xf32> -> vector<4x128xf32>
    %306 = vector.extract_strided_slice %131 {offsets = [4, 0], sizes = [2, 128], strides = [1, 1]} : vector<32x256xf32> to vector<2x128xf32>
    %307 = vector.extract_strided_slice %131 {offsets = [26, 128], sizes = [2, 128], strides = [1, 1]} : vector<32x256xf32> to vector<2x128xf32>
    %308 = tpu.concatenate %306, %307 in 0 : vector<2x128xf32>, vector<2x128xf32> -> vector<4x128xf32>
    %309 = arith.addf %305, %308 : vector<4x128xf32>
    %310 = vector.extract_strided_slice %309 {offsets = [0, 0], sizes = [4, 96], strides = [1, 1]} : vector<4x128xf32> to vector<4x96xf32>
    %311 = arith.negf %310 : vector<4x96xf32>
    %312 = math.exp %311 : vector<4x96xf32>
    %cst_92 = arith.constant 1.000000e+00 : f32
    %313 = vector.broadcast %cst_92 : f32 to vector<4x96xf32>
    %314 = arith.addf %313, %312 : vector<4x96xf32>
    %315 = arith.divf %313, %314 : vector<4x96xf32>
    %316 = vector.extract_strided_slice %315 {offsets = [0, 0], sizes = [4, 32], strides = [1, 1]} : vector<4x96xf32> to vector<4x32xf32>
    %317 = vector.extract_strided_slice %315 {offsets = [0, 32], sizes = [4, 32], strides = [1, 1]} : vector<4x96xf32> to vector<4x32xf32>
    %318 = vector.extract_strided_slice %315 {offsets = [0, 64], sizes = [4, 32], strides = [1, 1]} : vector<4x96xf32> to vector<4x32xf32>
    %319 = vector.extract_strided_slice %309 {offsets = [0, 96], sizes = [4, 32], strides = [1, 1]} : vector<4x128xf32> to vector<4x32xf32>
    %320 = math.tanh %319 : vector<4x32xf32>
    %321 = arith.mulf %317, %302 : vector<4x32xf32>
    %322 = arith.mulf %316, %320 : vector<4x32xf32>
    %323 = arith.addf %321, %322 : vector<4x32xf32>
    %324 = math.tanh %323 : vector<4x32xf32>
    %325 = arith.mulf %318, %324 : vector<4x32xf32>
    %326 = vector.shape_cast %161 : vector<4x1xi1> to vector<4x1xi1>
    %327 = vector.broadcast %326 : vector<4x1xi1> to vector<4x32xi1>
    %328 = arith.select %327, %325, %299 : vector<4x32xi1>, vector<4x32xf32>
    %329 = vector.shape_cast %161 : vector<4x1xi1> to vector<4x1xi1>
    %330 = vector.broadcast %329 : vector<4x1xi1> to vector<4x32xi1>
    %331 = arith.select %330, %323, %302 : vector<4x32xi1>, vector<4x32xf32>
    %332 = tpu.concatenate %328, %328 in 1 : vector<4x32xf32>, vector<4x32xf32> -> vector<4x64xf32>
    %333 = arith.select %145, %332, %242 : vector<4x64xi1>, vector<4x64xf32>
    %cst_93 = arith.constant dense<0.000000e+00> : vector<4x128xf32>
    %334 = tpu.matmul %333, %244, %cst_93 {dimension_numbers = #tpu.dot_dimension_numbers<[1], [0], [0], [1], [0, 0, 1, 1], [], []>} : vector<4x64xf32>, vector<64x128xf32>, vector<4x128xf32> -> vector<4x128xf32>
    %335 = vector.extract_strided_slice %131 {offsets = [6, 0], sizes = [2, 128], strides = [1, 1]} : vector<32x256xf32> to vector<2x128xf32>
    %336 = vector.extract_strided_slice %131 {offsets = [24, 128], sizes = [2, 128], strides = [1, 1]} : vector<32x256xf32> to vector<2x128xf32>
    %337 = tpu.concatenate %335, %336 in 0 : vector<2x128xf32>, vector<2x128xf32> -> vector<4x128xf32>
    %338 = arith.addf %334, %337 : vector<4x128xf32>
    %339 = vector.extract_strided_slice %338 {offsets = [0, 0], sizes = [4, 96], strides = [1, 1]} : vector<4x128xf32> to vector<4x96xf32>
    %340 = arith.negf %339 : vector<4x96xf32>
    %341 = math.exp %340 : vector<4x96xf32>
    %cst_94 = arith.constant 1.000000e+00 : f32
    %342 = vector.broadcast %cst_94 : f32 to vector<4x96xf32>
    %343 = arith.addf %342, %341 : vector<4x96xf32>
    %344 = arith.divf %342, %343 : vector<4x96xf32>
    %345 = vector.extract_strided_slice %344 {offsets = [0, 0], sizes = [4, 32], strides = [1, 1]} : vector<4x96xf32> to vector<4x32xf32>
    %346 = vector.extract_strided_slice %344 {offsets = [0, 32], sizes = [4, 32], strides = [1, 1]} : vector<4x96xf32> to vector<4x32xf32>
    %347 = vector.extract_strided_slice %344 {offsets = [0, 64], sizes = [4, 32], strides = [1, 1]} : vector<4x96xf32> to vector<4x32xf32>
    %348 = vector.extract_strided_slice %338 {offsets = [0, 96], sizes = [4, 32], strides = [1, 1]} : vector<4x128xf32> to vector<4x32xf32>
    %349 = math.tanh %348 : vector<4x32xf32>
    %350 = arith.mulf %346, %331 : vector<4x32xf32>
    %351 = arith.mulf %345, %349 : vector<4x32xf32>
    %352 = arith.addf %350, %351 : vector<4x32xf32>
    %353 = math.tanh %352 : vector<4x32xf32>
    %354 = arith.mulf %347, %353 : vector<4x32xf32>
    %355 = vector.shape_cast %167 : vector<4x1xi1> to vector<4x1xi1>
    %356 = vector.broadcast %355 : vector<4x1xi1> to vector<4x32xi1>
    %357 = arith.select %356, %354, %328 : vector<4x32xi1>, vector<4x32xf32>
    %358 = vector.shape_cast %167 : vector<4x1xi1> to vector<4x1xi1>
    %359 = vector.broadcast %358 : vector<4x1xi1> to vector<4x32xi1>
    %360 = arith.select %359, %352, %331 : vector<4x32xi1>, vector<4x32xf32>
    %361 = tpu.concatenate %357, %357 in 1 : vector<4x32xf32>, vector<4x32xf32> -> vector<4x64xf32>
    %362 = arith.select %145, %361, %242 : vector<4x64xi1>, vector<4x64xf32>
    %cst_95 = arith.constant dense<0.000000e+00> : vector<4x128xf32>
    %363 = tpu.matmul %362, %244, %cst_95 {dimension_numbers = #tpu.dot_dimension_numbers<[1], [0], [0], [1], [0, 0, 1, 1], [], []>} : vector<4x64xf32>, vector<64x128xf32>, vector<4x128xf32> -> vector<4x128xf32>
    %364 = vector.extract_strided_slice %131 {offsets = [8, 0], sizes = [2, 128], strides = [1, 1]} : vector<32x256xf32> to vector<2x128xf32>
    %365 = vector.extract_strided_slice %131 {offsets = [22, 128], sizes = [2, 128], strides = [1, 1]} : vector<32x256xf32> to vector<2x128xf32>
    %366 = tpu.concatenate %364, %365 in 0 : vector<2x128xf32>, vector<2x128xf32> -> vector<4x128xf32>
    %367 = arith.addf %363, %366 : vector<4x128xf32>
    %368 = vector.extract_strided_slice %367 {offsets = [0, 0], sizes = [4, 96], strides = [1, 1]} : vector<4x128xf32> to vector<4x96xf32>
    %369 = arith.negf %368 : vector<4x96xf32>
    %370 = math.exp %369 : vector<4x96xf32>
    %cst_96 = arith.constant 1.000000e+00 : f32
    %371 = vector.broadcast %cst_96 : f32 to vector<4x96xf32>
    %372 = arith.addf %371, %370 : vector<4x96xf32>
    %373 = arith.divf %371, %372 : vector<4x96xf32>
    %374 = vector.extract_strided_slice %373 {offsets = [0, 0], sizes = [4, 32], strides = [1, 1]} : vector<4x96xf32> to vector<4x32xf32>
    %375 = vector.extract_strided_slice %373 {offsets = [0, 32], sizes = [4, 32], strides = [1, 1]} : vector<4x96xf32> to vector<4x32xf32>
    %376 = vector.extract_strided_slice %373 {offsets = [0, 64], sizes = [4, 32], strides = [1, 1]} : vector<4x96xf32> to vector<4x32xf32>
    %377 = vector.extract_strided_slice %367 {offsets = [0, 96], sizes = [4, 32], strides = [1, 1]} : vector<4x128xf32> to vector<4x32xf32>
    %378 = math.tanh %377 : vector<4x32xf32>
    %379 = arith.mulf %375, %360 : vector<4x32xf32>
    %380 = arith.mulf %374, %378 : vector<4x32xf32>
    %381 = arith.addf %379, %380 : vector<4x32xf32>
    %382 = math.tanh %381 : vector<4x32xf32>
    %383 = arith.mulf %376, %382 : vector<4x32xf32>
    %384 = vector.shape_cast %173 : vector<4x1xi1> to vector<4x1xi1>
    %385 = vector.broadcast %384 : vector<4x1xi1> to vector<4x32xi1>
    %386 = arith.select %385, %383, %357 : vector<4x32xi1>, vector<4x32xf32>
    %387 = vector.shape_cast %173 : vector<4x1xi1> to vector<4x1xi1>
    %388 = vector.broadcast %387 : vector<4x1xi1> to vector<4x32xi1>
    %389 = arith.select %388, %381, %360 : vector<4x32xi1>, vector<4x32xf32>
    %390 = tpu.concatenate %386, %386 in 1 : vector<4x32xf32>, vector<4x32xf32> -> vector<4x64xf32>
    %391 = arith.select %145, %390, %242 : vector<4x64xi1>, vector<4x64xf32>
    %cst_97 = arith.constant dense<0.000000e+00> : vector<4x128xf32>
    %392 = tpu.matmul %391, %244, %cst_97 {dimension_numbers = #tpu.dot_dimension_numbers<[1], [0], [0], [1], [0, 0, 1, 1], [], []>} : vector<4x64xf32>, vector<64x128xf32>, vector<4x128xf32> -> vector<4x128xf32>
    %393 = vector.extract_strided_slice %131 {offsets = [10, 0], sizes = [2, 128], strides = [1, 1]} : vector<32x256xf32> to vector<2x128xf32>
    %394 = vector.extract_strided_slice %131 {offsets = [20, 128], sizes = [2, 128], strides = [1, 1]} : vector<32x256xf32> to vector<2x128xf32>
    %395 = tpu.concatenate %393, %394 in 0 : vector<2x128xf32>, vector<2x128xf32> -> vector<4x128xf32>
    %396 = arith.addf %392, %395 : vector<4x128xf32>
    %397 = vector.extract_strided_slice %396 {offsets = [0, 0], sizes = [4, 96], strides = [1, 1]} : vector<4x128xf32> to vector<4x96xf32>
    %398 = arith.negf %397 : vector<4x96xf32>
    %399 = math.exp %398 : vector<4x96xf32>
    %cst_98 = arith.constant 1.000000e+00 : f32
    %400 = vector.broadcast %cst_98 : f32 to vector<4x96xf32>
    %401 = arith.addf %400, %399 : vector<4x96xf32>
    %402 = arith.divf %400, %401 : vector<4x96xf32>
    %403 = vector.extract_strided_slice %402 {offsets = [0, 0], sizes = [4, 32], strides = [1, 1]} : vector<4x96xf32> to vector<4x32xf32>
    %404 = vector.extract_strided_slice %402 {offsets = [0, 32], sizes = [4, 32], strides = [1, 1]} : vector<4x96xf32> to vector<4x32xf32>
    %405 = vector.extract_strided_slice %402 {offsets = [0, 64], sizes = [4, 32], strides = [1, 1]} : vector<4x96xf32> to vector<4x32xf32>
    %406 = vector.extract_strided_slice %396 {offsets = [0, 96], sizes = [4, 32], strides = [1, 1]} : vector<4x128xf32> to vector<4x32xf32>
    %407 = math.tanh %406 : vector<4x32xf32>
    %408 = arith.mulf %404, %389 : vector<4x32xf32>
    %409 = arith.mulf %403, %407 : vector<4x32xf32>
    %410 = arith.addf %408, %409 : vector<4x32xf32>
    %411 = math.tanh %410 : vector<4x32xf32>
    %412 = arith.mulf %405, %411 : vector<4x32xf32>
    %413 = vector.shape_cast %179 : vector<4x1xi1> to vector<4x1xi1>
    %414 = vector.broadcast %413 : vector<4x1xi1> to vector<4x32xi1>
    %415 = arith.select %414, %412, %386 : vector<4x32xi1>, vector<4x32xf32>
    %416 = vector.shape_cast %179 : vector<4x1xi1> to vector<4x1xi1>
    %417 = vector.broadcast %416 : vector<4x1xi1> to vector<4x32xi1>
    %418 = arith.select %417, %410, %389 : vector<4x32xi1>, vector<4x32xf32>
    %419 = tpu.concatenate %415, %415 in 1 : vector<4x32xf32>, vector<4x32xf32> -> vector<4x64xf32>
    %420 = arith.select %145, %419, %242 : vector<4x64xi1>, vector<4x64xf32>
    %cst_99 = arith.constant dense<0.000000e+00> : vector<4x128xf32>
    %421 = tpu.matmul %420, %244, %cst_99 {dimension_numbers = #tpu.dot_dimension_numbers<[1], [0], [0], [1], [0, 0, 1, 1], [], []>} : vector<4x64xf32>, vector<64x128xf32>, vector<4x128xf32> -> vector<4x128xf32>
    %422 = vector.extract_strided_slice %131 {offsets = [12, 0], sizes = [2, 128], strides = [1, 1]} : vector<32x256xf32> to vector<2x128xf32>
    %423 = vector.extract_strided_slice %131 {offsets = [18, 128], sizes = [2, 128], strides = [1, 1]} : vector<32x256xf32> to vector<2x128xf32>
    %424 = tpu.concatenate %422, %423 in 0 : vector<2x128xf32>, vector<2x128xf32> -> vector<4x128xf32>
    %425 = arith.addf %421, %424 : vector<4x128xf32>
    %426 = vector.extract_strided_slice %425 {offsets = [0, 0], sizes = [4, 96], strides = [1, 1]} : vector<4x128xf32> to vector<4x96xf32>
    %427 = arith.negf %426 : vector<4x96xf32>
    %428 = math.exp %427 : vector<4x96xf32>
    %cst_100 = arith.constant 1.000000e+00 : f32
    %429 = vector.broadcast %cst_100 : f32 to vector<4x96xf32>
    %430 = arith.addf %429, %428 : vector<4x96xf32>
    %431 = arith.divf %429, %430 : vector<4x96xf32>
    %432 = vector.extract_strided_slice %431 {offsets = [0, 0], sizes = [4, 32], strides = [1, 1]} : vector<4x96xf32> to vector<4x32xf32>
    %433 = vector.extract_strided_slice %431 {offsets = [0, 32], sizes = [4, 32], strides = [1, 1]} : vector<4x96xf32> to vector<4x32xf32>
    %434 = vector.extract_strided_slice %431 {offsets = [0, 64], sizes = [4, 32], strides = [1, 1]} : vector<4x96xf32> to vector<4x32xf32>
    %435 = vector.extract_strided_slice %425 {offsets = [0, 96], sizes = [4, 32], strides = [1, 1]} : vector<4x128xf32> to vector<4x32xf32>
    %436 = math.tanh %435 : vector<4x32xf32>
    %437 = arith.mulf %433, %418 : vector<4x32xf32>
    %438 = arith.mulf %432, %436 : vector<4x32xf32>
    %439 = arith.addf %437, %438 : vector<4x32xf32>
    %440 = math.tanh %439 : vector<4x32xf32>
    %441 = arith.mulf %434, %440 : vector<4x32xf32>
    %442 = vector.shape_cast %185 : vector<4x1xi1> to vector<4x1xi1>
    %443 = vector.broadcast %442 : vector<4x1xi1> to vector<4x32xi1>
    %444 = arith.select %443, %441, %415 : vector<4x32xi1>, vector<4x32xf32>
    %445 = vector.shape_cast %185 : vector<4x1xi1> to vector<4x1xi1>
    %446 = vector.broadcast %445 : vector<4x1xi1> to vector<4x32xi1>
    %447 = arith.select %446, %439, %418 : vector<4x32xi1>, vector<4x32xf32>
    %448 = tpu.concatenate %444, %444 in 1 : vector<4x32xf32>, vector<4x32xf32> -> vector<4x64xf32>
    %449 = arith.select %145, %448, %242 : vector<4x64xi1>, vector<4x64xf32>
    %cst_101 = arith.constant dense<0.000000e+00> : vector<4x128xf32>
    %450 = tpu.matmul %449, %244, %cst_101 {dimension_numbers = #tpu.dot_dimension_numbers<[1], [0], [0], [1], [0, 0, 1, 1], [], []>} : vector<4x64xf32>, vector<64x128xf32>, vector<4x128xf32> -> vector<4x128xf32>
    %451 = vector.extract_strided_slice %131 {offsets = [14, 0], sizes = [2, 128], strides = [1, 1]} : vector<32x256xf32> to vector<2x128xf32>
    %452 = vector.extract_strided_slice %131 {offsets = [16, 128], sizes = [2, 128], strides = [1, 1]} : vector<32x256xf32> to vector<2x128xf32>
    %453 = tpu.concatenate %451, %452 in 0 : vector<2x128xf32>, vector<2x128xf32> -> vector<4x128xf32>
    %454 = arith.addf %450, %453 : vector<4x128xf32>
    %455 = vector.extract_strided_slice %454 {offsets = [0, 0], sizes = [4, 96], strides = [1, 1]} : vector<4x128xf32> to vector<4x96xf32>
    %456 = arith.negf %455 : vector<4x96xf32>
    %457 = math.exp %456 : vector<4x96xf32>
    %cst_102 = arith.constant 1.000000e+00 : f32
    %458 = vector.broadcast %cst_102 : f32 to vector<4x96xf32>
    %459 = arith.addf %458, %457 : vector<4x96xf32>
    %460 = arith.divf %458, %459 : vector<4x96xf32>
    %461 = vector.extract_strided_slice %460 {offsets = [0, 0], sizes = [4, 32], strides = [1, 1]} : vector<4x96xf32> to vector<4x32xf32>
    %462 = vector.extract_strided_slice %460 {offsets = [0, 32], sizes = [4, 32], strides = [1, 1]} : vector<4x96xf32> to vector<4x32xf32>
    %463 = vector.extract_strided_slice %460 {offsets = [0, 64], sizes = [4, 32], strides = [1, 1]} : vector<4x96xf32> to vector<4x32xf32>
    %464 = vector.extract_strided_slice %454 {offsets = [0, 96], sizes = [4, 32], strides = [1, 1]} : vector<4x128xf32> to vector<4x32xf32>
    %465 = math.tanh %464 : vector<4x32xf32>
    %466 = arith.mulf %462, %447 : vector<4x32xf32>
    %467 = arith.mulf %461, %465 : vector<4x32xf32>
    %468 = arith.addf %466, %467 : vector<4x32xf32>
    %469 = math.tanh %468 : vector<4x32xf32>
    %470 = arith.mulf %463, %469 : vector<4x32xf32>
    %471 = vector.shape_cast %191 : vector<4x1xi1> to vector<4x1xi1>
    %472 = vector.broadcast %471 : vector<4x1xi1> to vector<4x32xi1>
    %473 = arith.select %472, %470, %444 : vector<4x32xi1>, vector<4x32xf32>
    %474 = vector.shape_cast %191 : vector<4x1xi1> to vector<4x1xi1>
    %475 = vector.broadcast %474 : vector<4x1xi1> to vector<4x32xi1>
    %476 = arith.select %475, %468, %447 : vector<4x32xi1>, vector<4x32xf32>
    %477 = tpu.concatenate %473, %473 in 1 : vector<4x32xf32>, vector<4x32xf32> -> vector<4x64xf32>
    %478 = arith.select %145, %477, %242 : vector<4x64xi1>, vector<4x64xf32>
    %cst_103 = arith.constant dense<0.000000e+00> : vector<4x128xf32>
    %479 = tpu.matmul %478, %244, %cst_103 {dimension_numbers = #tpu.dot_dimension_numbers<[1], [0], [0], [1], [0, 0, 1, 1], [], []>} : vector<4x64xf32>, vector<64x128xf32>, vector<4x128xf32> -> vector<4x128xf32>
    %480 = vector.extract_strided_slice %131 {offsets = [16, 0], sizes = [2, 128], strides = [1, 1]} : vector<32x256xf32> to vector<2x128xf32>
    %481 = vector.extract_strided_slice %131 {offsets = [14, 128], sizes = [2, 128], strides = [1, 1]} : vector<32x256xf32> to vector<2x128xf32>
    %482 = tpu.concatenate %480, %481 in 0 : vector<2x128xf32>, vector<2x128xf32> -> vector<4x128xf32>
    %483 = arith.addf %479, %482 : vector<4x128xf32>
    %484 = vector.extract_strided_slice %483 {offsets = [0, 0], sizes = [4, 96], strides = [1, 1]} : vector<4x128xf32> to vector<4x96xf32>
    %485 = arith.negf %484 : vector<4x96xf32>
    %486 = math.exp %485 : vector<4x96xf32>
    %cst_104 = arith.constant 1.000000e+00 : f32
    %487 = vector.broadcast %cst_104 : f32 to vector<4x96xf32>
    %488 = arith.addf %487, %486 : vector<4x96xf32>
    %489 = arith.divf %487, %488 : vector<4x96xf32>
    %490 = vector.extract_strided_slice %489 {offsets = [0, 0], sizes = [4, 32], strides = [1, 1]} : vector<4x96xf32> to vector<4x32xf32>
    %491 = vector.extract_strided_slice %489 {offsets = [0, 32], sizes = [4, 32], strides = [1, 1]} : vector<4x96xf32> to vector<4x32xf32>
    %492 = vector.extract_strided_slice %489 {offsets = [0, 64], sizes = [4, 32], strides = [1, 1]} : vector<4x96xf32> to vector<4x32xf32>
    %493 = vector.extract_strided_slice %483 {offsets = [0, 96], sizes = [4, 32], strides = [1, 1]} : vector<4x128xf32> to vector<4x32xf32>
    %494 = math.tanh %493 : vector<4x32xf32>
    %495 = arith.mulf %491, %476 : vector<4x32xf32>
    %496 = arith.mulf %490, %494 : vector<4x32xf32>
    %497 = arith.addf %495, %496 : vector<4x32xf32>
    %498 = math.tanh %497 : vector<4x32xf32>
    %499 = arith.mulf %492, %498 : vector<4x32xf32>
    %500 = vector.shape_cast %197 : vector<4x1xi1> to vector<4x1xi1>
    %501 = vector.broadcast %500 : vector<4x1xi1> to vector<4x32xi1>
    %502 = arith.select %501, %499, %473 : vector<4x32xi1>, vector<4x32xf32>
    %503 = vector.shape_cast %197 : vector<4x1xi1> to vector<4x1xi1>
    %504 = vector.broadcast %503 : vector<4x1xi1> to vector<4x32xi1>
    %505 = arith.select %504, %497, %476 : vector<4x32xi1>, vector<4x32xf32>
    %506 = tpu.concatenate %502, %502 in 1 : vector<4x32xf32>, vector<4x32xf32> -> vector<4x64xf32>
    %507 = arith.select %145, %506, %242 : vector<4x64xi1>, vector<4x64xf32>
    %cst_105 = arith.constant dense<0.000000e+00> : vector<4x128xf32>
    %508 = tpu.matmul %507, %244, %cst_105 {dimension_numbers = #tpu.dot_dimension_numbers<[1], [0], [0], [1], [0, 0, 1, 1], [], []>} : vector<4x64xf32>, vector<64x128xf32>, vector<4x128xf32> -> vector<4x128xf32>
    %509 = vector.extract_strided_slice %131 {offsets = [18, 0], sizes = [2, 128], strides = [1, 1]} : vector<32x256xf32> to vector<2x128xf32>
    %510 = vector.extract_strided_slice %131 {offsets = [12, 128], sizes = [2, 128], strides = [1, 1]} : vector<32x256xf32> to vector<2x128xf32>
    %511 = tpu.concatenate %509, %510 in 0 : vector<2x128xf32>, vector<2x128xf32> -> vector<4x128xf32>
    %512 = arith.addf %508, %511 : vector<4x128xf32>
    %513 = vector.extract_strided_slice %512 {offsets = [0, 0], sizes = [4, 96], strides = [1, 1]} : vector<4x128xf32> to vector<4x96xf32>
    %514 = arith.negf %513 : vector<4x96xf32>
    %515 = math.exp %514 : vector<4x96xf32>
    %cst_106 = arith.constant 1.000000e+00 : f32
    %516 = vector.broadcast %cst_106 : f32 to vector<4x96xf32>
    %517 = arith.addf %516, %515 : vector<4x96xf32>
    %518 = arith.divf %516, %517 : vector<4x96xf32>
    %519 = vector.extract_strided_slice %518 {offsets = [0, 0], sizes = [4, 32], strides = [1, 1]} : vector<4x96xf32> to vector<4x32xf32>
    %520 = vector.extract_strided_slice %518 {offsets = [0, 32], sizes = [4, 32], strides = [1, 1]} : vector<4x96xf32> to vector<4x32xf32>
    %521 = vector.extract_strided_slice %518 {offsets = [0, 64], sizes = [4, 32], strides = [1, 1]} : vector<4x96xf32> to vector<4x32xf32>
    %522 = vector.extract_strided_slice %512 {offsets = [0, 96], sizes = [4, 32], strides = [1, 1]} : vector<4x128xf32> to vector<4x32xf32>
    %523 = math.tanh %522 : vector<4x32xf32>
    %524 = arith.mulf %520, %505 : vector<4x32xf32>
    %525 = arith.mulf %519, %523 : vector<4x32xf32>
    %526 = arith.addf %524, %525 : vector<4x32xf32>
    %527 = math.tanh %526 : vector<4x32xf32>
    %528 = arith.mulf %521, %527 : vector<4x32xf32>
    %529 = vector.shape_cast %203 : vector<4x1xi1> to vector<4x1xi1>
    %530 = vector.broadcast %529 : vector<4x1xi1> to vector<4x32xi1>
    %531 = arith.select %530, %528, %502 : vector<4x32xi1>, vector<4x32xf32>
    %532 = vector.shape_cast %203 : vector<4x1xi1> to vector<4x1xi1>
    %533 = vector.broadcast %532 : vector<4x1xi1> to vector<4x32xi1>
    %534 = arith.select %533, %526, %505 : vector<4x32xi1>, vector<4x32xf32>
    %535 = tpu.concatenate %531, %531 in 1 : vector<4x32xf32>, vector<4x32xf32> -> vector<4x64xf32>
    %536 = arith.select %145, %535, %242 : vector<4x64xi1>, vector<4x64xf32>
    %cst_107 = arith.constant dense<0.000000e+00> : vector<4x128xf32>
    %537 = tpu.matmul %536, %244, %cst_107 {dimension_numbers = #tpu.dot_dimension_numbers<[1], [0], [0], [1], [0, 0, 1, 1], [], []>} : vector<4x64xf32>, vector<64x128xf32>, vector<4x128xf32> -> vector<4x128xf32>
    %538 = vector.extract_strided_slice %131 {offsets = [20, 0], sizes = [2, 128], strides = [1, 1]} : vector<32x256xf32> to vector<2x128xf32>
    %539 = vector.extract_strided_slice %131 {offsets = [10, 128], sizes = [2, 128], strides = [1, 1]} : vector<32x256xf32> to vector<2x128xf32>
    %540 = tpu.concatenate %538, %539 in 0 : vector<2x128xf32>, vector<2x128xf32> -> vector<4x128xf32>
    %541 = arith.addf %537, %540 : vector<4x128xf32>
    %542 = vector.extract_strided_slice %541 {offsets = [0, 0], sizes = [4, 96], strides = [1, 1]} : vector<4x128xf32> to vector<4x96xf32>
    %543 = arith.negf %542 : vector<4x96xf32>
    %544 = math.exp %543 : vector<4x96xf32>
    %cst_108 = arith.constant 1.000000e+00 : f32
    %545 = vector.broadcast %cst_108 : f32 to vector<4x96xf32>
    %546 = arith.addf %545, %544 : vector<4x96xf32>
    %547 = arith.divf %545, %546 : vector<4x96xf32>
    %548 = vector.extract_strided_slice %547 {offsets = [0, 0], sizes = [4, 32], strides = [1, 1]} : vector<4x96xf32> to vector<4x32xf32>
    %549 = vector.extract_strided_slice %547 {offsets = [0, 32], sizes = [4, 32], strides = [1, 1]} : vector<4x96xf32> to vector<4x32xf32>
    %550 = vector.extract_strided_slice %547 {offsets = [0, 64], sizes = [4, 32], strides = [1, 1]} : vector<4x96xf32> to vector<4x32xf32>
    %551 = vector.extract_strided_slice %541 {offsets = [0, 96], sizes = [4, 32], strides = [1, 1]} : vector<4x128xf32> to vector<4x32xf32>
    %552 = math.tanh %551 : vector<4x32xf32>
    %553 = arith.mulf %549, %534 : vector<4x32xf32>
    %554 = arith.mulf %548, %552 : vector<4x32xf32>
    %555 = arith.addf %553, %554 : vector<4x32xf32>
    %556 = math.tanh %555 : vector<4x32xf32>
    %557 = arith.mulf %550, %556 : vector<4x32xf32>
    %558 = vector.shape_cast %209 : vector<4x1xi1> to vector<4x1xi1>
    %559 = vector.broadcast %558 : vector<4x1xi1> to vector<4x32xi1>
    %560 = arith.select %559, %557, %531 : vector<4x32xi1>, vector<4x32xf32>
    %561 = vector.shape_cast %209 : vector<4x1xi1> to vector<4x1xi1>
    %562 = vector.broadcast %561 : vector<4x1xi1> to vector<4x32xi1>
    %563 = arith.select %562, %555, %534 : vector<4x32xi1>, vector<4x32xf32>
    %564 = tpu.concatenate %560, %560 in 1 : vector<4x32xf32>, vector<4x32xf32> -> vector<4x64xf32>
    %565 = arith.select %145, %564, %242 : vector<4x64xi1>, vector<4x64xf32>
    %cst_109 = arith.constant dense<0.000000e+00> : vector<4x128xf32>
    %566 = tpu.matmul %565, %244, %cst_109 {dimension_numbers = #tpu.dot_dimension_numbers<[1], [0], [0], [1], [0, 0, 1, 1], [], []>} : vector<4x64xf32>, vector<64x128xf32>, vector<4x128xf32> -> vector<4x128xf32>
    %567 = vector.extract_strided_slice %131 {offsets = [22, 0], sizes = [2, 128], strides = [1, 1]} : vector<32x256xf32> to vector<2x128xf32>
    %568 = vector.extract_strided_slice %131 {offsets = [8, 128], sizes = [2, 128], strides = [1, 1]} : vector<32x256xf32> to vector<2x128xf32>
    %569 = tpu.concatenate %567, %568 in 0 : vector<2x128xf32>, vector<2x128xf32> -> vector<4x128xf32>
    %570 = arith.addf %566, %569 : vector<4x128xf32>
    %571 = vector.extract_strided_slice %570 {offsets = [0, 0], sizes = [4, 96], strides = [1, 1]} : vector<4x128xf32> to vector<4x96xf32>
    %572 = arith.negf %571 : vector<4x96xf32>
    %573 = math.exp %572 : vector<4x96xf32>
    %cst_110 = arith.constant 1.000000e+00 : f32
    %574 = vector.broadcast %cst_110 : f32 to vector<4x96xf32>
    %575 = arith.addf %574, %573 : vector<4x96xf32>
    %576 = arith.divf %574, %575 : vector<4x96xf32>
    %577 = vector.extract_strided_slice %576 {offsets = [0, 0], sizes = [4, 32], strides = [1, 1]} : vector<4x96xf32> to vector<4x32xf32>
    %578 = vector.extract_strided_slice %576 {offsets = [0, 32], sizes = [4, 32], strides = [1, 1]} : vector<4x96xf32> to vector<4x32xf32>
    %579 = vector.extract_strided_slice %576 {offsets = [0, 64], sizes = [4, 32], strides = [1, 1]} : vector<4x96xf32> to vector<4x32xf32>
    %580 = vector.extract_strided_slice %570 {offsets = [0, 96], sizes = [4, 32], strides = [1, 1]} : vector<4x128xf32> to vector<4x32xf32>
    %581 = math.tanh %580 : vector<4x32xf32>
    %582 = arith.mulf %578, %563 : vector<4x32xf32>
    %583 = arith.mulf %577, %581 : vector<4x32xf32>
    %584 = arith.addf %582, %583 : vector<4x32xf32>
    %585 = math.tanh %584 : vector<4x32xf32>
    %586 = arith.mulf %579, %585 : vector<4x32xf32>
    %587 = vector.shape_cast %215 : vector<4x1xi1> to vector<4x1xi1>
    %588 = vector.broadcast %587 : vector<4x1xi1> to vector<4x32xi1>
    %589 = arith.select %588, %586, %560 : vector<4x32xi1>, vector<4x32xf32>
    %590 = vector.shape_cast %215 : vector<4x1xi1> to vector<4x1xi1>
    %591 = vector.broadcast %590 : vector<4x1xi1> to vector<4x32xi1>
    %592 = arith.select %591, %584, %563 : vector<4x32xi1>, vector<4x32xf32>
    %593 = tpu.concatenate %589, %589 in 1 : vector<4x32xf32>, vector<4x32xf32> -> vector<4x64xf32>
    %594 = arith.select %145, %593, %242 : vector<4x64xi1>, vector<4x64xf32>
    %cst_111 = arith.constant dense<0.000000e+00> : vector<4x128xf32>
    %595 = tpu.matmul %594, %244, %cst_111 {dimension_numbers = #tpu.dot_dimension_numbers<[1], [0], [0], [1], [0, 0, 1, 1], [], []>} : vector<4x64xf32>, vector<64x128xf32>, vector<4x128xf32> -> vector<4x128xf32>
    %596 = vector.extract_strided_slice %131 {offsets = [24, 0], sizes = [2, 128], strides = [1, 1]} : vector<32x256xf32> to vector<2x128xf32>
    %597 = vector.extract_strided_slice %131 {offsets = [6, 128], sizes = [2, 128], strides = [1, 1]} : vector<32x256xf32> to vector<2x128xf32>
    %598 = tpu.concatenate %596, %597 in 0 : vector<2x128xf32>, vector<2x128xf32> -> vector<4x128xf32>
    %599 = arith.addf %595, %598 : vector<4x128xf32>
    %600 = vector.extract_strided_slice %599 {offsets = [0, 0], sizes = [4, 96], strides = [1, 1]} : vector<4x128xf32> to vector<4x96xf32>
    %601 = arith.negf %600 : vector<4x96xf32>
    %602 = math.exp %601 : vector<4x96xf32>
    %cst_112 = arith.constant 1.000000e+00 : f32
    %603 = vector.broadcast %cst_112 : f32 to vector<4x96xf32>
    %604 = arith.addf %603, %602 : vector<4x96xf32>
    %605 = arith.divf %603, %604 : vector<4x96xf32>
    %606 = vector.extract_strided_slice %605 {offsets = [0, 0], sizes = [4, 32], strides = [1, 1]} : vector<4x96xf32> to vector<4x32xf32>
    %607 = vector.extract_strided_slice %605 {offsets = [0, 32], sizes = [4, 32], strides = [1, 1]} : vector<4x96xf32> to vector<4x32xf32>
    %608 = vector.extract_strided_slice %605 {offsets = [0, 64], sizes = [4, 32], strides = [1, 1]} : vector<4x96xf32> to vector<4x32xf32>
    %609 = vector.extract_strided_slice %599 {offsets = [0, 96], sizes = [4, 32], strides = [1, 1]} : vector<4x128xf32> to vector<4x32xf32>
    %610 = math.tanh %609 : vector<4x32xf32>
    %611 = arith.mulf %607, %592 : vector<4x32xf32>
    %612 = arith.mulf %606, %610 : vector<4x32xf32>
    %613 = arith.addf %611, %612 : vector<4x32xf32>
    %614 = math.tanh %613 : vector<4x32xf32>
    %615 = arith.mulf %608, %614 : vector<4x32xf32>
    %616 = vector.shape_cast %221 : vector<4x1xi1> to vector<4x1xi1>
    %617 = vector.broadcast %616 : vector<4x1xi1> to vector<4x32xi1>
    %618 = arith.select %617, %615, %589 : vector<4x32xi1>, vector<4x32xf32>
    %619 = vector.shape_cast %221 : vector<4x1xi1> to vector<4x1xi1>
    %620 = vector.broadcast %619 : vector<4x1xi1> to vector<4x32xi1>
    %621 = arith.select %620, %613, %592 : vector<4x32xi1>, vector<4x32xf32>
    %622 = tpu.concatenate %618, %618 in 1 : vector<4x32xf32>, vector<4x32xf32> -> vector<4x64xf32>
    %623 = arith.select %145, %622, %242 : vector<4x64xi1>, vector<4x64xf32>
    %cst_113 = arith.constant dense<0.000000e+00> : vector<4x128xf32>
    %624 = tpu.matmul %623, %244, %cst_113 {dimension_numbers = #tpu.dot_dimension_numbers<[1], [0], [0], [1], [0, 0, 1, 1], [], []>} : vector<4x64xf32>, vector<64x128xf32>, vector<4x128xf32> -> vector<4x128xf32>
    %625 = vector.extract_strided_slice %131 {offsets = [26, 0], sizes = [2, 128], strides = [1, 1]} : vector<32x256xf32> to vector<2x128xf32>
    %626 = vector.extract_strided_slice %131 {offsets = [4, 128], sizes = [2, 128], strides = [1, 1]} : vector<32x256xf32> to vector<2x128xf32>
    %627 = tpu.concatenate %625, %626 in 0 : vector<2x128xf32>, vector<2x128xf32> -> vector<4x128xf32>
    %628 = arith.addf %624, %627 : vector<4x128xf32>
    %629 = vector.extract_strided_slice %628 {offsets = [0, 0], sizes = [4, 96], strides = [1, 1]} : vector<4x128xf32> to vector<4x96xf32>
    %630 = arith.negf %629 : vector<4x96xf32>
    %631 = math.exp %630 : vector<4x96xf32>
    %cst_114 = arith.constant 1.000000e+00 : f32
    %632 = vector.broadcast %cst_114 : f32 to vector<4x96xf32>
    %633 = arith.addf %632, %631 : vector<4x96xf32>
    %634 = arith.divf %632, %633 : vector<4x96xf32>
    %635 = vector.extract_strided_slice %634 {offsets = [0, 0], sizes = [4, 32], strides = [1, 1]} : vector<4x96xf32> to vector<4x32xf32>
    %636 = vector.extract_strided_slice %634 {offsets = [0, 32], sizes = [4, 32], strides = [1, 1]} : vector<4x96xf32> to vector<4x32xf32>
    %637 = vector.extract_strided_slice %634 {offsets = [0, 64], sizes = [4, 32], strides = [1, 1]} : vector<4x96xf32> to vector<4x32xf32>
    %638 = vector.extract_strided_slice %628 {offsets = [0, 96], sizes = [4, 32], strides = [1, 1]} : vector<4x128xf32> to vector<4x32xf32>
    %639 = math.tanh %638 : vector<4x32xf32>
    %640 = arith.mulf %636, %621 : vector<4x32xf32>
    %641 = arith.mulf %635, %639 : vector<4x32xf32>
    %642 = arith.addf %640, %641 : vector<4x32xf32>
    %643 = math.tanh %642 : vector<4x32xf32>
    %644 = arith.mulf %637, %643 : vector<4x32xf32>
    %645 = vector.shape_cast %227 : vector<4x1xi1> to vector<4x1xi1>
    %646 = vector.broadcast %645 : vector<4x1xi1> to vector<4x32xi1>
    %647 = arith.select %646, %644, %618 : vector<4x32xi1>, vector<4x32xf32>
    %648 = vector.shape_cast %227 : vector<4x1xi1> to vector<4x1xi1>
    %649 = vector.broadcast %648 : vector<4x1xi1> to vector<4x32xi1>
    %650 = arith.select %649, %642, %621 : vector<4x32xi1>, vector<4x32xf32>
    %651 = tpu.concatenate %647, %647 in 1 : vector<4x32xf32>, vector<4x32xf32> -> vector<4x64xf32>
    %652 = arith.select %145, %651, %242 : vector<4x64xi1>, vector<4x64xf32>
    %cst_115 = arith.constant dense<0.000000e+00> : vector<4x128xf32>
    %653 = tpu.matmul %652, %244, %cst_115 {dimension_numbers = #tpu.dot_dimension_numbers<[1], [0], [0], [1], [0, 0, 1, 1], [], []>} : vector<4x64xf32>, vector<64x128xf32>, vector<4x128xf32> -> vector<4x128xf32>
    %654 = vector.extract_strided_slice %131 {offsets = [28, 0], sizes = [2, 128], strides = [1, 1]} : vector<32x256xf32> to vector<2x128xf32>
    %655 = vector.extract_strided_slice %131 {offsets = [2, 128], sizes = [2, 128], strides = [1, 1]} : vector<32x256xf32> to vector<2x128xf32>
    %656 = tpu.concatenate %654, %655 in 0 : vector<2x128xf32>, vector<2x128xf32> -> vector<4x128xf32>
    %657 = arith.addf %653, %656 : vector<4x128xf32>
    %658 = vector.extract_strided_slice %657 {offsets = [0, 0], sizes = [4, 96], strides = [1, 1]} : vector<4x128xf32> to vector<4x96xf32>
    %659 = arith.negf %658 : vector<4x96xf32>
    %660 = math.exp %659 : vector<4x96xf32>
    %cst_116 = arith.constant 1.000000e+00 : f32
    %661 = vector.broadcast %cst_116 : f32 to vector<4x96xf32>
    %662 = arith.addf %661, %660 : vector<4x96xf32>
    %663 = arith.divf %661, %662 : vector<4x96xf32>
    %664 = vector.extract_strided_slice %663 {offsets = [0, 0], sizes = [4, 32], strides = [1, 1]} : vector<4x96xf32> to vector<4x32xf32>
    %665 = vector.extract_strided_slice %663 {offsets = [0, 32], sizes = [4, 32], strides = [1, 1]} : vector<4x96xf32> to vector<4x32xf32>
    %666 = vector.extract_strided_slice %663 {offsets = [0, 64], sizes = [4, 32], strides = [1, 1]} : vector<4x96xf32> to vector<4x32xf32>
    %667 = vector.extract_strided_slice %657 {offsets = [0, 96], sizes = [4, 32], strides = [1, 1]} : vector<4x128xf32> to vector<4x32xf32>
    %668 = math.tanh %667 : vector<4x32xf32>
    %669 = arith.mulf %665, %650 : vector<4x32xf32>
    %670 = arith.mulf %664, %668 : vector<4x32xf32>
    %671 = arith.addf %669, %670 : vector<4x32xf32>
    %672 = math.tanh %671 : vector<4x32xf32>
    %673 = arith.mulf %666, %672 : vector<4x32xf32>
    %674 = vector.shape_cast %233 : vector<4x1xi1> to vector<4x1xi1>
    %675 = vector.broadcast %674 : vector<4x1xi1> to vector<4x32xi1>
    %676 = arith.select %675, %673, %647 : vector<4x32xi1>, vector<4x32xf32>
    %677 = vector.shape_cast %233 : vector<4x1xi1> to vector<4x1xi1>
    %678 = vector.broadcast %677 : vector<4x1xi1> to vector<4x32xi1>
    %679 = arith.select %678, %671, %650 : vector<4x32xi1>, vector<4x32xf32>
    %680 = tpu.concatenate %676, %676 in 1 : vector<4x32xf32>, vector<4x32xf32> -> vector<4x64xf32>
    %681 = arith.select %145, %680, %242 : vector<4x64xi1>, vector<4x64xf32>
    %cst_117 = arith.constant dense<0.000000e+00> : vector<4x128xf32>
    %682 = tpu.matmul %681, %244, %cst_117 {dimension_numbers = #tpu.dot_dimension_numbers<[1], [0], [0], [1], [0, 0, 1, 1], [], []>} : vector<4x64xf32>, vector<64x128xf32>, vector<4x128xf32> -> vector<4x128xf32>
    %683 = vector.extract_strided_slice %131 {offsets = [30, 0], sizes = [2, 128], strides = [1, 1]} : vector<32x256xf32> to vector<2x128xf32>
    %684 = vector.extract_strided_slice %131 {offsets = [0, 128], sizes = [2, 128], strides = [1, 1]} : vector<32x256xf32> to vector<2x128xf32>
    %685 = tpu.concatenate %683, %684 in 0 : vector<2x128xf32>, vector<2x128xf32> -> vector<4x128xf32>
    %686 = arith.addf %682, %685 : vector<4x128xf32>
    %687 = vector.extract_strided_slice %686 {offsets = [0, 0], sizes = [4, 96], strides = [1, 1]} : vector<4x128xf32> to vector<4x96xf32>
    %688 = arith.negf %687 : vector<4x96xf32>
    %689 = math.exp %688 : vector<4x96xf32>
    %cst_118 = arith.constant 1.000000e+00 : f32
    %690 = vector.broadcast %cst_118 : f32 to vector<4x96xf32>
    %691 = arith.addf %690, %689 : vector<4x96xf32>
    %692 = arith.divf %690, %691 : vector<4x96xf32>
    %693 = vector.extract_strided_slice %692 {offsets = [0, 0], sizes = [4, 32], strides = [1, 1]} : vector<4x96xf32> to vector<4x32xf32>
    %694 = vector.extract_strided_slice %692 {offsets = [0, 32], sizes = [4, 32], strides = [1, 1]} : vector<4x96xf32> to vector<4x32xf32>
    %695 = vector.extract_strided_slice %692 {offsets = [0, 64], sizes = [4, 32], strides = [1, 1]} : vector<4x96xf32> to vector<4x32xf32>
    %696 = vector.extract_strided_slice %686 {offsets = [0, 96], sizes = [4, 32], strides = [1, 1]} : vector<4x128xf32> to vector<4x32xf32>
    %697 = math.tanh %696 : vector<4x32xf32>
    %698 = arith.mulf %694, %679 : vector<4x32xf32>
    %699 = arith.mulf %693, %697 : vector<4x32xf32>
    %700 = arith.addf %698, %699 : vector<4x32xf32>
    %701 = math.tanh %700 : vector<4x32xf32>
    %702 = arith.mulf %695, %701 : vector<4x32xf32>
    %703 = vector.shape_cast %239 : vector<4x1xi1> to vector<4x1xi1>
    %704 = vector.broadcast %703 : vector<4x1xi1> to vector<4x32xi1>
    %705 = arith.select %704, %702, %676 : vector<4x32xi1>, vector<4x32xf32>
    %706 = vector.extract_strided_slice %270 {offsets = [0, 0], sizes = [2, 32], strides = [1, 1]} : vector<4x32xf32> to vector<2x32xf32>
    %707 = vector.extract_strided_slice %299 {offsets = [0, 0], sizes = [2, 32], strides = [1, 1]} : vector<4x32xf32> to vector<2x32xf32>
    %708 = vector.extract_strided_slice %328 {offsets = [0, 0], sizes = [2, 32], strides = [1, 1]} : vector<4x32xf32> to vector<2x32xf32>
    %709 = vector.extract_strided_slice %357 {offsets = [0, 0], sizes = [2, 32], strides = [1, 1]} : vector<4x32xf32> to vector<2x32xf32>
    %710 = vector.extract_strided_slice %386 {offsets = [0, 0], sizes = [2, 32], strides = [1, 1]} : vector<4x32xf32> to vector<2x32xf32>
    %711 = vector.extract_strided_slice %415 {offsets = [0, 0], sizes = [2, 32], strides = [1, 1]} : vector<4x32xf32> to vector<2x32xf32>
    %712 = vector.extract_strided_slice %444 {offsets = [0, 0], sizes = [2, 32], strides = [1, 1]} : vector<4x32xf32> to vector<2x32xf32>
    %713 = vector.extract_strided_slice %473 {offsets = [0, 0], sizes = [2, 32], strides = [1, 1]} : vector<4x32xf32> to vector<2x32xf32>
    %714 = vector.extract_strided_slice %502 {offsets = [0, 0], sizes = [2, 32], strides = [1, 1]} : vector<4x32xf32> to vector<2x32xf32>
    %715 = vector.extract_strided_slice %531 {offsets = [0, 0], sizes = [2, 32], strides = [1, 1]} : vector<4x32xf32> to vector<2x32xf32>
    %716 = vector.extract_strided_slice %560 {offsets = [0, 0], sizes = [2, 32], strides = [1, 1]} : vector<4x32xf32> to vector<2x32xf32>
    %717 = vector.extract_strided_slice %589 {offsets = [0, 0], sizes = [2, 32], strides = [1, 1]} : vector<4x32xf32> to vector<2x32xf32>
    %718 = vector.extract_strided_slice %618 {offsets = [0, 0], sizes = [2, 32], strides = [1, 1]} : vector<4x32xf32> to vector<2x32xf32>
    %719 = vector.extract_strided_slice %647 {offsets = [0, 0], sizes = [2, 32], strides = [1, 1]} : vector<4x32xf32> to vector<2x32xf32>
    %720 = vector.extract_strided_slice %676 {offsets = [0, 0], sizes = [2, 32], strides = [1, 1]} : vector<4x32xf32> to vector<2x32xf32>
    %721 = vector.extract_strided_slice %705 {offsets = [0, 0], sizes = [2, 32], strides = [1, 1]} : vector<4x32xf32> to vector<2x32xf32>
    %722 = tpu.concatenate %706, %707, %708, %709, %710, %711, %712, %713, %714, %715, %716, %717, %718, %719, %720, %721 in 0 : vector<2x32xf32>, vector<2x32xf32>, vector<2x32xf32>, vector<2x32xf32>, vector<2x32xf32>, vector<2x32xf32>, vector<2x32xf32>, vector<2x32xf32>, vector<2x32xf32>, vector<2x32xf32>, vector<2x32xf32>, vector<2x32xf32>, vector<2x32xf32>, vector<2x32xf32>, vector<2x32xf32>, vector<2x32xf32> -> vector<32x32xf32>
    %723 = vector.extract_strided_slice %705 {offsets = [2, 0], sizes = [2, 32], strides = [1, 1]} : vector<4x32xf32> to vector<2x32xf32>
    %724 = vector.extract_strided_slice %676 {offsets = [2, 0], sizes = [2, 32], strides = [1, 1]} : vector<4x32xf32> to vector<2x32xf32>
    %725 = vector.extract_strided_slice %647 {offsets = [2, 0], sizes = [2, 32], strides = [1, 1]} : vector<4x32xf32> to vector<2x32xf32>
    %726 = vector.extract_strided_slice %618 {offsets = [2, 0], sizes = [2, 32], strides = [1, 1]} : vector<4x32xf32> to vector<2x32xf32>
    %727 = vector.extract_strided_slice %589 {offsets = [2, 0], sizes = [2, 32], strides = [1, 1]} : vector<4x32xf32> to vector<2x32xf32>
    %728 = vector.extract_strided_slice %560 {offsets = [2, 0], sizes = [2, 32], strides = [1, 1]} : vector<4x32xf32> to vector<2x32xf32>
    %729 = vector.extract_strided_slice %531 {offsets = [2, 0], sizes = [2, 32], strides = [1, 1]} : vector<4x32xf32> to vector<2x32xf32>
    %730 = vector.extract_strided_slice %502 {offsets = [2, 0], sizes = [2, 32], strides = [1, 1]} : vector<4x32xf32> to vector<2x32xf32>
    %731 = vector.extract_strided_slice %473 {offsets = [2, 0], sizes = [2, 32], strides = [1, 1]} : vector<4x32xf32> to vector<2x32xf32>
    %732 = vector.extract_strided_slice %444 {offsets = [2, 0], sizes = [2, 32], strides = [1, 1]} : vector<4x32xf32> to vector<2x32xf32>
    %733 = vector.extract_strided_slice %415 {offsets = [2, 0], sizes = [2, 32], strides = [1, 1]} : vector<4x32xf32> to vector<2x32xf32>
    %734 = vector.extract_strided_slice %386 {offsets = [2, 0], sizes = [2, 32], strides = [1, 1]} : vector<4x32xf32> to vector<2x32xf32>
    %735 = vector.extract_strided_slice %357 {offsets = [2, 0], sizes = [2, 32], strides = [1, 1]} : vector<4x32xf32> to vector<2x32xf32>
    %736 = vector.extract_strided_slice %328 {offsets = [2, 0], sizes = [2, 32], strides = [1, 1]} : vector<4x32xf32> to vector<2x32xf32>
    %737 = vector.extract_strided_slice %299 {offsets = [2, 0], sizes = [2, 32], strides = [1, 1]} : vector<4x32xf32> to vector<2x32xf32>
    %738 = vector.extract_strided_slice %270 {offsets = [2, 0], sizes = [2, 32], strides = [1, 1]} : vector<4x32xf32> to vector<2x32xf32>
    %739 = tpu.concatenate %723, %724, %725, %726, %727, %728, %729, %730, %731, %732, %733, %734, %735, %736, %737, %738 in 0 : vector<2x32xf32>, vector<2x32xf32>, vector<2x32xf32>, vector<2x32xf32>, vector<2x32xf32>, vector<2x32xf32>, vector<2x32xf32>, vector<2x32xf32>, vector<2x32xf32>, vector<2x32xf32>, vector<2x32xf32>, vector<2x32xf32>, vector<2x32xf32>, vector<2x32xf32>, vector<2x32xf32>, vector<2x32xf32> -> vector<32x32xf32>
    %740 = tpu.concatenate %722, %739 in 1 : vector<32x32xf32>, vector<32x32xf32> -> vector<32x64xf32>
    %c0_119 = arith.constant 0 : index
    %c0_120 = arith.constant 0 : index
    %741 = vector.load %arg13[%c0_119, %c0_120] : memref<64x256xf32, #tpu.memory_space<vmem>>, vector<64x256xf32>
    %cst_121 = arith.constant dense<0.000000e+00> : vector<32x256xf32>
    %742 = tpu.matmul %740, %741, %cst_121 {dimension_numbers = #tpu.dot_dimension_numbers<[1], [0], [0], [1], [0, 0, 1, 1], [], []>} : vector<32x64xf32>, vector<64x256xf32>, vector<32x256xf32> -> vector<32x256xf32>
    %c0_122 = arith.constant 0 : index
    %c0_123 = arith.constant 0 : index
    %743 = vector.load %arg15[%c0_122, %c0_123] : memref<1x256xf32, #tpu.memory_space<vmem>>, vector<1x256xf32>
    %744 = vector.broadcast %743 : vector<1x256xf32> to vector<32x256xf32>
    %745 = arith.addf %742, %744 : vector<32x256xf32>
    %c0_124 = arith.constant 0 : index
    %c0_125 = arith.constant 0 : index
    %746 = vector.load %arg14[%c0_124, %c0_125] : memref<64x128xf32, #tpu.memory_space<vmem>>, vector<64x128xf32>
    %cst_126 = arith.constant 0.000000e+00 : f32
    %747 = vector.broadcast %cst_126 : f32 to vector<2x32xf32>
    %748 = tpu.concatenate %243, %243 in 1 : vector<4x32xf32>, vector<4x32xf32> -> vector<4x64xf32>
    %749 = arith.select %145, %748, %242 : vector<4x64xi1>, vector<4x64xf32>
    %cst_127 = arith.constant dense<0.000000e+00> : vector<4x128xf32>
    %750 = tpu.matmul %749, %746, %cst_127 {dimension_numbers = #tpu.dot_dimension_numbers<[1], [0], [0], [1], [0, 0, 1, 1], [], []>} : vector<4x64xf32>, vector<64x128xf32>, vector<4x128xf32> -> vector<4x128xf32>
    %751 = vector.extract_strided_slice %745 {offsets = [0, 0], sizes = [2, 128], strides = [1, 1]} : vector<32x256xf32> to vector<2x128xf32>
    %752 = vector.extract_strided_slice %745 {offsets = [30, 128], sizes = [2, 128], strides = [1, 1]} : vector<32x256xf32> to vector<2x128xf32>
    %753 = tpu.concatenate %751, %752 in 0 : vector<2x128xf32>, vector<2x128xf32> -> vector<4x128xf32>
    %754 = arith.addf %750, %753 : vector<4x128xf32>
    %755 = vector.extract_strided_slice %754 {offsets = [0, 0], sizes = [4, 96], strides = [1, 1]} : vector<4x128xf32> to vector<4x96xf32>
    %756 = arith.negf %755 : vector<4x96xf32>
    %757 = math.exp %756 : vector<4x96xf32>
    %cst_128 = arith.constant 1.000000e+00 : f32
    %758 = vector.broadcast %cst_128 : f32 to vector<4x96xf32>
    %759 = arith.addf %758, %757 : vector<4x96xf32>
    %760 = arith.divf %758, %759 : vector<4x96xf32>
    %761 = vector.extract_strided_slice %760 {offsets = [0, 0], sizes = [4, 32], strides = [1, 1]} : vector<4x96xf32> to vector<4x32xf32>
    %762 = vector.extract_strided_slice %760 {offsets = [0, 32], sizes = [4, 32], strides = [1, 1]} : vector<4x96xf32> to vector<4x32xf32>
    %763 = vector.extract_strided_slice %760 {offsets = [0, 64], sizes = [4, 32], strides = [1, 1]} : vector<4x96xf32> to vector<4x32xf32>
    %764 = vector.extract_strided_slice %754 {offsets = [0, 96], sizes = [4, 32], strides = [1, 1]} : vector<4x128xf32> to vector<4x32xf32>
    %765 = math.tanh %764 : vector<4x32xf32>
    %766 = arith.mulf %762, %243 : vector<4x32xf32>
    %767 = arith.mulf %761, %765 : vector<4x32xf32>
    %768 = arith.addf %766, %767 : vector<4x32xf32>
    %769 = math.tanh %768 : vector<4x32xf32>
    %770 = arith.mulf %763, %769 : vector<4x32xf32>
    %771 = vector.shape_cast %149 : vector<4x1xi1> to vector<4x1xi1>
    %772 = vector.broadcast %771 : vector<4x1xi1> to vector<4x32xi1>
    %773 = arith.select %772, %770, %243 : vector<4x32xi1>, vector<4x32xf32>
    %774 = vector.shape_cast %149 : vector<4x1xi1> to vector<4x1xi1>
    %775 = vector.broadcast %774 : vector<4x1xi1> to vector<4x32xi1>
    %776 = arith.select %775, %768, %243 : vector<4x32xi1>, vector<4x32xf32>
    %777 = vector.extract_strided_slice %773 {offsets = [2, 0], sizes = [2, 32], strides = [1, 1]} : vector<4x32xf32> to vector<2x32xf32>
    %778 = vector.shape_cast %151 : vector<2x1xi1> to vector<2x1xi1>
    %779 = vector.broadcast %778 : vector<2x1xi1> to vector<2x32xi1>
    %780 = arith.select %779, %777, %747 : vector<2x32xi1>, vector<2x32xf32>
    %781 = tpu.concatenate %773, %773 in 1 : vector<4x32xf32>, vector<4x32xf32> -> vector<4x64xf32>
    %782 = arith.select %145, %781, %242 : vector<4x64xi1>, vector<4x64xf32>
    %cst_129 = arith.constant dense<0.000000e+00> : vector<4x128xf32>
    %783 = tpu.matmul %782, %746, %cst_129 {dimension_numbers = #tpu.dot_dimension_numbers<[1], [0], [0], [1], [0, 0, 1, 1], [], []>} : vector<4x64xf32>, vector<64x128xf32>, vector<4x128xf32> -> vector<4x128xf32>
    %784 = vector.extract_strided_slice %745 {offsets = [2, 0], sizes = [2, 128], strides = [1, 1]} : vector<32x256xf32> to vector<2x128xf32>
    %785 = vector.extract_strided_slice %745 {offsets = [28, 128], sizes = [2, 128], strides = [1, 1]} : vector<32x256xf32> to vector<2x128xf32>
    %786 = tpu.concatenate %784, %785 in 0 : vector<2x128xf32>, vector<2x128xf32> -> vector<4x128xf32>
    %787 = arith.addf %783, %786 : vector<4x128xf32>
    %788 = vector.extract_strided_slice %787 {offsets = [0, 0], sizes = [4, 96], strides = [1, 1]} : vector<4x128xf32> to vector<4x96xf32>
    %789 = arith.negf %788 : vector<4x96xf32>
    %790 = math.exp %789 : vector<4x96xf32>
    %cst_130 = arith.constant 1.000000e+00 : f32
    %791 = vector.broadcast %cst_130 : f32 to vector<4x96xf32>
    %792 = arith.addf %791, %790 : vector<4x96xf32>
    %793 = arith.divf %791, %792 : vector<4x96xf32>
    %794 = vector.extract_strided_slice %793 {offsets = [0, 0], sizes = [4, 32], strides = [1, 1]} : vector<4x96xf32> to vector<4x32xf32>
    %795 = vector.extract_strided_slice %793 {offsets = [0, 32], sizes = [4, 32], strides = [1, 1]} : vector<4x96xf32> to vector<4x32xf32>
    %796 = vector.extract_strided_slice %793 {offsets = [0, 64], sizes = [4, 32], strides = [1, 1]} : vector<4x96xf32> to vector<4x32xf32>
    %797 = vector.extract_strided_slice %787 {offsets = [0, 96], sizes = [4, 32], strides = [1, 1]} : vector<4x128xf32> to vector<4x32xf32>
    %798 = math.tanh %797 : vector<4x32xf32>
    %799 = arith.mulf %795, %776 : vector<4x32xf32>
    %800 = arith.mulf %794, %798 : vector<4x32xf32>
    %801 = arith.addf %799, %800 : vector<4x32xf32>
    %802 = math.tanh %801 : vector<4x32xf32>
    %803 = arith.mulf %796, %802 : vector<4x32xf32>
    %804 = vector.shape_cast %155 : vector<4x1xi1> to vector<4x1xi1>
    %805 = vector.broadcast %804 : vector<4x1xi1> to vector<4x32xi1>
    %806 = arith.select %805, %803, %773 : vector<4x32xi1>, vector<4x32xf32>
    %807 = vector.shape_cast %155 : vector<4x1xi1> to vector<4x1xi1>
    %808 = vector.broadcast %807 : vector<4x1xi1> to vector<4x32xi1>
    %809 = arith.select %808, %801, %776 : vector<4x32xi1>, vector<4x32xf32>
    %810 = vector.extract_strided_slice %806 {offsets = [2, 0], sizes = [2, 32], strides = [1, 1]} : vector<4x32xf32> to vector<2x32xf32>
    %811 = vector.shape_cast %157 : vector<2x1xi1> to vector<2x1xi1>
    %812 = vector.broadcast %811 : vector<2x1xi1> to vector<2x32xi1>
    %813 = arith.select %812, %810, %780 : vector<2x32xi1>, vector<2x32xf32>
    %814 = tpu.concatenate %806, %806 in 1 : vector<4x32xf32>, vector<4x32xf32> -> vector<4x64xf32>
    %815 = arith.select %145, %814, %242 : vector<4x64xi1>, vector<4x64xf32>
    %cst_131 = arith.constant dense<0.000000e+00> : vector<4x128xf32>
    %816 = tpu.matmul %815, %746, %cst_131 {dimension_numbers = #tpu.dot_dimension_numbers<[1], [0], [0], [1], [0, 0, 1, 1], [], []>} : vector<4x64xf32>, vector<64x128xf32>, vector<4x128xf32> -> vector<4x128xf32>
    %817 = vector.extract_strided_slice %745 {offsets = [4, 0], sizes = [2, 128], strides = [1, 1]} : vector<32x256xf32> to vector<2x128xf32>
    %818 = vector.extract_strided_slice %745 {offsets = [26, 128], sizes = [2, 128], strides = [1, 1]} : vector<32x256xf32> to vector<2x128xf32>
    %819 = tpu.concatenate %817, %818 in 0 : vector<2x128xf32>, vector<2x128xf32> -> vector<4x128xf32>
    %820 = arith.addf %816, %819 : vector<4x128xf32>
    %821 = vector.extract_strided_slice %820 {offsets = [0, 0], sizes = [4, 96], strides = [1, 1]} : vector<4x128xf32> to vector<4x96xf32>
    %822 = arith.negf %821 : vector<4x96xf32>
    %823 = math.exp %822 : vector<4x96xf32>
    %cst_132 = arith.constant 1.000000e+00 : f32
    %824 = vector.broadcast %cst_132 : f32 to vector<4x96xf32>
    %825 = arith.addf %824, %823 : vector<4x96xf32>
    %826 = arith.divf %824, %825 : vector<4x96xf32>
    %827 = vector.extract_strided_slice %826 {offsets = [0, 0], sizes = [4, 32], strides = [1, 1]} : vector<4x96xf32> to vector<4x32xf32>
    %828 = vector.extract_strided_slice %826 {offsets = [0, 32], sizes = [4, 32], strides = [1, 1]} : vector<4x96xf32> to vector<4x32xf32>
    %829 = vector.extract_strided_slice %826 {offsets = [0, 64], sizes = [4, 32], strides = [1, 1]} : vector<4x96xf32> to vector<4x32xf32>
    %830 = vector.extract_strided_slice %820 {offsets = [0, 96], sizes = [4, 32], strides = [1, 1]} : vector<4x128xf32> to vector<4x32xf32>
    %831 = math.tanh %830 : vector<4x32xf32>
    %832 = arith.mulf %828, %809 : vector<4x32xf32>
    %833 = arith.mulf %827, %831 : vector<4x32xf32>
    %834 = arith.addf %832, %833 : vector<4x32xf32>
    %835 = math.tanh %834 : vector<4x32xf32>
    %836 = arith.mulf %829, %835 : vector<4x32xf32>
    %837 = vector.shape_cast %161 : vector<4x1xi1> to vector<4x1xi1>
    %838 = vector.broadcast %837 : vector<4x1xi1> to vector<4x32xi1>
    %839 = arith.select %838, %836, %806 : vector<4x32xi1>, vector<4x32xf32>
    %840 = vector.shape_cast %161 : vector<4x1xi1> to vector<4x1xi1>
    %841 = vector.broadcast %840 : vector<4x1xi1> to vector<4x32xi1>
    %842 = arith.select %841, %834, %809 : vector<4x32xi1>, vector<4x32xf32>
    %843 = vector.extract_strided_slice %839 {offsets = [2, 0], sizes = [2, 32], strides = [1, 1]} : vector<4x32xf32> to vector<2x32xf32>
    %844 = vector.shape_cast %163 : vector<2x1xi1> to vector<2x1xi1>
    %845 = vector.broadcast %844 : vector<2x1xi1> to vector<2x32xi1>
    %846 = arith.select %845, %843, %813 : vector<2x32xi1>, vector<2x32xf32>
    %847 = tpu.concatenate %839, %839 in 1 : vector<4x32xf32>, vector<4x32xf32> -> vector<4x64xf32>
    %848 = arith.select %145, %847, %242 : vector<4x64xi1>, vector<4x64xf32>
    %cst_133 = arith.constant dense<0.000000e+00> : vector<4x128xf32>
    %849 = tpu.matmul %848, %746, %cst_133 {dimension_numbers = #tpu.dot_dimension_numbers<[1], [0], [0], [1], [0, 0, 1, 1], [], []>} : vector<4x64xf32>, vector<64x128xf32>, vector<4x128xf32> -> vector<4x128xf32>
    %850 = vector.extract_strided_slice %745 {offsets = [6, 0], sizes = [2, 128], strides = [1, 1]} : vector<32x256xf32> to vector<2x128xf32>
    %851 = vector.extract_strided_slice %745 {offsets = [24, 128], sizes = [2, 128], strides = [1, 1]} : vector<32x256xf32> to vector<2x128xf32>
    %852 = tpu.concatenate %850, %851 in 0 : vector<2x128xf32>, vector<2x128xf32> -> vector<4x128xf32>
    %853 = arith.addf %849, %852 : vector<4x128xf32>
    %854 = vector.extract_strided_slice %853 {offsets = [0, 0], sizes = [4, 96], strides = [1, 1]} : vector<4x128xf32> to vector<4x96xf32>
    %855 = arith.negf %854 : vector<4x96xf32>
    %856 = math.exp %855 : vector<4x96xf32>
    %cst_134 = arith.constant 1.000000e+00 : f32
    %857 = vector.broadcast %cst_134 : f32 to vector<4x96xf32>
    %858 = arith.addf %857, %856 : vector<4x96xf32>
    %859 = arith.divf %857, %858 : vector<4x96xf32>
    %860 = vector.extract_strided_slice %859 {offsets = [0, 0], sizes = [4, 32], strides = [1, 1]} : vector<4x96xf32> to vector<4x32xf32>
    %861 = vector.extract_strided_slice %859 {offsets = [0, 32], sizes = [4, 32], strides = [1, 1]} : vector<4x96xf32> to vector<4x32xf32>
    %862 = vector.extract_strided_slice %859 {offsets = [0, 64], sizes = [4, 32], strides = [1, 1]} : vector<4x96xf32> to vector<4x32xf32>
    %863 = vector.extract_strided_slice %853 {offsets = [0, 96], sizes = [4, 32], strides = [1, 1]} : vector<4x128xf32> to vector<4x32xf32>
    %864 = math.tanh %863 : vector<4x32xf32>
    %865 = arith.mulf %861, %842 : vector<4x32xf32>
    %866 = arith.mulf %860, %864 : vector<4x32xf32>
    %867 = arith.addf %865, %866 : vector<4x32xf32>
    %868 = math.tanh %867 : vector<4x32xf32>
    %869 = arith.mulf %862, %868 : vector<4x32xf32>
    %870 = vector.shape_cast %167 : vector<4x1xi1> to vector<4x1xi1>
    %871 = vector.broadcast %870 : vector<4x1xi1> to vector<4x32xi1>
    %872 = arith.select %871, %869, %839 : vector<4x32xi1>, vector<4x32xf32>
    %873 = vector.shape_cast %167 : vector<4x1xi1> to vector<4x1xi1>
    %874 = vector.broadcast %873 : vector<4x1xi1> to vector<4x32xi1>
    %875 = arith.select %874, %867, %842 : vector<4x32xi1>, vector<4x32xf32>
    %876 = vector.extract_strided_slice %872 {offsets = [2, 0], sizes = [2, 32], strides = [1, 1]} : vector<4x32xf32> to vector<2x32xf32>
    %877 = vector.shape_cast %169 : vector<2x1xi1> to vector<2x1xi1>
    %878 = vector.broadcast %877 : vector<2x1xi1> to vector<2x32xi1>
    %879 = arith.select %878, %876, %846 : vector<2x32xi1>, vector<2x32xf32>
    %880 = tpu.concatenate %872, %872 in 1 : vector<4x32xf32>, vector<4x32xf32> -> vector<4x64xf32>
    %881 = arith.select %145, %880, %242 : vector<4x64xi1>, vector<4x64xf32>
    %cst_135 = arith.constant dense<0.000000e+00> : vector<4x128xf32>
    %882 = tpu.matmul %881, %746, %cst_135 {dimension_numbers = #tpu.dot_dimension_numbers<[1], [0], [0], [1], [0, 0, 1, 1], [], []>} : vector<4x64xf32>, vector<64x128xf32>, vector<4x128xf32> -> vector<4x128xf32>
    %883 = vector.extract_strided_slice %745 {offsets = [8, 0], sizes = [2, 128], strides = [1, 1]} : vector<32x256xf32> to vector<2x128xf32>
    %884 = vector.extract_strided_slice %745 {offsets = [22, 128], sizes = [2, 128], strides = [1, 1]} : vector<32x256xf32> to vector<2x128xf32>
    %885 = tpu.concatenate %883, %884 in 0 : vector<2x128xf32>, vector<2x128xf32> -> vector<4x128xf32>
    %886 = arith.addf %882, %885 : vector<4x128xf32>
    %887 = vector.extract_strided_slice %886 {offsets = [0, 0], sizes = [4, 96], strides = [1, 1]} : vector<4x128xf32> to vector<4x96xf32>
    %888 = arith.negf %887 : vector<4x96xf32>
    %889 = math.exp %888 : vector<4x96xf32>
    %cst_136 = arith.constant 1.000000e+00 : f32
    %890 = vector.broadcast %cst_136 : f32 to vector<4x96xf32>
    %891 = arith.addf %890, %889 : vector<4x96xf32>
    %892 = arith.divf %890, %891 : vector<4x96xf32>
    %893 = vector.extract_strided_slice %892 {offsets = [0, 0], sizes = [4, 32], strides = [1, 1]} : vector<4x96xf32> to vector<4x32xf32>
    %894 = vector.extract_strided_slice %892 {offsets = [0, 32], sizes = [4, 32], strides = [1, 1]} : vector<4x96xf32> to vector<4x32xf32>
    %895 = vector.extract_strided_slice %892 {offsets = [0, 64], sizes = [4, 32], strides = [1, 1]} : vector<4x96xf32> to vector<4x32xf32>
    %896 = vector.extract_strided_slice %886 {offsets = [0, 96], sizes = [4, 32], strides = [1, 1]} : vector<4x128xf32> to vector<4x32xf32>
    %897 = math.tanh %896 : vector<4x32xf32>
    %898 = arith.mulf %894, %875 : vector<4x32xf32>
    %899 = arith.mulf %893, %897 : vector<4x32xf32>
    %900 = arith.addf %898, %899 : vector<4x32xf32>
    %901 = math.tanh %900 : vector<4x32xf32>
    %902 = arith.mulf %895, %901 : vector<4x32xf32>
    %903 = vector.shape_cast %173 : vector<4x1xi1> to vector<4x1xi1>
    %904 = vector.broadcast %903 : vector<4x1xi1> to vector<4x32xi1>
    %905 = arith.select %904, %902, %872 : vector<4x32xi1>, vector<4x32xf32>
    %906 = vector.shape_cast %173 : vector<4x1xi1> to vector<4x1xi1>
    %907 = vector.broadcast %906 : vector<4x1xi1> to vector<4x32xi1>
    %908 = arith.select %907, %900, %875 : vector<4x32xi1>, vector<4x32xf32>
    %909 = vector.extract_strided_slice %905 {offsets = [2, 0], sizes = [2, 32], strides = [1, 1]} : vector<4x32xf32> to vector<2x32xf32>
    %910 = vector.shape_cast %175 : vector<2x1xi1> to vector<2x1xi1>
    %911 = vector.broadcast %910 : vector<2x1xi1> to vector<2x32xi1>
    %912 = arith.select %911, %909, %879 : vector<2x32xi1>, vector<2x32xf32>
    %913 = tpu.concatenate %905, %905 in 1 : vector<4x32xf32>, vector<4x32xf32> -> vector<4x64xf32>
    %914 = arith.select %145, %913, %242 : vector<4x64xi1>, vector<4x64xf32>
    %cst_137 = arith.constant dense<0.000000e+00> : vector<4x128xf32>
    %915 = tpu.matmul %914, %746, %cst_137 {dimension_numbers = #tpu.dot_dimension_numbers<[1], [0], [0], [1], [0, 0, 1, 1], [], []>} : vector<4x64xf32>, vector<64x128xf32>, vector<4x128xf32> -> vector<4x128xf32>
    %916 = vector.extract_strided_slice %745 {offsets = [10, 0], sizes = [2, 128], strides = [1, 1]} : vector<32x256xf32> to vector<2x128xf32>
    %917 = vector.extract_strided_slice %745 {offsets = [20, 128], sizes = [2, 128], strides = [1, 1]} : vector<32x256xf32> to vector<2x128xf32>
    %918 = tpu.concatenate %916, %917 in 0 : vector<2x128xf32>, vector<2x128xf32> -> vector<4x128xf32>
    %919 = arith.addf %915, %918 : vector<4x128xf32>
    %920 = vector.extract_strided_slice %919 {offsets = [0, 0], sizes = [4, 96], strides = [1, 1]} : vector<4x128xf32> to vector<4x96xf32>
    %921 = arith.negf %920 : vector<4x96xf32>
    %922 = math.exp %921 : vector<4x96xf32>
    %cst_138 = arith.constant 1.000000e+00 : f32
    %923 = vector.broadcast %cst_138 : f32 to vector<4x96xf32>
    %924 = arith.addf %923, %922 : vector<4x96xf32>
    %925 = arith.divf %923, %924 : vector<4x96xf32>
    %926 = vector.extract_strided_slice %925 {offsets = [0, 0], sizes = [4, 32], strides = [1, 1]} : vector<4x96xf32> to vector<4x32xf32>
    %927 = vector.extract_strided_slice %925 {offsets = [0, 32], sizes = [4, 32], strides = [1, 1]} : vector<4x96xf32> to vector<4x32xf32>
    %928 = vector.extract_strided_slice %925 {offsets = [0, 64], sizes = [4, 32], strides = [1, 1]} : vector<4x96xf32> to vector<4x32xf32>
    %929 = vector.extract_strided_slice %919 {offsets = [0, 96], sizes = [4, 32], strides = [1, 1]} : vector<4x128xf32> to vector<4x32xf32>
    %930 = math.tanh %929 : vector<4x32xf32>
    %931 = arith.mulf %927, %908 : vector<4x32xf32>
    %932 = arith.mulf %926, %930 : vector<4x32xf32>
    %933 = arith.addf %931, %932 : vector<4x32xf32>
    %934 = math.tanh %933 : vector<4x32xf32>
    %935 = arith.mulf %928, %934 : vector<4x32xf32>
    %936 = vector.shape_cast %179 : vector<4x1xi1> to vector<4x1xi1>
    %937 = vector.broadcast %936 : vector<4x1xi1> to vector<4x32xi1>
    %938 = arith.select %937, %935, %905 : vector<4x32xi1>, vector<4x32xf32>
    %939 = vector.shape_cast %179 : vector<4x1xi1> to vector<4x1xi1>
    %940 = vector.broadcast %939 : vector<4x1xi1> to vector<4x32xi1>
    %941 = arith.select %940, %933, %908 : vector<4x32xi1>, vector<4x32xf32>
    %942 = vector.extract_strided_slice %938 {offsets = [2, 0], sizes = [2, 32], strides = [1, 1]} : vector<4x32xf32> to vector<2x32xf32>
    %943 = vector.shape_cast %181 : vector<2x1xi1> to vector<2x1xi1>
    %944 = vector.broadcast %943 : vector<2x1xi1> to vector<2x32xi1>
    %945 = arith.select %944, %942, %912 : vector<2x32xi1>, vector<2x32xf32>
    %946 = tpu.concatenate %938, %938 in 1 : vector<4x32xf32>, vector<4x32xf32> -> vector<4x64xf32>
    %947 = arith.select %145, %946, %242 : vector<4x64xi1>, vector<4x64xf32>
    %cst_139 = arith.constant dense<0.000000e+00> : vector<4x128xf32>
    %948 = tpu.matmul %947, %746, %cst_139 {dimension_numbers = #tpu.dot_dimension_numbers<[1], [0], [0], [1], [0, 0, 1, 1], [], []>} : vector<4x64xf32>, vector<64x128xf32>, vector<4x128xf32> -> vector<4x128xf32>
    %949 = vector.extract_strided_slice %745 {offsets = [12, 0], sizes = [2, 128], strides = [1, 1]} : vector<32x256xf32> to vector<2x128xf32>
    %950 = vector.extract_strided_slice %745 {offsets = [18, 128], sizes = [2, 128], strides = [1, 1]} : vector<32x256xf32> to vector<2x128xf32>
    %951 = tpu.concatenate %949, %950 in 0 : vector<2x128xf32>, vector<2x128xf32> -> vector<4x128xf32>
    %952 = arith.addf %948, %951 : vector<4x128xf32>
    %953 = vector.extract_strided_slice %952 {offsets = [0, 0], sizes = [4, 96], strides = [1, 1]} : vector<4x128xf32> to vector<4x96xf32>
    %954 = arith.negf %953 : vector<4x96xf32>
    %955 = math.exp %954 : vector<4x96xf32>
    %cst_140 = arith.constant 1.000000e+00 : f32
    %956 = vector.broadcast %cst_140 : f32 to vector<4x96xf32>
    %957 = arith.addf %956, %955 : vector<4x96xf32>
    %958 = arith.divf %956, %957 : vector<4x96xf32>
    %959 = vector.extract_strided_slice %958 {offsets = [0, 0], sizes = [4, 32], strides = [1, 1]} : vector<4x96xf32> to vector<4x32xf32>
    %960 = vector.extract_strided_slice %958 {offsets = [0, 32], sizes = [4, 32], strides = [1, 1]} : vector<4x96xf32> to vector<4x32xf32>
    %961 = vector.extract_strided_slice %958 {offsets = [0, 64], sizes = [4, 32], strides = [1, 1]} : vector<4x96xf32> to vector<4x32xf32>
    %962 = vector.extract_strided_slice %952 {offsets = [0, 96], sizes = [4, 32], strides = [1, 1]} : vector<4x128xf32> to vector<4x32xf32>
    %963 = math.tanh %962 : vector<4x32xf32>
    %964 = arith.mulf %960, %941 : vector<4x32xf32>
    %965 = arith.mulf %959, %963 : vector<4x32xf32>
    %966 = arith.addf %964, %965 : vector<4x32xf32>
    %967 = math.tanh %966 : vector<4x32xf32>
    %968 = arith.mulf %961, %967 : vector<4x32xf32>
    %969 = vector.shape_cast %185 : vector<4x1xi1> to vector<4x1xi1>
    %970 = vector.broadcast %969 : vector<4x1xi1> to vector<4x32xi1>
    %971 = arith.select %970, %968, %938 : vector<4x32xi1>, vector<4x32xf32>
    %972 = vector.shape_cast %185 : vector<4x1xi1> to vector<4x1xi1>
    %973 = vector.broadcast %972 : vector<4x1xi1> to vector<4x32xi1>
    %974 = arith.select %973, %966, %941 : vector<4x32xi1>, vector<4x32xf32>
    %975 = vector.extract_strided_slice %971 {offsets = [2, 0], sizes = [2, 32], strides = [1, 1]} : vector<4x32xf32> to vector<2x32xf32>
    %976 = vector.shape_cast %187 : vector<2x1xi1> to vector<2x1xi1>
    %977 = vector.broadcast %976 : vector<2x1xi1> to vector<2x32xi1>
    %978 = arith.select %977, %975, %945 : vector<2x32xi1>, vector<2x32xf32>
    %979 = tpu.concatenate %971, %971 in 1 : vector<4x32xf32>, vector<4x32xf32> -> vector<4x64xf32>
    %980 = arith.select %145, %979, %242 : vector<4x64xi1>, vector<4x64xf32>
    %cst_141 = arith.constant dense<0.000000e+00> : vector<4x128xf32>
    %981 = tpu.matmul %980, %746, %cst_141 {dimension_numbers = #tpu.dot_dimension_numbers<[1], [0], [0], [1], [0, 0, 1, 1], [], []>} : vector<4x64xf32>, vector<64x128xf32>, vector<4x128xf32> -> vector<4x128xf32>
    %982 = vector.extract_strided_slice %745 {offsets = [14, 0], sizes = [2, 128], strides = [1, 1]} : vector<32x256xf32> to vector<2x128xf32>
    %983 = vector.extract_strided_slice %745 {offsets = [16, 128], sizes = [2, 128], strides = [1, 1]} : vector<32x256xf32> to vector<2x128xf32>
    %984 = tpu.concatenate %982, %983 in 0 : vector<2x128xf32>, vector<2x128xf32> -> vector<4x128xf32>
    %985 = arith.addf %981, %984 : vector<4x128xf32>
    %986 = vector.extract_strided_slice %985 {offsets = [0, 0], sizes = [4, 96], strides = [1, 1]} : vector<4x128xf32> to vector<4x96xf32>
    %987 = arith.negf %986 : vector<4x96xf32>
    %988 = math.exp %987 : vector<4x96xf32>
    %cst_142 = arith.constant 1.000000e+00 : f32
    %989 = vector.broadcast %cst_142 : f32 to vector<4x96xf32>
    %990 = arith.addf %989, %988 : vector<4x96xf32>
    %991 = arith.divf %989, %990 : vector<4x96xf32>
    %992 = vector.extract_strided_slice %991 {offsets = [0, 0], sizes = [4, 32], strides = [1, 1]} : vector<4x96xf32> to vector<4x32xf32>
    %993 = vector.extract_strided_slice %991 {offsets = [0, 32], sizes = [4, 32], strides = [1, 1]} : vector<4x96xf32> to vector<4x32xf32>
    %994 = vector.extract_strided_slice %991 {offsets = [0, 64], sizes = [4, 32], strides = [1, 1]} : vector<4x96xf32> to vector<4x32xf32>
    %995 = vector.extract_strided_slice %985 {offsets = [0, 96], sizes = [4, 32], strides = [1, 1]} : vector<4x128xf32> to vector<4x32xf32>
    %996 = math.tanh %995 : vector<4x32xf32>
    %997 = arith.mulf %993, %974 : vector<4x32xf32>
    %998 = arith.mulf %992, %996 : vector<4x32xf32>
    %999 = arith.addf %997, %998 : vector<4x32xf32>
    %1000 = math.tanh %999 : vector<4x32xf32>
    %1001 = arith.mulf %994, %1000 : vector<4x32xf32>
    %1002 = vector.shape_cast %191 : vector<4x1xi1> to vector<4x1xi1>
    %1003 = vector.broadcast %1002 : vector<4x1xi1> to vector<4x32xi1>
    %1004 = arith.select %1003, %1001, %971 : vector<4x32xi1>, vector<4x32xf32>
    %1005 = vector.shape_cast %191 : vector<4x1xi1> to vector<4x1xi1>
    %1006 = vector.broadcast %1005 : vector<4x1xi1> to vector<4x32xi1>
    %1007 = arith.select %1006, %999, %974 : vector<4x32xi1>, vector<4x32xf32>
    %1008 = vector.extract_strided_slice %1004 {offsets = [2, 0], sizes = [2, 32], strides = [1, 1]} : vector<4x32xf32> to vector<2x32xf32>
    %1009 = vector.shape_cast %193 : vector<2x1xi1> to vector<2x1xi1>
    %1010 = vector.broadcast %1009 : vector<2x1xi1> to vector<2x32xi1>
    %1011 = arith.select %1010, %1008, %978 : vector<2x32xi1>, vector<2x32xf32>
    %1012 = tpu.concatenate %1004, %1004 in 1 : vector<4x32xf32>, vector<4x32xf32> -> vector<4x64xf32>
    %1013 = arith.select %145, %1012, %242 : vector<4x64xi1>, vector<4x64xf32>
    %cst_143 = arith.constant dense<0.000000e+00> : vector<4x128xf32>
    %1014 = tpu.matmul %1013, %746, %cst_143 {dimension_numbers = #tpu.dot_dimension_numbers<[1], [0], [0], [1], [0, 0, 1, 1], [], []>} : vector<4x64xf32>, vector<64x128xf32>, vector<4x128xf32> -> vector<4x128xf32>
    %1015 = vector.extract_strided_slice %745 {offsets = [16, 0], sizes = [2, 128], strides = [1, 1]} : vector<32x256xf32> to vector<2x128xf32>
    %1016 = vector.extract_strided_slice %745 {offsets = [14, 128], sizes = [2, 128], strides = [1, 1]} : vector<32x256xf32> to vector<2x128xf32>
    %1017 = tpu.concatenate %1015, %1016 in 0 : vector<2x128xf32>, vector<2x128xf32> -> vector<4x128xf32>
    %1018 = arith.addf %1014, %1017 : vector<4x128xf32>
    %1019 = vector.extract_strided_slice %1018 {offsets = [0, 0], sizes = [4, 96], strides = [1, 1]} : vector<4x128xf32> to vector<4x96xf32>
    %1020 = arith.negf %1019 : vector<4x96xf32>
    %1021 = math.exp %1020 : vector<4x96xf32>
    %cst_144 = arith.constant 1.000000e+00 : f32
    %1022 = vector.broadcast %cst_144 : f32 to vector<4x96xf32>
    %1023 = arith.addf %1022, %1021 : vector<4x96xf32>
    %1024 = arith.divf %1022, %1023 : vector<4x96xf32>
    %1025 = vector.extract_strided_slice %1024 {offsets = [0, 0], sizes = [4, 32], strides = [1, 1]} : vector<4x96xf32> to vector<4x32xf32>
    %1026 = vector.extract_strided_slice %1024 {offsets = [0, 32], sizes = [4, 32], strides = [1, 1]} : vector<4x96xf32> to vector<4x32xf32>
    %1027 = vector.extract_strided_slice %1024 {offsets = [0, 64], sizes = [4, 32], strides = [1, 1]} : vector<4x96xf32> to vector<4x32xf32>
    %1028 = vector.extract_strided_slice %1018 {offsets = [0, 96], sizes = [4, 32], strides = [1, 1]} : vector<4x128xf32> to vector<4x32xf32>
    %1029 = math.tanh %1028 : vector<4x32xf32>
    %1030 = arith.mulf %1026, %1007 : vector<4x32xf32>
    %1031 = arith.mulf %1025, %1029 : vector<4x32xf32>
    %1032 = arith.addf %1030, %1031 : vector<4x32xf32>
    %1033 = math.tanh %1032 : vector<4x32xf32>
    %1034 = arith.mulf %1027, %1033 : vector<4x32xf32>
    %1035 = vector.shape_cast %197 : vector<4x1xi1> to vector<4x1xi1>
    %1036 = vector.broadcast %1035 : vector<4x1xi1> to vector<4x32xi1>
    %1037 = arith.select %1036, %1034, %1004 : vector<4x32xi1>, vector<4x32xf32>
    %1038 = vector.shape_cast %197 : vector<4x1xi1> to vector<4x1xi1>
    %1039 = vector.broadcast %1038 : vector<4x1xi1> to vector<4x32xi1>
    %1040 = arith.select %1039, %1032, %1007 : vector<4x32xi1>, vector<4x32xf32>
    %1041 = vector.extract_strided_slice %1037 {offsets = [2, 0], sizes = [2, 32], strides = [1, 1]} : vector<4x32xf32> to vector<2x32xf32>
    %1042 = vector.shape_cast %199 : vector<2x1xi1> to vector<2x1xi1>
    %1043 = vector.broadcast %1042 : vector<2x1xi1> to vector<2x32xi1>
    %1044 = arith.select %1043, %1041, %1011 : vector<2x32xi1>, vector<2x32xf32>
    %1045 = tpu.concatenate %1037, %1037 in 1 : vector<4x32xf32>, vector<4x32xf32> -> vector<4x64xf32>
    %1046 = arith.select %145, %1045, %242 : vector<4x64xi1>, vector<4x64xf32>
    %cst_145 = arith.constant dense<0.000000e+00> : vector<4x128xf32>
    %1047 = tpu.matmul %1046, %746, %cst_145 {dimension_numbers = #tpu.dot_dimension_numbers<[1], [0], [0], [1], [0, 0, 1, 1], [], []>} : vector<4x64xf32>, vector<64x128xf32>, vector<4x128xf32> -> vector<4x128xf32>
    %1048 = vector.extract_strided_slice %745 {offsets = [18, 0], sizes = [2, 128], strides = [1, 1]} : vector<32x256xf32> to vector<2x128xf32>
    %1049 = vector.extract_strided_slice %745 {offsets = [12, 128], sizes = [2, 128], strides = [1, 1]} : vector<32x256xf32> to vector<2x128xf32>
    %1050 = tpu.concatenate %1048, %1049 in 0 : vector<2x128xf32>, vector<2x128xf32> -> vector<4x128xf32>
    %1051 = arith.addf %1047, %1050 : vector<4x128xf32>
    %1052 = vector.extract_strided_slice %1051 {offsets = [0, 0], sizes = [4, 96], strides = [1, 1]} : vector<4x128xf32> to vector<4x96xf32>
    %1053 = arith.negf %1052 : vector<4x96xf32>
    %1054 = math.exp %1053 : vector<4x96xf32>
    %cst_146 = arith.constant 1.000000e+00 : f32
    %1055 = vector.broadcast %cst_146 : f32 to vector<4x96xf32>
    %1056 = arith.addf %1055, %1054 : vector<4x96xf32>
    %1057 = arith.divf %1055, %1056 : vector<4x96xf32>
    %1058 = vector.extract_strided_slice %1057 {offsets = [0, 0], sizes = [4, 32], strides = [1, 1]} : vector<4x96xf32> to vector<4x32xf32>
    %1059 = vector.extract_strided_slice %1057 {offsets = [0, 32], sizes = [4, 32], strides = [1, 1]} : vector<4x96xf32> to vector<4x32xf32>
    %1060 = vector.extract_strided_slice %1057 {offsets = [0, 64], sizes = [4, 32], strides = [1, 1]} : vector<4x96xf32> to vector<4x32xf32>
    %1061 = vector.extract_strided_slice %1051 {offsets = [0, 96], sizes = [4, 32], strides = [1, 1]} : vector<4x128xf32> to vector<4x32xf32>
    %1062 = math.tanh %1061 : vector<4x32xf32>
    %1063 = arith.mulf %1059, %1040 : vector<4x32xf32>
    %1064 = arith.mulf %1058, %1062 : vector<4x32xf32>
    %1065 = arith.addf %1063, %1064 : vector<4x32xf32>
    %1066 = math.tanh %1065 : vector<4x32xf32>
    %1067 = arith.mulf %1060, %1066 : vector<4x32xf32>
    %1068 = vector.shape_cast %203 : vector<4x1xi1> to vector<4x1xi1>
    %1069 = vector.broadcast %1068 : vector<4x1xi1> to vector<4x32xi1>
    %1070 = arith.select %1069, %1067, %1037 : vector<4x32xi1>, vector<4x32xf32>
    %1071 = vector.shape_cast %203 : vector<4x1xi1> to vector<4x1xi1>
    %1072 = vector.broadcast %1071 : vector<4x1xi1> to vector<4x32xi1>
    %1073 = arith.select %1072, %1065, %1040 : vector<4x32xi1>, vector<4x32xf32>
    %1074 = vector.extract_strided_slice %1070 {offsets = [2, 0], sizes = [2, 32], strides = [1, 1]} : vector<4x32xf32> to vector<2x32xf32>
    %1075 = vector.shape_cast %205 : vector<2x1xi1> to vector<2x1xi1>
    %1076 = vector.broadcast %1075 : vector<2x1xi1> to vector<2x32xi1>
    %1077 = arith.select %1076, %1074, %1044 : vector<2x32xi1>, vector<2x32xf32>
    %1078 = tpu.concatenate %1070, %1070 in 1 : vector<4x32xf32>, vector<4x32xf32> -> vector<4x64xf32>
    %1079 = arith.select %145, %1078, %242 : vector<4x64xi1>, vector<4x64xf32>
    %cst_147 = arith.constant dense<0.000000e+00> : vector<4x128xf32>
    %1080 = tpu.matmul %1079, %746, %cst_147 {dimension_numbers = #tpu.dot_dimension_numbers<[1], [0], [0], [1], [0, 0, 1, 1], [], []>} : vector<4x64xf32>, vector<64x128xf32>, vector<4x128xf32> -> vector<4x128xf32>
    %1081 = vector.extract_strided_slice %745 {offsets = [20, 0], sizes = [2, 128], strides = [1, 1]} : vector<32x256xf32> to vector<2x128xf32>
    %1082 = vector.extract_strided_slice %745 {offsets = [10, 128], sizes = [2, 128], strides = [1, 1]} : vector<32x256xf32> to vector<2x128xf32>
    %1083 = tpu.concatenate %1081, %1082 in 0 : vector<2x128xf32>, vector<2x128xf32> -> vector<4x128xf32>
    %1084 = arith.addf %1080, %1083 : vector<4x128xf32>
    %1085 = vector.extract_strided_slice %1084 {offsets = [0, 0], sizes = [4, 96], strides = [1, 1]} : vector<4x128xf32> to vector<4x96xf32>
    %1086 = arith.negf %1085 : vector<4x96xf32>
    %1087 = math.exp %1086 : vector<4x96xf32>
    %cst_148 = arith.constant 1.000000e+00 : f32
    %1088 = vector.broadcast %cst_148 : f32 to vector<4x96xf32>
    %1089 = arith.addf %1088, %1087 : vector<4x96xf32>
    %1090 = arith.divf %1088, %1089 : vector<4x96xf32>
    %1091 = vector.extract_strided_slice %1090 {offsets = [0, 0], sizes = [4, 32], strides = [1, 1]} : vector<4x96xf32> to vector<4x32xf32>
    %1092 = vector.extract_strided_slice %1090 {offsets = [0, 32], sizes = [4, 32], strides = [1, 1]} : vector<4x96xf32> to vector<4x32xf32>
    %1093 = vector.extract_strided_slice %1090 {offsets = [0, 64], sizes = [4, 32], strides = [1, 1]} : vector<4x96xf32> to vector<4x32xf32>
    %1094 = vector.extract_strided_slice %1084 {offsets = [0, 96], sizes = [4, 32], strides = [1, 1]} : vector<4x128xf32> to vector<4x32xf32>
    %1095 = math.tanh %1094 : vector<4x32xf32>
    %1096 = arith.mulf %1092, %1073 : vector<4x32xf32>
    %1097 = arith.mulf %1091, %1095 : vector<4x32xf32>
    %1098 = arith.addf %1096, %1097 : vector<4x32xf32>
    %1099 = math.tanh %1098 : vector<4x32xf32>
    %1100 = arith.mulf %1093, %1099 : vector<4x32xf32>
    %1101 = vector.shape_cast %209 : vector<4x1xi1> to vector<4x1xi1>
    %1102 = vector.broadcast %1101 : vector<4x1xi1> to vector<4x32xi1>
    %1103 = arith.select %1102, %1100, %1070 : vector<4x32xi1>, vector<4x32xf32>
    %1104 = vector.shape_cast %209 : vector<4x1xi1> to vector<4x1xi1>
    %1105 = vector.broadcast %1104 : vector<4x1xi1> to vector<4x32xi1>
    %1106 = arith.select %1105, %1098, %1073 : vector<4x32xi1>, vector<4x32xf32>
    %1107 = vector.extract_strided_slice %1103 {offsets = [2, 0], sizes = [2, 32], strides = [1, 1]} : vector<4x32xf32> to vector<2x32xf32>
    %1108 = vector.shape_cast %211 : vector<2x1xi1> to vector<2x1xi1>
    %1109 = vector.broadcast %1108 : vector<2x1xi1> to vector<2x32xi1>
    %1110 = arith.select %1109, %1107, %1077 : vector<2x32xi1>, vector<2x32xf32>
    %1111 = tpu.concatenate %1103, %1103 in 1 : vector<4x32xf32>, vector<4x32xf32> -> vector<4x64xf32>
    %1112 = arith.select %145, %1111, %242 : vector<4x64xi1>, vector<4x64xf32>
    %cst_149 = arith.constant dense<0.000000e+00> : vector<4x128xf32>
    %1113 = tpu.matmul %1112, %746, %cst_149 {dimension_numbers = #tpu.dot_dimension_numbers<[1], [0], [0], [1], [0, 0, 1, 1], [], []>} : vector<4x64xf32>, vector<64x128xf32>, vector<4x128xf32> -> vector<4x128xf32>
    %1114 = vector.extract_strided_slice %745 {offsets = [22, 0], sizes = [2, 128], strides = [1, 1]} : vector<32x256xf32> to vector<2x128xf32>
    %1115 = vector.extract_strided_slice %745 {offsets = [8, 128], sizes = [2, 128], strides = [1, 1]} : vector<32x256xf32> to vector<2x128xf32>
    %1116 = tpu.concatenate %1114, %1115 in 0 : vector<2x128xf32>, vector<2x128xf32> -> vector<4x128xf32>
    %1117 = arith.addf %1113, %1116 : vector<4x128xf32>
    %1118 = vector.extract_strided_slice %1117 {offsets = [0, 0], sizes = [4, 96], strides = [1, 1]} : vector<4x128xf32> to vector<4x96xf32>
    %1119 = arith.negf %1118 : vector<4x96xf32>
    %1120 = math.exp %1119 : vector<4x96xf32>
    %cst_150 = arith.constant 1.000000e+00 : f32
    %1121 = vector.broadcast %cst_150 : f32 to vector<4x96xf32>
    %1122 = arith.addf %1121, %1120 : vector<4x96xf32>
    %1123 = arith.divf %1121, %1122 : vector<4x96xf32>
    %1124 = vector.extract_strided_slice %1123 {offsets = [0, 0], sizes = [4, 32], strides = [1, 1]} : vector<4x96xf32> to vector<4x32xf32>
    %1125 = vector.extract_strided_slice %1123 {offsets = [0, 32], sizes = [4, 32], strides = [1, 1]} : vector<4x96xf32> to vector<4x32xf32>
    %1126 = vector.extract_strided_slice %1123 {offsets = [0, 64], sizes = [4, 32], strides = [1, 1]} : vector<4x96xf32> to vector<4x32xf32>
    %1127 = vector.extract_strided_slice %1117 {offsets = [0, 96], sizes = [4, 32], strides = [1, 1]} : vector<4x128xf32> to vector<4x32xf32>
    %1128 = math.tanh %1127 : vector<4x32xf32>
    %1129 = arith.mulf %1125, %1106 : vector<4x32xf32>
    %1130 = arith.mulf %1124, %1128 : vector<4x32xf32>
    %1131 = arith.addf %1129, %1130 : vector<4x32xf32>
    %1132 = math.tanh %1131 : vector<4x32xf32>
    %1133 = arith.mulf %1126, %1132 : vector<4x32xf32>
    %1134 = vector.shape_cast %215 : vector<4x1xi1> to vector<4x1xi1>
    %1135 = vector.broadcast %1134 : vector<4x1xi1> to vector<4x32xi1>
    %1136 = arith.select %1135, %1133, %1103 : vector<4x32xi1>, vector<4x32xf32>
    %1137 = vector.shape_cast %215 : vector<4x1xi1> to vector<4x1xi1>
    %1138 = vector.broadcast %1137 : vector<4x1xi1> to vector<4x32xi1>
    %1139 = arith.select %1138, %1131, %1106 : vector<4x32xi1>, vector<4x32xf32>
    %1140 = vector.extract_strided_slice %1136 {offsets = [2, 0], sizes = [2, 32], strides = [1, 1]} : vector<4x32xf32> to vector<2x32xf32>
    %1141 = vector.shape_cast %217 : vector<2x1xi1> to vector<2x1xi1>
    %1142 = vector.broadcast %1141 : vector<2x1xi1> to vector<2x32xi1>
    %1143 = arith.select %1142, %1140, %1110 : vector<2x32xi1>, vector<2x32xf32>
    %1144 = tpu.concatenate %1136, %1136 in 1 : vector<4x32xf32>, vector<4x32xf32> -> vector<4x64xf32>
    %1145 = arith.select %145, %1144, %242 : vector<4x64xi1>, vector<4x64xf32>
    %cst_151 = arith.constant dense<0.000000e+00> : vector<4x128xf32>
    %1146 = tpu.matmul %1145, %746, %cst_151 {dimension_numbers = #tpu.dot_dimension_numbers<[1], [0], [0], [1], [0, 0, 1, 1], [], []>} : vector<4x64xf32>, vector<64x128xf32>, vector<4x128xf32> -> vector<4x128xf32>
    %1147 = vector.extract_strided_slice %745 {offsets = [24, 0], sizes = [2, 128], strides = [1, 1]} : vector<32x256xf32> to vector<2x128xf32>
    %1148 = vector.extract_strided_slice %745 {offsets = [6, 128], sizes = [2, 128], strides = [1, 1]} : vector<32x256xf32> to vector<2x128xf32>
    %1149 = tpu.concatenate %1147, %1148 in 0 : vector<2x128xf32>, vector<2x128xf32> -> vector<4x128xf32>
    %1150 = arith.addf %1146, %1149 : vector<4x128xf32>
    %1151 = vector.extract_strided_slice %1150 {offsets = [0, 0], sizes = [4, 96], strides = [1, 1]} : vector<4x128xf32> to vector<4x96xf32>
    %1152 = arith.negf %1151 : vector<4x96xf32>
    %1153 = math.exp %1152 : vector<4x96xf32>
    %cst_152 = arith.constant 1.000000e+00 : f32
    %1154 = vector.broadcast %cst_152 : f32 to vector<4x96xf32>
    %1155 = arith.addf %1154, %1153 : vector<4x96xf32>
    %1156 = arith.divf %1154, %1155 : vector<4x96xf32>
    %1157 = vector.extract_strided_slice %1156 {offsets = [0, 0], sizes = [4, 32], strides = [1, 1]} : vector<4x96xf32> to vector<4x32xf32>
    %1158 = vector.extract_strided_slice %1156 {offsets = [0, 32], sizes = [4, 32], strides = [1, 1]} : vector<4x96xf32> to vector<4x32xf32>
    %1159 = vector.extract_strided_slice %1156 {offsets = [0, 64], sizes = [4, 32], strides = [1, 1]} : vector<4x96xf32> to vector<4x32xf32>
    %1160 = vector.extract_strided_slice %1150 {offsets = [0, 96], sizes = [4, 32], strides = [1, 1]} : vector<4x128xf32> to vector<4x32xf32>
    %1161 = math.tanh %1160 : vector<4x32xf32>
    %1162 = arith.mulf %1158, %1139 : vector<4x32xf32>
    %1163 = arith.mulf %1157, %1161 : vector<4x32xf32>
    %1164 = arith.addf %1162, %1163 : vector<4x32xf32>
    %1165 = math.tanh %1164 : vector<4x32xf32>
    %1166 = arith.mulf %1159, %1165 : vector<4x32xf32>
    %1167 = vector.shape_cast %221 : vector<4x1xi1> to vector<4x1xi1>
    %1168 = vector.broadcast %1167 : vector<4x1xi1> to vector<4x32xi1>
    %1169 = arith.select %1168, %1166, %1136 : vector<4x32xi1>, vector<4x32xf32>
    %1170 = vector.shape_cast %221 : vector<4x1xi1> to vector<4x1xi1>
    %1171 = vector.broadcast %1170 : vector<4x1xi1> to vector<4x32xi1>
    %1172 = arith.select %1171, %1164, %1139 : vector<4x32xi1>, vector<4x32xf32>
    %1173 = vector.extract_strided_slice %1169 {offsets = [2, 0], sizes = [2, 32], strides = [1, 1]} : vector<4x32xf32> to vector<2x32xf32>
    %1174 = vector.shape_cast %223 : vector<2x1xi1> to vector<2x1xi1>
    %1175 = vector.broadcast %1174 : vector<2x1xi1> to vector<2x32xi1>
    %1176 = arith.select %1175, %1173, %1143 : vector<2x32xi1>, vector<2x32xf32>
    %1177 = tpu.concatenate %1169, %1169 in 1 : vector<4x32xf32>, vector<4x32xf32> -> vector<4x64xf32>
    %1178 = arith.select %145, %1177, %242 : vector<4x64xi1>, vector<4x64xf32>
    %cst_153 = arith.constant dense<0.000000e+00> : vector<4x128xf32>
    %1179 = tpu.matmul %1178, %746, %cst_153 {dimension_numbers = #tpu.dot_dimension_numbers<[1], [0], [0], [1], [0, 0, 1, 1], [], []>} : vector<4x64xf32>, vector<64x128xf32>, vector<4x128xf32> -> vector<4x128xf32>
    %1180 = vector.extract_strided_slice %745 {offsets = [26, 0], sizes = [2, 128], strides = [1, 1]} : vector<32x256xf32> to vector<2x128xf32>
    %1181 = vector.extract_strided_slice %745 {offsets = [4, 128], sizes = [2, 128], strides = [1, 1]} : vector<32x256xf32> to vector<2x128xf32>
    %1182 = tpu.concatenate %1180, %1181 in 0 : vector<2x128xf32>, vector<2x128xf32> -> vector<4x128xf32>
    %1183 = arith.addf %1179, %1182 : vector<4x128xf32>
    %1184 = vector.extract_strided_slice %1183 {offsets = [0, 0], sizes = [4, 96], strides = [1, 1]} : vector<4x128xf32> to vector<4x96xf32>
    %1185 = arith.negf %1184 : vector<4x96xf32>
    %1186 = math.exp %1185 : vector<4x96xf32>
    %cst_154 = arith.constant 1.000000e+00 : f32
    %1187 = vector.broadcast %cst_154 : f32 to vector<4x96xf32>
    %1188 = arith.addf %1187, %1186 : vector<4x96xf32>
    %1189 = arith.divf %1187, %1188 : vector<4x96xf32>
    %1190 = vector.extract_strided_slice %1189 {offsets = [0, 0], sizes = [4, 32], strides = [1, 1]} : vector<4x96xf32> to vector<4x32xf32>
    %1191 = vector.extract_strided_slice %1189 {offsets = [0, 32], sizes = [4, 32], strides = [1, 1]} : vector<4x96xf32> to vector<4x32xf32>
    %1192 = vector.extract_strided_slice %1189 {offsets = [0, 64], sizes = [4, 32], strides = [1, 1]} : vector<4x96xf32> to vector<4x32xf32>
    %1193 = vector.extract_strided_slice %1183 {offsets = [0, 96], sizes = [4, 32], strides = [1, 1]} : vector<4x128xf32> to vector<4x32xf32>
    %1194 = math.tanh %1193 : vector<4x32xf32>
    %1195 = arith.mulf %1191, %1172 : vector<4x32xf32>
    %1196 = arith.mulf %1190, %1194 : vector<4x32xf32>
    %1197 = arith.addf %1195, %1196 : vector<4x32xf32>
    %1198 = math.tanh %1197 : vector<4x32xf32>
    %1199 = arith.mulf %1192, %1198 : vector<4x32xf32>
    %1200 = vector.shape_cast %227 : vector<4x1xi1> to vector<4x1xi1>
    %1201 = vector.broadcast %1200 : vector<4x1xi1> to vector<4x32xi1>
    %1202 = arith.select %1201, %1199, %1169 : vector<4x32xi1>, vector<4x32xf32>
    %1203 = vector.shape_cast %227 : vector<4x1xi1> to vector<4x1xi1>
    %1204 = vector.broadcast %1203 : vector<4x1xi1> to vector<4x32xi1>
    %1205 = arith.select %1204, %1197, %1172 : vector<4x32xi1>, vector<4x32xf32>
    %1206 = vector.extract_strided_slice %1202 {offsets = [2, 0], sizes = [2, 32], strides = [1, 1]} : vector<4x32xf32> to vector<2x32xf32>
    %1207 = vector.shape_cast %229 : vector<2x1xi1> to vector<2x1xi1>
    %1208 = vector.broadcast %1207 : vector<2x1xi1> to vector<2x32xi1>
    %1209 = arith.select %1208, %1206, %1176 : vector<2x32xi1>, vector<2x32xf32>
    %1210 = tpu.concatenate %1202, %1202 in 1 : vector<4x32xf32>, vector<4x32xf32> -> vector<4x64xf32>
    %1211 = arith.select %145, %1210, %242 : vector<4x64xi1>, vector<4x64xf32>
    %cst_155 = arith.constant dense<0.000000e+00> : vector<4x128xf32>
    %1212 = tpu.matmul %1211, %746, %cst_155 {dimension_numbers = #tpu.dot_dimension_numbers<[1], [0], [0], [1], [0, 0, 1, 1], [], []>} : vector<4x64xf32>, vector<64x128xf32>, vector<4x128xf32> -> vector<4x128xf32>
    %1213 = vector.extract_strided_slice %745 {offsets = [28, 0], sizes = [2, 128], strides = [1, 1]} : vector<32x256xf32> to vector<2x128xf32>
    %1214 = vector.extract_strided_slice %745 {offsets = [2, 128], sizes = [2, 128], strides = [1, 1]} : vector<32x256xf32> to vector<2x128xf32>
    %1215 = tpu.concatenate %1213, %1214 in 0 : vector<2x128xf32>, vector<2x128xf32> -> vector<4x128xf32>
    %1216 = arith.addf %1212, %1215 : vector<4x128xf32>
    %1217 = vector.extract_strided_slice %1216 {offsets = [0, 0], sizes = [4, 96], strides = [1, 1]} : vector<4x128xf32> to vector<4x96xf32>
    %1218 = arith.negf %1217 : vector<4x96xf32>
    %1219 = math.exp %1218 : vector<4x96xf32>
    %cst_156 = arith.constant 1.000000e+00 : f32
    %1220 = vector.broadcast %cst_156 : f32 to vector<4x96xf32>
    %1221 = arith.addf %1220, %1219 : vector<4x96xf32>
    %1222 = arith.divf %1220, %1221 : vector<4x96xf32>
    %1223 = vector.extract_strided_slice %1222 {offsets = [0, 0], sizes = [4, 32], strides = [1, 1]} : vector<4x96xf32> to vector<4x32xf32>
    %1224 = vector.extract_strided_slice %1222 {offsets = [0, 32], sizes = [4, 32], strides = [1, 1]} : vector<4x96xf32> to vector<4x32xf32>
    %1225 = vector.extract_strided_slice %1222 {offsets = [0, 64], sizes = [4, 32], strides = [1, 1]} : vector<4x96xf32> to vector<4x32xf32>
    %1226 = vector.extract_strided_slice %1216 {offsets = [0, 96], sizes = [4, 32], strides = [1, 1]} : vector<4x128xf32> to vector<4x32xf32>
    %1227 = math.tanh %1226 : vector<4x32xf32>
    %1228 = arith.mulf %1224, %1205 : vector<4x32xf32>
    %1229 = arith.mulf %1223, %1227 : vector<4x32xf32>
    %1230 = arith.addf %1228, %1229 : vector<4x32xf32>
    %1231 = math.tanh %1230 : vector<4x32xf32>
    %1232 = arith.mulf %1225, %1231 : vector<4x32xf32>
    %1233 = vector.shape_cast %233 : vector<4x1xi1> to vector<4x1xi1>
    %1234 = vector.broadcast %1233 : vector<4x1xi1> to vector<4x32xi1>
    %1235 = arith.select %1234, %1232, %1202 : vector<4x32xi1>, vector<4x32xf32>
    %1236 = vector.shape_cast %233 : vector<4x1xi1> to vector<4x1xi1>
    %1237 = vector.broadcast %1236 : vector<4x1xi1> to vector<4x32xi1>
    %1238 = arith.select %1237, %1230, %1205 : vector<4x32xi1>, vector<4x32xf32>
    %1239 = vector.extract_strided_slice %1235 {offsets = [2, 0], sizes = [2, 32], strides = [1, 1]} : vector<4x32xf32> to vector<2x32xf32>
    %1240 = vector.shape_cast %235 : vector<2x1xi1> to vector<2x1xi1>
    %1241 = vector.broadcast %1240 : vector<2x1xi1> to vector<2x32xi1>
    %1242 = arith.select %1241, %1239, %1209 : vector<2x32xi1>, vector<2x32xf32>
    %1243 = tpu.concatenate %1235, %1235 in 1 : vector<4x32xf32>, vector<4x32xf32> -> vector<4x64xf32>
    %1244 = arith.select %145, %1243, %242 : vector<4x64xi1>, vector<4x64xf32>
    %cst_157 = arith.constant dense<0.000000e+00> : vector<4x128xf32>
    %1245 = tpu.matmul %1244, %746, %cst_157 {dimension_numbers = #tpu.dot_dimension_numbers<[1], [0], [0], [1], [0, 0, 1, 1], [], []>} : vector<4x64xf32>, vector<64x128xf32>, vector<4x128xf32> -> vector<4x128xf32>
    %1246 = vector.extract_strided_slice %745 {offsets = [30, 0], sizes = [2, 128], strides = [1, 1]} : vector<32x256xf32> to vector<2x128xf32>
    %1247 = vector.extract_strided_slice %745 {offsets = [0, 128], sizes = [2, 128], strides = [1, 1]} : vector<32x256xf32> to vector<2x128xf32>
    %1248 = tpu.concatenate %1246, %1247 in 0 : vector<2x128xf32>, vector<2x128xf32> -> vector<4x128xf32>
    %1249 = arith.addf %1245, %1248 : vector<4x128xf32>
    %1250 = vector.extract_strided_slice %1249 {offsets = [0, 0], sizes = [4, 96], strides = [1, 1]} : vector<4x128xf32> to vector<4x96xf32>
    %1251 = arith.negf %1250 : vector<4x96xf32>
    %1252 = math.exp %1251 : vector<4x96xf32>
    %cst_158 = arith.constant 1.000000e+00 : f32
    %1253 = vector.broadcast %cst_158 : f32 to vector<4x96xf32>
    %1254 = arith.addf %1253, %1252 : vector<4x96xf32>
    %1255 = arith.divf %1253, %1254 : vector<4x96xf32>
    %1256 = vector.extract_strided_slice %1255 {offsets = [0, 0], sizes = [4, 32], strides = [1, 1]} : vector<4x96xf32> to vector<4x32xf32>
    %1257 = vector.extract_strided_slice %1255 {offsets = [0, 32], sizes = [4, 32], strides = [1, 1]} : vector<4x96xf32> to vector<4x32xf32>
    %1258 = vector.extract_strided_slice %1255 {offsets = [0, 64], sizes = [4, 32], strides = [1, 1]} : vector<4x96xf32> to vector<4x32xf32>
    %1259 = vector.extract_strided_slice %1249 {offsets = [0, 96], sizes = [4, 32], strides = [1, 1]} : vector<4x128xf32> to vector<4x32xf32>
    %1260 = math.tanh %1259 : vector<4x32xf32>
    %1261 = arith.mulf %1257, %1238 : vector<4x32xf32>
    %1262 = arith.mulf %1256, %1260 : vector<4x32xf32>
    %1263 = arith.addf %1261, %1262 : vector<4x32xf32>
    %1264 = math.tanh %1263 : vector<4x32xf32>
    %1265 = arith.mulf %1258, %1264 : vector<4x32xf32>
    %1266 = vector.shape_cast %239 : vector<4x1xi1> to vector<4x1xi1>
    %1267 = vector.broadcast %1266 : vector<4x1xi1> to vector<4x32xi1>
    %1268 = arith.select %1267, %1265, %1235 : vector<4x32xi1>, vector<4x32xf32>
    %1269 = vector.extract_strided_slice %1268 {offsets = [2, 0], sizes = [2, 32], strides = [1, 1]} : vector<4x32xf32> to vector<2x32xf32>
    %1270 = vector.shape_cast %241 : vector<2x1xi1> to vector<2x1xi1>
    %1271 = vector.broadcast %1270 : vector<2x1xi1> to vector<2x32xi1>
    %1272 = arith.select %1271, %1269, %1242 : vector<2x32xi1>, vector<2x32xf32>
    %1273 = vector.extract_strided_slice %1268 {offsets = [0, 0], sizes = [2, 32], strides = [1, 1]} : vector<4x32xf32> to vector<2x32xf32>
    %1274 = tpu.concatenate %1273, %1272 in 1 : vector<2x32xf32>, vector<2x32xf32> -> vector<2x64xf32>
    %c0_159 = arith.constant 0 : index
    %c0_160 = arith.constant 0 : index
    %1275 = vector.load %arg16[%c0_159, %c0_160] : memref<1x64xf32, #tpu.memory_space<vmem>>, vector<1x64xf32>
    %1276 = vector.broadcast %1275 : vector<1x64xf32> to vector<2x64xf32>
    %1277 = arith.mulf %1274, %1276 : vector<2x64xf32>
    %cst_161 = arith.constant dense<0.000000e+00> : vector<2xf32>
    %1278 = vector.multi_reduction <add>, %1277, %cst_161 [1] : vector<2x64xf32> to vector<2xf32>
    %1279 = vector.shape_cast %1278 : vector<2xf32> to vector<2x1xf32>
    %c0_162 = arith.constant 0 : index
    %c0_163 = arith.constant 0 : index
    %1280 = vector.load %arg17[%c0_162, %c0_163] : memref<1x1xf32, #tpu.memory_space<vmem>>, vector<1x1xf32>
    %1281 = vector.broadcast %1280 : vector<1x1xf32> to vector<2x1xf32>
    %1282 = arith.addf %1279, %1281 : vector<2x1xf32>
    %c0_164 = arith.constant 0 : index
    %c0_165 = arith.constant 0 : index
    %1283 = vector.load %arg18[%c0_164, %c0_165] : memref<2x1xf32, #tpu.memory_space<vmem>>, vector<2x1xf32>
    tpu.vector_store %arg18[%c0_164, %c0_165], %1282 {strides = array<i32>} : memref<2x1xf32, #tpu.memory_space<vmem>>, vector<2x1xf32>,
    return
  }
}

</mosaic_0001>

<bundles_post_ra>
// kernel: cnn_bilstm_forward.1
= control target key start
LH: loop header
LB: loop body
LE: loop exit
PB: predicated region body
PF: predicated region fallthrough
CT: control target
= control target key end

     0   :  { %s6283_s0 = inlined_call_operand.vmem [shape: f32[32,5], index: 0, kind: input, shape index: {}]   ;;  %s6284_s1 = inlined_call_operand.vmem [shape: s32[2,1], index: 1, kind: input, shape index: {}]   ;;  %s6285_s2 = inlined_call_operand.hbm [shape: f32[5,16], index: 2, kind: input, shape index: {}]   ;;  %s6286_s3 = inlined_call_operand.vmem [shape: f32[1,16], index: 3, kind: input, shape index: {}]   ;;  %s6287_s4 = inlined_call_operand.hbm [shape: f32[5,16,16], index: 4, kind: input, shape index: {}]   ;;  %s6288_s5 = inlined_call_operand.vmem [shape: f32[1,16], index: 5, kind: input, shape index: {}]   ;;  %s6289_s6 = inlined_call_operand.vmem [shape: f32[1,16], index: 6, kind: input, shape index: {}]   ;;  %s6290_s7 = inlined_call_operand.vmem [shape: f32[1,16], index: 7, kind: input, shape index: {}]   ;;  %s6291_s8 = inlined_call_operand.hbm [shape: f32[16,16], index: 8, kind: input, shape index: {}]   ;;  %s6292_s9 = inlined_call_operand.vmem [shape: f32[1,16], index: 9, kind: input, shape index: {}]   ;;  %s6293_s10 = inlined_call_operand.hbm [shape: f32[16,256], index: 10, kind: input, shape index: {}]   ;;  %s6294_s11 = inlined_call_operand.vmem [shape: f32[64,128], index: 11, kind: input, shape index: {}]   ;;  %s6295_s12 = inlined_call_operand.vmem [shape: f32[1,256], index: 12, kind: input, shape index: {}]   ;;  %s6296_s13 = inlined_call_operand.hbm [shape: f32[64,256], index: 13, kind: input, shape index: {}]   ;;  %s6297_s14 = inlined_call_operand.hbm [shape: f32[64,128], index: 14, kind: input, shape index: {}]   ;;  %s6298_s15 = inlined_call_operand.vmem [shape: f32[1,256], index: 15, kind: input, shape index: {}]   ;;  %s6299_s16 = inlined_call_operand.hbm [shape: f32[1,64], index: 16, kind: input, shape index: {}]   ;;  %s6300_s17 = inlined_call_operand.<no memory space> [shape: f32[1,1], index: 17, kind: input, shape index: {}]   ;;  %s6301_s18 = inlined_call_operand.vmem [shape: f32[2,1], index: 18, kind: output, shape index: {}]  }
   0x1   :  { %6314 = sst [smem:[#allocation18_spill]] %s6283_s0  ;;  %v23_v0 = vstv %s6300_s17 }
   0x2   :  { %6315 = sst [smem:[#allocation19_spill]] %s6284_s1  ;;  %24 = vst [vmem:[#allocation2] sm:$0x1] %v23_v0 }
   0x3   :  { %6316 = sst [smem:[#allocation20_spill]] %s6285_s2 }
   0x4   :  { %25 = vsyncpa [#allocation4], 0 }
   0x5   :  { %26 = vsyncpa [#allocation6], 0 }
   0x6   :  { %27 = vsyncpa [#allocation9], 0  ;;  %s50_s0 = sshll.u32 %s6287_s4, 4  ;;  %s51_s0 = int_to_ptr.hbm [resolvable:$true] %s50_s0 }
   0x7   :  { %28 = vsyncpa [#allocation12], 0  ;;  %s4555_s19 = smov [#allocation5]   ;;  %s84_s22 = sshll.u32 %s6293_s10, 4  ;;  %s85_s22 = int_to_ptr.hbm [resolvable:$true] %s84_s22 }
   0x8   :  { %s52_s1 = sshll.u32 %s4555_s19, 4  ;;  %s4556_s2 = smov 128   ;;  %s53_s1 = int_to_ptr.vmem [resolvable:$true] %s52_s1 }
   0x9   :  { %s4557_s23 = smov 8   ;;  %s4558_s17 = smov [#allocation8]  }
   0xa   :  { %58 = dma.hbm_to_vmem [thread:$0]  %s51_s0, 1280, %s53_s1, [#allocation6], %s4556_s2, %s4556_s2, %s4557_s23  }
   0xb   :  { %s86_s24 = sshll.u32 %s4558_s17, 4  ;;  %s4559_s4 = smov 256   ;;  %s87_s24 = int_to_ptr.vmem [resolvable:$true] %s86_s24 }
   0xc   :  { %s4560_s25 = smov 16   ;;  %s114_s10 = sshll.u32 %s6297_s14, 4  ;;  %s115_s10 = int_to_ptr.hbm [resolvable:$true] %s114_s10 }
   0xd   :  { %92 = dma.hbm_to_vmem [thread:$0]  %s85_s22, 512, %s87_s24, [#allocation9], %s4559_s4, %s4559_s4, %s4560_s25  }
   0xe   :  { %s4561_s28 = smov [#allocation11]   ;;  %s6317_s19 = sld [smem:[#allocation20_spill]] }
   0xf   :  { %s116_s29 = sshll.u32 %s4561_s28, 4  ;;  %s4562_s20 = smov [#allocation3]   ;;  %s117_s29 = int_to_ptr.vmem [resolvable:$true] %s116_s29 }
  0x10   :  { %122 = dma.hbm_to_vmem [thread:$0]  %s115_s10, 1024, %s117_s29, [#allocation12], %s4556_s2, %s4556_s2, %s4557_s23  }
  0x11   :  { %s40_s21 = sshll.u32 %s4562_s20, 4  ;;  %s69_s24 = sshll.u32 %s6291_s8, 4  ;;  %s41_s21 = int_to_ptr.vmem [resolvable:$true] %s40_s21  ;;  %s70_s24 = int_to_ptr.hbm [resolvable:$true] %s69_s24 }
  0x12   :  { %s101_s27 = sshll.u32 %s6296_s13, 4  ;;  %s4563_s28 = smov [#allocation7]   ;;  %s102_s27 = int_to_ptr.hbm [resolvable:$true] %s101_s27 }
  0x13   :  { %s71_s30 = sshll.u32 %s4563_s28, 4  ;;  %s4564_s10 = smov [#allocation10]   ;;  %s72_s30 = int_to_ptr.vmem [resolvable:$true] %s71_s30 }
  0x14   :  { %s38_s1 = sshll.u32 %s6317_s19, 4  ;;  %s103_s29 = sshll.u32 %s4564_s10, 4  ;;  %s39_s1 = int_to_ptr.hbm [resolvable:$true] %s38_s1  ;;  %s104_s29 = int_to_ptr.vmem [resolvable:$true] %s103_s29 }
  0x15   :  { %43 = dma.hbm_to_vmem [thread:$0]  %s39_s1, 128, %s41_s21, [#allocation4]  }
  0x16   :  { %77 = dma.hbm_to_vmem [thread:$0]  %s70_s24, 256, %s72_s30, [#allocation6], %s4556_s2, %s4556_s2, %s4557_s23  }
  0x17   :  { %s130_s8 = sshll.u32 %s6299_s16, 4  ;;  %s4565_s13 = smov [#allocation13]   ;;  %s131_s8 = int_to_ptr.hbm [resolvable:$true] %s130_s8 }
  0x18   :  { %109 = dma.hbm_to_vmem [thread:$0]  %s102_s27, 2048, %s104_s29, [#allocation9], %s4559_s4, %s4559_s4, %s4560_s25  }
  0x19   :  { %s132_s1 = sshll.u32 %s4565_s13, 4  ;;  %s133_s1 = int_to_ptr.vmem [resolvable:$true] %s132_s1 }
  0x1a   :  { %135 = dma.hbm_to_vmem [thread:$0]  %s131_s8, 16, %s133_s1, [#allocation12]  }
  0x1b   :  { %4547 = dma.done.wait [#allocation4], 128  }
  0x1c   :  { %4548 = vsyncadd [#allocation4], 4294967168 }
  0x1d   :  { %4549 = dma.done.wait [#allocation6], 1536  }
  0x1e   :  { %4550 = vsyncadd [#allocation6], 4294965760 }
  0x1f   :  { %4551 = dma.done.wait [#allocation9], 2560  }
  0x20   :  { %4552 = vsyncadd [#allocation9], 4294964736 }
  0x21   :  { %4553 = dma.done.wait [#allocation12], 1040  }
  0x22   :  { %4554 = vsyncadd [#allocation12], 4294966256  ;;  %v4566_v1 = vmov 1   ;;  %v4567_v2 = vmov 0   ;;  %v4568_v3 = vmov 2   ;;  %s6318_s23 = sld [smem:[#allocation18_spill]] }
  0x23   :  { %4014 = vset.pattern.permute.xlu1 %v4566_v1  ;;  %4013 = vset.pattern.permute.xlu0 %v4567_v2  ;;  %v4569_v6 = vmov 3   ;;  %v4570_v8 = vmov 4   ;;  %v171_v14 = vld [vmem:[#allocation3] sm:$0x1f]  ;;  %v4757_v19 = vld [vmem:[%s6286_s3] ss:$0 sm:$0xff] }
  0x24   :  { %4015 = vset.pattern.permute.xlu2 %v4568_v3  ;;  %v4752_v16 = vperm.slane %v171_v14, 0  ;;  %v4760_v21 = vperm.slane %v171_v14, 1  ;;  %v4763_v23 = vperm.slane %v171_v14, 2  ;;  %v4767_v27 = vperm.slane %v171_v14, 3  ;;  %v403_v61 = vld [vmem:[#allocation5 + $0x8] sm:$0xff]  ;;  %s6319_s26 = sld [smem:[#allocation19_spill]] }
  0x25   :  { %v4769_v28 = vperm.slane %v171_v14, 4  ;;  %479 = vmatpush.msra.mxu1 %v403_v61  ;;  %v549_v14 = vld [vmem:[#allocation5 + $0x38] sm:$0xff]  ;;  %vm390_vm5 = vcmask 1043456   ;;  %vm419_vm6 = vcmask 130048   ;;  %vm409_vm8 = vcmask 1045504   ;;  %s4575_s27 = smov 64  }
  0x26   :  { %582 = vmatpush.msra.mxu3 %v549_v14  ;;  %vm550_vm9 = vcmask 1041408  }
  0x28   :  { %v167_v4 = vld [vmem:[%s6318_s23] sm:$0xff]  ;;  %v168_v5 = vld [vmem:[%s6318_s23 + $0x8] sm:$0xff]  ;;  %v169_v7 = vld [vmem:[%s6318_s23 + $0x10] sm:$0xff] }
  0x29   :  { %207 = vperm.xlu1 %4014, %v167_v4   ;;  %179 = vperm.xlu0 %4013, %v167_v4   ;;  %v170_v9 = vld [vmem:[%s6318_s23 + $0x18] sm:$0xff] }
  0x2a   :  { %232 = vperm.xlu2 %4015, %v167_v4  }
  0x31   :  { %211 = vperm.xlu1 %4014, %v168_v5   ;;  %184 = vperm.xlu0 %4013, %v168_v5  }
  0x32   :  { %236 = vperm.xlu2 %4015, %v168_v5  }
  0x39   :  { %4017 = vset.pattern.permute.xlu1 %v4569_v6  ;;  %4016 = vset.pattern.permute.xlu0 %v4569_v6 }
  0x3a   :  { %261 = vperm.xlu1 %4017, %v168_v5   ;;  %257 = vperm.xlu0 %4016, %v167_v4  }
  0x3b   :  { %4018 = vset.pattern.permute.xlu2 %v4567_v2 }
  0x3c   :  { %189 = vperm.xlu2 %4018, %v169_v7  }
  0x42   :  { %4019 = vset.pattern.permute.xlu1 %v4570_v8  ;;  %4021 = vset.pattern.permute.xlu0 %v4566_v1 }
  0x43   :  { %282 = vperm.xlu1 %4019, %v167_v4   ;;  %215 = vperm.xlu0 %4021, %v169_v7  }
  0x44   :  { %4020 = vset.pattern.permute.xlu2 %v4570_v8 }
  0x45   :  { %286 = vperm.xlu2 %4020, %v168_v5  }
  0x4b   :  { %4022 = vset.pattern.permute.xlu1 %v4568_v3  ;;  %219 = vperm.xlu0 %4021, %v170_v9  }
  0x4c   :  { %240 = vperm.xlu1 %4022, %v169_v7  }
  0x4d   :  { %4023 = vset.pattern.permute.xlu2 %v4569_v6 }
  0x4e   :  { %265 = vperm.xlu2 %4023, %v169_v7  }
  0x53   :  { %4028 = vset.pattern.permute.xlu0 %v4570_v8 }
  0x54   :  { %4024 = vset.pattern.permute.xlu1 %v4567_v2  ;;  %294 = vperm.xlu0 %4028, %v170_v9  }
  0x55   :  { %194 = vperm.xlu1 %4024, %v170_v9  }
  0x56   :  { %4025 = vset.pattern.permute.xlu2 %v4570_v8 }
  0x57   :  { %290 = vperm.xlu2 %4025, %v169_v7  }
  0x5c   :  { %4031 = vset.pattern.permute.xlu0 %v4567_v2 }
  0x5d   :  { %4026 = vset.pattern.permute.xlu1 %v4568_v3 }
  0x5e   :  { %244 = vperm.xlu1 %4026, %v170_v9  }
  0x5f   :  { %4027 = vset.pattern.permute.xlu2 %v4569_v6 }
  0x60   :  { %269 = vperm.xlu2 %4027, %v170_v9   ;;  %v402_v9 = vld [vmem:[#allocation5] sm:$0xff] }
  0x61   :  { %480 = vmatpush.msra.mxu1 %v402_v9 }
  0x66   :  { %4030 = vset.pattern.permute.xlu1 %v4567_v2 }
  0x68   :  { %4029 = vset.pattern.permute.xlu2 %v4567_v2 }
  0x84   :  { %v233_v10 = vpop.permute.xlu2 %232 }
  0x85   :  { %v248_v41 = vmul.f32 %v4763_v23, %v233_v10 }
  0x8c   :  { %v237_v11 = vpop.permute.xlu2 %236 }
  0x8d   :  { %v249_v30 = vmul.f32 %v4763_v23, %v237_v11 }
  0x96   :  { %v190_v15 = vpop.permute.xlu2 %189 }
  0x97   :  { %v200_v53 = vmul.f32 %v4752_v16, %v190_v15 }
  0x99   :  { %v204_v57 = vadd.f32 %v4757_v19, %v200_v53 }
  0x9b   :  { %v208_v12 = vpop.permute.xlu1 %207  ;;  %v180_v13 = vpop.permute.xlu0 %179 }
  0x9c   :  { %v198_v25 = vmul.f32 %v4752_v16, %v180_v13  ;;  %v223_v36 = vmul.f32 %v4760_v21, %v208_v12  ;;  %v406_v12 = vld [vmem:[#allocation5 + $0x18] sm:$0xff]  ;;  %v496_v13 = vld [vmem:[#allocation5 + $0x28] sm:$0xff] }
  0x9d   :  { %442 = vmatpush.msra.mxu0 %v406_v12  ;;  %528 = vmatpush.msra.mxu2 %v496_v13 }
  0x9e   :  { %v202_v31 = vadd.f32 %v4757_v19, %v198_v25 }
  0x9f   :  { %v287_v29 = vpop.permute.xlu2 %286 }
  0xa0   :  { %v299_v35 = vmul.f32 %v4769_v28, %v287_v29  ;;  %v227_v39 = vadd.f32 %v223_v36, %v202_v31 }
  0xa2   :  { %v252_v44 = vadd.f32 %v248_v41, %v227_v39 }
  0xa3   :  { %v212_v17 = vpop.permute.xlu1 %211  ;;  %v185_v18 = vpop.permute.xlu0 %184 }
  0xa4   :  { %v199_v20 = vmul.f32 %v4752_v16, %v185_v18  ;;  %v224_v24 = vmul.f32 %v4760_v21, %v212_v17  ;;  %v405_v18 = vld [vmem:[#allocation5 + $0x10] sm:$0xff] }
  0xa5   :  { %443 = vmatpush.msra.mxu0 %v405_v18 }
  0xa6   :  { %v203_v22 = vadd.f32 %v4757_v19, %v199_v20  ;;  %v495_v20 = vld [vmem:[#allocation5 + $0x20] sm:$0xff] }
  0xa7   :  { %529 = vmatpush.msra.mxu2 %v495_v20 }
  0xa8   :  { %v228_v26 = vadd.f32 %v224_v24, %v203_v22  ;;  %v266_v45 = vpop.permute.xlu2 %265  ;;  %v548_v22 = vld [vmem:[#allocation5 + $0x30] sm:$0xff] }
  0xa9   :  { %v275_v0 = vmul.f32 %v4767_v27, %v266_v45  ;;  %583 = vmatpush.msra.mxu3 %v548_v22 }
  0xaa   :  { %v253_v33 = vadd.f32 %v249_v30, %v228_v26 }
  0xac   :  { %v262_v32 = vpop.permute.xlu1 %261  ;;  %v258_v37 = vpop.permute.xlu0 %257 }
  0xad   :  { %v274_v34 = vmul.f32 %v4767_v27, %v262_v32  ;;  %v273_v42 = vmul.f32 %v4767_v27, %v258_v37 }
  0xaf   :  { %v278_v38 = vadd.f32 %v274_v34, %v253_v33  ;;  %v277_v48 = vadd.f32 %v273_v42, %v252_v44 }
  0xb1   :  { %v4776_v40 = vadd.f32 %v299_v35, %v278_v38  ;;  %v291_v60 = vpop.permute.xlu2 %290 }
  0xb2   :  { %v300_v11 = vmul.f32 %v4769_v28, %v291_v60 }
  0xb3   :  { %v319_v43 = vand.u32 2147483647, %v4776_v40  ;;  %v307_v39 = vmax.f32 %v4776_v40, 0.0  ;;  %vm311_vm1 = vcmp.ne.f32.partialorder %v4776_v40, %v4776_v40 }
  0xb5   :  { %v323_v46 = vsub.f32 0.0, %v319_v43  ;;  %v283_v47 = vpop.permute.xlu1 %282  ;;  %v216_v52 = vpop.permute.xlu0 %215 }
  0xb6   :  { %v298_v49 = vmul.f32 %v4769_v28, %v283_v47  ;;  %v225_v55 = vmul.f32 %v4760_v21, %v216_v52 }
  0xb7   :  { %v328_v50 = vmul.f32 1.442695, %v323_v46 }
  0xb8   :  { %v4782_v51 = vadd.f32 %v298_v49, %v277_v48  ;;  %v229_v63 = vadd.f32 %v225_v55, %v204_v57 }
  0xb9   :  { %4039 = vpow2.f32 %v328_v50 }
  0xba   :  { %v318_v54 = vand.u32 2147483647, %v4782_v51  ;;  %v270_v45 = vpop.permute.xlu2 %269  ;;  %v306_v57 = vmax.f32 %v4782_v51, 0.0  ;;  %vm310_vm3 = vcmp.ne.f32.partialorder %v4782_v51, %v4782_v51 }
  0xbb   :  { %v276_v52 = vmul.f32 %v4767_v27, %v270_v45  ;;  %v603_v27 = vld [vmem:[#allocation5 + $0x48] sm:$0xff] }
  0xbc   :  { %v322_v56 = vsub.f32 0.0, %v318_v54  ;;  %620 = vmatpush.msrb.mxu0 %v603_v27 }
  0xbd   :  { %v220_v33 = vpop.permute.xlu0 %219 }
  0xbe   :  { %v326_v58 = vmul.f32 1.442695, %v322_v56  ;;  %v241_v59 = vpop.permute.xlu1 %240  ;;  %v226_v48 = vmul.f32 %v4760_v21, %v220_v33 }
  0xbf   :  { %v4040_v62 = vpop.eup %4039  ;;  %v250_v4 = vmul.f32 %v4763_v23, %v241_v59 }
  0xc0   :  { %v343_v5 = vadd.f32 1.0, %v4040_v62  ;;  %v346_v7 = vmul.f32 -0.5, %v4040_v62  ;;  %4041 = vpow2.f32 %v326_v58  ;;  %v349_v26 = vand.u32 2147483647, %v4040_v62 }
  0xc1   :  { %v254_v10 = vadd.f32 %v250_v4, %v229_v63 }
  0xc2   :  { %4043 = vlog2.f32 %v343_v5  ;;  %v347_v17 = vadd.f32 1.0, %v346_v7  ;;  %vm350_vm0 = vcmp.lt.f32.partialorder %v349_v26, 0.0004427343 }
  0xc3   :  { %v279_v15 = vadd.f32 %v275_v0, %v254_v10 }
  0xc4   :  { %v348_v32 = vmul.f32 %v4040_v62, %v347_v17 }
  0xc5   :  { %v4791_v24 = vadd.f32 %v300_v11, %v279_v15 }
  0xc6   :  { %v4042_v25 = vpop.eup %4041  ;;  %v295_v53 = vpop.permute.xlu0 %294 }
  0xc7   :  { %v320_v29 = vand.u32 2147483647, %v4791_v24  ;;  %v195_v30 = vpop.permute.xlu1 %194  ;;  %v334_v34 = vadd.f32 1.0, %v4042_v25  ;;  %v337_v38 = vmul.f32 -0.5, %v4042_v25  ;;  %v340_v47 = vand.u32 2147483647, %v4042_v25 }
  0xc8   :  { %v4044_v31 = vpop.eup %4043  ;;  %v201_v37 = vmul.f32 %v4752_v16, %v195_v30  ;;  %v301_v21 = vmul.f32 %v4769_v28, %v295_v53  ;;  %v308_v18 = vmax.f32 %v4791_v24, 0.0  ;;  %vm312_vm7 = vcmp.ne.f32.partialorder %v4791_v24, %v4791_v24 }
  0xc9   :  { %v345_v35 = vmul.f32 0.6931472, %v4044_v31  ;;  %v324_v36 = vsub.f32 0.0, %v320_v29  ;;  %4045 = vlog2.f32 %v334_v34  ;;  %v338_v46 = vadd.f32 1.0, %v337_v38 }
  0xca   :  { %v205_v44 = vadd.f32 %v4757_v19, %v201_v37  ;;  %vm341_vm2 = vcmp.lt.f32.partialorder %v340_v47, 0.0004427343 }
  0xcb   :  { %v351_v41 = vsel %vm350_vm0, %v348_v32, %v345_v35  ;;  %v330_v42 = vmul.f32 1.442695, %v324_v36  ;;  %v339_v19 = vmul.f32 %v4042_v25, %v338_v46 }
  0xcc   :  { %v371_v43 = vadd.f32 %v351_v41, %v307_v39  ;;  %v230_v54 = vadd.f32 %v226_v48, %v205_v44  ;;  %v602_v39 = vld [vmem:[#allocation5 + $0x40] sm:$0xff] }
  0xcd   :  { %4047 = vpow2.f32 %v330_v42  ;;  %621 = vmatpush.msrb.mxu0 %v602_v39 }
  0xce   :  { %v375_v49 = vsel %vm311_vm1, %v4776_v40, %v371_v43 }
  0xcf   :  { %v4046_v16 = vpop.eup %4045  ;;  %4049 = vtanh.f32 %v375_v49 }
  0xd0   :  { %v245_v50 = vpop.permute.xlu1 %244  ;;  %v336_v56 = vmul.f32 0.6931472, %v4046_v16 }
  0xd1   :  { %v251_v55 = vmul.f32 %v4763_v23, %v245_v50 }
  0xd2   :  { %v342_v60 = vsel %vm341_vm2, %v339_v19, %v336_v56 }
  0xd3   :  { %v4048_v58 = vpop.eup %4047  ;;  %v255_v59 = vadd.f32 %v251_v55, %v230_v54  ;;  %v370_v62 = vadd.f32 %v342_v60, %v306_v57 }
  0xd4   :  { %v352_v61 = vadd.f32 1.0, %v4048_v58  ;;  %v355_v63 = vmul.f32 -0.5, %v4048_v58  ;;  %v358_v9 = vand.u32 2147483647, %v4048_v58 }
  0xd5   :  { %v280_v0 = vadd.f32 %v276_v52, %v255_v59  ;;  %v374_v23 = vsel %vm310_vm3, %v4782_v51, %v370_v62  ;;  %v4050_v5 = vpop.eup %4049 }
  0xd6   :  { %4051 = vlog2.f32 %v352_v61  ;;  %v356_v7 = vadd.f32 1.0, %v355_v63  ;;  %v383_v12 = vmul.f32 %v4050_v5, %v4776_v40  ;;  %vm359_vm4 = vcmp.lt.f32.partialorder %v358_v9, 0.0004427343 }
  0xd7   :  { %v4808_v4 = vadd.f32 %v301_v21, %v280_v0  ;;  %4053 = vtanh.f32 %v374_v23 }
  0xd8   :  { %v357_v15 = vmul.f32 %v4048_v58, %v356_v7  ;;  %v392_v29 = vrot.slane %v383_v12, 4 }
  0xd9   :  { %v321_v28 = vand.u32 2147483647, %v4808_v4  ;;  %v309_v19 = vmax.f32 %v4808_v4, 0.0  ;;  %vm313_vm11 = vcmp.ne.f32.partialorder %v4808_v4, %v4808_v4 }
  0xdb   :  { %v325_v10 = vsub.f32 0.0, %v321_v28 }
  0xdc   :  { %v4052_v11 = vpop.eup %4051 }
  0xdd   :  { %v4054_v13 = vpop.eup %4053  ;;  %v354_v14 = vmul.f32 0.6931472, %v4052_v11  ;;  %v332_v17 = vmul.f32 1.442695, %v325_v10 }
  0xde   :  { %v382_v20 = vmul.f32 %v4054_v13, %v4782_v51 }
  0xdf   :  { %v360_v22 = vsel %vm359_vm4, %v357_v15, %v354_v14  ;;  %4055 = vpow2.f32 %v332_v17 }
  0xe0   :  { %v372_v25 = vadd.f32 %v360_v22, %v308_v18  ;;  %v391_v26 = vrot.slane %v382_v20, 4 }
  0xe2   :  { %v376_v40 = vsel %vm312_vm7, %v4791_v24, %v372_v25  ;;  %v4818_v30 = vsel %vm390_vm5, %v391_v26, %v392_v29  ;;  %v400_v31 = vsel %vm390_vm5, 0.0, %v391_v26 }
  0xe3   :  { %4057 = vtanh.f32 %v376_v40  ;;  %3882 = vmatmul.msk.f32.vlgmr.msra.gmra.mxu1 %vm419_vm6, %v400_v31  ;;  %v410_v51 = vrot.slane %v400_v31, 2  ;;  %v411_v32 = vrot.slane %v4818_v30, 2  ;;  %v497_v33 = vrot.slane %v400_v31, 4 }
  0xe4   :  { %v498_v34 = vrot.slane %v4818_v30, 4  ;;  %v551_v35 = vrot.slane %v400_v31, 6  ;;  %v552_v36 = vrot.slane %v4818_v30, 6 }
  0xe5   :  { %v4056_v37 = vpop.eup %4055  ;;  %v412_v38 = vsel %vm409_vm8, %v410_v51, %v411_v32 }
  0xe6   :  { %v361_v41 = vadd.f32 1.0, %v4056_v37  ;;  %v364_v42 = vmul.f32 -0.5, %v4056_v37  ;;  %3878 = vmatmul.msk.f32.vlgmr.msra.gmra.mxu0 %vm419_vm6, %v412_v38  ;;  %v499_v43 = vsel %vm390_vm5, %v497_v33, %v498_v34  ;;  %v553_v44 = vsel %vm550_vm9, %v551_v35, %v552_v36 }
  0xe7   :  { %3886 = vmatmul.msk.f32.vlgmr.msra.gmra.mxu2 %vm419_vm6, %v499_v43  ;;  %3890 = vmatmul.msk.f32.vlgmr.msra.gmra.mxu3 %vm419_vm6, %v553_v44  ;;  %v367_v16 = vand.u32 2147483647, %v4056_v37 }
  0xe8   :  { %4059 = vlog2.f32 %v361_v41  ;;  %v365_v47 = vadd.f32 1.0, %v364_v42 }
  0xe9   :  { %v4058_v45 = vpop.eup %4057  ;;  %vm368_vm10 = vcmp.lt.f32.partialorder %v367_v16, 0.0004427343 }
  0xea   :  { %v384_v46 = vmul.f32 %v4058_v45, %v4791_v24  ;;  %v366_v50 = vmul.f32 %v4056_v37, %v365_v47  ;;  %v744_v47 = vld [vmem:[#allocation7 + $0x8] sm:$0xff] }
  0xeb   :  { %3883 = vmatmul.msk.f32.gmra.mxu1 %vm419_vm6, %v4818_v30 }
  0xec   :  { %v394_v48 = vrot.slane %v384_v46, 4  ;;  %775 = vmatpush.msrb.mxu1 %v744_v47 }
  0xee   :  { %v4060_v49 = vpop.eup %4059  ;;  %v395_v52 = vsel %vm390_vm5, %v392_v29, %v394_v48 }
  0xef   :  { %v363_v53 = vmul.f32 0.6931472, %v4060_v49  ;;  %v413_v54 = vrot.slane %v395_v52, 2  ;;  %v500_v55 = vrot.slane %v395_v52, 4  ;;  %v554_v56 = vrot.slane %v395_v52, 6 }
  0xf1   :  { %v369_v57 = vsel %vm368_vm10, %v366_v50, %v363_v53  ;;  %v414_v24 = vsel %vm409_vm8, %v411_v32, %v413_v54  ;;  %v501_v58 = vsel %vm390_vm5, %v498_v34, %v500_v55  ;;  %v555_v59 = vsel %vm550_vm9, %v552_v36, %v554_v56 }
  0xf2   :  { %v373_v21 = vadd.f32 %v369_v57, %v309_v19  ;;  %3879 = vmatmul.msk.f32.gmra.mxu0 %vm419_vm6, %v414_v24  ;;  %3887 = vmatmul.msk.f32.gmra.mxu2 %vm419_vm6, %v501_v58  ;;  %v743_v57 = vld [vmem:[#allocation7] sm:$0xff] }
  0xf3   :  { %3884 = vmatmul.msk.f32.gmra.mxu1 %vm419_vm6, %v395_v52  ;;  %3891 = vmatmul.msk.f32.gmra.mxu3 %vm419_vm6, %v555_v59 }
  0xf4   :  { %v377_v60 = vsel %vm313_vm11, %v4808_v4, %v373_v21  ;;  %776 = vmatpush.msrb.mxu1 %v743_v57 }
  0xf5   :  { %4061 = vtanh.f32 %v377_v60 }
  0xfb   :  { %v4062_v61 = vpop.eup %4061 }
  0xfc   :  { %v385_v62 = vmul.f32 %v4062_v61, %v4808_v4 }
  0xfe   :  { %v396_v63 = vrot.slane %v385_v62, 4 }
 0x100   :  { %v397_v0 = vsel %vm390_vm5, %v394_v48, %v396_v63  ;;  %v401_v4 = vsel %vm390_vm5, %v396_v63, 0.0 }
 0x101   :  { %3885 = vmatmul.msk.f32.gmra.mxu1 %vm419_vm6, %v397_v0  ;;  %v415_v27 = vrot.slane %v397_v0, 2  ;;  %v502_v23 = vrot.slane %v397_v0, 4  ;;  %v556_v5 = vrot.slane %v397_v0, 6  ;;  %v417_v10 = vrot.slane %v401_v4, 2 }
 0x102   :  { %v504_v11 = vrot.slane %v401_v4, 4  ;;  %v558_v12 = vrot.slane %v401_v4, 6 }
 0x103   :  { %v416_v7 = vsel %vm409_vm8, %v413_v54, %v415_v27  ;;  %v503_v28 = vsel %vm390_vm5, %v500_v55, %v502_v23  ;;  %v557_v9 = vsel %vm550_vm9, %v554_v56, %v556_v5  ;;  %v418_v13 = vsel %vm409_vm8, %v415_v27, %v417_v10 }
 0x104   :  { %3880 = vmatmul.msk.f32.gmra.mxu0 %vm419_vm6, %v416_v7  ;;  %3888 = vmatmul.msk.f32.gmra.mxu2 %vm419_vm6, %v503_v28  ;;  %v505_v14 = vsel %vm390_vm5, %v502_v23, %v504_v11  ;;  %v559_v15 = vsel %vm550_vm9, %v556_v5, %v558_v12 }
 0x105   :  { %3892 = vmatmul.msk.f32.gmra.mxu3 %vm419_vm6, %v557_v9 }
 0x10c   :  { %3881 = vmatmul.msk.f32.gmra.mxu0 %vm419_vm6, %v418_v13  ;;  %3889 = vmatmul.msk.f32.gmra.mxu2 %vm419_vm6, %v505_v14 }
 0x10d   :  { %3893 = vmatmul.msk.f32.gmra.mxu3 %vm419_vm6, %v559_v15 }
 0x114   :  { %3894 = vmatmul.msk.f32.vlgmr.msrb.gmra.mxu0 %vm419_vm6, %v4818_v30  ;;  %v4033_v30 = vld [vmem:[%s6288_s5] ss:$0 sm:$0xff]  ;;  %s4574_s5 = smov 96  }
 0x11c   :  { %3895 = vmatmul.msk.f32.gmra.mxu0 %vm419_vm6, %v395_v52 }
 0x124   :  { %3896 = vmatmul.msk.f32.gmra.mxu0 %vm419_vm6, %v397_v0 }
 0x12c   :  { %3897 = vmatmul.msk.f32.gmra.mxu0 %vm419_vm6, %v401_v4 }
 0x160   :  { %v482_v22 = vpop.f32.mrf.mxu1 }
 0x163   :  { %v445_v17 = vpop.f32.mrf.mxu0 }
 0x164   :  { %v483_v29 = vadd.f32 %v482_v22, %v445_v17 }
 0x168   :  { %v485_v51 = vpop.f32.mrf.mxu1 }
 0x16a   :  { %v531_v25 = vpop.f32.mrf.mxu2  ;;  %v585_v31 = vpop.f32.mrf.mxu3 }
 0x16b   :  { %v543_v40 = vadd.f32 %v531_v25, %v483_v29 }
 0x16d   :  { %v597_v33 = vadd.f32 %v585_v31, %v543_v40 }
 0x16f   :  { %v448_v18 = vpop.f32.mrf.mxu0 }
 0x170   :  { %v486_v35 = vadd.f32 %v485_v51, %v448_v18  ;;  %v488_v43 = vpop.f32.mrf.mxu1 }
 0x175   :  { %v534_v32 = vpop.f32.mrf.mxu2 }
 0x176   :  { %v544_v37 = vadd.f32 %v534_v32, %v486_v35  ;;  %v588_v39 = vpop.f32.mrf.mxu3 }
 0x178   :  { %v598_v44 = vadd.f32 %v588_v39, %v544_v37 }
 0x17e   :  { %v491_v55 = vpop.f32.mrf.mxu1 }
 0x181   :  { %v451_v20 = vpop.f32.mrf.mxu0 }
 0x182   :  { %v489_v48 = vadd.f32 %v488_v43, %v451_v20 }
 0x187   :  { %v537_v42 = vpop.f32.mrf.mxu2 }
 0x188   :  { %v545_v50 = vadd.f32 %v537_v42, %v489_v48  ;;  %v591_v53 = vpop.f32.mrf.mxu3 }
 0x189   :  { %v454_v26 = vpop.f32.mrf.mxu0 }
 0x18a   :  { %v599_v56 = vadd.f32 %v591_v53, %v545_v50  ;;  %v492_v21 = vadd.f32 %v491_v55, %v454_v26  ;;  %v4035_v50 = vld [vmem:[%s6290_s7] ss:$0 sm:$0xff] }
 0x18f   :  { %v540_v24 = vpop.f32.mrf.mxu2 }
 0x190   :  { %v546_v0 = vadd.f32 %v540_v24, %v492_v21  ;;  %v594_v5 = vpop.f32.mrf.mxu3 }
 0x191   :  { %v623_v34 = vpop.f32.mrf.mxu0 }
 0x192   :  { %v635_v36 = vadd.f32 %v623_v34, %v597_v33  ;;  %v600_v28 = vadd.f32 %v594_v5, %v546_v0 }
 0x194   :  { %v4870_v38 = vadd.f32 %v4033_v30, %v635_v36 }
 0x196   :  { %v659_v41 = vand.u32 2147483647, %v4870_v38  ;;  %v647_v25 = vmax.f32 %v4870_v38, 0.0  ;;  %vm651_vm13 = vcmp.ne.f32.partialorder %v4870_v38, %v4870_v38 }
 0x198   :  { %v663_v45 = vsub.f32 0.0, %v659_v41 }
 0x199   :  { %v626_v46 = vpop.f32.mrf.mxu0 }
 0x19a   :  { %v667_v16 = vmul.f32 1.442695, %v663_v45  ;;  %v636_v49 = vadd.f32 %v626_v46, %v598_v44  ;;  %v4034_v45 = vld [vmem:[%s6289_s6] ss:$0 sm:$0xff] }
 0x19c   :  { %4063 = vpow2.f32 %v667_v16  ;;  %v4873_v52 = vadd.f32 %v4033_v30, %v636_v49 }
 0x19e   :  { %v660_v54 = vand.u32 2147483647, %v4873_v52  ;;  %v648_v42 = vmax.f32 %v4873_v52, 0.0  ;;  %vm652_vm15 = vcmp.ne.f32.partialorder %v4873_v52, %v4873_v52 }
 0x1a0   :  { %v664_v19 = vsub.f32 0.0, %v660_v54 }
 0x1a1   :  { %v629_v58 = vpop.f32.mrf.mxu0 }
 0x1a2   :  { %v4064_v59 = vpop.eup %4063  ;;  %v669_v60 = vmul.f32 1.442695, %v664_v19  ;;  %v637_v61 = vadd.f32 %v629_v58, %v599_v56 }
 0x1a3   :  { %v675_v62 = vadd.f32 1.0, %v4064_v59  ;;  %v678_v63 = vmul.f32 -0.5, %v4064_v59  ;;  %v681_v4 = vand.u32 2147483647, %v4064_v59 }
 0x1a4   :  { %4065 = vpow2.f32 %v669_v60  ;;  %v4876_v27 = vadd.f32 %v4033_v30, %v637_v61 }
 0x1a5   :  { %4067 = vlog2.f32 %v675_v62  ;;  %v679_v7 = vadd.f32 1.0, %v678_v63  ;;  %vm682_vm12 = vcmp.lt.f32.partialorder %v681_v4, 0.0004427343 }
 0x1a6   :  { %v661_v23 = vand.u32 2147483647, %v4876_v27  ;;  %v649_v58 = vmax.f32 %v4876_v27, 0.0  ;;  %vm653_vm1 = vcmp.ne.f32.partialorder %v4876_v27, %v4876_v27 }
 0x1a7   :  { %v680_v15 = vmul.f32 %v4064_v59, %v679_v7 }
 0x1a8   :  { %v665_v9 = vsub.f32 0.0, %v661_v23 }
 0x1a9   :  { %v632_v10 = vpop.f32.mrf.mxu0 }
 0x1aa   :  { %v4066_v11 = vpop.eup %4065  ;;  %v671_v12 = vmul.f32 1.442695, %v665_v9  ;;  %v638_v13 = vadd.f32 %v632_v10, %v600_v28 }
 0x1ab   :  { %v4068_v14 = vpop.eup %4067  ;;  %v684_v17 = vadd.f32 1.0, %v4066_v11  ;;  %v687_v20 = vmul.f32 -0.5, %v4066_v11  ;;  %v690_v33 = vand.u32 2147483647, %v4066_v11 }
 0x1ac   :  { %v677_v18 = vmul.f32 0.6931472, %v4068_v14  ;;  %4069 = vpow2.f32 %v671_v12  ;;  %v4879_v22 = vadd.f32 %v4033_v30, %v638_v13 }
 0x1ad   :  { %4071 = vlog2.f32 %v684_v17  ;;  %v688_v31 = vadd.f32 1.0, %v687_v20  ;;  %vm691_vm14 = vcmp.lt.f32.partialorder %v690_v33, 0.0004427343  ;;  %v872_v33 = vld [vmem:[#allocation8 + $0x10] sm:$0xff] }
 0x1ae   :  { %v683_v26 = vsel %vm682_vm12, %v680_v15, %v677_v18  ;;  %v662_v29 = vand.u32 2147483647, %v4879_v22  ;;  %v650_v9 = vmax.f32 %v4879_v22, 0.0  ;;  %vm654_vm3 = vcmp.ne.f32.partialorder %v4879_v22, %v4879_v22  ;;  %906 = vmatpush.msrb.mxu2 %v872_v33 }
 0x1af   :  { %v711_v40 = vadd.f32 %v683_v26, %v647_v25  ;;  %v689_v39 = vmul.f32 %v4066_v11, %v688_v31  ;;  %v4036_v26 = vld [vmem:[%s6292_s9] ss:$0 sm:$0xff]  ;;  %v873_v31 = vld [vmem:[#allocation8 + $0x18] sm:$0xff] }
 0x1b0   :  { %v666_v51 = vsub.f32 0.0, %v662_v29  ;;  %935 = vmatpush.msrb.mxu3 %v873_v31 }
 0x1b1   :  { %v715_v32 = vsel %vm651_vm13, %v4870_v38, %v711_v40 }
 0x1b2   :  { %v4070_v34 = vpop.eup %4069  ;;  %4073 = vtanh.f32 %v715_v32  ;;  %v673_v30 = vmul.f32 1.442695, %v666_v51 }
 0x1b3   :  { %v4072_v35 = vpop.eup %4071  ;;  %v693_v36 = vadd.f32 1.0, %v4070_v34  ;;  %v696_v41 = vmul.f32 -0.5, %v4070_v34  ;;  %v699_v16 = vand.u32 2147483647, %v4070_v34 }
 0x1b4   :  { %v686_v37 = vmul.f32 0.6931472, %v4072_v35  ;;  %4075 = vpow2.f32 %v673_v30  ;;  %v871_v30 = vld [vmem:[#allocation8 + $0x8] sm:$0xff]  ;;  %v870_v35 = vld [vmem:[#allocation8] sm:$0xff] }
 0x1b5   :  { %4077 = vlog2.f32 %v693_v36  ;;  %v697_v47 = vadd.f32 1.0, %v696_v41  ;;  %vm700_vm0 = vcmp.lt.f32.partialorder %v699_v16, 0.0004427343  ;;  %936 = vmatpush.msrb.mxu3 %v871_v30  ;;  %907 = vmatpush.msrb.mxu2 %v870_v35 }
 0x1b6   :  { %v692_v43 = vsel %vm691_vm14, %v689_v39, %v686_v37 }
 0x1b7   :  { %v712_v44 = vadd.f32 %v692_v43, %v648_v42  ;;  %v698_v57 = vmul.f32 %v4070_v34, %v697_v47  ;;  %v4927_v47 = vld [vmem:[%s6294_s11 + $0x38] sm:$0xff] }
 0x1b8   :  { %v4074_v46 = vpop.eup %4073  ;;  %1033 = vmatpush.msra.mxu0 %v4927_v47  ;;  %1116 = vmatpush.msra.mxu1 %v4927_v47 }
 0x1b9   :  { %v716_v48 = vsel %vm652_vm15, %v4873_v52, %v712_v44  ;;  %v723_v49 = vmul.f32 %v4074_v46, %v4870_v38  ;;  %1195 = vmatpush.msra.mxu2 %v4927_v47  ;;  %1276 = vmatpush.msra.mxu3 %v4927_v47 }
 0x1ba   :  { %v4076_v53 = vpop.eup %4075  ;;  %4079 = vtanh.f32 %v716_v48  ;;  %v4932_v48 = vld [vmem:[%s6294_s11 + $0x30] sm:$0xff] }
 0x1bb   :  { %v4078_v54 = vpop.eup %4077  ;;  %v702_v55 = vadd.f32 1.0, %v4076_v53  ;;  %v731_v56 = vmul.f32 %v4034_v45, %v723_v49  ;;  %v705_v24 = vmul.f32 -0.5, %v4076_v53  ;;  %v708_v63 = vand.u32 2147483647, %v4076_v53  ;;  %1034 = vmatpush.msra.mxu0 %v4932_v48  ;;  %1117 = vmatpush.msra.mxu1 %v4932_v48 }
 0x1bc   :  { %v695_v19 = vmul.f32 0.6931472, %v4078_v54  ;;  %1196 = vmatpush.msra.mxu2 %v4932_v48  ;;  %1277 = vmatpush.msra.mxu3 %v4932_v48 }
 0x1bd   :  { %4081 = vlog2.f32 %v702_v55  ;;  %v739_v59 = vadd.f32 %v4035_v50, %v731_v56  ;;  %v706_v61 = vadd.f32 1.0, %v705_v24  ;;  %vm709_vm2 = vcmp.lt.f32.partialorder %v708_v63, 0.0004427343 }
 0x1be   :  { %v701_v21 = vsel %vm700_vm0, %v698_v57, %v695_v19 }
 0x1bf   :  { %v713_v60 = vadd.f32 %v701_v21, %v649_v58  ;;  %3898 = vmatmul.msk.f32.vlgmr.msrb.gmra.mxu1 %vm419_vm6, %v739_v59  ;;  %v707_v28 = vmul.f32 %v4076_v53, %v706_v61  ;;  %v4939_v53 = vld [vmem:[%s6294_s11 + $0x28] sm:$0xff]  ;;  %v4948_v58 = vld [vmem:[%s6294_s11 + $0x20] sm:$0xff]  ;;  %v4960_v61 = vld [vmem:[%s6294_s11 + $0x18] sm:$0xff] }
 0x1c0   :  { %v4080_v38 = vpop.eup %4079  ;;  %1035 = vmatpush.msra.mxu0 %v4939_v53  ;;  %1118 = vmatpush.msra.mxu1 %v4939_v53 }
 0x1c1   :  { %v717_v62 = vsel %vm653_vm1, %v4876_v27, %v713_v60  ;;  %v724_v0 = vmul.f32 %v4080_v38, %v4873_v52  ;;  %1197 = vmatpush.msra.mxu2 %v4939_v53  ;;  %1278 = vmatpush.msra.mxu3 %v4939_v53 }
 0x1c2   :  { %4083 = vtanh.f32 %v717_v62  ;;  %1036 = vmatpush.msra.mxu0 %v4948_v58  ;;  %1119 = vmatpush.msra.mxu1 %v4948_v58 }
 0x1c3   :  { %v4082_v23 = vpop.eup %4081  ;;  %v732_v5 = vmul.f32 %v4034_v45, %v724_v0  ;;  %1198 = vmatpush.msra.mxu2 %v4948_v58  ;;  %1279 = vmatpush.msra.mxu3 %v4948_v58 }
 0x1c4   :  { %v704_v7 = vmul.f32 0.6931472, %v4082_v23  ;;  %1037 = vmatpush.msra.mxu0 %v4960_v61  ;;  %1120 = vmatpush.msra.mxu1 %v4960_v61 }
 0x1c5   :  { %v740_v4 = vadd.f32 %v4035_v50, %v732_v5  ;;  %v4970_v5 = vld [vmem:[%s6294_s11 + $0x10] sm:$0xff]  ;;  %1199 = vmatpush.msra.mxu2 %v4960_v61  ;;  %1280 = vmatpush.msra.mxu3 %v4960_v61 }
 0x1c6   :  { %v710_v10 = vsel %vm709_vm2, %v707_v28, %v704_v7  ;;  %1038 = vmatpush.msra.mxu0 %v4970_v5  ;;  %1121 = vmatpush.msra.mxu1 %v4970_v5 }
 0x1c7   :  { %v714_v11 = vadd.f32 %v710_v10, %v650_v9  ;;  %3899 = vmatmul.msk.f32.gmra.mxu1 %vm419_vm6, %v740_v4  ;;  %1200 = vmatpush.msra.mxu2 %v4970_v5 }
 0x1c8   :  { %v4084_v12 = vpop.eup %4083  ;;  %1281 = vmatpush.msra.mxu3 %v4970_v5 }
 0x1c9   :  { %v718_v13 = vsel %vm654_vm3, %v4879_v22, %v714_v11  ;;  %v725_v52 = vmul.f32 %v4084_v12, %v4876_v27 }
 0x1ca   :  { %4085 = vtanh.f32 %v718_v13 }
 0x1cb   :  { %v733_v14 = vmul.f32 %v4034_v45, %v725_v52  ;;  %v4986_v52 = vld [vmem:[%s6294_s11 + $0x8] sm:$0xff] }
 0x1cc   :  { %1039 = vmatpush.msra.mxu0 %v4986_v52  ;;  %1122 = vmatpush.msra.mxu1 %v4986_v52 }
 0x1cd   :  { %v741_v15 = vadd.f32 %v4035_v50, %v733_v14  ;;  %v4991_v14 = vld [vmem:[%s6294_s11] sm:$0xff]  ;;  %1201 = vmatpush.msra.mxu2 %v4986_v52  ;;  %1282 = vmatpush.msra.mxu3 %v4986_v52 }
 0x1ce   :  { %1040 = vmatpush.msra.mxu0 %v4991_v14  ;;  %1123 = vmatpush.msra.mxu1 %v4991_v14 }
 0x1cf   :  { %3900 = vmatmul.msk.f32.gmra.mxu1 %vm419_vm6, %v741_v15  ;;  %1202 = vmatpush.msra.mxu2 %v4991_v14 }
 0x1d0   :  { %v4086_v17 = vpop.eup %4085  ;;  %1283 = vmatpush.msra.mxu3 %v4991_v14  ;;  %1356 = vmatpush.msrb.mxu0 %v4927_v47 }
 0x1d1   :  { %v726_v18 = vmul.f32 %v4086_v17, %v4879_v22  ;;  %1438 = vmatpush.msrb.mxu1 %v4927_v47 }
 0x1d2   :  { %1357 = vmatpush.msrb.mxu0 %v4932_v48 }
 0x1d3   :  { %v734_v20 = vmul.f32 %v4034_v45, %v726_v18  ;;  %1439 = vmatpush.msrb.mxu1 %v4932_v48 }
 0x1d4   :  { %1358 = vmatpush.msrb.mxu0 %v4939_v53 }
 0x1d5   :  { %v742_v25 = vadd.f32 %v4035_v50, %v734_v20  ;;  %1440 = vmatpush.msrb.mxu1 %v4939_v53 }
 0x1d6   :  { %1359 = vmatpush.msrb.mxu0 %v4948_v58 }
 0x1d7   :  { %3901 = vmatmul.msk.f32.gmra.mxu1 %vm419_vm6, %v742_v25 }
 0x1d8   :  { %1360 = vmatpush.msrb.mxu0 %v4960_v61  ;;  %1441 = vmatpush.msrb.mxu1 %v4948_v58 }
 0x1da   :  { %1361 = vmatpush.msrb.mxu0 %v4970_v5  ;;  %1442 = vmatpush.msrb.mxu1 %v4960_v61 }
 0x1dc   :  { %1362 = vmatpush.msrb.mxu0 %v4986_v52  ;;  %1443 = vmatpush.msrb.mxu1 %v4970_v5 }
 0x1de   :  { %1363 = vmatpush.msrb.mxu0 %v4991_v14  ;;  %1444 = vmatpush.msrb.mxu1 %v4986_v52 }
 0x1e0   :  { %1445 = vmatpush.msrb.mxu1 %v4991_v14 }
 0x23c   :  { %v778_v29 = vpop.f32.mrf.mxu1 }
 0x23d   :  { %v4915_v40 = vadd.f32 %v4036_v26, %v778_v29 }
 0x23f   :  { %v802_v27 = vand.u32 2147483647, %v4915_v40  ;;  %v790_v38 = vmax.f32 %v4915_v40, 0.0  ;;  %vm794_vm7 = vcmp.ne.f32.partialorder %v4915_v40, %v4915_v40 }
 0x241   :  { %v806_v51 = vsub.f32 0.0, %v802_v27 }
 0x243   :  { %v810_v32 = vmul.f32 1.442695, %v806_v51 }
 0x244   :  { %v781_v34 = vpop.f32.mrf.mxu1 }
 0x245   :  { %4087 = vpow2.f32 %v810_v32  ;;  %v4918_v22 = vadd.f32 %v4036_v26, %v781_v34 }
 0x247   :  { %v803_v36 = vand.u32 2147483647, %v4918_v22  ;;  %v791_v18 = vmax.f32 %v4918_v22, 0.0  ;;  %vm795_vm11 = vcmp.ne.f32.partialorder %v4918_v22, %v4918_v22 }
 0x249   :  { %v807_v37 = vsub.f32 0.0, %v803_v36 }
 0x24b   :  { %v4088_v39 = vpop.eup %4087  ;;  %v812_v41 = vmul.f32 1.442695, %v807_v37 }
 0x24c   :  { %v818_v42 = vadd.f32 1.0, %v4088_v39  ;;  %v784_v43 = vpop.f32.mrf.mxu1  ;;  %v821_v44 = vmul.f32 -0.5, %v4088_v39  ;;  %v824_v50 = vand.u32 2147483647, %v4088_v39 }
 0x24d   :  { %4089 = vpow2.f32 %v812_v41  ;;  %v4921_v45 = vadd.f32 %v4036_v26, %v784_v43 }
 0x24e   :  { %4091 = vlog2.f32 %v818_v42  ;;  %v822_v16 = vadd.f32 1.0, %v821_v44  ;;  %vm825_vm4 = vcmp.lt.f32.partialorder %v824_v50, 0.0004427343 }
 0x24f   :  { %v804_v46 = vand.u32 2147483647, %v4921_v45  ;;  %vm796_vm13 = vcmp.ne.f32.partialorder %v4921_v45, %v4921_v45 }
 0x250   :  { %v823_v21 = vmul.f32 %v4088_v39, %v822_v16 }
 0x251   :  { %v808_v49 = vsub.f32 0.0, %v804_v46 }
 0x253   :  { %v4090_v54 = vpop.eup %4089  ;;  %v814_v55 = vmul.f32 1.442695, %v808_v49 }
 0x254   :  { %v4092_v56 = vpop.eup %4091  ;;  %v827_v19 = vadd.f32 1.0, %v4090_v54  ;;  %v830_v57 = vmul.f32 -0.5, %v4090_v54  ;;  %v787_v24 = vpop.f32.mrf.mxu1  ;;  %v833_v9 = vand.u32 2147483647, %v4090_v54 }
 0x255   :  { %v820_v59 = vmul.f32 0.6931472, %v4092_v56  ;;  %4093 = vpow2.f32 %v814_v55  ;;  %v4952_v60 = vadd.f32 %v4036_v26, %v787_v24  ;;  %v4571_v26 = vmov 0.0  }
 0x256   :  { %4095 = vlog2.f32 %v827_v19  ;;  %v831_v23 = vadd.f32 1.0, %v830_v57  ;;  %vm834_vm10 = vcmp.lt.f32.partialorder %v833_v9, 0.0004427343  ;;  %1041 = vmatmul.f32.vlgmr.msra.gmra.mxu0 %v4571_v26 }
 0x257   :  { %v826_v62 = vsel %vm825_vm4, %v823_v21, %v820_v59  ;;  %v805_v63 = vand.u32 2147483647, %v4952_v60  ;;  %vm797_vm15 = vcmp.ne.f32.partialorder %v4952_v60, %v4952_v60  ;;  %1678 = vmatpush.msra.mxu0 %v4927_v47  ;;  %v874_v21 = vld [vmem:[%s6295_s12] sm:$0x3]  ;;  %s4572_s12 = smov 32  }
 0x258   :  { %v854_v0 = vadd.f32 %v826_v62, %v790_v38  ;;  %v832_v12 = vmul.f32 %v4090_v54, %v831_v23  ;;  %v877_v38 = vperm.slane %v874_v21, 1 }
 0x259   :  { %v809_v7 = vsub.f32 0.0, %v805_v63  ;;  %1679 = vmatpush.msra.mxu0 %v4932_v48 }
 0x25a   :  { %v858_v28 = vsel %vm794_vm7, %v4915_v40, %v854_v0  ;;  %v876_v0 = vperm.slane %v874_v21, 0 }
 0x25b   :  { %v4094_v4 = vpop.eup %4093  ;;  %4097 = vtanh.f32 %v858_v28  ;;  %v816_v10 = vmul.f32 1.442695, %v809_v7  ;;  %1680 = vmatpush.msra.mxu0 %v4939_v53 }
 0x25c   :  { %v4096_v11 = vpop.eup %4095  ;;  %v836_v13 = vadd.f32 1.0, %v4094_v4  ;;  %v839_v17 = vmul.f32 -0.5, %v4094_v4  ;;  %v842_v31 = vand.u32 2147483647, %v4094_v4 }
 0x25d   :  { %v829_v15 = vmul.f32 0.6931472, %v4096_v11  ;;  %4099 = vpow2.f32 %v816_v10  ;;  %1681 = vmatpush.msra.mxu0 %v4948_v58 }
 0x25e   :  { %4101 = vlog2.f32 %v836_v13  ;;  %v840_v27 = vadd.f32 1.0, %v839_v17  ;;  %vm843_vm12 = vcmp.lt.f32.partialorder %v842_v31, 0.0004427343 }
 0x25f   :  { %v835_v20 = vsel %vm834_vm10, %v832_v12, %v829_v15  ;;  %1682 = vmatpush.msra.mxu0 %v4960_v61 }
 0x260   :  { %v855_v25 = vadd.f32 %v835_v20, %v791_v18  ;;  %v841_v36 = vmul.f32 %v4094_v4, %v840_v27 }
 0x261   :  { %v4098_v29 = vpop.eup %4097  ;;  %1683 = vmatpush.msra.mxu0 %v4970_v5 }
 0x262   :  { %v866_v51 = vmul.f32 %v4098_v29, %v4915_v40  ;;  %v859_v32 = vsel %vm795_vm11, %v4918_v22, %v855_v25  ;;  %v792_v40 = vmax.f32 %v4921_v45, 0.0 }
 0x263   :  { %v4100_v33 = vpop.eup %4099  ;;  %4103 = vtanh.f32 %v859_v32  ;;  %1684 = vmatpush.msra.mxu0 %v4986_v52 }
 0x264   :  { %v4102_v34 = vpop.eup %4101  ;;  %v845_v30 = vadd.f32 1.0, %v4100_v33  ;;  %3902 = vmatmul.msk.f32.vlgmr.msrb.gmra.mxu2 %vm419_vm6, %v866_v51  ;;  %3906 = vmatmul.msk.f32.vlgmr.msrb.gmra.mxu3 %vm419_vm6, %v866_v51  ;;  %v848_v37 = vmul.f32 -0.5, %v4100_v33  ;;  %v851_v44 = vand.u32 2147483647, %v4100_v33 }
 0x265   :  { %v838_v35 = vmul.f32 0.6931472, %v4102_v34  ;;  %1517 = vmatpush.msrb.mxu2 %v4927_v47  ;;  %1598 = vmatpush.msrb.mxu3 %v4927_v47 }
 0x266   :  { %4105 = vlog2.f32 %v845_v30  ;;  %v849_v43 = vadd.f32 1.0, %v848_v37  ;;  %vm852_vm14 = vcmp.lt.f32.partialorder %v851_v44, 0.0004427343  ;;  %1685 = vmatpush.msra.mxu0 %v4991_v14 }
 0x267   :  { %v844_v39 = vsel %vm843_vm12, %v841_v36, %v838_v35  ;;  %1518 = vmatpush.msrb.mxu2 %v4932_v48  ;;  %1599 = vmatpush.msrb.mxu3 %v4932_v48  ;;  %vm1096_vm12 = vcmask 261120  }
 0x268   :  { %v856_v41 = vadd.f32 %v844_v39, %v792_v40  ;;  %v850_v54 = vmul.f32 %v4100_v33, %v849_v43 }
 0x269   :  { %v4104_v42 = vpop.eup %4103  ;;  %1519 = vmatpush.msrb.mxu2 %v4939_v53  ;;  %1600 = vmatpush.msrb.mxu3 %v4939_v53 }
 0x26a   :  { %v867_v46 = vmul.f32 %v4104_v42, %v4918_v22  ;;  %v860_v16 = vsel %vm796_vm13, %v4921_v45, %v856_v41  ;;  %v793_v22 = vmax.f32 %v4952_v60, 0.0  ;;  %vm4576_vm13 = vmmov 1  }
 0x26b   :  { %4107 = vtanh.f32 %v860_v16  ;;  %1520 = vmatpush.msrb.mxu2 %v4948_v58  ;;  %1601 = vmatpush.msrb.mxu3 %v4948_v58 }
 0x26c   :  { %v4106_v49 = vpop.eup %4105  ;;  %3903 = vmatmul.msk.f32.gmra.mxu2 %vm419_vm6, %v867_v46  ;;  %3907 = vmatmul.msk.f32.gmra.mxu3 %vm419_vm6, %v867_v46 }
 0x26d   :  { %v847_v50 = vmul.f32 0.6931472, %v4106_v49  ;;  %1521 = vmatpush.msrb.mxu2 %v4960_v61  ;;  %1602 = vmatpush.msrb.mxu3 %v4960_v61 }
 0x26f   :  { %v853_v55 = vsel %vm852_vm14, %v850_v54, %v847_v50  ;;  %1522 = vmatpush.msrb.mxu2 %v4970_v5  ;;  %1603 = vmatpush.msrb.mxu3 %v4970_v5 }
 0x270   :  { %v857_v56 = vadd.f32 %v853_v55, %v793_v22 }
 0x271   :  { %v4108_v19 = vpop.eup %4107  ;;  %1523 = vmatpush.msrb.mxu2 %v4986_v52  ;;  %1604 = vmatpush.msrb.mxu3 %v4986_v52 }
 0x272   :  { %v868_v57 = vmul.f32 %v4108_v19, %v4921_v45  ;;  %v861_v24 = vsel %vm797_vm15, %v4952_v60, %v857_v56  ;;  %vm1021_vm15 = vcmask 523264  }
 0x273   :  { %4109 = vtanh.f32 %v861_v24  ;;  %1524 = vmatpush.msrb.mxu2 %v4991_v14  ;;  %1605 = vmatpush.msrb.mxu3 %v4991_v14 }
 0x274   :  { %3904 = vmatmul.msk.f32.gmra.mxu2 %vm419_vm6, %v868_v57  ;;  %3908 = vmatmul.msk.f32.gmra.mxu3 %vm419_vm6, %v868_v57 }
 0x279   :  { %v4110_v45 = vpop.eup %4109 }
 0x27a   :  { %v869_v59 = vmul.f32 %v4110_v45, %v4952_v60 }
 0x27c   :  { %3905 = vmatmul.msk.f32.gmra.mxu2 %vm419_vm6, %v869_v59  ;;  %3909 = vmatmul.msk.f32.gmra.mxu3 %vm419_vm6, %v869_v59 }
 0x2d3   :  { %v1042_v57 = vpop.f32.mrf.mxu0 }
 0x2e7   :  { %v909_v62 = vpop.f32.mrf.mxu2  ;;  %v938_v63 = vpop.f32.mrf.mxu3 }
 0x2e8   :  { %v939_v60 = vadd.f32 %v938_v63, %v877_v38  ;;  %v910_v35 = vadd.f32 %v909_v62, %v876_v0 }
 0x2ea   :  { %v1100_v49 = vrot.slane %v910_v35, 2  ;;  %v1181_v50 = vrot.slane %v910_v35, 4  ;;  %v1260_v54 = vrot.slane %v910_v35, 6  ;;  %v1986_v22 = vrot.slane %v939_v60, 4 }
 0x2eb   :  { %v2068_v55 = vrot.slane %v939_v60, 2  ;;  %v2228_v56 = vrot.slane %v939_v60, 6 }
 0x2ef   :  { %v912_v23 = vpop.f32.mrf.mxu2  ;;  %v941_v7 = vpop.f32.mrf.mxu3 }
 0x2f0   :  { %v913_v28 = vadd.f32 %v912_v23, %v876_v0  ;;  %v942_v9 = vadd.f32 %v941_v7, %v877_v38 }
 0x2f2   :  { %v1422_v13 = vrot.slane %v913_v28, 2  ;;  %v1503_v15 = vrot.slane %v913_v28, 4  ;;  %v1582_v17 = vrot.slane %v913_v28, 6  ;;  %v1664_v18 = vrot.slane %v942_v9, 4 }
 0x2f3   :  { %v1746_v20 = vrot.slane %v942_v9, 2  ;;  %v1906_v25 = vrot.slane %v942_v9, 6 }
 0x2f7   :  { %v915_v4 = vpop.f32.mrf.mxu2  ;;  %v944_v10 = vpop.f32.mrf.mxu3 }
 0x2f8   :  { %v916_v11 = vadd.f32 %v915_v4, %v876_v0  ;;  %v945_v12 = vadd.f32 %v944_v10, %v877_v38 }
 0x2fa   :  { %v1342_v29 = vrot.slane %v945_v12, 4  ;;  %v1424_v27 = vrot.slane %v945_v12, 2  ;;  %v5072_v31 = vsel %vm550_vm9, %v1503_v15, %v945_v12  ;;  %v1584_v51 = vrot.slane %v945_v12, 6 }
 0x2fb   :  { %v5075_v32 = vsel %vm550_vm9, %v916_v11, %v1664_v18  ;;  %v1744_v33 = vrot.slane %v916_v11, 2  ;;  %v1825_v34 = vrot.slane %v916_v11, 4  ;;  %v1904_v30 = vrot.slane %v916_v11, 6 }
 0x2fc   :  { %v5078_v36 = vsel %vm550_vm9, %v913_v28, %v1342_v29  ;;  %v5081_v37 = vsel %vm550_vm9, %v1422_v13, %v1424_v27  ;;  %v5084_v40 = vsel %vm550_vm9, %v1582_v17, %v1584_v51  ;;  %v950_v29 = vlaneseq }
 0x2fd   :  { %v5087_v39 = vsel %vm550_vm9, %v1744_v33, %v1746_v20  ;;  %v5090_v41 = vsel %vm550_vm9, %v1825_v34, %v942_v9  ;;  %v5093_v42 = vsel %vm550_vm9, %v1904_v30, %v1906_v25  ;;  %v166_v33 = vld [vmem:[%s6319_s26] sm:$0x3] }
 0x2fe   :  { %v5121_v34 = vshrl.u32 %v950_v29, 7 }
 0x2ff   :  { %v918_v43 = vpop.f32.mrf.mxu2  ;;  %v947_v44 = vpop.f32.mrf.mxu3 }
 0x300   :  { %v919_v46 = vadd.f32 %v918_v43, %v876_v0  ;;  %v948_v16 = vadd.f32 %v947_v44, %v877_v38  ;;  %v953_v43 = vrot.slane %v166_v33, 6  ;;  %vm952_vm3 = vcmp.lt.s32.totalorder %v5121_v34, 2 }
 0x302   :  { %v1018_v19 = vrot.slane %v948_v16, 4  ;;  %v1102_v24 = vrot.slane %v948_v16, 2  ;;  %v5096_v45 = vsel %vm550_vm9, %v1181_v50, %v948_v16  ;;  %v1262_v59 = vrot.slane %v948_v16, 6 }
 0x303   :  { %v5099_v21 = vsel %vm550_vm9, %v919_v46, %v1986_v22  ;;  %v2066_v62 = vrot.slane %v919_v46, 2  ;;  %v2147_v63 = vrot.slane %v919_v46, 4  ;;  %v2226_v0 = vrot.slane %v919_v46, 6 }
 0x304   :  { %v1020_v38 = vsel %vm550_vm9, %v910_v35, %v1018_v19  ;;  %v5103_v23 = vsel %vm550_vm9, %v1100_v49, %v1102_v24  ;;  %v5106_v7 = vsel %vm550_vm9, %v1260_v54, %v1262_v59  ;;  %v5125_v49 = vsel %vm550_vm9, %v166_v33, %v953_v43 }
 0x305   :  { %v1043_v28 = vadd.f32 %v1042_v57, %v1020_v38  ;;  %v5109_v9 = vsel %vm550_vm9, %v2066_v62, %v2068_v55  ;;  %v5112_v4 = vsel %vm550_vm9, %v2147_v63, %v939_v60  ;;  %v5115_v10 = vsel %vm550_vm9, %v2226_v0, %v2228_v56 }
 0x306   :  { %v4573_v50 = vmov 15   ;;  %v957_v0 = vand.u32 127, %v950_v29 }
 0x307   :  { %4111 = vtanh.f32 %v1043_v28  ;;  %v3911_v12 = vmul.f32 -1.442695, %v1043_v28  ;;  %v961_v54 = vsel %vm952_vm3, 0, %v4573_v50 }
 0x308   :  { %vm962_vm4 = vcmp.lt.s32.totalorder %v961_v54, %v5125_v49  ;;  %vm958_vm10 = vcmp.lt.s32.totalorder %v957_v0, 32 }
 0x309   :  { %4113 = vpow2.f32 %v3911_v12  ;;  %v1082_v22 = vsel %vm962_vm4, 1, %v4567_v2  ;;  %vm959_vm11 = vmxor %vm952_vm3, %vm958_vm10 }
 0x30a   :  { %vm5149_vm14 = vmxor %vm959_vm11, %vm4576_vm13 }
 0x30d   :  { %v4112_v11 = vpop.eup %4111 }
 0x30e   :  { %1067 = vrot.lane.b32.xlu1 %v4112_v11, %s4572_s12 }
 0x30f   :  { %v4114_v13 = vpop.eup %4113 }
 0x310   :  { %v1048_v15 = vadd.f32 1.0, %v4114_v13 }
 0x312   :  { %4115 = vrcp.f32 %v1048_v15  ;;  %v1060_v27 = vand.u32 2147483648, %v1048_v15  ;;  %vm1054_vm0 = vweird.f32 %v1048_v15  ;;  %v1058_v51 = vand.u32 2147483647, %v1048_v15 }
 0x314   :  { %v1061_v35 = vor.u32 1.1754944e-38, %v1060_v27  ;;  %vm1059_vm2 = vcmp.eq.f32.partialorder %v1058_v51, 8.507059e+37 }
 0x318   :  { %v4116_v17 = vpop.eup %4115 }
 0x319   :  { %v1050_v18 = vmul.f32 %v4116_v17, %v1048_v15  ;;  %vm1055_vm6 = vweird.f32 %v4116_v17 }
 0x31a   :  { %vm1056_vm1 = vmor %vm1054_vm0, %vm1055_vm6 }
 0x31b   :  { %v1051_v20 = vsub.f32 1.0, %v1050_v18 }
 0x31d   :  { %v1052_v25 = vmul.f32 %v4116_v17, %v1051_v20  ;;  %v4577_v20 = vmov 14  }
 0x31f   :  { %v1053_v60 = vadd.f32 %v4116_v17, %v1052_v25  ;;  %v964_v25 = vsel %vm952_vm3, 1, %v4577_v20 }
 0x320   :  { %vm965_vm6 = vcmp.lt.s32.totalorder %v964_v25, %v5125_v49 }
 0x321   :  { %v1057_v30 = vsel %vm1056_vm1, %v4116_v17, %v1053_v60  ;;  %v1165_v29 = vsel %vm965_vm6, 1, %v4567_v2 }
 0x322   :  { %v1062_v46 = vsel %vm1059_vm2, %v1061_v35, %v1057_v30 }
 0x323   :  { %v1065_v55 = vmul.f32 0.0, %v1062_v46 }
 0x380   :  { %v1068_v44 = vpop.permute.xlu1 %1067 }
 0x381   :  { %v1070_v16 = vmul.f32 %v1068_v44, %v1062_v46 }
 0x383   :  { %1072 = vrot.lane.b32.xlu2 %v1070_v16, %s4572_s12 }
 0x38b   :  { %1084 = vperm.xlu2 %4029, %v1082_v22  }
 0x3dd   :  { %v1073_v56 = vpop.permute.xlu2 %1072 }
 0x3de   :  { %v5132_v19 = vadd.f32 %v1073_v56, %v1065_v55 }
 0x3e0   :  { %4117 = vtanh.f32 %v5132_v19 }
 0x3e5   :  { %v5136_v24 = vpop.permute.xlu2 %1084 }
 0x3e6   :  { %v4118_v57 = vpop.eup %4117  ;;  %vm1086_vm7 = vcmp.eq.s32.totalorder %v5136_v24, 1 }
 0x3e7   :  { %1078 = vrot.lane.b32.xlu1 %v4118_v57, %s4572_s12  ;;  %v1088_v56 = vsel %vm1086_vm7, %v5132_v19, 0.0 }
 0x459   :  { %v1079_v59 = vpop.permute.xlu1 %1078 }
 0x45a   :  { %v1081_v62 = vmul.f32 %v1079_v59, %v1062_v46 }
 0x45c   :  { %v5141_v63 = vsel %vm1086_vm7, %v1081_v62, 0.0 }
 0x45d   :  { %1093 = vrot.lane.b32.xlu1 %v5141_v63, %s4574_s5  ;;  %1090 = vrot.lane.b32.xlu0 %v5141_v63, %s4575_s27 }
 0x4cf   :  { %v1094_v28 = vpop.permute.xlu1 %1093  ;;  %v1091_v11 = vpop.permute.xlu0 %1090 }
 0x4d0   :  { %v1097_v12 = vsel %vm1096_vm12, %v1091_v11, %v1094_v28 }
 0x4d1   :  { %v1098_v13 = vsel %vm5149_vm14, %v1097_v12, 0.0 }
 0x4d2   :  { %3912 = vmatmul.msk.f32.vlgmr.msra.gmra.mxu1 %vm1021_vm15, %v1098_v13 }
 0x4d3   :  { %1760 = vmatpush.msra.mxu1 %v4927_v47 }
 0x4d5   :  { %1761 = vmatpush.msra.mxu1 %v4932_v48 }
 0x4d7   :  { %1762 = vmatpush.msra.mxu1 %v4939_v53 }
 0x4d9   :  { %1763 = vmatpush.msra.mxu1 %v4948_v58 }
 0x4db   :  { %1764 = vmatpush.msra.mxu1 %v4960_v61 }
 0x4dd   :  { %1765 = vmatpush.msra.mxu1 %v4970_v5 }
 0x4df   :  { %1766 = vmatpush.msra.mxu1 %v4986_v52 }
 0x4e1   :  { %1767 = vmatpush.msra.mxu1 %v4991_v14 }
 0x54f   :  { %v1125_v15 = vpop.f32.mrf.mxu1 }
 0x550   :  { %v1126_v17 = vadd.f32 %v1125_v15, %v5103_v23 }
 0x552   :  { %4119 = vtanh.f32 %v1126_v17  ;;  %v3913_v60 = vmul.f32 -1.442695, %v1126_v17 }
 0x554   :  { %4121 = vpow2.f32 %v3913_v60  ;;  %v4578_v60 = vmov 13  }
 0x558   :  { %v4120_v18 = vpop.eup %4119 }
 0x559   :  { %1150 = vrot.lane.b32.xlu2 %v4120_v18, %s4572_s12 }
 0x55a   :  { %v4122_v27 = vpop.eup %4121 }
 0x55b   :  { %v1131_v51 = vadd.f32 1.0, %v4122_v27  ;;  %v967_v27 = vsel %vm952_vm3, 2, %v4578_v60 }
 0x55c   :  { %vm968_vm11 = vcmp.lt.s32.totalorder %v967_v27, %v5125_v49 }
 0x55d   :  { %4123 = vrcp.f32 %v1131_v51  ;;  %v1143_v44 = vand.u32 2147483648, %v1131_v51  ;;  %vm1137_vm1 = vweird.f32 %v1131_v51  ;;  %v1141_v46 = vand.u32 2147483647, %v1131_v51 }
 0x55f   :  { %v1144_v50 = vor.u32 1.1754944e-38, %v1143_v44  ;;  %vm1142_vm4 = vcmp.eq.f32.partialorder %v1141_v46, 8.507059e+37 }
 0x561   :  { %1167 = vperm.xlu2 %4029, %v1165_v29  }
 0x563   :  { %v4124_v33 = vpop.eup %4123 }
 0x564   :  { %v1133_v23 = vmul.f32 %v4124_v33, %v1131_v51  ;;  %vm1138_vm0 = vweird.f32 %v4124_v33  ;;  %v1244_v51 = vsel %vm968_vm11, 1, %v4567_v2 }
 0x565   :  { %vm1139_vm2 = vmor %vm1137_vm1, %vm1138_vm0 }
 0x566   :  { %v1134_v30 = vsub.f32 1.0, %v1133_v23 }
 0x568   :  { %v1135_v35 = vmul.f32 %v4124_v33, %v1134_v30 }
 0x56a   :  { %v1136_v43 = vadd.f32 %v4124_v33, %v1135_v35 }
 0x56c   :  { %v1140_v16 = vsel %vm1139_vm2, %v4124_v33, %v1136_v43 }
 0x56d   :  { %v1145_v22 = vsel %vm1142_vm4, %v1144_v50, %v1140_v16 }
 0x56e   :  { %v1148_v57 = vmul.f32 %v1145_v22, %v1088_v56 }
 0x5b3   :  { %v1151_v54 = vpop.permute.xlu2 %1150 }
 0x5b4   :  { %v1153_v55 = vmul.f32 %v1151_v54, %v1145_v22 }
 0x5b6   :  { %1155 = vrot.lane.b32.xlu0 %v1153_v55, %s4572_s12 }
 0x5bb   :  { %v5176_v28 = vpop.permute.xlu2 %1167 }
 0x5bc   :  { %vm1169_vm10 = vcmp.eq.s32.totalorder %v5176_v28, 1 }
 0x628   :  { %v1156_v59 = vpop.permute.xlu0 %1155 }
 0x629   :  { %v1158_v62 = vadd.f32 %v1156_v59, %v1148_v57 }
 0x62b   :  { %4125 = vtanh.f32 %v1158_v62 }
 0x631   :  { %v4126_v0 = vpop.eup %4125 }
 0x632   :  { %1161 = vrot.lane.b32.xlu1 %v4126_v0, %s4572_s12  ;;  %v1171_v0 = vsel %vm1169_vm10, %v1158_v62, %v1088_v56 }
 0x6a4   :  { %v1162_v11 = vpop.permute.xlu1 %1161 }
 0x6a5   :  { %v1164_v12 = vmul.f32 %v1162_v11, %v1145_v22 }
 0x6a7   :  { %v5182_v13 = vsel %vm1169_vm10, %v1164_v12, %v5141_v63 }
 0x6a8   :  { %1176 = vrot.lane.b32.xlu1 %v5182_v13, %s4574_s5  ;;  %1173 = vrot.lane.b32.xlu0 %v5182_v13, %s4575_s27 }
 0x71a   :  { %v1177_v19 = vpop.permute.xlu1 %1176  ;;  %v1174_v15 = vpop.permute.xlu0 %1173 }
 0x71b   :  { %v1179_v17 = vsel %vm1096_vm12, %v1174_v15, %v1177_v19 }
 0x71c   :  { %v1180_v18 = vsel %vm5149_vm14, %v1179_v17, 0.0 }
 0x71d   :  { %3914 = vmatmul.msk.f32.vlgmr.msra.gmra.mxu2 %vm1021_vm15, %v1180_v18 }
 0x71e   :  { %1839 = vmatpush.msra.mxu2 %v4927_v47 }
 0x720   :  { %1840 = vmatpush.msra.mxu2 %v4932_v48 }
 0x722   :  { %1841 = vmatpush.msra.mxu2 %v4939_v53 }
 0x724   :  { %1842 = vmatpush.msra.mxu2 %v4948_v58 }
 0x726   :  { %1843 = vmatpush.msra.mxu2 %v4960_v61 }
 0x728   :  { %1844 = vmatpush.msra.mxu2 %v4970_v5 }
 0x72a   :  { %1845 = vmatpush.msra.mxu2 %v4986_v52 }
 0x72c   :  { %1846 = vmatpush.msra.mxu2 %v4991_v14 }
 0x7a0   :  { %v1204_v20 = vpop.f32.mrf.mxu2 }
 0x7a1   :  { %v1205_v25 = vadd.f32 %v1204_v20, %v5096_v45 }
 0x7a3   :  { %4127 = vtanh.f32 %v1205_v25  ;;  %v3915_v33 = vmul.f32 -1.442695, %v1205_v25 }
 0x7a5   :  { %4129 = vpow2.f32 %v3915_v33 }
 0x7a9   :  { %v4128_v29 = vpop.eup %4127 }
 0x7aa   :  { %1229 = vrot.lane.b32.xlu2 %v4128_v29, %s4572_s12 }
 0x7ab   :  { %v4130_v23 = vpop.eup %4129 }
 0x7ac   :  { %v1210_v30 = vadd.f32 1.0, %v4130_v23  ;;  %v4579_v23 = vmov 12  }
 0x7ae   :  { %4131 = vrcp.f32 %v1210_v30  ;;  %v1222_v16 = vand.u32 2147483648, %v1210_v30  ;;  %vm1216_vm6 = vweird.f32 %v1210_v30  ;;  %v1220_v50 = vand.u32 2147483647, %v1210_v30 }
 0x7b0   :  { %v1223_v22 = vor.u32 1.1754944e-38, %v1222_v16  ;;  %vm1221_vm1 = vcmp.eq.f32.partialorder %v1220_v50, 8.507059e+37 }
 0x7b2   :  { %1246 = vperm.xlu2 %4029, %v1244_v51  }
 0x7b4   :  { %v4132_v35 = vpop.eup %4131 }
 0x7b5   :  { %v1212_v45 = vmul.f32 %v4132_v35, %v1210_v30  ;;  %vm1217_vm13 = vweird.f32 %v4132_v35  ;;  %v970_v30 = vsel %vm952_vm3, 3, %v4579_v23 }
 0x7b6   :  { %vm1218_vm0 = vmor %vm1216_vm6, %vm1217_vm13  ;;  %vm971_vm4 = vcmp.lt.s32.totalorder %v970_v30, %v5125_v49 }
 0x7b7   :  { %v1213_v43 = vsub.f32 1.0, %v1212_v45 }
 0x7b9   :  { %v1214_v44 = vmul.f32 %v4132_v35, %v1213_v43 }
 0x7bb   :  { %v1215_v46 = vadd.f32 %v4132_v35, %v1214_v44 }
 0x7bd   :  { %v1219_v54 = vsel %vm1218_vm0, %v4132_v35, %v1215_v46  ;;  %v1325_v35 = vsel %vm971_vm4, 1, %v4567_v2 }
 0x7be   :  { %v1224_v57 = vsel %vm1221_vm1, %v1223_v22, %v1219_v54 }
 0x7bf   :  { %v1227_v11 = vmul.f32 %v1224_v57, %v1171_v0 }
 0x804   :  { %v1230_v55 = vpop.permute.xlu2 %1229 }
 0x805   :  { %v1232_v59 = vmul.f32 %v1230_v55, %v1224_v57 }
 0x807   :  { %1234 = vrot.lane.b32.xlu0 %v1232_v59, %s4572_s12 }
 0x80c   :  { %v5210_v17 = vpop.permute.xlu2 %1246 }
 0x80d   :  { %vm1248_vm2 = vcmp.eq.s32.totalorder %v5210_v17, 1 }
 0x879   :  { %v1235_v12 = vpop.permute.xlu0 %1234 }
 0x87a   :  { %v1237_v19 = vadd.f32 %v1235_v12, %v1227_v11 }
 0x87c   :  { %4133 = vtanh.f32 %v1237_v19 }
 0x882   :  { %v4134_v15 = vpop.eup %4133 }
 0x883   :  { %1240 = vrot.lane.b32.xlu1 %v4134_v15, %s4572_s12 }
 0x8f5   :  { %v1241_v18 = vpop.permute.xlu1 %1240 }
 0x8f6   :  { %v1243_v20 = vmul.f32 %v1241_v18, %v1224_v57  ;;  %v1250_v18 = vsel %vm1248_vm2, %v1237_v19, %v1171_v0 }
 0x8f8   :  { %v5216_v25 = vsel %vm1248_vm2, %v1243_v20, %v5182_v13 }
 0x8f9   :  { %1255 = vrot.lane.b32.xlu1 %v5216_v25, %s4574_s5  ;;  %1252 = vrot.lane.b32.xlu0 %v5216_v25, %s4575_s27 }
 0x96b   :  { %v1256_v56 = vpop.permute.xlu1 %1255  ;;  %v1253_v62 = vpop.permute.xlu0 %1252 }
 0x96c   :  { %v1258_v29 = vsel %vm1096_vm12, %v1253_v62, %v1256_v56 }
 0x96d   :  { %v1259_v60 = vsel %vm5149_vm14, %v1258_v29, 0.0 }
 0x96e   :  { %3916 = vmatmul.msk.f32.vlgmr.msra.gmra.mxu3 %vm1021_vm15, %v1259_v60 }
 0x96f   :  { %1920 = vmatpush.msra.mxu3 %v4927_v47 }
 0x971   :  { %1921 = vmatpush.msra.mxu3 %v4932_v48 }
 0x973   :  { %1922 = vmatpush.msra.mxu3 %v4939_v53 }
 0x975   :  { %1923 = vmatpush.msra.mxu3 %v4948_v58 }
 0x977   :  { %1924 = vmatpush.msra.mxu3 %v4960_v61 }
 0x979   :  { %1925 = vmatpush.msra.mxu3 %v4970_v5 }
 0x97b   :  { %1926 = vmatpush.msra.mxu3 %v4986_v52 }
 0x97d   :  { %1927 = vmatpush.msra.mxu3 %v4991_v14 }
 0x9f1   :  { %v1285_v27 = vpop.f32.mrf.mxu3 }
 0x9f2   :  { %v1286_v51 = vadd.f32 %v1285_v27, %v5106_v7 }
 0x9f4   :  { %4135 = vtanh.f32 %v1286_v51  ;;  %v3917_v45 = vmul.f32 -1.442695, %v1286_v51 }
 0x9f6   :  { %4137 = vpow2.f32 %v3917_v45 }
 0x9fa   :  { %v4136_v33 = vpop.eup %4135 }
 0x9fb   :  { %1310 = vrot.lane.b32.xlu2 %v4136_v33, %s4572_s12 }
 0x9fc   :  { %v4138_v43 = vpop.eup %4137 }
 0x9fd   :  { %v1291_v44 = vadd.f32 1.0, %v4138_v43 }
 0x9ff   :  { %4139 = vrcp.f32 %v1291_v44  ;;  %v1303_v22 = vand.u32 2147483648, %v1291_v44  ;;  %vm1297_vm13 = vweird.f32 %v1291_v44  ;;  %v1301_v55 = vand.u32 2147483647, %v1291_v44 }
 0xa01   :  { %v1304_v59 = vor.u32 1.1754944e-38, %v1303_v22  ;;  %vm1302_vm0 = vcmp.eq.f32.partialorder %v1301_v55, 8.507059e+37 }
 0xa03   :  { %1327 = vperm.xlu2 %4029, %v1325_v35  }
 0xa05   :  { %v4140_v46 = vpop.eup %4139 }
 0xa06   :  { %v1293_v7 = vmul.f32 %v4140_v46, %v1291_v44  ;;  %vm1298_vm11 = vweird.f32 %v4140_v46 }
 0xa07   :  { %vm1299_vm6 = vmor %vm1297_vm13, %vm1298_vm11 }
 0xa08   :  { %v1294_v16 = vsub.f32 1.0, %v1293_v7 }
 0xa0a   :  { %v1295_v50 = vmul.f32 %v4140_v46, %v1294_v16 }
 0xa0c   :  { %v1296_v54 = vadd.f32 %v4140_v46, %v1295_v50 }
 0xa0e   :  { %v1300_v57 = vsel %vm1299_vm6, %v4140_v46, %v1296_v54 }
 0xa0f   :  { %v1305_v12 = vsel %vm1302_vm0, %v1304_v59, %v1300_v57 }
 0xa10   :  { %v1308_v20 = vmul.f32 %v1305_v12, %v1250_v18 }
 0xa55   :  { %v1311_v11 = vpop.permute.xlu2 %1310 }
 0xa56   :  { %v1313_v15 = vmul.f32 %v1311_v11, %v1305_v12 }
 0xa58   :  { %1315 = vrot.lane.b32.xlu0 %v1313_v15, %s4572_s12 }
 0xa5d   :  { %v5244_v60 = vpop.permute.xlu2 %1327 }
 0xa5e   :  { %vm6304_vm1 = vcmp.eq.s32.totalorder %v5244_v60, 1 }
 0xaca   :  { %v1316_v56 = vpop.permute.xlu0 %1315 }
 0xacb   :  { %v1318_v62 = vadd.f32 %v1316_v56, %v1308_v20 }
 0xacd   :  { %4141 = vtanh.f32 %v1318_v62  ;;  %v5277_v20 = vsel %vm6304_vm1, %v1318_v62, %v1250_v18 }
 0xad3   :  { %v4142_v29 = vpop.eup %4141 }
 0xad4   :  { %1321 = vrot.lane.b32.xlu1 %v4142_v29, %s4572_s12 }
 0xb46   :  { %v1322_v27 = vpop.permute.xlu1 %1321 }
 0xb47   :  { %v1324_v51 = vmul.f32 %v1322_v27, %v1305_v12 }
 0xb49   :  { %v5250_v33 = vsel %vm6304_vm1, %v1324_v51, %v5216_v25 }
 0xb4a   :  { %1336 = vrot.lane.b32.xlu1 %v5250_v33, %s4574_s5  ;;  %1333 = vrot.lane.b32.xlu0 %v5250_v33, %s4575_s27 }
 0xbbc   :  { %v1337_v0 = vpop.permute.xlu1 %1336  ;;  %v1334_v19 = vpop.permute.xlu0 %1333 }
 0xbbd   :  { %v1339_v23 = vsel %vm1096_vm12, %v1334_v19, %v1337_v0 }
 0xbbe   :  { %v1340_v30 = vsel %vm5149_vm14, %v1339_v23, 0.0 }
 0xbbf   :  { %3918 = vmatmul.msk.f32.vlgmr.msrb.gmra.mxu0 %vm1021_vm15, %v1340_v30 }
 0xbc0   :  { %2000 = vmatpush.msrb.mxu0 %v4927_v47  ;;  %v4580_v47 = vmov 11  }
 0xbc2   :  { %2001 = vmatpush.msrb.mxu0 %v4932_v48  ;;  %v973_v48 = vsel %vm952_vm3, 4, %v4580_v47  ;;  %v5306_v47 = vld [vmem:[%s6294_s11 + $0x30] sm:$0xff] }
 0xbc3   :  { %vm974_vm4 = vcmp.lt.s32.totalorder %v973_v48, %v5125_v49  ;;  %v5312_v48 = vld [vmem:[%s6294_s11 + $0x28] sm:$0xff] }
 0xbc4   :  { %2002 = vmatpush.msrb.mxu0 %v4939_v53  ;;  %v1405_v53 = vsel %vm974_vm4, 1, %v4567_v2 }
 0xbc6   :  { %2003 = vmatpush.msrb.mxu0 %v4948_v58 }
 0xbc8   :  { %2004 = vmatpush.msrb.mxu0 %v4960_v61 }
 0xbca   :  { %2005 = vmatpush.msrb.mxu0 %v4970_v5 }
 0xbcc   :  { %2006 = vmatpush.msrb.mxu0 %v4986_v52 }
 0xbce   :  { %2007 = vmatpush.msrb.mxu0 %v4991_v14 }
 0xc3c   :  { %v1365_v35 = vpop.f32.mrf.mxu0 }
 0xc3d   :  { %v1366_v45 = vadd.f32 %v1365_v35, %v5078_v36 }
 0xc3f   :  { %4143 = vtanh.f32 %v1366_v45  ;;  %v3919_v58 = vmul.f32 -1.442695, %v1366_v45 }
 0xc41   :  { %4145 = vpow2.f32 %v3919_v58 }
 0xc45   :  { %v4144_v43 = vpop.eup %4143 }
 0xc46   :  { %1390 = vrot.lane.b32.xlu2 %v4144_v43, %s4572_s12  ;;  %v5300_v43 = vld [vmem:[%s6294_s11 + $0x38] sm:$0xff] }
 0xc47   :  { %v4146_v44 = vpop.eup %4145 }
 0xc48   :  { %v1371_v46 = vadd.f32 1.0, %v4146_v44 }
 0xc4a   :  { %4147 = vrcp.f32 %v1371_v46  ;;  %v1383_v22 = vand.u32 2147483648, %v1371_v46  ;;  %vm1377_vm13 = vweird.f32 %v1371_v46  ;;  %v1381_v55 = vand.u32 2147483647, %v1371_v46 }
 0xc4c   :  { %v1384_v59 = vor.u32 1.1754944e-38, %v1383_v22  ;;  %vm1382_vm0 = vcmp.eq.f32.partialorder %v1381_v55, 8.507059e+37 }
 0xc4e   :  { %1407 = vperm.xlu2 %4029, %v1405_v53   ;;  %v5318_v53 = vld [vmem:[%s6294_s11 + $0x20] sm:$0xff] }
 0xc50   :  { %v4148_v7 = vpop.eup %4147 }
 0xc51   :  { %v1373_v36 = vmul.f32 %v4148_v7, %v1371_v46  ;;  %vm1378_vm11 = vweird.f32 %v4148_v7 }
 0xc52   :  { %vm1379_vm6 = vmor %vm1377_vm13, %vm1378_vm11 }
 0xc53   :  { %v1374_v16 = vsub.f32 1.0, %v1373_v36 }
 0xc55   :  { %v1375_v50 = vmul.f32 %v4148_v7, %v1374_v16 }
 0xc57   :  { %v1376_v54 = vadd.f32 %v4148_v7, %v1375_v50 }
 0xc59   :  { %v1380_v57 = vsel %vm1379_vm6, %v4148_v7, %v1376_v54  ;;  %v4581_v7 = vmov 10  }
 0xc5a   :  { %v1385_v12 = vsel %vm1382_vm0, %v1384_v59, %v1380_v57  ;;  %v976_v36 = vsel %vm952_vm3, 5, %v4581_v7  ;;  %v4371_v7 = vld [vmem:[%s6294_s11 + $0x18] sm:$0xff] }
 0xc5b   :  { %v1388_v56 = vmul.f32 %v1385_v12, %v5277_v20  ;;  %vm977_vm11 = vcmp.lt.s32.totalorder %v976_v36, %v5125_v49  ;;  %v4372_v36 = vld [vmem:[%s6294_s11 + $0x10] sm:$0xff] }
 0xca0   :  { %v1391_v11 = vpop.permute.xlu2 %1390 }
 0xca1   :  { %v1393_v15 = vmul.f32 %v1391_v11, %v1385_v12 }
 0xca3   :  { %1395 = vrot.lane.b32.xlu0 %v1393_v15, %s4572_s12 }
 0xca8   :  { %v5281_v0 = vpop.permute.xlu2 %1407 }
 0xca9   :  { %vm6305_vm4 = vcmp.eq.s32.totalorder %v5281_v0, 1 }
 0xd15   :  { %v1396_v29 = vpop.permute.xlu0 %1395 }
 0xd16   :  { %v1398_v27 = vadd.f32 %v1396_v29, %v1388_v56 }
 0xd18   :  { %4149 = vtanh.f32 %v1398_v27  ;;  %v5335_v29 = vsel %vm6305_vm4, %v1398_v27, %v5277_v20 }
 0xd1e   :  { %v4150_v51 = vpop.eup %4149 }
 0xd1f   :  { %1401 = vrot.lane.b32.xlu1 %v4150_v51, %s4572_s12 }
 0xd91   :  { %v1402_v19 = vpop.permute.xlu1 %1401 }
 0xd92   :  { %v1404_v23 = vmul.f32 %v1402_v19, %v1385_v12 }
 0xd94   :  { %v5287_v30 = vsel %vm6305_vm4, %v1404_v23, %v5250_v33 }
 0xd95   :  { %1416 = vrot.lane.b32.xlu1 %v5287_v30, %s4574_s5  ;;  %1413 = vrot.lane.b32.xlu0 %v5287_v30, %s4575_s27 }
 0xe07   :  { %v1417_v18 = vpop.permute.xlu1 %1416  ;;  %v1414_v62 = vpop.permute.xlu0 %1413 }
 0xe08   :  { %v1419_v35 = vsel %vm1096_vm12, %v1414_v62, %v1417_v18 }
 0xe09   :  { %v1420_v45 = vsel %vm5149_vm14, %v1419_v35, 0.0 }
 0xe0a   :  { %3920 = vmatmul.msk.f32.vlgmr.msrb.gmra.mxu1 %vm1021_vm15, %v1420_v45 }
 0xe0b   :  { %2082 = vmatpush.msrb.mxu1 %v5300_v43 }
 0xe0d   :  { %2083 = vmatpush.msrb.mxu1 %v5306_v47 }
 0xe0f   :  { %2084 = vmatpush.msrb.mxu1 %v5312_v48 }
 0xe11   :  { %2085 = vmatpush.msrb.mxu1 %v5318_v53 }
 0xe13   :  { %2086 = vmatpush.msrb.mxu1 %v4960_v61  ;;  %v1487_v61 = vsel %vm977_vm11, 1, %v4567_v2 }
 0xe15   :  { %2087 = vmatpush.msrb.mxu1 %v4970_v5 }
 0xe17   :  { %2088 = vmatpush.msrb.mxu1 %v4986_v52 }
 0xe19   :  { %2089 = vmatpush.msrb.mxu1 %v4991_v14 }
 0xe87   :  { %v1447_v58 = vpop.f32.mrf.mxu1 }
 0xe88   :  { %v1448_v44 = vadd.f32 %v1447_v58, %v5081_v37 }
 0xe8a   :  { %4151 = vtanh.f32 %v1448_v44  ;;  %v3921_v5 = vmul.f32 -1.442695, %v1448_v44 }
 0xe8c   :  { %4153 = vpow2.f32 %v3921_v5  ;;  %v4374_v5 = vld [vmem:[%s6294_s11] sm:$0xff] }
 0xe90   :  { %v4152_v46 = vpop.eup %4151 }
 0xe91   :  { %1472 = vrot.lane.b32.xlu2 %v4152_v46, %s4572_s12 }
 0xe92   :  { %v4154_v52 = vpop.eup %4153 }
 0xe93   :  { %v1453_v14 = vadd.f32 1.0, %v4154_v52 }
 0xe95   :  { %4155 = vrcp.f32 %v1453_v14  ;;  %v1465_v55 = vand.u32 2147483648, %v1453_v14  ;;  %vm1459_vm6 = vweird.f32 %v1453_v14  ;;  %v1463_v57 = vand.u32 2147483647, %v1453_v14 }
 0xe97   :  { %v1466_v11 = vor.u32 1.1754944e-38, %v1465_v55  ;;  %vm1464_vm1 = vcmp.eq.f32.partialorder %v1463_v57, 8.507059e+37 }
 0xe99   :  { %1489 = vperm.xlu2 %4029, %v1487_v61   ;;  %v4373_v61 = vld [vmem:[%s6294_s11 + $0x8] sm:$0xff] }
 0xe9b   :  { %v4156_v16 = vpop.eup %4155 }
 0xe9c   :  { %v1455_v37 = vmul.f32 %v4156_v16, %v1453_v14  ;;  %vm1460_vm13 = vweird.f32 %v4156_v16 }
 0xe9d   :  { %vm1461_vm0 = vmor %vm1459_vm6, %vm1460_vm13 }
 0xe9e   :  { %v1456_v50 = vsub.f32 1.0, %v1455_v37  ;;  %v4582_v37 = vmov 9  }
 0xea0   :  { %v1457_v54 = vmul.f32 %v4156_v16, %v1456_v50  ;;  %v979_v50 = vsel %vm952_vm3, 6, %v4582_v37 }
 0xea1   :  { %vm980_vm11 = vcmp.lt.s32.totalorder %v979_v50, %v5125_v49 }
 0xea2   :  { %v1458_v22 = vadd.f32 %v4156_v16, %v1457_v54  ;;  %v1566_v54 = vsel %vm980_vm11, 1, %v4567_v2 }
 0xea4   :  { %v1462_v59 = vsel %vm1461_vm0, %v4156_v16, %v1458_v22 }
 0xea5   :  { %v1467_v15 = vsel %vm1464_vm1, %v1466_v11, %v1462_v59 }
 0xea6   :  { %v1470_v51 = vmul.f32 %v1467_v15, %v5335_v29 }
 0xeeb   :  { %v1473_v12 = vpop.permute.xlu2 %1472 }
 0xeec   :  { %v1475_v56 = vmul.f32 %v1473_v12, %v1467_v15 }
 0xeee   :  { %1477 = vrot.lane.b32.xlu0 %v1475_v56, %s4572_s12 }
 0xef3   :  { %v5339_v62 = vpop.permute.xlu2 %1489 }
 0xef4   :  { %vm6306_vm1 = vcmp.eq.s32.totalorder %v5339_v62, 1 }
 0xf60   :  { %v1478_v19 = vpop.permute.xlu0 %1477 }
 0xf61   :  { %v1480_v23 = vadd.f32 %v1478_v19, %v1470_v51 }
 0xf63   :  { %4157 = vtanh.f32 %v1480_v23 }
 0xf69   :  { %v4158_v18 = vpop.eup %4157 }
 0xf6a   :  { %1483 = vrot.lane.b32.xlu1 %v4158_v18, %s4572_s12 }
 0xfdc   :  { %v1484_v35 = vpop.permute.xlu1 %1483 }
 0xfdd   :  { %v1486_v45 = vmul.f32 %v1484_v35, %v1467_v15 }
 0xfdf   :  { %v5345_v58 = vsel %vm6306_vm1, %v1486_v45, %v5287_v30 }
 0xfe0   :  { %1498 = vrot.lane.b32.xlu1 %v5345_v58, %s4574_s5  ;;  %1495 = vrot.lane.b32.xlu0 %v5345_v58, %s4575_s27 }
0x1052   :  { %v1499_v20 = vpop.permute.xlu1 %1498  ;;  %v1496_v27 = vpop.permute.xlu0 %1495 }
0x1053   :  { %v1501_v44 = vsel %vm1096_vm12, %v1496_v27, %v1499_v20  ;;  %v1493_v27 = vsel %vm6306_vm1, %v1480_v23, %v5335_v29 }
0x1054   :  { %v1502_v46 = vsel %vm5149_vm14, %v1501_v44, 0.0 }
0x1055   :  { %3922 = vmatmul.msk.f32.vlgmr.msrb.gmra.mxu2 %vm1021_vm15, %v1502_v46 }
0x1056   :  { %2161 = vmatpush.msrb.mxu2 %v5300_v43 }
0x1058   :  { %2162 = vmatpush.msrb.mxu2 %v5306_v47 }
0x105a   :  { %2163 = vmatpush.msrb.mxu2 %v5312_v48 }
0x105c   :  { %2164 = vmatpush.msrb.mxu2 %v5318_v53 }
0x105e   :  { %2165 = vmatpush.msrb.mxu2 %v4371_v7 }
0x1060   :  { %2166 = vmatpush.msrb.mxu2 %v4372_v36 }
0x1062   :  { %2167 = vmatpush.msrb.mxu2 %v4373_v61 }
0x1064   :  { %2168 = vmatpush.msrb.mxu2 %v4374_v5 }
0x10d8   :  { %v1526_v52 = vpop.f32.mrf.mxu2 }
0x10d9   :  { %v1527_v14 = vadd.f32 %v1526_v52, %v5072_v31 }
0x10db   :  { %4159 = vtanh.f32 %v1527_v14  ;;  %v3923_v22 = vmul.f32 -1.442695, %v1527_v14 }
0x10dd   :  { %4161 = vpow2.f32 %v3923_v22 }
0x10e1   :  { %v4160_v16 = vpop.eup %4159 }
0x10e2   :  { %1551 = vrot.lane.b32.xlu2 %v4160_v16, %s4572_s12 }
0x10e3   :  { %v4162_v55 = vpop.eup %4161 }
0x10e4   :  { %v1532_v57 = vadd.f32 1.0, %v4162_v55 }
0x10e6   :  { %4163 = vrcp.f32 %v1532_v57  ;;  %v1544_v56 = vand.u32 2147483648, %v1532_v57  ;;  %vm1538_vm6 = vweird.f32 %v1532_v57  ;;  %v1542_v51 = vand.u32 2147483647, %v1532_v57 }
0x10e8   :  { %v1545_v18 = vor.u32 1.1754944e-38, %v1544_v56  ;;  %vm1543_vm4 = vcmp.eq.f32.partialorder %v1542_v51, 8.507059e+37 }
0x10ea   :  { %1568 = vperm.xlu2 %4029, %v1566_v54  }
0x10ec   :  { %v4164_v59 = vpop.eup %4163 }
0x10ed   :  { %v1534_v31 = vmul.f32 %v4164_v59, %v1532_v57  ;;  %vm1539_vm13 = vweird.f32 %v4164_v59 }
0x10ee   :  { %vm1540_vm0 = vmor %vm1538_vm6, %vm1539_vm13 }
0x10ef   :  { %v1535_v11 = vsub.f32 1.0, %v1534_v31 }
0x10f1   :  { %v1536_v12 = vmul.f32 %v4164_v59, %v1535_v11  ;;  %v4583_v11 = vmov 8  }
0x10f3   :  { %v1537_v15 = vadd.f32 %v4164_v59, %v1536_v12  ;;  %v982_v12 = vsel %vm952_vm3, 7, %v4583_v11 }
0x10f4   :  { %vm983_vm11 = vcmp.lt.s32.totalorder %v982_v12, %v5125_v49  ;;  %v4584_v12 = vmov 7  }
0x10f5   :  { %v1541_v19 = vsel %vm1540_vm0, %v4164_v59, %v1537_v15 }
0x10f6   :  { %v1546_v45 = vsel %vm1543_vm4, %v1545_v18, %v1541_v19 }
0x10f7   :  { %v1549_v44 = vmul.f32 %v1546_v45, %v1493_v27 }
0x113c   :  { %v1552_v35 = vpop.permute.xlu2 %1551 }
0x113d   :  { %v1554_v20 = vmul.f32 %v1552_v35, %v1546_v45 }
0x113f   :  { %1556 = vrot.lane.b32.xlu0 %v1554_v20, %s4572_s12 }
0x1144   :  { %v5382_v16 = vpop.permute.xlu2 %1568 }
0x1145   :  { %vm6307_vm4 = vcmp.eq.s32.totalorder %v5382_v16, 1 }
0x11b1   :  { %v1557_v46 = vpop.permute.xlu0 %1556 }
0x11b2   :  { %v1559_v52 = vadd.f32 %v1557_v46, %v1549_v44 }
0x11b4   :  { %4165 = vtanh.f32 %v1559_v52  ;;  %v1572_v20 = vsel %vm6307_vm4, %v1559_v52, %v1493_v27 }
0x11ba   :  { %v4166_v14 = vpop.eup %4165 }
0x11bb   :  { %1562 = vrot.lane.b32.xlu1 %v4166_v14, %s4572_s12 }
0x122d   :  { %v1563_v37 = vpop.permute.xlu1 %1562 }
0x122e   :  { %v1565_v50 = vmul.f32 %v1563_v37, %v1546_v45 }
0x1230   :  { %v5388_v54 = vsel %vm6307_vm4, %v1565_v50, %v5345_v58 }
0x1231   :  { %1577 = vrot.lane.b32.xlu1 %v5388_v54, %s4574_s5  ;;  %1574 = vrot.lane.b32.xlu0 %v5388_v54, %s4575_s27 }
0x12a3   :  { %v1578_v29 = vpop.permute.xlu1 %1577  ;;  %v1575_v23 = vpop.permute.xlu0 %1574 }
0x12a4   :  { %v1580_v22 = vsel %vm1096_vm12, %v1575_v23, %v1578_v29 }
0x12a5   :  { %v1581_v55 = vsel %vm5149_vm14, %v1580_v22, 0.0 }
0x12a6   :  { %3924 = vmatmul.msk.f32.vlgmr.msrb.gmra.mxu3 %vm1021_vm15, %v1581_v55 }
0x12a7   :  { %2242 = vmatpush.msrb.mxu3 %v5300_v43  ;;  %v1647_v43 = vsel %vm983_vm11, 1, %v4567_v2 }
0x12a9   :  { %2243 = vmatpush.msrb.mxu3 %v5306_v47 }
0x12ab   :  { %2244 = vmatpush.msrb.mxu3 %v5312_v48 }
0x12ad   :  { %2245 = vmatpush.msrb.mxu3 %v5318_v53 }
0x12af   :  { %2246 = vmatpush.msrb.mxu3 %v4371_v7 }
0x12b1   :  { %2247 = vmatpush.msrb.mxu3 %v4372_v36 }
0x12b3   :  { %2248 = vmatpush.msrb.mxu3 %v4373_v61 }
0x12b5   :  { %2249 = vmatpush.msrb.mxu3 %v4374_v5 }
0x1329   :  { %v1607_v57 = vpop.f32.mrf.mxu3 }
0x132a   :  { %v1608_v59 = vadd.f32 %v1607_v57, %v5084_v40 }
0x132c   :  { %4167 = vtanh.f32 %v1608_v59  ;;  %v3925_v47 = vmul.f32 -1.442695, %v1608_v59 }
0x132e   :  { %4169 = vpow2.f32 %v3925_v47 }
0x1332   :  { %v4168_v31 = vpop.eup %4167 }
0x1333   :  { %1632 = vrot.lane.b32.xlu2 %v4168_v31, %s4572_s12 }
0x1334   :  { %v4170_v48 = vpop.eup %4169 }
0x1335   :  { %v1613_v53 = vadd.f32 1.0, %v4170_v48 }
0x1337   :  { %4171 = vrcp.f32 %v1613_v53  ;;  %v1625_v15 = vand.u32 2147483648, %v1613_v53  ;;  %vm1619_vm6 = vweird.f32 %v1613_v53  ;;  %v1623_v56 = vand.u32 2147483647, %v1613_v53 }
0x1339   :  { %v1626_v19 = vor.u32 1.1754944e-38, %v1625_v15  ;;  %vm1624_vm1 = vcmp.eq.f32.partialorder %v1623_v56, 8.507059e+37 }
0x133b   :  { %1649 = vperm.xlu2 %4029, %v1647_v43   ;;  %v985_v43 = vsel %vm952_vm3, 8, %v4584_v12 }
0x133d   :  { %v4172_v7 = vpop.eup %4171 }
0x133e   :  { %v1615_v40 = vmul.f32 %v4172_v7, %v1613_v53  ;;  %vm1620_vm13 = vweird.f32 %v4172_v7 }
0x133f   :  { %vm1621_vm0 = vmor %vm1619_vm6, %vm1620_vm13 }
0x1340   :  { %v1616_v36 = vsub.f32 1.0, %v1615_v40 }
0x1342   :  { %v1617_v61 = vmul.f32 %v4172_v7, %v1616_v36 }
0x1344   :  { %v1618_v5 = vadd.f32 %v4172_v7, %v1617_v61 }
0x1346   :  { %v1622_v51 = vsel %vm1621_vm0, %v4172_v7, %v1618_v5 }
0x1347   :  { %v1627_v35 = vsel %vm1624_vm1, %v1626_v19, %v1622_v51  ;;  %vm986_vm1 = vcmp.lt.s32.totalorder %v985_v43, %v5125_v49 }
0x1348   :  { %v1630_v44 = vmul.f32 %v1627_v35, %v1572_v20  ;;  %v1727_v47 = vsel %vm986_vm1, 1, %v4567_v2 }
0x138d   :  { %v1633_v18 = vpop.permute.xlu2 %1632 }
0x138e   :  { %v1635_v45 = vmul.f32 %v1633_v18, %v1627_v35 }
0x1390   :  { %1637 = vrot.lane.b32.xlu0 %v1635_v45, %s4572_s12 }
0x1395   :  { %v5412_v50 = vpop.permute.xlu2 %1649 }
0x1396   :  { %vm6308_vm11 = vcmp.eq.s32.totalorder %v5412_v50, 1 }
0x1402   :  { %v1638_v46 = vpop.permute.xlu0 %1637 }
0x1403   :  { %v1640_v14 = vadd.f32 %v1638_v46, %v1630_v44 }
0x1405   :  { %4173 = vtanh.f32 %v1640_v14  ;;  %v1653_v44 = vsel %vm6308_vm11, %v1640_v14, %v1572_v20 }
0x140b   :  { %v4174_v37 = vpop.eup %4173 }
0x140c   :  { %1643 = vrot.lane.b32.xlu1 %v4174_v37, %s4572_s12 }
0x147e   :  { %v1644_v29 = vpop.permute.xlu1 %1643 }
0x147f   :  { %v1646_v23 = vmul.f32 %v1644_v29, %v1627_v35 }
0x1481   :  { %v5418_v22 = vsel %vm6308_vm11, %v1646_v23, %v5388_v54 }
0x1482   :  { %1658 = vrot.lane.b32.xlu1 %v5418_v22, %s4574_s5  ;;  %1655 = vrot.lane.b32.xlu0 %v5418_v22, %s4575_s27 }
0x14f4   :  { %v1659_v27 = vpop.permute.xlu1 %1658  ;;  %v1656_v52 = vpop.permute.xlu0 %1655 }
0x14f5   :  { %v1661_v55 = vsel %vm1096_vm12, %v1656_v52, %v1659_v27 }
0x14f6   :  { %v1662_v57 = vsel %vm5149_vm14, %v1661_v55, 0.0 }
0x14f7   :  { %3926 = vmatmul.msk.f32.vlgmr.msra.gmra.mxu0 %vm1021_vm15, %v1662_v57 }
0x1574   :  { %v1687_v59 = vpop.f32.mrf.mxu0 }
0x1575   :  { %v1688_v31 = vadd.f32 %v1687_v59, %v5075_v32 }
0x1577   :  { %4175 = vtanh.f32 %v1688_v31  ;;  %v3927_v48 = vmul.f32 -1.442695, %v1688_v31 }
0x1579   :  { %4177 = vpow2.f32 %v3927_v48 }
0x157d   :  { %v4176_v11 = vpop.eup %4175 }
0x157e   :  { %1712 = vrot.lane.b32.xlu2 %v4176_v11, %s4572_s12 }
0x157f   :  { %v4178_v53 = vpop.eup %4177 }
0x1580   :  { %v1693_v7 = vadd.f32 1.0, %v4178_v53 }
0x1582   :  { %4179 = vrcp.f32 %v1693_v7  ;;  %v1705_v15 = vand.u32 2147483648, %v1693_v7  ;;  %vm1699_vm6 = vweird.f32 %v1693_v7  ;;  %v1703_v56 = vand.u32 2147483647, %v1693_v7 }
0x1584   :  { %v1706_v19 = vor.u32 1.1754944e-38, %v1705_v15  ;;  %vm1704_vm4 = vcmp.eq.f32.partialorder %v1703_v56, 8.507059e+37 }
0x1586   :  { %1729 = vperm.xlu2 %4029, %v1727_v47   ;;  %v4585_v47 = vmov 6  }
0x1587   :  { %v988_v48 = vsel %vm952_vm3, 9, %v4585_v47 }
0x1588   :  { %v4180_v40 = vpop.eup %4179 }
0x1589   :  { %v1695_v32 = vmul.f32 %v4180_v40, %v1693_v7  ;;  %vm1700_vm13 = vweird.f32 %v4180_v40 }
0x158a   :  { %vm1701_vm0 = vmor %vm1699_vm6, %vm1700_vm13 }
0x158b   :  { %v1696_v36 = vsub.f32 1.0, %v1695_v32 }
0x158d   :  { %v1697_v61 = vmul.f32 %v4180_v40, %v1696_v36 }
0x158f   :  { %v1698_v5 = vadd.f32 %v4180_v40, %v1697_v61 }
0x1591   :  { %v1702_v51 = vsel %vm1701_vm0, %v4180_v40, %v1698_v5 }
0x1592   :  { %v1707_v35 = vsel %vm1704_vm4, %v1706_v19, %v1702_v51  ;;  %vm989_vm4 = vcmp.lt.s32.totalorder %v988_v48, %v5125_v49 }
0x1593   :  { %v1710_v46 = vmul.f32 %v1707_v35, %v1653_v44  ;;  %v1809_v53 = vsel %vm989_vm4, 1, %v4567_v2 }
0x15d8   :  { %v1713_v18 = vpop.permute.xlu2 %1712 }
0x15d9   :  { %v1715_v45 = vmul.f32 %v1713_v18, %v1707_v35 }
0x15db   :  { %1717 = vrot.lane.b32.xlu0 %v1715_v45, %s4572_s12 }
0x15e0   :  { %v5438_v27 = vpop.permute.xlu2 %1729 }
0x15e1   :  { %vm6309_vm1 = vcmp.eq.s32.totalorder %v5438_v27, 1 }
0x164d   :  { %v1718_v37 = vpop.permute.xlu0 %1717 }
0x164e   :  { %v1720_v29 = vadd.f32 %v1718_v37, %v1710_v46 }
0x1650   :  { %4181 = vtanh.f32 %v1720_v29  ;;  %v1733_v37 = vsel %vm6309_vm1, %v1720_v29, %v1653_v44 }
0x1656   :  { %v4182_v23 = vpop.eup %4181 }
0x1657   :  { %1723 = vrot.lane.b32.xlu1 %v4182_v23, %s4572_s12 }
0x16c9   :  { %v1724_v52 = vpop.permute.xlu1 %1723 }
0x16ca   :  { %v1726_v55 = vmul.f32 %v1724_v52, %v1707_v35 }
0x16cc   :  { %v5444_v57 = vsel %vm6309_vm1, %v1726_v55, %v5418_v22 }
0x16cd   :  { %1738 = vrot.lane.b32.xlu1 %v5444_v57, %s4574_s5  ;;  %1735 = vrot.lane.b32.xlu0 %v5444_v57, %s4575_s27 }
0x173f   :  { %v1739_v20 = vpop.permute.xlu1 %1738  ;;  %v1736_v14 = vpop.permute.xlu0 %1735 }
0x1740   :  { %v1741_v59 = vsel %vm1096_vm12, %v1736_v14, %v1739_v20 }
0x1741   :  { %v1742_v31 = vsel %vm5149_vm14, %v1741_v59, 0.0 }
0x1742   :  { %3928 = vmatmul.msk.f32.vlgmr.msra.gmra.mxu1 %vm1021_vm15, %v1742_v31 }
0x17bf   :  { %v1769_v11 = vpop.f32.mrf.mxu1 }
0x17c0   :  { %v1770_v12 = vadd.f32 %v1769_v11, %v5087_v39 }
0x17c2   :  { %4183 = vtanh.f32 %v1770_v12  ;;  %v3929_v7 = vmul.f32 -1.442695, %v1770_v12 }
0x17c4   :  { %4185 = vpow2.f32 %v3929_v7  ;;  %v4586_v7 = vmov 5  }
0x17c8   :  { %v4184_v43 = vpop.eup %4183 }
0x17c9   :  { %1794 = vrot.lane.b32.xlu2 %v4184_v43, %s4572_s12 }
0x17ca   :  { %v4186_v40 = vpop.eup %4185 }
0x17cb   :  { %v1775_v32 = vadd.f32 1.0, %v4186_v40  ;;  %v991_v40 = vsel %vm952_vm3, 10, %v4586_v7 }
0x17cd   :  { %4187 = vrcp.f32 %v1775_v32  ;;  %v1787_v56 = vand.u32 2147483648, %v1775_v32  ;;  %vm1781_vm6 = vweird.f32 %v1775_v32  ;;  %v1785_v51 = vand.u32 2147483647, %v1775_v32 }
0x17cf   :  { %v1788_v18 = vor.u32 1.1754944e-38, %v1787_v56  ;;  %vm1786_vm11 = vcmp.eq.f32.partialorder %v1785_v51, 8.507059e+37 }
0x17d1   :  { %1811 = vperm.xlu2 %4029, %v1809_v53  }
0x17d3   :  { %v4188_v36 = vpop.eup %4187 }
0x17d4   :  { %v1777_v39 = vmul.f32 %v4188_v36, %v1775_v32  ;;  %vm1782_vm13 = vweird.f32 %v4188_v36 }
0x17d5   :  { %vm1783_vm0 = vmor %vm1781_vm6, %vm1782_vm13 }
0x17d6   :  { %v1778_v61 = vsub.f32 1.0, %v1777_v39 }
0x17d8   :  { %v1779_v5 = vmul.f32 %v4188_v36, %v1778_v61 }
0x17da   :  { %v1780_v15 = vadd.f32 %v4188_v36, %v1779_v5 }
0x17dc   :  { %v1784_v19 = vsel %vm1783_vm0, %v4188_v36, %v1780_v15 }
0x17dd   :  { %v1789_v45 = vsel %vm1786_vm11, %v1788_v18, %v1784_v19  ;;  %vm992_vm11 = vcmp.lt.s32.totalorder %v991_v40, %v5125_v49 }
0x17de   :  { %v1792_v23 = vmul.f32 %v1789_v45, %v1733_v37  ;;  %v1888_v32 = vsel %vm992_vm11, 1, %v4567_v2 }
0x1823   :  { %v1795_v35 = vpop.permute.xlu2 %1794 }
0x1824   :  { %v1797_v46 = vmul.f32 %v1795_v35, %v1789_v45 }
0x1826   :  { %1799 = vrot.lane.b32.xlu0 %v1797_v46, %s4572_s12 }
0x182b   :  { %v5464_v14 = vpop.permute.xlu2 %1811 }
0x182c   :  { %vm6310_vm4 = vcmp.eq.s32.totalorder %v5464_v14, 1 }
0x1898   :  { %v1800_v52 = vpop.permute.xlu0 %1799 }
0x1899   :  { %v1802_v55 = vadd.f32 %v1800_v52, %v1792_v23 }
0x189b   :  { %4189 = vtanh.f32 %v1802_v55 }
0x18a1   :  { %v4190_v20 = vpop.eup %4189 }
0x18a2   :  { %1805 = vrot.lane.b32.xlu1 %v4190_v20, %s4572_s12  ;;  %v1815_v20 = vsel %vm6310_vm4, %v1802_v55, %v1733_v37 }
0x1914   :  { %v1806_v59 = vpop.permute.xlu1 %1805 }
0x1915   :  { %v1808_v31 = vmul.f32 %v1806_v59, %v1789_v45 }
0x1917   :  { %v5470_v11 = vsel %vm6310_vm4, %v1808_v31, %v5444_v57 }
0x1918   :  { %1820 = vrot.lane.b32.xlu1 %v5470_v11, %s4574_s5  ;;  %1817 = vrot.lane.b32.xlu0 %v5470_v11, %s4575_s27 }
0x198a   :  { %v1821_v44 = vpop.permute.xlu1 %1820  ;;  %v1818_v29 = vpop.permute.xlu0 %1817 }
0x198b   :  { %v1823_v12 = vsel %vm1096_vm12, %v1818_v29, %v1821_v44 }
0x198c   :  { %v1824_v43 = vsel %vm5149_vm14, %v1823_v12, 0.0 }
0x198d   :  { %3930 = vmatmul.msk.f32.vlgmr.msra.gmra.mxu2 %vm1021_vm15, %v1824_v43 }
0x1a10   :  { %v1848_v47 = vpop.f32.mrf.mxu2 }
0x1a11   :  { %v1849_v48 = vadd.f32 %v1848_v47, %v5090_v41 }
0x1a13   :  { %4191 = vtanh.f32 %v1849_v48  ;;  %v3931_v36 = vmul.f32 -1.442695, %v1849_v48 }
0x1a15   :  { %4193 = vpow2.f32 %v3931_v36 }
0x1a19   :  { %v4192_v53 = vpop.eup %4191 }
0x1a1a   :  { %1873 = vrot.lane.b32.xlu2 %v4192_v53, %s4572_s12 }
0x1a1b   :  { %v4194_v39 = vpop.eup %4193 }
0x1a1c   :  { %v1854_v61 = vadd.f32 1.0, %v4194_v39  ;;  %v994_v39 = vsel %vm952_vm3, 11, %v4570_v8 }
0x1a1e   :  { %4195 = vrcp.f32 %v1854_v61  ;;  %v1866_v19 = vand.u32 2147483648, %v1854_v61  ;;  %vm1860_vm6 = vweird.f32 %v1854_v61  ;;  %v1864_v18 = vand.u32 2147483647, %v1854_v61 }
0x1a20   :  { %v1867_v45 = vor.u32 1.1754944e-38, %v1866_v19  ;;  %vm1865_vm1 = vcmp.eq.f32.partialorder %v1864_v18, 8.507059e+37 }
0x1a22   :  { %1890 = vperm.xlu2 %4029, %v1888_v32  }
0x1a24   :  { %v4196_v5 = vpop.eup %4195 }
0x1a25   :  { %v1856_v41 = vmul.f32 %v4196_v5, %v1854_v61  ;;  %vm1861_vm13 = vweird.f32 %v4196_v5 }
0x1a26   :  { %vm1862_vm0 = vmor %vm1860_vm6, %vm1861_vm13 }
0x1a27   :  { %v1857_v15 = vsub.f32 1.0, %v1856_v41 }
0x1a29   :  { %v1858_v56 = vmul.f32 %v4196_v5, %v1857_v15 }
0x1a2b   :  { %v1859_v51 = vadd.f32 %v4196_v5, %v1858_v56 }
0x1a2d   :  { %v1863_v35 = vsel %vm1862_vm0, %v4196_v5, %v1859_v51 }
0x1a2e   :  { %v1868_v23 = vsel %vm1865_vm1, %v1867_v45, %v1863_v35  ;;  %vm995_vm1 = vcmp.lt.s32.totalorder %v994_v39, %v5125_v49 }
0x1a2f   :  { %v1871_v59 = vmul.f32 %v1868_v23, %v1815_v20  ;;  %v1969_v61 = vsel %vm995_vm1, 1, %v4567_v2 }
0x1a74   :  { %v1874_v46 = vpop.permute.xlu2 %1873 }
0x1a75   :  { %v1876_v52 = vmul.f32 %v1874_v46, %v1868_v23 }
0x1a77   :  { %1878 = vrot.lane.b32.xlu0 %v1876_v52, %s4572_s12 }
0x1a7c   :  { %v5490_v12 = vpop.permute.xlu2 %1890 }
0x1a7d   :  { %vm6311_vm11 = vcmp.eq.s32.totalorder %v5490_v12, 1 }
0x1ae9   :  { %v1879_v31 = vpop.permute.xlu0 %1878 }
0x1aea   :  { %v1881_v44 = vadd.f32 %v1879_v31, %v1871_v59 }
0x1aec   :  { %4197 = vtanh.f32 %v1881_v44  ;;  %v1894_v31 = vsel %vm6311_vm11, %v1881_v44, %v1815_v20 }
0x1af2   :  { %v4198_v29 = vpop.eup %4197 }
0x1af3   :  { %1884 = vrot.lane.b32.xlu1 %v4198_v29, %s4572_s12 }
0x1b65   :  { %v1885_v43 = vpop.permute.xlu1 %1884 }
0x1b66   :  { %v1887_v47 = vmul.f32 %v1885_v43, %v1868_v23 }
0x1b68   :  { %v5496_v48 = vsel %vm6311_vm11, %v1887_v47, %v5470_v11 }
0x1b69   :  { %1899 = vrot.lane.b32.xlu1 %v5496_v48, %s4574_s5  ;;  %1896 = vrot.lane.b32.xlu0 %v5496_v48, %s4575_s27 }
0x1bdb   :  { %v1900_v37 = vpop.permute.xlu1 %1899  ;;  %v1897_v55 = vpop.permute.xlu0 %1896 }
0x1bdc   :  { %v1902_v53 = vsel %vm1096_vm12, %v1897_v55, %v1900_v37 }
0x1bdd   :  { %v1903_v7 = vsel %vm5149_vm14, %v1902_v53, 0.0 }
0x1bde   :  { %3932 = vmatmul.msk.f32.vlgmr.msra.gmra.mxu3 %vm1021_vm15, %v1903_v7 }
0x1c61   :  { %v1929_v40 = vpop.f32.mrf.mxu3 }
0x1c62   :  { %v1930_v32 = vadd.f32 %v1929_v40, %v5093_v42 }
0x1c64   :  { %4199 = vtanh.f32 %v1930_v32  ;;  %v3933_v5 = vmul.f32 -1.442695, %v1930_v32 }
0x1c66   :  { %4201 = vpow2.f32 %v3933_v5 }
0x1c6a   :  { %v4200_v36 = vpop.eup %4199 }
0x1c6b   :  { %1954 = vrot.lane.b32.xlu2 %v4200_v36, %s4572_s12 }
0x1c6c   :  { %v4202_v41 = vpop.eup %4201 }
0x1c6d   :  { %v1935_v15 = vadd.f32 1.0, %v4202_v41  ;;  %v997_v41 = vsel %vm952_vm3, 12, %v4569_v6 }
0x1c6f   :  { %4203 = vrcp.f32 %v1935_v15  ;;  %v1947_v35 = vand.u32 2147483648, %v1935_v15  ;;  %vm1941_vm6 = vweird.f32 %v1935_v15  ;;  %v1945_v8 = vand.u32 2147483647, %v1935_v15 }
0x1c71   :  { %v1948_v46 = vor.u32 1.1754944e-38, %v1947_v35  ;;  %vm1946_vm4 = vcmp.eq.f32.partialorder %v1945_v8, 8.507059e+37 }
0x1c73   :  { %1971 = vperm.xlu2 %4029, %v1969_v61  }
0x1c75   :  { %v4204_v56 = vpop.eup %4203 }
0x1c76   :  { %v1937_v42 = vmul.f32 %v4204_v56, %v1935_v15  ;;  %vm1942_vm13 = vweird.f32 %v4204_v56 }
0x1c77   :  { %vm1943_vm0 = vmor %vm1941_vm6, %vm1942_vm13 }
0x1c78   :  { %v1938_v51 = vsub.f32 1.0, %v1937_v42 }
0x1c7a   :  { %v1939_v19 = vmul.f32 %v4204_v56, %v1938_v51 }
0x1c7c   :  { %v1940_v18 = vadd.f32 %v4204_v56, %v1939_v19 }
0x1c7e   :  { %v1944_v45 = vsel %vm1943_vm0, %v4204_v56, %v1940_v18 }
0x1c7f   :  { %v1949_v52 = vsel %vm1946_vm4, %v1948_v46, %v1944_v45  ;;  %vm998_vm4 = vcmp.lt.s32.totalorder %v997_v41, %v5125_v49 }
0x1c80   :  { %v1952_v29 = vmul.f32 %v1949_v52, %v1894_v31  ;;  %v2049_v15 = vsel %vm998_vm4, 1, %v4567_v2 }
0x1cc5   :  { %v1955_v23 = vpop.permute.xlu2 %1954 }
0x1cc6   :  { %v1957_v59 = vmul.f32 %v1955_v23, %v1949_v52 }
0x1cc8   :  { %1959 = vrot.lane.b32.xlu0 %v1957_v59, %s4572_s12 }
0x1ccd   :  { %v5517_v55 = vpop.permute.xlu2 %1971 }
0x1cce   :  { %vm6312_vm1 = vcmp.eq.s32.totalorder %v5517_v55, 1 }
0x1d3a   :  { %v1960_v43 = vpop.permute.xlu0 %1959 }
0x1d3b   :  { %v1962_v47 = vadd.f32 %v1960_v43, %v1952_v29 }
0x1d3d   :  { %4205 = vtanh.f32 %v1962_v47  ;;  %v1975_v43 = vsel %vm6312_vm1, %v1962_v47, %v1894_v31 }
0x1d43   :  { %v4206_v37 = vpop.eup %4205 }
0x1d44   :  { %1965 = vrot.lane.b32.xlu1 %v4206_v37, %s4572_s12 }
0x1db6   :  { %v1966_v53 = vpop.permute.xlu1 %1965 }
0x1db7   :  { %v1968_v7 = vmul.f32 %v1966_v53, %v1949_v52 }
0x1db9   :  { %v5523_v40 = vsel %vm6312_vm1, %v1968_v7, %v5496_v48 }
0x1dba   :  { %1980 = vrot.lane.b32.xlu1 %v5523_v40, %s4574_s5  ;;  %1977 = vrot.lane.b32.xlu0 %v5523_v40, %s4575_s27 }
0x1e2c   :  { %v1981_v20 = vpop.permute.xlu1 %1980  ;;  %v1978_v44 = vpop.permute.xlu0 %1977 }
0x1e2d   :  { %v1983_v32 = vsel %vm1096_vm12, %v1978_v44, %v1981_v20 }
0x1e2e   :  { %v1984_v36 = vsel %vm5149_vm14, %v1983_v32, 0.0 }
0x1e2f   :  { %3934 = vmatmul.msk.f32.vlgmr.msrb.gmra.mxu0 %vm1021_vm15, %v1984_v36 }
0x1eac   :  { %v2009_v39 = vpop.f32.mrf.mxu0 }
0x1ead   :  { %v2010_v61 = vadd.f32 %v2009_v39, %v5099_v21 }
0x1eaf   :  { %4207 = vtanh.f32 %v2010_v61  ;;  %v3935_v56 = vmul.f32 -1.442695, %v2010_v61 }
0x1eb1   :  { %4209 = vpow2.f32 %v3935_v56 }
0x1eb5   :  { %v4208_v5 = vpop.eup %4207 }
0x1eb6   :  { %2034 = vrot.lane.b32.xlu2 %v4208_v5, %s4572_s12 }
0x1eb7   :  { %v4210_v42 = vpop.eup %4209 }
0x1eb8   :  { %v2015_v51 = vadd.f32 1.0, %v4210_v42  ;;  %v1000_v42 = vsel %vm952_vm3, 13, %v4568_v3 }
0x1eba   :  { %4211 = vrcp.f32 %v2015_v51  ;;  %v2027_v45 = vand.u32 2147483648, %v2015_v51  ;;  %vm2021_vm6 = vweird.f32 %v2015_v51  ;;  %v2025_v6 = vand.u32 2147483647, %v2015_v51 }
0x1ebc   :  { %v2028_v23 = vor.u32 1.1754944e-38, %v2027_v45  ;;  %vm2026_vm11 = vcmp.eq.f32.partialorder %v2025_v6, 8.507059e+37 }
0x1ebe   :  { %2051 = vperm.xlu2 %4029, %v2049_v15  }
0x1ec0   :  { %v4212_v19 = vpop.eup %4211 }
0x1ec1   :  { %v2017_v21 = vmul.f32 %v4212_v19, %v2015_v51  ;;  %vm2022_vm13 = vweird.f32 %v4212_v19 }
0x1ec2   :  { %vm2023_vm0 = vmor %vm2021_vm6, %vm2022_vm13 }
0x1ec3   :  { %v2018_v18 = vsub.f32 1.0, %v2017_v21 }
0x1ec5   :  { %v2019_v35 = vmul.f32 %v4212_v19, %v2018_v18 }
0x1ec7   :  { %v2020_v8 = vadd.f32 %v4212_v19, %v2019_v35 }
0x1ec9   :  { %v2024_v46 = vsel %vm2023_vm0, %v4212_v19, %v2020_v8 }
0x1eca   :  { %v2029_v59 = vsel %vm2026_vm11, %v2028_v23, %v2024_v46  ;;  %vm1001_vm11 = vcmp.lt.s32.totalorder %v1000_v42, %v5125_v49 }
0x1ecb   :  { %v2032_v37 = vmul.f32 %v2029_v59, %v1975_v43  ;;  %v2131_v51 = vsel %vm1001_vm11, 1, %v4567_v2 }
0x1f10   :  { %v2035_v52 = vpop.permute.xlu2 %2034 }
0x1f11   :  { %v2037_v29 = vmul.f32 %v2035_v52, %v2029_v59 }
0x1f13   :  { %2039 = vrot.lane.b32.xlu0 %v2037_v29, %s4572_s12 }
0x1f18   :  { %v5544_v44 = vpop.permute.xlu2 %2051 }
0x1f19   :  { %vm6313_vm4 = vcmp.eq.s32.totalorder %v5544_v44, 1 }
0x1f85   :  { %v2040_v53 = vpop.permute.xlu0 %2039 }
0x1f86   :  { %v2042_v7 = vadd.f32 %v2040_v53, %v2032_v37 }
0x1f88   :  { %4213 = vtanh.f32 %v2042_v7  ;;  %v2055_v53 = vsel %vm6313_vm4, %v2042_v7, %v1975_v43 }
0x1f8e   :  { %v4214_v20 = vpop.eup %4213 }
0x1f8f   :  { %2045 = vrot.lane.b32.xlu1 %v4214_v20, %s4572_s12 }
0x2001   :  { %v2046_v32 = vpop.permute.xlu1 %2045 }
0x2002   :  { %v2048_v36 = vmul.f32 %v2046_v32, %v2029_v59 }
0x2004   :  { %v5550_v39 = vsel %vm6313_vm4, %v2048_v36, %v5523_v40 }
0x2005   :  { %2060 = vrot.lane.b32.xlu1 %v5550_v39, %s4574_s5  ;;  %2057 = vrot.lane.b32.xlu0 %v5550_v39, %s4575_s27 }
0x2077   :  { %v2061_v31 = vpop.permute.xlu1 %2060  ;;  %v2058_v47 = vpop.permute.xlu0 %2057 }
0x2078   :  { %v2063_v61 = vsel %vm1096_vm12, %v2058_v47, %v2061_v31 }
0x2079   :  { %v2064_v5 = vsel %vm5149_vm14, %v2063_v61, 0.0 }
0x207a   :  { %3936 = vmatmul.msk.f32.vlgmr.msrb.gmra.mxu1 %vm1021_vm15, %v2064_v5 }
0x20f7   :  { %v2091_v41 = vpop.f32.mrf.mxu1 }
0x20f8   :  { %v2092_v15 = vadd.f32 %v2091_v41, %v5109_v9 }
0x20fa   :  { %4215 = vtanh.f32 %v2092_v15  ;;  %v3937_v19 = vmul.f32 -1.442695, %v2092_v15 }
0x20fc   :  { %4217 = vpow2.f32 %v3937_v19 }
0x2100   :  { %v4216_v56 = vpop.eup %4215 }
0x2101   :  { %2116 = vrot.lane.b32.xlu2 %v4216_v56, %s4572_s12 }
0x2102   :  { %v4218_v21 = vpop.eup %4217 }
0x2103   :  { %v2097_v18 = vadd.f32 1.0, %v4218_v21  ;;  %v1003_v21 = vsel %vm952_vm3, 14, %v4566_v1 }
0x2105   :  { %4219 = vrcp.f32 %v2097_v18  ;;  %v2109_v46 = vand.u32 2147483648, %v2097_v18  ;;  %vm2103_vm6 = vweird.f32 %v2097_v18  ;;  %v2107_v3 = vand.u32 2147483647, %v2097_v18 }
0x2107   :  { %v2110_v52 = vor.u32 1.1754944e-38, %v2109_v46  ;;  %vm2108_vm1 = vcmp.eq.f32.partialorder %v2107_v3, 8.507059e+37 }
0x2109   :  { %2133 = vperm.xlu2 %4029, %v2131_v51  }
0x210b   :  { %v4220_v35 = vpop.eup %4219 }
0x210c   :  { %v2099_v9 = vmul.f32 %v4220_v35, %v2097_v18  ;;  %vm2104_vm13 = vweird.f32 %v4220_v35 }
0x210d   :  { %vm2105_vm0 = vmor %vm2103_vm6, %vm2104_vm13 }
0x210e   :  { %v2100_v8 = vsub.f32 1.0, %v2099_v9 }
0x2110   :  { %v2101_v45 = vmul.f32 %v4220_v35, %v2100_v8 }
0x2112   :  { %v2102_v6 = vadd.f32 %v4220_v35, %v2101_v45 }
0x2114   :  { %v2106_v23 = vsel %vm2105_vm0, %v4220_v35, %v2102_v6 }
0x2115   :  { %v2111_v29 = vsel %vm2108_vm1, %v2110_v52, %v2106_v23  ;;  %vm1004_vm1 = vcmp.lt.s32.totalorder %v1003_v21, %v5125_v49 }
0x2116   :  { %v2114_v20 = vmul.f32 %v2111_v29, %v2055_v53  ;;  %v2210_v18 = vsel %vm1004_vm1, 1, %v4567_v2 }
0x215b   :  { %v2117_v59 = vpop.permute.xlu2 %2116 }
0x215c   :  { %v2119_v37 = vmul.f32 %v2117_v59, %v2111_v29 }
0x215e   :  { %2121 = vrot.lane.b32.xlu0 %v2119_v37, %s4572_s12 }
0x2163   :  { %v5571_v47 = vpop.permute.xlu2 %2133 }
0x2164   :  { %vm2135_vm11 = vcmp.eq.s32.totalorder %v5571_v47, 1 }
0x21d0   :  { %v2122_v32 = vpop.permute.xlu0 %2121 }
0x21d1   :  { %v2124_v36 = vadd.f32 %v2122_v32, %v2114_v20 }
0x21d3   :  { %4221 = vtanh.f32 %v2124_v36  ;;  %v5597_v32 = vsel %vm2135_vm11, %v2124_v36, %v2055_v53 }
0x21d9   :  { %v4222_v31 = vpop.eup %4221 }
0x21da   :  { %2127 = vrot.lane.b32.xlu1 %v4222_v31, %s4572_s12 }
0x224c   :  { %v2128_v61 = vpop.permute.xlu1 %2127 }
0x224d   :  { %v2130_v5 = vmul.f32 %v2128_v61, %v2111_v29 }
0x224f   :  { %v5577_v41 = vsel %vm2135_vm11, %v2130_v5, %v5550_v39 }
0x2250   :  { %2142 = vrot.lane.b32.xlu1 %v5577_v41, %s4574_s5  ;;  %2139 = vrot.lane.b32.xlu0 %v5577_v41, %s4575_s27 }
0x22c2   :  { %v2143_v43 = vpop.permute.xlu1 %2142  ;;  %v2140_v7 = vpop.permute.xlu0 %2139 }
0x22c3   :  { %v2145_v15 = vsel %vm1096_vm12, %v2140_v7, %v2143_v43 }
0x22c4   :  { %v2146_v56 = vsel %vm5149_vm14, %v2145_v15, 0.0 }
0x22c5   :  { %3938 = vmatmul.msk.f32.vlgmr.msrb.gmra.mxu2 %vm1021_vm15, %v2146_v56 }
0x2348   :  { %v2170_v42 = vpop.f32.mrf.mxu2 }
0x2349   :  { %v2171_v51 = vadd.f32 %v2170_v42, %v5112_v4 }
0x234b   :  { %4223 = vtanh.f32 %v2171_v51  ;;  %v3939_v35 = vmul.f32 -1.442695, %v2171_v51 }
0x234d   :  { %4225 = vpow2.f32 %v3939_v35 }
0x2351   :  { %v4224_v19 = vpop.eup %4223 }
0x2352   :  { %2195 = vrot.lane.b32.xlu2 %v4224_v19, %s4572_s12 }
0x2353   :  { %v4226_v9 = vpop.eup %4225 }
0x2354   :  { %v2176_v8 = vadd.f32 1.0, %v4226_v9  ;;  %v1006_v9 = vsel %vm952_vm3, 15, %v4567_v2 }
0x2355   :  { %vm1007_vm1 = vcmp.lt.s32.totalorder %v1006_v9, %v5125_v49 }
0x2356   :  { %4227 = vrcp.f32 %v2176_v8  ;;  %v2188_v23 = vand.u32 2147483648, %v2176_v8  ;;  %vm2182_vm6 = vweird.f32 %v2176_v8  ;;  %v2186_v1 = vand.u32 2147483647, %v2176_v8 }
0x2358   :  { %v2189_v59 = vor.u32 1.1754944e-38, %v2188_v23  ;;  %vm2187_vm4 = vcmp.eq.f32.partialorder %v2186_v1, 8.507059e+37 }
0x235a   :  { %2212 = vperm.xlu2 %4029, %v2210_v18  }
0x235c   :  { %v4228_v45 = vpop.eup %4227 }
0x235d   :  { %v2178_v4 = vmul.f32 %v4228_v45, %v2176_v8  ;;  %vm2183_vm13 = vweird.f32 %v4228_v45  ;;  %v2291_v8 = vsel %vm1007_vm1, 1, %v4567_v2 }
0x235e   :  { %vm2184_vm0 = vmor %vm2182_vm6, %vm2183_vm13 }
0x235f   :  { %v2179_v6 = vsub.f32 1.0, %v2178_v4  ;;  %v2305_v4 = vrot.slane %v5388_v54, 4 }
0x2361   :  { %v2180_v46 = vmul.f32 %v4228_v45, %v2179_v6  ;;  %v2307_v6 = vrot.slane %v5418_v22, 2 }
0x2363   :  { %v2181_v3 = vadd.f32 %v4228_v45, %v2180_v46  ;;  %v2348_v49 = vsel %vm550_vm9, %v2307_v6, %v5388_v54 }
0x2365   :  { %v2185_v52 = vsel %vm2184_vm0, %v4228_v45, %v2181_v3  ;;  %v2303_v45 = vrot.slane %v5345_v58, 6  ;;  %v2338_v58 = vrot.slane %v5287_v30, 4 }
0x2366   :  { %v2190_v37 = vsel %vm2187_vm4, %v2189_v59, %v2185_v52 }
0x2367   :  { %v2193_v31 = vmul.f32 %v2190_v37, %v5597_v32  ;;  %v2349_v3 = vsel %vm390_vm5, %v2348_v49, %v2303_v45 }
0x2368   :  { %v2350_v23 = vsel %vm409_vm8, %v2349_v3, %v2338_v58 }
0x23ac   :  { %v2196_v29 = vpop.permute.xlu2 %2195 }
0x23ad   :  { %v2198_v20 = vmul.f32 %v2196_v29, %v2190_v37 }
0x23af   :  { %2200 = vrot.lane.b32.xlu0 %v2198_v20, %s4572_s12 }
0x23b4   :  { %v5604_v7 = vpop.permute.xlu2 %2212 }
0x23b5   :  { %vm2214_vm4 = vcmp.eq.s32.totalorder %v5604_v7, 1 }
0x2421   :  { %v2201_v61 = vpop.permute.xlu0 %2200 }
0x2422   :  { %v5600_v5 = vadd.f32 %v2201_v61, %v2193_v31 }
0x2424   :  { %4229 = vtanh.f32 %v5600_v5 }
0x242a   :  { %v4230_v43 = vpop.eup %4229 }
0x242b   :  { %2206 = vrot.lane.b32.xlu1 %v4230_v43, %s4572_s12 }
0x249d   :  { %v2207_v15 = vpop.permute.xlu1 %2206 }
0x249e   :  { %v2209_v56 = vmul.f32 %v2207_v15, %v2190_v37 }
0x24a0   :  { %v5610_v53 = vsel %vm2214_vm4, %v2209_v56, %v5577_v41 }
0x24a1   :  { %2221 = vrot.lane.b32.xlu1 %v5610_v53, %s4574_s5  ;;  %2218 = vrot.lane.b32.xlu0 %v5610_v53, %s4575_s27 }
0x2513   :  { %v2222_v36 = vpop.permute.xlu1 %2221  ;;  %v2219_v42 = vpop.permute.xlu0 %2218 }
0x2514   :  { %v2224_v51 = vsel %vm1096_vm12, %v2219_v42, %v2222_v36  ;;  %v2297_v42 = vrot.slane %v5182_v13, 6  ;;  %v5718_v13 = vld [vmem:[#allocation11 + $0x20] sm:$0xff] }
0x2515   :  { %v2225_v19 = vsel %vm5149_vm14, %v2224_v51, 0.0  ;;  %v2299_v51 = vrot.slane %v5216_v25, 4 }
0x2516   :  { %3940 = vmatmul.msk.f32.vlgmr.msrb.gmra.mxu3 %vm1021_vm15, %v2225_v19  ;;  %v2301_v19 = vrot.slane %v5250_v33, 2  ;;  %v5706_v33 = vld [vmem:[#allocation11 + $0x38] sm:$0xff] }
0x2517   :  { %2502 = vmatpush.msra.mxu2 %v5706_v33  ;;  %2589 = vmatpush.msra.mxu3 %v5706_v33 }
0x2599   :  { %v2251_v21 = vpop.f32.mrf.mxu3 }
0x259a   :  { %v2252_v18 = vadd.f32 %v2251_v21, %v5115_v10  ;;  %v2325_v10 = vsel %vm550_vm9, %v5287_v30, %v2303_v45  ;;  %v2313_v21 = vrot.slane %v5523_v40, 2  ;;  %v2309_v45 = vrot.slane %v5470_v11, 6  ;;  %v2404_v11 = vld [vmem:[#allocation10 + $0x70] sm:$0xff] }
0x259b   :  { %v2326_v46 = vsel %vm390_vm5, %v2325_v10, %v2305_v4  ;;  %2432 = vmatpush.msra.mxu0 %v2404_v11  ;;  %v2392_v40 = vld [vmem:[#allocation10 + $0x10] sm:$0xff] }
0x259c   :  { %4231 = vtanh.f32 %v2252_v18  ;;  %v2327_v34 = vsel %vm409_vm8, %v2326_v46, %v2307_v6  ;;  %v3941_v22 = vmul.f32 -1.442695, %v2252_v18  ;;  %v2322_v18 = vsel %vm550_vm9, %v5141_v63, %v2297_v42 }
0x259d   :  { %v2336_v6 = vrot.slane %v5444_v57, 4  ;;  %v2216_v46 = vsel %vm2214_vm4, %v5600_v5, %v5597_v32  ;;  %v2396_v5 = vld [vmem:[#allocation10 + $0x30] sm:$0xff] }
0x259e   :  { %4233 = vpow2.f32 %v3941_v22  ;;  %v2402_v22 = vld [vmem:[#allocation10 + $0x60] sm:$0xff] }
0x259f   :  { %2433 = vmatpush.msra.mxu0 %v2402_v22 }
0x25a2   :  { %v4232_v35 = vpop.eup %4231 }
0x25a3   :  { %2276 = vrot.lane.b32.xlu2 %v4232_v35, %s4572_s12  ;;  %v2323_v35 = vsel %vm390_vm5, %v2322_v18, %v2299_v51 }
0x25a4   :  { %v4234_v1 = vpop.eup %4233  ;;  %v2324_v9 = vsel %vm409_vm8, %v2323_v35, %v2301_v19  ;;  %v2334_v35 = vrot.slane %v5550_v39, 4 }
0x25a5   :  { %v2257_v52 = vadd.f32 1.0, %v4234_v1  ;;  %v2403_v1 = vld [vmem:[#allocation10 + $0x68] sm:$0xff] }
0x25a7   :  { %4235 = vrcp.f32 %v2257_v52  ;;  %v2269_v54 = vand.u32 2147483648, %v2257_v52  ;;  %vm2263_vm13 = vweird.f32 %v2257_v52  ;;  %v2267_v61 = vand.u32 2147483647, %v2257_v52 }
0x25a9   :  { %v2270_v43 = vor.u32 1.1754944e-38, %v2269_v54  ;;  %vm2268_vm0 = vcmp.eq.f32.partialorder %v2267_v61, 8.507059e+37 }
0x25ab   :  { %2293 = vperm.xlu2 %4029, %v2291_v8   ;;  %v2345_v8 = vsel %vm550_vm9, %v2313_v21, %v5496_v48 }
0x25ac   :  { %v2346_v4 = vsel %vm390_vm5, %v2345_v8, %v2309_v45 }
0x25ad   :  { %v4236_v59 = vpop.eup %4235  ;;  %v2347_v10 = vsel %vm409_vm8, %v2346_v4, %v2336_v6  ;;  %v2311_v6 = vrot.slane %v5496_v48, 4 }
0x25ae   :  { %v2259_v29 = vmul.f32 %v4236_v59, %v2257_v52  ;;  %vm2264_vm3 = vweird.f32 %v4236_v59  ;;  %v2400_v52 = vld [vmem:[#allocation10 + $0x50] sm:$0xff] }
0x25af   :  { %vm2265_vm6 = vmor %vm2263_vm13, %vm2264_vm3  ;;  %2434 = vmatpush.msra.mxu0 %v2400_v52 }
0x25b0   :  { %v2260_v37 = vsub.f32 1.0, %v2259_v29  ;;  %v2398_v29 = vld [vmem:[#allocation10 + $0x40] sm:$0xff] }
0x25b1   :  { %2435 = vmatpush.msra.mxu0 %v2398_v29 }
0x25b2   :  { %v2261_v20 = vmul.f32 %v4236_v59, %v2260_v37  ;;  %v2399_v37 = vld [vmem:[#allocation10 + $0x48] sm:$0xff] }
0x25b3   :  { %2360 = vrot.lane.b32.xlu2 %v2327_v34, %s4575_s27  ;;  %2436 = vmatpush.msra.mxu0 %v2396_v5 }
0x25b4   :  { %v2262_v31 = vadd.f32 %v4236_v59, %v2261_v20  ;;  %v2397_v20 = vld [vmem:[#allocation10 + $0x38] sm:$0xff] }
0x25b6   :  { %v2266_v30 = vsel %vm2265_vm6, %v4236_v59, %v2262_v31  ;;  %v2401_v59 = vld [vmem:[#allocation10 + $0x58] sm:$0xff]  ;;  %v2315_v31 = vrot.slane %v5577_v41, 6 }
0x25b7   :  { %v2271_v56 = vsel %vm2268_vm0, %v2270_v43, %v2266_v30  ;;  %v2317_v30 = vrot.slane %v5610_v53, 4  ;;  %v2394_v43 = vld [vmem:[#allocation10 + $0x20] sm:$0xff] }
0x25b8   :  { %v2274_v34 = vmul.f32 %v2271_v56, %v2216_v46  ;;  %v2331_v41 = vsel %vm550_vm9, %v5550_v39, %v2315_v31  ;;  %2437 = vmatpush.msra.mxu0 %v2394_v43 }
0x25ba   :  { %2438 = vmatpush.msra.mxu0 %v2392_v40 }
0x25bb   :  { %2378 = vrot.lane.b32.xlu2 %v2350_v23, %s4574_s5  ;;  %v2405_v23 = vld [vmem:[#allocation10 + $0x78] sm:$0xff] }
0x25bc   :  { %2461 = vmatpush.msra.mxu1 %v2405_v23 }
0x25be   :  { %2462 = vmatpush.msra.mxu1 %v2403_v1 }
0x25c0   :  { %2463 = vmatpush.msra.mxu1 %v2401_v59 }
0x25c2   :  { %2464 = vmatpush.msra.mxu1 %v2399_v37 }
0x25c4   :  { %2465 = vmatpush.msra.mxu1 %v2397_v20 }
0x25fd   :  { %v2277_v15 = vpop.permute.xlu2 %2276 }
0x25fe   :  { %v2279_v36 = vmul.f32 %v2277_v15, %v2271_v56  ;;  %v2395_v15 = vld [vmem:[#allocation10 + $0x28] sm:$0xff] }
0x25ff   :  { %2466 = vmatpush.msra.mxu1 %v2395_v15 }
0x2600   :  { %2281 = vrot.lane.b32.xlu0 %v2279_v36, %s4572_s12 }
0x2605   :  { %v5669_v32 = vpop.permute.xlu2 %2293 }
0x2606   :  { %vm2295_vm1 = vcmp.eq.s32.totalorder %v5669_v32, 1 }
0x2608   :  { %2358 = vrot.lane.b32.xlu0 %v2324_v9, %s4575_s27 }
0x260d   :  { %v2361_v22 = vpop.permute.xlu2 %2360 }
0x2610   :  { %2376 = vrot.lane.b32.xlu0 %v2347_v10, %s4574_s5  ;;  %v2328_v10 = vsel %vm550_vm9, %v5444_v57, %v2309_v45  ;;  %v2393_v45 = vld [vmem:[#allocation10 + $0x18] sm:$0xff] }
0x2611   :  { %v2329_v46 = vsel %vm390_vm5, %v2328_v10, %v2311_v6  ;;  %2467 = vmatpush.msra.mxu1 %v2393_v45 }
0x2612   :  { %v2330_v39 = vsel %vm409_vm8, %v2329_v46, %v2313_v21  ;;  %v2390_v21 = vld [vmem:[#allocation10] sm:$0xff] }
0x2613   :  { %2439 = vmatpush.msra.mxu0 %v2390_v21 }
0x2615   :  { %2844 = vmatpush.msrb.mxu0 %v5706_v33  ;;  %v2379_v29 = vpop.permute.xlu2 %2378 }
0x2672   :  { %v2282_v49 = vpop.permute.xlu0 %2281 }
0x2673   :  { %v2284_v3 = vadd.f32 %v2282_v49, %v2274_v34  ;;  %v2340_v34 = vrot.slane %v5141_v63, 4  ;;  %v2391_v49 = vld [vmem:[#allocation10 + $0x8] sm:$0xff] }
0x2674   :  { %2468 = vmatpush.msra.mxu1 %v2391_v49  ;;  %v5712_v63 = vld [vmem:[#allocation11 + $0x28] sm:$0xff] }
0x2675   :  { %4237 = vtanh.f32 %v2284_v3  ;;  %v5736_v3 = vld [vmem:[#allocation11 + $0x8] sm:$0xff] }
0x2676   :  { %2931 = vmatpush.msrb.mxu1 %v5706_v33 }
0x267a   :  { %v2359_v11 = vpop.permute.xlu0 %2358 }
0x267b   :  { %v4238_v58 = vpop.eup %4237 }
0x267c   :  { %2287 = vrot.lane.b32.xlu1 %v4238_v58, %s4572_s12  ;;  %v5742_v58 = vld [vmem:[#allocation11] sm:$0xff] }
0x2682   :  { %v2377_v1 = vpop.permute.xlu0 %2376 }
0x2683   :  { %v2387_v52 = vsel %vm1096_vm12, %v2361_v22, %v2377_v1 }
0x26ee   :  { %v2288_v54 = vpop.permute.xlu1 %2287 }
0x26ef   :  { %v2290_v61 = vmul.f32 %v2288_v54, %v2271_v56  ;;  %v2332_v56 = vsel %vm390_vm5, %v2331_v41, %v2317_v30  ;;  %v2406_v54 = vld [vmem:[%s6298_s15] sm:$0x3] }
0x26f1   :  { %v2296_v36 = vsel %vm2295_vm1, %v2290_v61, %v5610_v53  ;;  %v2409_v61 = vperm.slane %v2406_v54, 1 }
0x26f2   :  { %v2320_v51 = vrot.slane %v2296_v36, 2 }
0x26f4   :  { %v2333_v18 = vsel %vm409_vm8, %v2332_v56, %v2320_v51  ;;  %v2342_v9 = vsel %vm550_vm9, %v2320_v51, %v5610_v53  ;;  %v2351_v53 = vsel %vm550_vm9, %v2301_v19, %v5216_v25  ;;  %v5708_v25 = vld [vmem:[#allocation11 + $0x30] sm:$0xff]  ;;  %v2408_v56 = vperm.slane %v2406_v54, 0 }
0x26f5   :  { %2364 = vrot.lane.b32.xlu0 %v2333_v18, %s4575_s27  ;;  %v2343_v8 = vsel %vm390_vm5, %v2342_v9, %v2315_v31  ;;  %v2352_v48 = vsel %vm390_vm5, %v2351_v53, %v2297_v42  ;;  %2503 = vmatpush.msra.mxu2 %v5708_v25  ;;  %v5728_v42 = vld [vmem:[#allocation11 + $0x18] sm:$0xff]  ;;  %v5730_v19 = vld [vmem:[#allocation11 + $0x10] sm:$0xff] }
0x26f6   :  { %v2344_v4 = vsel %vm409_vm8, %v2343_v8, %v2334_v35  ;;  %v2353_v57 = vsel %vm409_vm8, %v2352_v48, %v2340_v34  ;;  %2590 = vmatpush.msra.mxu3 %v5708_v25  ;;  %2845 = vmatpush.msrb.mxu0 %v5708_v25 }
0x26f7   :  { %2374 = vrot.lane.b32.xlu1 %v2344_v4, %s4574_s5  ;;  %2932 = vmatpush.msrb.mxu1 %v5708_v25 }
0x26f8   :  { %2504 = vmatpush.msra.mxu2 %v5712_v63  ;;  %2591 = vmatpush.msra.mxu3 %v5712_v63 }
0x26f9   :  { %2846 = vmatpush.msrb.mxu0 %v5712_v63  ;;  %2933 = vmatpush.msrb.mxu1 %v5712_v63 }
0x26fa   :  { %2505 = vmatpush.msra.mxu2 %v5718_v13  ;;  %2592 = vmatpush.msra.mxu3 %v5718_v13 }
0x26fb   :  { %2847 = vmatpush.msrb.mxu0 %v5718_v13  ;;  %2934 = vmatpush.msrb.mxu1 %v5718_v13 }
0x26fc   :  { %2506 = vmatpush.msra.mxu2 %v5728_v42  ;;  %2593 = vmatpush.msra.mxu3 %v5728_v42 }
0x26fd   :  { %2848 = vmatpush.msrb.mxu0 %v5728_v42  ;;  %2935 = vmatpush.msrb.mxu1 %v5728_v42 }
0x26fe   :  { %2507 = vmatpush.msra.mxu2 %v5730_v19  ;;  %2594 = vmatpush.msra.mxu3 %v5730_v19 }
0x26ff   :  { %2362 = vrot.lane.b32.xlu1 %v2330_v39, %s4575_s27  ;;  %2849 = vmatpush.msrb.mxu0 %v5730_v19 }
0x2700   :  { %2936 = vmatpush.msrb.mxu1 %v5730_v19  ;;  %2508 = vmatpush.msra.mxu2 %v5736_v3 }
0x2701   :  { %2595 = vmatpush.msra.mxu3 %v5736_v3  ;;  %2850 = vmatpush.msrb.mxu0 %v5736_v3 }
0x2702   :  { %2937 = vmatpush.msrb.mxu1 %v5736_v3  ;;  %2509 = vmatpush.msra.mxu2 %v5742_v58 }
0x2703   :  { %2596 = vmatpush.msra.mxu3 %v5742_v58  ;;  %2510 = vmatmul.f32.vlgmr.msra.gmra.mxu2 %v4571_v26 }
0x2704   :  { %2673 = vmatpush.msrb.mxu2 %v5706_v33  ;;  %2851 = vmatpush.msrb.mxu0 %v5742_v58 }
0x2705   :  { %2759 = vmatpush.msrb.mxu3 %v5706_v33  ;;  %2938 = vmatpush.msrb.mxu1 %v5742_v58 }
0x2706   :  { %2674 = vmatpush.msrb.mxu2 %v5708_v25 }
0x2707   :  { %2380 = vrot.lane.b32.xlu1 %v2353_v57, %s4574_s5  ;;  %2760 = vmatpush.msrb.mxu3 %v5708_v25 }
0x2708   :  { %2675 = vmatpush.msrb.mxu2 %v5712_v63 }
0x2709   :  { %2761 = vmatpush.msrb.mxu3 %v5712_v63 }
0x270a   :  { %2676 = vmatpush.msrb.mxu2 %v5718_v13 }
0x270b   :  { %2762 = vmatpush.msrb.mxu3 %v5718_v13 }
0x270c   :  { %2677 = vmatpush.msrb.mxu2 %v5728_v42 }
0x270d   :  { %2763 = vmatpush.msrb.mxu3 %v5728_v42 }
0x270e   :  { %2678 = vmatpush.msrb.mxu2 %v5730_v19 }
0x270f   :  { %2764 = vmatpush.msrb.mxu3 %v5730_v19 }
0x2710   :  { %2679 = vmatpush.msrb.mxu2 %v5736_v3 }
0x2711   :  { %2765 = vmatpush.msrb.mxu3 %v5736_v3 }
0x2712   :  { %2680 = vmatpush.msrb.mxu2 %v5742_v58 }
0x2713   :  { %2766 = vmatpush.msrb.mxu3 %v5742_v58 }
0x2714   :  { %3015 = vmatpush.msra.mxu2 %v5706_v33 }
0x2716   :  { %3016 = vmatpush.msra.mxu2 %v5708_v25 }
0x2718   :  { %3017 = vmatpush.msra.mxu2 %v5712_v63 }
0x271a   :  { %3018 = vmatpush.msra.mxu2 %v5718_v13 }
0x271c   :  { %3019 = vmatpush.msra.mxu2 %v5728_v42 }
0x271e   :  { %3020 = vmatpush.msra.mxu2 %v5730_v19 }
0x2720   :  { %3021 = vmatpush.msra.mxu2 %v5736_v3 }
0x2722   :  { %3022 = vmatpush.msra.mxu2 %v5742_v58 }
0x2767   :  { %v2365_v20 = vpop.permute.xlu0 %2364 }
0x2769   :  { %v2375_v23 = vpop.permute.xlu1 %2374 }
0x276a   :  { %v2386_v26 = vsel %vm1096_vm12, %v2359_v11, %v2375_v23 }
0x276b   :  { %3942 = vmatmul.msk.f32.vlgmr.msra.gmra.mxu0 %vm1021_vm15, %v2386_v26  ;;  %3946 = vmatmul.msk.f32.vlgmr.msra.gmra.mxu1 %vm1021_vm15, %v2386_v26 }
0x276c   :  { %3186 = vmatpush.msra.mxu0 %v5706_v33  ;;  %3273 = vmatpush.msra.mxu1 %v5706_v33 }
0x276e   :  { %3187 = vmatpush.msra.mxu0 %v5708_v25  ;;  %3274 = vmatpush.msra.mxu1 %v5708_v25 }
0x2770   :  { %3188 = vmatpush.msra.mxu0 %v5712_v63  ;;  %3275 = vmatpush.msra.mxu1 %v5712_v63 }
0x2771   :  { %v2363_v59 = vpop.permute.xlu1 %2362 }
0x2772   :  { %3189 = vmatpush.msra.mxu0 %v5718_v13  ;;  %3276 = vmatpush.msra.mxu1 %v5718_v13  ;;  %v2388_v37 = vsel %vm1096_vm12, %v2363_v59, %v2379_v29 }
0x2773   :  { %3943 = vmatmul.msk.f32.gmra.mxu0 %vm1021_vm15, %v2387_v52  ;;  %3947 = vmatmul.msk.f32.gmra.mxu1 %vm1021_vm15, %v2387_v52 }
0x2774   :  { %3190 = vmatpush.msra.mxu0 %v5728_v42  ;;  %3277 = vmatpush.msra.mxu1 %v5728_v42 }
0x2776   :  { %3191 = vmatpush.msra.mxu0 %v5730_v19  ;;  %3278 = vmatpush.msra.mxu1 %v5730_v19 }
0x2778   :  { %3192 = vmatpush.msra.mxu0 %v5736_v3  ;;  %3279 = vmatpush.msra.mxu1 %v5736_v3 }
0x2779   :  { %v2381_v5 = vpop.permute.xlu1 %2380 }
0x277a   :  { %3193 = vmatpush.msra.mxu0 %v5742_v58  ;;  %3280 = vmatpush.msra.mxu1 %v5742_v58  ;;  %v2389_v31 = vsel %vm1096_vm12, %v2365_v20, %v2381_v5 }
0x277b   :  { %3944 = vmatmul.msk.f32.gmra.mxu0 %vm1021_vm15, %v2388_v37  ;;  %3948 = vmatmul.msk.f32.gmra.mxu1 %vm1021_vm15, %v2388_v37 }
0x2783   :  { %3945 = vmatmul.msk.f32.gmra.mxu0 %vm1021_vm15, %v2389_v31  ;;  %3949 = vmatmul.msk.f32.gmra.mxu1 %vm1021_vm15, %v2389_v31 }
0x27e8   :  { %v2441_v30 = vpop.f32.mrf.mxu0  ;;  %v2470_v43 = vpop.f32.mrf.mxu1 }
0x27e9   :  { %v2471_v15 = vadd.f32 %v2470_v43, %v2409_v61  ;;  %v2442_v26 = vadd.f32 %v2441_v30, %v2408_v56 }
0x27eb   :  { %v2573_v30 = vrot.slane %v2442_v26, 2  ;;  %v2659_v43 = vrot.slane %v2442_v26, 4 }
0x27f0   :  { %v2444_v36 = vpop.f32.mrf.mxu0  ;;  %v2473_v51 = vpop.f32.mrf.mxu1 }
0x27f1   :  { %v2474_v41 = vadd.f32 %v2473_v51, %v2409_v61  ;;  %v2445_v18 = vadd.f32 %v2444_v36, %v2408_v56  ;;  %v2743_v36 = vrot.slane %v2442_v26, 6  ;;  %v3514_v51 = vrot.slane %v2471_v15, 4 }
0x27f3   :  { %v2915_v6 = vrot.slane %v2445_v18, 2  ;;  %v3001_v10 = vrot.slane %v2445_v18, 4  ;;  %v3085_v46 = vrot.slane %v2445_v18, 6  ;;  %v3172_v39 = vrot.slane %v2474_v41, 4 }
0x27f4   :  { %v3259_v53 = vrot.slane %v2474_v41, 2  ;;  %v3429_v48 = vrot.slane %v2474_v41, 6 }
0x27f8   :  { %v2447_v35 = vpop.f32.mrf.mxu0  ;;  %v2476_v9 = vpop.f32.mrf.mxu1 }
0x27f9   :  { %v2448_v8 = vadd.f32 %v2447_v35, %v2408_v56  ;;  %v2477_v4 = vadd.f32 %v2476_v9, %v2409_v61  ;;  %v3771_v35 = vrot.slane %v2471_v15, 6 }
0x27fb   :  { %v2830_v34 = vrot.slane %v2477_v4, 4  ;;  %v2917_v57 = vrot.slane %v2477_v4, 2  ;;  %v5811_v40 = vsel %vm550_vm9, %v3001_v10, %v2477_v4  ;;  %v3087_v45 = vrot.slane %v2477_v4, 6 }
0x27fc   :  { %v5814_v21 = vsel %vm550_vm9, %v2448_v8, %v3172_v39  ;;  %v3257_v49 = vrot.slane %v2448_v8, 2  ;;  %v3343_v11 = vrot.slane %v2448_v8, 4  ;;  %v3427_v23 = vrot.slane %v2448_v8, 6  ;;  %v2511_v8 = vpop.f32.mrf.mxu2 }
0x27fd   :  { %v5817_v22 = vsel %vm550_vm9, %v2445_v18, %v2830_v34  ;;  %v5820_v1 = vsel %vm550_vm9, %v2915_v6, %v2917_v57  ;;  %v5823_v52 = vsel %vm550_vm9, %v3085_v46, %v3087_v45  ;;  %v3601_v18 = vrot.slane %v2471_v15, 2 }
0x27fe   :  { %v5826_v59 = vsel %vm550_vm9, %v3257_v49, %v3259_v53  ;;  %v5829_v29 = vsel %vm550_vm9, %v3343_v11, %v2474_v41  ;;  %v5832_v37 = vsel %vm550_vm9, %v3427_v23, %v3429_v48 }
0x2800   :  { %v2450_v5 = vpop.f32.mrf.mxu0  ;;  %v2479_v20 = vpop.f32.mrf.mxu1 }
0x2801   :  { %v2451_v31 = vadd.f32 %v2450_v5, %v2408_v56  ;;  %v2480_v54 = vadd.f32 %v2479_v20, %v2409_v61 }
0x2803   :  { %v2491_v9 = vrot.slane %v2480_v54, 4  ;;  %v2575_v4 = vrot.slane %v2480_v54, 2  ;;  %v5835_v6 = vsel %vm550_vm9, %v2659_v43, %v2480_v54  ;;  %v2745_v41 = vrot.slane %v2480_v54, 6 }
0x2804   :  { %v5838_v10 = vsel %vm550_vm9, %v2451_v31, %v3514_v51  ;;  %v3599_v46 = vrot.slane %v2451_v31, 2  ;;  %v3685_v39 = vrot.slane %v2451_v31, 4  ;;  %v3769_v56 = vrot.slane %v2451_v31, 6 }
0x2805   :  { %v2493_v61 = vsel %vm550_vm9, %v2442_v26, %v2491_v9  ;;  %v2577_v53 = vsel %vm550_vm9, %v2573_v30, %v2575_v4  ;;  %v5843_v48 = vsel %vm550_vm9, %v2743_v36, %v2745_v41 }
0x2806   :  { %v2512_v34 = vadd.f32 %v2511_v8, %v2493_v61  ;;  %v5846_v57 = vsel %vm550_vm9, %v3599_v46, %v3601_v18  ;;  %v5849_v45 = vsel %vm550_vm9, %v3685_v39, %v2471_v15  ;;  %v5852_v49 = vsel %vm550_vm9, %v3769_v56, %v3771_v35 }
0x2808   :  { %4239 = vtanh.f32 %v2512_v34  ;;  %v3950_v23 = vmul.f32 -1.442695, %v2512_v34 }
0x280a   :  { %4241 = vpow2.f32 %v3950_v23 }
0x280e   :  { %v4240_v11 = vpop.eup %4239 }
0x280f   :  { %2536 = vrot.lane.b32.xlu2 %v4240_v11, %s4572_s12 }
0x2810   :  { %v4242_v26 = vpop.eup %4241 }
0x2811   :  { %v2517_v5 = vadd.f32 1.0, %v4242_v26 }
0x2813   :  { %4243 = vrcp.f32 %v2517_v5  ;;  %v2529_v15 = vand.u32 2147483648, %v2517_v5  ;;  %vm2523_vm8 = vweird.f32 %v2517_v5  ;;  %v2527_v36 = vand.u32 2147483647, %v2517_v5 }
0x2815   :  { %v2530_v18 = vor.u32 1.1754944e-38, %v2529_v15  ;;  %vm2528_vm3 = vcmp.eq.f32.partialorder %v2527_v36, 8.507059e+37 }
0x2819   :  { %v4244_v20 = vpop.eup %4243 }
0x281a   :  { %v2519_v31 = vmul.f32 %v4244_v20, %v2517_v5  ;;  %vm2524_vm5 = vweird.f32 %v4244_v20 }
0x281b   :  { %vm2525_vm9 = vmor %vm2523_vm8, %vm2524_vm5 }
0x281c   :  { %v2520_v54 = vsub.f32 1.0, %v2519_v31 }
0x281e   :  { %v2521_v30 = vmul.f32 %v4244_v20, %v2520_v54 }
0x2820   :  { %v2522_v43 = vadd.f32 %v4244_v20, %v2521_v30 }
0x2822   :  { %v2526_v51 = vsel %vm2525_vm9, %v4244_v20, %v2522_v43 }
0x2823   :  { %v2531_v9 = vsel %vm2528_vm3, %v2530_v18, %v2526_v51 }
0x2824   :  { %v2534_v4 = vmul.f32 0.0, %v2531_v9 }
0x2869   :  { %v2537_v35 = vpop.permute.xlu2 %2536 }
0x286a   :  { %v2539_v8 = vmul.f32 %v2537_v35, %v2531_v9 }
0x286c   :  { %2541 = vrot.lane.b32.xlu0 %v2539_v8, %s4572_s12 }
0x28de   :  { %v2542_v41 = vpop.permute.xlu0 %2541 }
0x28df   :  { %v2544_v46 = vadd.f32 %v2542_v41, %v2534_v4 }
0x28e1   :  { %4245 = vtanh.f32 %v2544_v46 }
0x28e7   :  { %v4246_v39 = vpop.eup %4245 }
0x28e8   :  { %2547 = vrot.lane.b32.xlu1 %v4246_v39, %s4572_s12 }
0x295a   :  { %v2548_v56 = vpop.permute.xlu1 %2547 }
0x295b   :  { %v2550_v61 = vmul.f32 %v2548_v56, %v2531_v9 }
0x295d   :  { %v5859_v34 = vsel %vm1086_vm7, %v2550_v61, 0.0 }
0x295e   :  { %2567 = vrot.lane.b32.xlu0 %v5859_v34, %s4574_s5  ;;  %2564 = vrot.lane.b32.xlu2 %v5859_v34, %s4575_s27 }
0x29b8   :  { %v2565_v11 = vpop.permute.xlu2 %2564 }
0x29d0   :  { %v2568_v23 = vpop.permute.xlu0 %2567 }
0x29d1   :  { %v2570_v26 = vsel %vm1096_vm12, %v2565_v11, %v2568_v23  ;;  %v2552_v11 = vsel %vm1086_vm7, %v2544_v46, 0.0 }
0x29d2   :  { %v2571_v5 = vsel %vm5149_vm14, %v2570_v26, 0.0 }
0x29d3   :  { %3951 = vmatmul.msk.f32.vlgmr.msra.gmra.mxu3 %vm1021_vm15, %v2571_v5 }
0x29d4   :  { %3101 = vmatpush.msra.mxu3 %v5706_v33 }
0x29d6   :  { %3102 = vmatpush.msra.mxu3 %v5708_v25 }
0x29d8   :  { %3103 = vmatpush.msra.mxu3 %v5712_v63 }
0x29da   :  { %3104 = vmatpush.msra.mxu3 %v5718_v13 }
0x29dc   :  { %3105 = vmatpush.msra.mxu3 %v5728_v42 }
0x29de   :  { %3106 = vmatpush.msra.mxu3 %v5730_v19 }
0x29e0   :  { %3107 = vmatpush.msra.mxu3 %v5736_v3 }
0x29e2   :  { %3108 = vmatpush.msra.mxu3 %v5742_v58 }
0x2a56   :  { %v2598_v20 = vpop.f32.mrf.mxu3 }
0x2a57   :  { %v2599_v31 = vadd.f32 %v2598_v20, %v2577_v53 }
0x2a59   :  { %4247 = vtanh.f32 %v2599_v31  ;;  %v3952_v30 = vmul.f32 -1.442695, %v2599_v31 }
0x2a5b   :  { %4249 = vpow2.f32 %v3952_v30 }
0x2a5f   :  { %v4248_v54 = vpop.eup %4247 }
0x2a60   :  { %2623 = vrot.lane.b32.xlu1 %v4248_v54, %s4572_s12 }
0x2a61   :  { %v4250_v43 = vpop.eup %4249 }
0x2a62   :  { %v2604_v15 = vadd.f32 1.0, %v4250_v43 }
0x2a64   :  { %4251 = vrcp.f32 %v2604_v15  ;;  %v2616_v8 = vand.u32 2147483648, %v2604_v15  ;;  %vm2610_vm6 = vweird.f32 %v2604_v15  ;;  %v2614_v4 = vand.u32 2147483647, %v2604_v15 }
0x2a66   :  { %v2617_v41 = vor.u32 1.1754944e-38, %v2616_v8  ;;  %vm2615_vm5 = vcmp.eq.f32.partialorder %v2614_v4, 8.507059e+37 }
0x2a6a   :  { %v4252_v36 = vpop.eup %4251 }
0x2a6b   :  { %v2606_v51 = vmul.f32 %v4252_v36, %v2604_v15  ;;  %vm2611_vm13 = vweird.f32 %v4252_v36 }
0x2a6c   :  { %vm2612_vm0 = vmor %vm2610_vm6, %vm2611_vm13 }
0x2a6d   :  { %v2607_v18 = vsub.f32 1.0, %v2606_v51 }
0x2a6f   :  { %v2608_v35 = vmul.f32 %v4252_v36, %v2607_v18 }
0x2a71   :  { %v2609_v9 = vadd.f32 %v4252_v36, %v2608_v35 }
0x2a73   :  { %v2613_v53 = vsel %vm2612_vm0, %v4252_v36, %v2609_v9 }
0x2a74   :  { %v2618_v56 = vsel %vm2615_vm5, %v2617_v41, %v2613_v53  ;;  %vm6322_vm5 = vcmp.eq.s32.totalorder %v5244_v60, 1 }
0x2a75   :  { %v2621_v23 = vmul.f32 %v2618_v56, %v2552_v11 }
0x2ad2   :  { %v2624_v39 = vpop.permute.xlu1 %2623 }
0x2ad3   :  { %v2626_v61 = vmul.f32 %v2624_v39, %v2618_v56 }
0x2ad5   :  { %2628 = vrot.lane.b32.xlu2 %v2626_v61, %s4572_s12 }
0x2b2f   :  { %v2629_v26 = vpop.permute.xlu2 %2628 }
0x2b30   :  { %v2631_v5 = vadd.f32 %v2629_v26, %v2621_v23 }
0x2b32   :  { %4253 = vtanh.f32 %v2631_v5 }
0x2b38   :  { %v4254_v20 = vpop.eup %4253 }
0x2b39   :  { %2634 = vrot.lane.b32.xlu0 %v4254_v20, %s4572_s12 }
0x2bab   :  { %v2635_v31 = vpop.permute.xlu0 %2634 }
0x2bac   :  { %v2637_v54 = vmul.f32 %v2635_v31, %v2618_v56 }
0x2bae   :  { %v5885_v30 = vsel %vm1169_vm10, %v2637_v54, %v5859_v34 }
0x2baf   :  { %2654 = vrot.lane.b32.xlu2 %v5885_v30, %s4574_s5  ;;  %2651 = vrot.lane.b32.xlu1 %v5885_v30, %s4575_s27 }
0x2c09   :  { %v2655_v24 = vpop.permute.xlu2 %2654 }
0x2c21   :  { %v2652_v46 = vpop.permute.xlu1 %2651 }
0x2c22   :  { %v2657_v43 = vsel %vm1096_vm12, %v2652_v46, %v2655_v24  ;;  %v2639_v24 = vsel %vm1169_vm10, %v2631_v5, %v2552_v11 }
0x2c23   :  { %v2658_v15 = vsel %vm5149_vm14, %v2657_v43, 0.0 }
0x2c24   :  { %3953 = vmatmul.msk.f32.vlgmr.msrb.gmra.mxu2 %vm1021_vm15, %v2658_v15 }
0x2c25   :  { %3357 = vmatpush.msrb.mxu2 %v5706_v33 }
0x2c27   :  { %3358 = vmatpush.msrb.mxu2 %v5708_v25 }
0x2c29   :  { %3359 = vmatpush.msrb.mxu2 %v5712_v63 }
0x2c2b   :  { %3360 = vmatpush.msrb.mxu2 %v5718_v13 }
0x2c2d   :  { %3361 = vmatpush.msrb.mxu2 %v5728_v42 }
0x2c2f   :  { %3362 = vmatpush.msrb.mxu2 %v5730_v19 }
0x2c31   :  { %3363 = vmatpush.msrb.mxu2 %v5736_v3 }
0x2c33   :  { %3364 = vmatpush.msrb.mxu2 %v5742_v58 }
0x2ca7   :  { %v2682_v36 = vpop.f32.mrf.mxu2 }
0x2ca8   :  { %v2683_v51 = vadd.f32 %v2682_v36, %v5835_v6 }
0x2caa   :  { %4255 = vtanh.f32 %v2683_v51  ;;  %v3954_v35 = vmul.f32 -1.442695, %v2683_v51 }
0x2cac   :  { %4257 = vpow2.f32 %v3954_v35 }
0x2cb0   :  { %v4256_v18 = vpop.eup %4255 }
0x2cb1   :  { %2707 = vrot.lane.b32.xlu0 %v4256_v18, %s4572_s12 }
0x2cb2   :  { %v4258_v9 = vpop.eup %4257 }
0x2cb3   :  { %v2688_v8 = vadd.f32 1.0, %v4258_v9 }
0x2cb5   :  { %4259 = vrcp.f32 %v2688_v8  ;;  %v2700_v61 = vand.u32 2147483648, %v2688_v8  ;;  %vm2694_vm8 = vweird.f32 %v2688_v8  ;;  %v2698_v23 = vand.u32 2147483647, %v2688_v8 }
0x2cb7   :  { %v2701_v26 = vor.u32 1.1754944e-38, %v2700_v61  ;;  %vm2699_vm3 = vcmp.eq.f32.partialorder %v2698_v23, 8.507059e+37 }
0x2cbb   :  { %v4260_v4 = vpop.eup %4259 }
0x2cbc   :  { %v2690_v53 = vmul.f32 %v4260_v4, %v2688_v8  ;;  %vm2695_vm7 = vweird.f32 %v4260_v4 }
0x2cbd   :  { %vm2696_vm9 = vmor %vm2694_vm8, %vm2695_vm7 }
0x2cbe   :  { %v2691_v41 = vsub.f32 1.0, %v2690_v53 }
0x2cc0   :  { %v2692_v39 = vmul.f32 %v4260_v4, %v2691_v41 }
0x2cc2   :  { %v2693_v56 = vadd.f32 %v4260_v4, %v2692_v39 }
0x2cc4   :  { %v2697_v6 = vsel %vm2696_vm9, %v4260_v4, %v2693_v56 }
0x2cc5   :  { %v2702_v31 = vsel %vm2699_vm3, %v2701_v26, %v2697_v6  ;;  %vm6323_vm3 = vmmov %vm6322_vm5 }
0x2cc6   :  { %v2705_v46 = vmul.f32 %v2702_v31, %v2639_v24 }
0x2d23   :  { %v2708_v20 = vpop.permute.xlu0 %2707 }
0x2d24   :  { %v2710_v54 = vmul.f32 %v2708_v20, %v2702_v31 }
0x2d26   :  { %2712 = vrot.lane.b32.xlu1 %v2710_v54, %s4572_s12 }
0x2d98   :  { %v2713_v43 = vpop.permute.xlu1 %2712 }
0x2d99   :  { %v2715_v15 = vadd.f32 %v2713_v43, %v2705_v46 }
0x2d9b   :  { %4261 = vtanh.f32 %v2715_v15 }
0x2da1   :  { %v4262_v36 = vpop.eup %4261 }
0x2da2   :  { %2718 = vrot.lane.b32.xlu2 %v4262_v36, %s4572_s12 }
0x2dfc   :  { %v2719_v51 = vpop.permute.xlu2 %2718 }
0x2dfd   :  { %v2721_v18 = vmul.f32 %v2719_v51, %v2702_v31 }
0x2dff   :  { %v5912_v35 = vsel %vm1248_vm2, %v2721_v18, %v5885_v30  ;;  %v2723_v18 = vsel %vm1248_vm2, %v2715_v15, %v2639_v24 }
0x2e00   :  { %2738 = vrot.lane.b32.xlu1 %v5912_v35, %s4574_s5  ;;  %2735 = vrot.lane.b32.xlu0 %v5912_v35, %s4575_s27 }
0x2e72   :  { %v2739_v28 = vpop.permute.xlu1 %2738  ;;  %v2736_v11 = vpop.permute.xlu0 %2735 }
0x2e73   :  { %v2741_v5 = vsel %vm1096_vm12, %v2736_v11, %v2739_v28 }
0x2e74   :  { %v2742_v9 = vsel %vm5149_vm14, %v2741_v5, 0.0 }
0x2e75   :  { %3955 = vmatmul.msk.f32.vlgmr.msrb.gmra.mxu3 %vm1021_vm15, %v2742_v9 }
0x2e76   :  { %3443 = vmatpush.msrb.mxu3 %v5706_v33 }
0x2e78   :  { %3444 = vmatpush.msrb.mxu3 %v5708_v25 }
0x2e7a   :  { %3445 = vmatpush.msrb.mxu3 %v5712_v63 }
0x2e7c   :  { %3446 = vmatpush.msrb.mxu3 %v5718_v13 }
0x2e7e   :  { %3447 = vmatpush.msrb.mxu3 %v5728_v42 }
0x2e80   :  { %3448 = vmatpush.msrb.mxu3 %v5730_v19 }
0x2e82   :  { %3449 = vmatpush.msrb.mxu3 %v5736_v3 }
0x2e84   :  { %3450 = vmatpush.msrb.mxu3 %v5742_v58 }
0x2ef8   :  { %v2768_v8 = vpop.f32.mrf.mxu3 }
0x2ef9   :  { %v2769_v4 = vadd.f32 %v2768_v8, %v5843_v48 }
0x2efb   :  { %4263 = vtanh.f32 %v2769_v4  ;;  %v3956_v41 = vmul.f32 -1.442695, %v2769_v4 }
0x2efd   :  { %4265 = vpow2.f32 %v3956_v41 }
0x2f01   :  { %v4264_v53 = vpop.eup %4263 }
0x2f02   :  { %2793 = vrot.lane.b32.xlu2 %v4264_v53, %s4572_s12 }
0x2f03   :  { %v4266_v39 = vpop.eup %4265 }
0x2f04   :  { %v2774_v56 = vadd.f32 1.0, %v4266_v39 }
0x2f06   :  { %4267 = vrcp.f32 %v2774_v56  ;;  %v2786_v31 = vand.u32 2147483648, %v2774_v56  ;;  %vm2780_vm13 = vweird.f32 %v2774_v56  ;;  %v2784_v54 = vand.u32 2147483647, %v2774_v56 }
0x2f08   :  { %v2787_v46 = vor.u32 1.1754944e-38, %v2786_v31  ;;  %vm2785_vm0 = vcmp.eq.f32.partialorder %v2784_v54, 8.507059e+37 }
0x2f0c   :  { %v4268_v61 = vpop.eup %4267 }
0x2f0d   :  { %v2776_v23 = vmul.f32 %v4268_v61, %v2774_v56  ;;  %vm2781_vm10 = vweird.f32 %v4268_v61 }
0x2f0e   :  { %vm2782_vm6 = vmor %vm2780_vm13, %vm2781_vm10  ;;  %vm6324_vm10 = vcmp.eq.s32.totalorder %v5281_v0, 1 }
0x2f0f   :  { %v2777_v6 = vsub.f32 1.0, %v2776_v23 }
0x2f11   :  { %v2778_v26 = vmul.f32 %v4268_v61, %v2777_v6 }
0x2f13   :  { %v2779_v20 = vadd.f32 %v4268_v61, %v2778_v26 }
0x2f15   :  { %v2783_v48 = vsel %vm2782_vm6, %v4268_v61, %v2779_v20 }
0x2f16   :  { %v2788_v36 = vsel %vm2785_vm0, %v2787_v46, %v2783_v48 }
0x2f17   :  { %v2791_v28 = vmul.f32 %v2788_v36, %v2723_v18 }
0x2f5c   :  { %v2794_v43 = vpop.permute.xlu2 %2793 }
0x2f5d   :  { %v2796_v51 = vmul.f32 %v2794_v43, %v2788_v36 }
0x2f5f   :  { %2798 = vrot.lane.b32.xlu0 %v2796_v51, %s4572_s12 }
0x2fd1   :  { %v2799_v11 = vpop.permute.xlu0 %2798 }
0x2fd2   :  { %v2801_v5 = vadd.f32 %v2799_v11, %v2791_v28 }
0x2fd4   :  { %4269 = vtanh.f32 %v2801_v5 }
0x2fda   :  { %v4270_v9 = vpop.eup %4269 }
0x2fdb   :  { %2804 = vrot.lane.b32.xlu1 %v4270_v9, %s4572_s12 }
0x304d   :  { %v2805_v8 = vpop.permute.xlu1 %2804 }
0x304e   :  { %v2807_v4 = vmul.f32 %v2805_v8, %v2788_v36  ;;  %v2809_v8 = vsel %vm6323_vm3, %v2801_v5, %v2723_v18 }
0x3050   :  { %v5939_v53 = vsel %vm6322_vm5, %v2807_v4, %v5912_v35 }
0x3051   :  { %2824 = vrot.lane.b32.xlu0 %v5939_v53, %s4574_s5  ;;  %2821 = vrot.lane.b32.xlu2 %v5939_v53, %s4575_s27 }
0x30ab   :  { %v2822_v17 = vpop.permute.xlu2 %2821 }
0x30c3   :  { %v2825_v24 = vpop.permute.xlu0 %2824 }
0x30c4   :  { %v2827_v15 = vsel %vm1096_vm12, %v2822_v17, %v2825_v24 }
0x30c5   :  { %v2828_v41 = vsel %vm5149_vm14, %v2827_v15, 0.0 }
0x30c6   :  { %3957 = vmatmul.msk.f32.vlgmr.msrb.gmra.mxu0 %vm1021_vm15, %v2828_v41 }
0x30c7   :  { %3528 = vmatpush.msrb.mxu0 %v5706_v33 }
0x30c9   :  { %3529 = vmatpush.msrb.mxu0 %v5708_v25 }
0x30cb   :  { %3530 = vmatpush.msrb.mxu0 %v5712_v63 }
0x30cd   :  { %3531 = vmatpush.msrb.mxu0 %v5718_v13 }
0x30cf   :  { %3532 = vmatpush.msrb.mxu0 %v5728_v42 }
0x30d1   :  { %3533 = vmatpush.msrb.mxu0 %v5730_v19 }
0x30d3   :  { %3534 = vmatpush.msrb.mxu0 %v5736_v3 }
0x30d5   :  { %3535 = vmatpush.msrb.mxu0 %v5742_v58 }
0x3143   :  { %v2853_v39 = vpop.f32.mrf.mxu0 }
0x3144   :  { %v2854_v56 = vadd.f32 %v2853_v39, %v5817_v22 }
0x3146   :  { %4271 = vtanh.f32 %v2854_v56  ;;  %v3958_v23 = vmul.f32 -1.442695, %v2854_v56 }
0x3148   :  { %4273 = vpow2.f32 %v3958_v23 }
0x314c   :  { %v4272_v61 = vpop.eup %4271 }
0x314d   :  { %2878 = vrot.lane.b32.xlu1 %v4272_v61, %s4572_s12 }
0x314e   :  { %v4274_v6 = vpop.eup %4273 }
0x314f   :  { %v2859_v26 = vadd.f32 1.0, %v4274_v6 }
0x3151   :  { %4275 = vrcp.f32 %v2859_v26  ;;  %v2871_v43 = vand.u32 2147483648, %v2859_v26  ;;  %vm2865_vm7 = vweird.f32 %v2859_v26  ;;  %v2869_v36 = vand.u32 2147483647, %v2859_v26 }
0x3153   :  { %v2872_v51 = vor.u32 1.1754944e-38, %v2871_v43  ;;  %vm2870_vm9 = vcmp.eq.f32.partialorder %v2869_v36, 8.507059e+37 }
0x3157   :  { %v4276_v20 = vpop.eup %4275 }
0x3158   :  { %v2861_v31 = vmul.f32 %v4276_v20, %v2859_v26  ;;  %vm2866_vm2 = vweird.f32 %v4276_v20 }
0x3159   :  { %vm2867_vm8 = vmor %vm2865_vm7, %vm2866_vm2  ;;  %vm6326_vm7 = vcmp.eq.s32.totalorder %v5339_v62, 1 }
0x315a   :  { %v2862_v54 = vsub.f32 1.0, %v2861_v31  ;;  %vm6325_vm2 = vmmov %vm6324_vm10 }
0x315c   :  { %v2863_v48 = vmul.f32 %v4276_v20, %v2862_v54 }
0x315e   :  { %v2864_v46 = vadd.f32 %v4276_v20, %v2863_v48 }
0x3160   :  { %v2868_v22 = vsel %vm2867_vm8, %v4276_v20, %v2864_v46 }
0x3161   :  { %v2873_v11 = vsel %vm2870_vm9, %v2872_v51, %v2868_v22 }
0x3162   :  { %v2876_v4 = vmul.f32 %v2873_v11, %v2809_v8 }
0x31bf   :  { %v2879_v28 = vpop.permute.xlu1 %2878 }
0x31c0   :  { %v2881_v9 = vmul.f32 %v2879_v28, %v2873_v11 }
0x31c2   :  { %2883 = vrot.lane.b32.xlu2 %v2881_v9, %s4572_s12 }
0x321c   :  { %v2884_v17 = vpop.permute.xlu2 %2883 }
0x321d   :  { %v2886_v24 = vadd.f32 %v2884_v17, %v2876_v4 }
0x321f   :  { %4277 = vtanh.f32 %v2886_v24 }
0x3225   :  { %v4278_v15 = vpop.eup %4277 }
0x3226   :  { %2889 = vrot.lane.b32.xlu0 %v4278_v15, %s4572_s12  ;;  %v2894_v15 = vsel %vm6325_vm2, %v2886_v24, %v2809_v8 }
0x3298   :  { %v2890_v41 = vpop.permute.xlu0 %2889 }
0x3299   :  { %v2892_v39 = vmul.f32 %v2890_v41, %v2873_v11 }
0x329b   :  { %v5966_v56 = vsel %vm6324_vm10, %v2892_v39, %v5939_v53 }
0x329c   :  { %2909 = vrot.lane.b32.xlu2 %v5966_v56, %s4574_s5  ;;  %2906 = vrot.lane.b32.xlu1 %v5966_v56, %s4575_s27 }
0x32f6   :  { %v2910_v60 = vpop.permute.xlu2 %2909 }
0x330e   :  { %v2907_v18 = vpop.permute.xlu1 %2906 }
0x330f   :  { %v2912_v5 = vsel %vm1096_vm12, %v2907_v18, %v2910_v60 }
0x3310   :  { %v2913_v61 = vsel %vm5149_vm14, %v2912_v5, 0.0 }
0x3311   :  { %3959 = vmatmul.msk.f32.vlgmr.msrb.gmra.mxu1 %vm1021_vm15, %v2913_v61 }
0x3312   :  { %3615 = vmatpush.msrb.mxu1 %v5706_v33 }
0x3314   :  { %3616 = vmatpush.msrb.mxu1 %v5708_v25 }
0x3316   :  { %3617 = vmatpush.msrb.mxu1 %v5712_v63 }
0x3318   :  { %3618 = vmatpush.msrb.mxu1 %v5718_v13 }
0x331a   :  { %3619 = vmatpush.msrb.mxu1 %v5728_v42 }
0x331c   :  { %3620 = vmatpush.msrb.mxu1 %v5730_v19 }
0x331e   :  { %3621 = vmatpush.msrb.mxu1 %v5736_v3 }
0x3320   :  { %3622 = vmatpush.msrb.mxu1 %v5742_v58 }
0x338e   :  { %v2940_v23 = vpop.f32.mrf.mxu1 }
0x338f   :  { %v2941_v6 = vadd.f32 %v2940_v23, %v5820_v1 }
0x3391   :  { %4279 = vtanh.f32 %v2941_v6  ;;  %v3960_v20 = vmul.f32 -1.442695, %v2941_v6 }
0x3393   :  { %4281 = vpow2.f32 %v3960_v20 }
0x3397   :  { %v4280_v26 = vpop.eup %4279 }
0x3398   :  { %2965 = vrot.lane.b32.xlu0 %v4280_v26, %s4572_s12 }
0x3399   :  { %v4282_v31 = vpop.eup %4281 }
0x339a   :  { %v2946_v54 = vadd.f32 1.0, %v4282_v31 }
0x339c   :  { %4283 = vrcp.f32 %v2946_v54  ;;  %v2958_v51 = vand.u32 2147483648, %v2946_v54  ;;  %vm2952_vm6 = vweird.f32 %v2946_v54  ;;  %v2956_v28 = vand.u32 2147483647, %v2946_v54 }
0x339e   :  { %v2959_v11 = vor.u32 1.1754944e-38, %v2958_v51  ;;  %vm2957_vm5 = vcmp.eq.f32.partialorder %v2956_v28, 8.507059e+37 }
0x33a2   :  { %v4284_v48 = vpop.eup %4283 }
0x33a3   :  { %v2948_v46 = vmul.f32 %v4284_v48, %v2946_v54  ;;  %vm2953_vm13 = vweird.f32 %v4284_v48 }
0x33a4   :  { %vm2954_vm0 = vmor %vm2952_vm6, %vm2953_vm13  ;;  %vm6328_vm6 = vcmp.eq.s32.totalorder %v5382_v16, 1 }
0x33a5   :  { %v2949_v43 = vsub.f32 1.0, %v2948_v46  ;;  %vm6327_vm13 = vmmov %vm6326_vm7 }
0x33a7   :  { %v2950_v36 = vmul.f32 %v4284_v48, %v2949_v43 }
0x33a9   :  { %v2951_v22 = vadd.f32 %v4284_v48, %v2950_v36 }
0x33ab   :  { %v2955_v1 = vsel %vm2954_vm0, %v4284_v48, %v2951_v22 }
0x33ac   :  { %v2960_v4 = vsel %vm2957_vm5, %v2959_v11, %v2955_v1 }
0x33ad   :  { %v2963_v41 = vmul.f32 %v2960_v4, %v2894_v15 }
0x340a   :  { %v2966_v9 = vpop.permute.xlu0 %2965 }
0x340b   :  { %v2968_v17 = vmul.f32 %v2966_v9, %v2960_v4 }
0x340d   :  { %2970 = vrot.lane.b32.xlu1 %v2968_v17, %s4572_s12 }
0x347f   :  { %v2971_v39 = vpop.permute.xlu1 %2970 }
0x3480   :  { %v2973_v60 = vadd.f32 %v2971_v39, %v2963_v41 }
0x3482   :  { %4285 = vtanh.f32 %v2973_v60 }
0x3488   :  { %v4286_v18 = vpop.eup %4285 }
0x3489   :  { %2976 = vrot.lane.b32.xlu2 %v4286_v18, %s4572_s12 }
0x34e3   :  { %v2977_v5 = vpop.permute.xlu2 %2976 }
0x34e4   :  { %v2979_v61 = vmul.f32 %v2977_v5, %v2960_v4  ;;  %v2981_v4 = vsel %vm6327_vm13, %v2973_v60, %v2894_v15 }
0x34e6   :  { %v5993_v23 = vsel %vm6326_vm7, %v2979_v61, %v5966_v56 }
0x34e7   :  { %2996 = vrot.lane.b32.xlu1 %v5993_v23, %s4574_s5  ;;  %2993 = vrot.lane.b32.xlu0 %v5993_v23, %s4575_s27 }
0x3559   :  { %v2997_v0 = vpop.permute.xlu1 %2996  ;;  %v2994_v8 = vpop.permute.xlu0 %2993 }
0x355a   :  { %v2999_v24 = vsel %vm1096_vm12, %v2994_v8, %v2997_v0 }
0x355b   :  { %v3000_v6 = vsel %vm5149_vm14, %v2999_v24, 0.0  ;;  %v4375_v24 = vld [vmem:[#allocation11 + $0x38] sm:$0xff] }
0x355c   :  { %3961 = vmatmul.msk.f32.vlgmr.msra.gmra.mxu2 %vm1021_vm15, %v3000_v6  ;;  %v4376_v6 = vld [vmem:[#allocation11 + $0x30] sm:$0xff] }
0x355d   :  { %3699 = vmatpush.msra.mxu2 %v5706_v33 }
0x355f   :  { %3700 = vmatpush.msra.mxu2 %v5708_v25 }
0x3561   :  { %3701 = vmatpush.msra.mxu2 %v5712_v63 }
0x3563   :  { %3702 = vmatpush.msra.mxu2 %v5718_v13 }
0x3565   :  { %3703 = vmatpush.msra.mxu2 %v5728_v42 }
0x3567   :  { %3704 = vmatpush.msra.mxu2 %v5730_v19 }
0x3569   :  { %3705 = vmatpush.msra.mxu2 %v5736_v3 }
0x356b   :  { %3706 = vmatpush.msra.mxu2 %v5742_v58 }
0x35df   :  { %v3024_v26 = vpop.f32.mrf.mxu2 }
0x35e0   :  { %v3025_v20 = vadd.f32 %v3024_v26, %v5811_v40  ;;  %v4377_v26 = vld [vmem:[#allocation11 + $0x28] sm:$0xff] }
0x35e2   :  { %4287 = vtanh.f32 %v3025_v20  ;;  %v3962_v33 = vmul.f32 -1.442695, %v3025_v20 }
0x35e4   :  { %4289 = vpow2.f32 %v3962_v33 }
0x35e8   :  { %v4288_v31 = vpop.eup %4287 }
0x35e9   :  { %3049 = vrot.lane.b32.xlu2 %v4288_v31, %s4572_s12 }
0x35ea   :  { %v4290_v25 = vpop.eup %4289 }
0x35eb   :  { %v3030_v63 = vadd.f32 1.0, %v4290_v25 }
0x35ed   :  { %4291 = vrcp.f32 %v3030_v63  ;;  %v3042_v22 = vand.u32 2147483648, %v3030_v63  ;;  %vm3036_vm9 = vweird.f32 %v3030_v63  ;;  %v3040_v51 = vand.u32 2147483647, %v3030_v63 }
0x35ef   :  { %v3043_v28 = vor.u32 1.1754944e-38, %v3042_v22  ;;  %vm3041_vm10 = vcmp.eq.f32.partialorder %v3040_v51, 8.507059e+37 }
0x35f3   :  { %v4292_v54 = vpop.eup %4291 }
0x35f4   :  { %v3032_v48 = vmul.f32 %v4292_v54, %v3030_v63  ;;  %vm3037_vm8 = vweird.f32 %v4292_v54 }
0x35f5   :  { %vm3038_vm3 = vmor %vm3036_vm9, %vm3037_vm8  ;;  %vm6330_vm9 = vcmp.eq.s32.totalorder %v5412_v50, 1 }
0x35f6   :  { %v3033_v46 = vsub.f32 1.0, %v3032_v48  ;;  %vm6329_vm8 = vmmov %vm6328_vm6 }
0x35f8   :  { %v3034_v43 = vmul.f32 %v4292_v54, %v3033_v46 }
0x35fa   :  { %v3035_v36 = vadd.f32 %v4292_v54, %v3034_v43 }
0x35fc   :  { %v3039_v40 = vsel %vm3038_vm3, %v4292_v54, %v3035_v36 }
0x35fd   :  { %v3044_v11 = vsel %vm3041_vm10, %v3043_v28, %v3039_v40 }
0x35fe   :  { %v3047_v17 = vmul.f32 %v3044_v11, %v2981_v4 }
0x3643   :  { %v3050_v1 = vpop.permute.xlu2 %3049 }
0x3644   :  { %v3052_v9 = vmul.f32 %v3050_v1, %v3044_v11 }
0x3646   :  { %3054 = vrot.lane.b32.xlu0 %v3052_v9, %s4572_s12 }
0x36b8   :  { %v3055_v41 = vpop.permute.xlu0 %3054 }
0x36b9   :  { %v3057_v39 = vadd.f32 %v3055_v41, %v3047_v17 }
0x36bb   :  { %4293 = vtanh.f32 %v3057_v39  ;;  %v3065_v40 = vsel %vm6329_vm8, %v3057_v39, %v2981_v4 }
0x36c1   :  { %v4294_v18 = vpop.eup %4293 }
0x36c2   :  { %3060 = vrot.lane.b32.xlu1 %v4294_v18, %s4572_s12 }
0x3734   :  { %v3061_v5 = vpop.permute.xlu1 %3060 }
0x3735   :  { %v3063_v61 = vmul.f32 %v3061_v5, %v3044_v11 }
0x3737   :  { %v6020_v0 = vsel %vm6328_vm6, %v3063_v61, %v5993_v23 }
0x3738   :  { %3080 = vrot.lane.b32.xlu0 %v6020_v0, %s4574_s5  ;;  %3077 = vrot.lane.b32.xlu2 %v6020_v0, %s4575_s27 }
0x3792   :  { %v3078_v62 = vpop.permute.xlu2 %3077 }
0x37aa   :  { %v3081_v15 = vpop.permute.xlu0 %3080 }
0x37ab   :  { %v3083_v60 = vsel %vm1096_vm12, %v3078_v62, %v3081_v15 }
0x37ac   :  { %v3084_v8 = vsel %vm5149_vm14, %v3083_v60, 0.0 }
0x37ad   :  { %3963 = vmatmul.msk.f32.vlgmr.msra.gmra.mxu3 %vm1021_vm15, %v3084_v8 }
0x37ae   :  { %3785 = vmatpush.msra.mxu3 %v4375_v24 }
0x37b0   :  { %3786 = vmatpush.msra.mxu3 %v4376_v6 }
0x37b2   :  { %3787 = vmatpush.msra.mxu3 %v4377_v26 }
0x37b4   :  { %3788 = vmatpush.msra.mxu3 %v5718_v13 }
0x37b6   :  { %3789 = vmatpush.msra.mxu3 %v5728_v42 }
0x37b8   :  { %3790 = vmatpush.msra.mxu3 %v5730_v19 }
0x37ba   :  { %3791 = vmatpush.msra.mxu3 %v5736_v3 }
0x37bc   :  { %3792 = vmatpush.msra.mxu3 %v5742_v58 }
0x3830   :  { %v3110_v20 = vpop.f32.mrf.mxu3 }
0x3831   :  { %v3111_v31 = vadd.f32 %v3110_v20, %v5823_v52 }
0x3833   :  { %4295 = vtanh.f32 %v3111_v31  ;;  %v3964_v25 = vmul.f32 -1.442695, %v3111_v31 }
0x3835   :  { %4297 = vpow2.f32 %v3964_v25 }
0x3839   :  { %v4296_v33 = vpop.eup %4295 }
0x383a   :  { %3135 = vrot.lane.b32.xlu1 %v4296_v33, %s4572_s12 }
0x383b   :  { %v4298_v63 = vpop.eup %4297 }
0x383c   :  { %v3116_v54 = vadd.f32 1.0, %v4298_v63 }
0x383e   :  { %4299 = vrcp.f32 %v3116_v54  ;;  %v3128_v3 = vand.u32 2147483648, %v3116_v54  ;;  %vm3122_vm5 = vweird.f32 %v3116_v54  ;;  %v3126_v58 = vand.u32 2147483647, %v3116_v54 }
0x3840   :  { %v3129_v43 = vor.u32 1.1754944e-38, %v3128_v3  ;;  %vm3127_vm7 = vcmp.eq.f32.partialorder %v3126_v58, 8.507059e+37 }
0x3844   :  { %v4300_v13 = vpop.eup %4299 }
0x3845   :  { %v3118_v42 = vmul.f32 %v4300_v13, %v3116_v54  ;;  %vm3123_vm0 = vweird.f32 %v4300_v13 }
0x3846   :  { %vm3124_vm2 = vmor %vm3122_vm5, %vm3123_vm0  ;;  %vm6332_vm5 = vcmp.eq.s32.totalorder %v5438_v27, 1 }
0x3847   :  { %v3119_v48 = vsub.f32 1.0, %v3118_v42  ;;  %vm6331_vm0 = vmmov %vm6330_vm9 }
0x3849   :  { %v3120_v19 = vmul.f32 %v4300_v13, %v3119_v48 }
0x384b   :  { %v3121_v46 = vadd.f32 %v4300_v13, %v3120_v19 }
0x384d   :  { %v3125_v52 = vsel %vm3124_vm2, %v4300_v13, %v3121_v46 }
0x384e   :  { %v3130_v22 = vsel %vm3127_vm7, %v3129_v43, %v3125_v52 }
0x384f   :  { %v3133_v28 = vmul.f32 %v3130_v22, %v3065_v40 }
0x38ac   :  { %v3136_v36 = vpop.permute.xlu1 %3135 }
0x38ad   :  { %v3138_v51 = vmul.f32 %v3136_v36, %v3130_v22 }
0x38af   :  { %3140 = vrot.lane.b32.xlu2 %v3138_v51, %s4572_s12 }
0x3909   :  { %v3141_v1 = vpop.permute.xlu2 %3140 }
0x390a   :  { %v3143_v11 = vadd.f32 %v3141_v1, %v3133_v28 }
0x390c   :  { %4301 = vtanh.f32 %v3143_v11  ;;  %v3151_v19 = vsel %vm6331_vm0, %v3143_v11, %v3065_v40 }
0x3912   :  { %v4302_v9 = vpop.eup %4301 }
0x3913   :  { %3146 = vrot.lane.b32.xlu0 %v4302_v9, %s4572_s12 }
0x3985   :  { %v3147_v17 = vpop.permute.xlu0 %3146 }
0x3986   :  { %v3149_v41 = vmul.f32 %v3147_v17, %v3130_v22 }
0x3988   :  { %v6044_v18 = vsel %vm6330_vm9, %v3149_v41, %v6020_v0 }
0x3989   :  { %3166 = vrot.lane.b32.xlu2 %v6044_v18, %s4574_s5  ;;  %3163 = vrot.lane.b32.xlu1 %v6044_v18, %s4575_s27 }
0x39e3   :  { %v3167_v16 = vpop.permute.xlu2 %3166 }
0x39fb   :  { %v3164_v4 = vpop.permute.xlu1 %3163 }
0x39fc   :  { %v3169_v39 = vsel %vm1096_vm12, %v3164_v4, %v3167_v16 }
0x39fd   :  { %v3170_v5 = vsel %vm5149_vm14, %v3169_v39, 0.0 }
0x39fe   :  { %3965 = vmatmul.msk.f32.vlgmr.msra.gmra.mxu0 %vm1021_vm15, %v3170_v5 }
0x3a7b   :  { %v3195_v61 = vpop.f32.mrf.mxu0 }
0x3a7c   :  { %v3196_v62 = vadd.f32 %v3195_v61, %v5814_v21 }
0x3a7e   :  { %4303 = vtanh.f32 %v3196_v62  ;;  %v3966_v60 = vmul.f32 -1.442695, %v3196_v62 }
0x3a80   :  { %4305 = vpow2.f32 %v3966_v60 }
0x3a84   :  { %v4304_v15 = vpop.eup %4303 }
0x3a85   :  { %3220 = vrot.lane.b32.xlu0 %v4304_v15, %s4572_s12 }
0x3a86   :  { %v4306_v8 = vpop.eup %4305 }
0x3a87   :  { %v3201_v24 = vadd.f32 1.0, %v4306_v8 }
0x3a89   :  { %4307 = vrcp.f32 %v3201_v24  ;;  %v3213_v25 = vand.u32 2147483648, %v3201_v24  ;;  %vm3207_vm10 = vweird.f32 %v3201_v24  ;;  %v3211_v63 = vand.u32 2147483647, %v3201_v24 }
0x3a8b   :  { %v3214_v54 = vor.u32 1.1754944e-38, %v3213_v25  ;;  %vm3212_vm6 = vcmp.eq.f32.partialorder %v3211_v63, 8.507059e+37 }
0x3a8f   :  { %v4308_v6 = vpop.eup %4307 }
0x3a90   :  { %v3203_v26 = vmul.f32 %v4308_v6, %v3201_v24  ;;  %vm3208_vm3 = vweird.f32 %v4308_v6 }
0x3a91   :  { %vm3209_vm13 = vmor %vm3207_vm10, %vm3208_vm3  ;;  %vm6334_vm10 = vcmp.eq.s32.totalorder %v5464_v14, 1 }
0x3a92   :  { %v3204_v20 = vsub.f32 1.0, %v3203_v26  ;;  %vm6333_vm3 = vmmov %vm6332_vm5 }
0x3a94   :  { %v3205_v31 = vmul.f32 %v4308_v6, %v3204_v20 }
0x3a96   :  { %v3206_v33 = vadd.f32 %v4308_v6, %v3205_v31 }
0x3a98   :  { %v3210_v21 = vsel %vm3209_vm13, %v4308_v6, %v3206_v33 }
0x3a99   :  { %v3215_v42 = vsel %vm3212_vm6, %v3214_v54, %v3210_v21 }
0x3a9a   :  { %v3218_v46 = vmul.f32 %v3215_v42, %v3151_v19 }
0x3af7   :  { %v3221_v13 = vpop.permute.xlu0 %3220 }
0x3af8   :  { %v3223_v48 = vmul.f32 %v3221_v13, %v3215_v42 }
0x3afa   :  { %3225 = vrot.lane.b32.xlu1 %v3223_v48, %s4572_s12 }
0x3b6c   :  { %v3226_v3 = vpop.permute.xlu1 %3225 }
0x3b6d   :  { %v3228_v58 = vadd.f32 %v3226_v3, %v3218_v46 }
0x3b6f   :  { %4309 = vtanh.f32 %v3228_v58  ;;  %v3236_v20 = vsel %vm6333_vm3, %v3228_v58, %v3151_v19 }
0x3b75   :  { %v4310_v52 = vpop.eup %4309 }
0x3b76   :  { %3231 = vrot.lane.b32.xlu2 %v4310_v52, %s4572_s12 }
0x3bd0   :  { %v3232_v43 = vpop.permute.xlu2 %3231 }
0x3bd1   :  { %v3234_v36 = vmul.f32 %v3232_v43, %v3215_v42 }
0x3bd3   :  { %v6063_v22 = vsel %vm6332_vm5, %v3234_v36, %v6044_v18 }
0x3bd4   :  { %3251 = vrot.lane.b32.xlu1 %v6063_v22, %s4574_s5  ;;  %3248 = vrot.lane.b32.xlu0 %v6063_v22, %s4575_s27 }
0x3c46   :  { %v3252_v50 = vpop.permute.xlu1 %3251  ;;  %v3249_v51 = vpop.permute.xlu0 %3248 }
0x3c47   :  { %v3254_v40 = vsel %vm1096_vm12, %v3249_v51, %v3252_v50 }
0x3c48   :  { %v3255_v28 = vsel %vm5149_vm14, %v3254_v40, 0.0 }
0x3c49   :  { %3967 = vmatmul.msk.f32.vlgmr.msra.gmra.mxu1 %vm1021_vm15, %v3255_v28 }
0x3cc6   :  { %v3282_v1 = vpop.f32.mrf.mxu1 }
0x3cc7   :  { %v3283_v11 = vadd.f32 %v3282_v1, %v5826_v59 }
0x3cc9   :  { %4311 = vtanh.f32 %v3283_v11  ;;  %v3968_v17 = vmul.f32 -1.442695, %v3283_v11 }
0x3ccb   :  { %4313 = vpow2.f32 %v3968_v17 }
0x3ccf   :  { %v4312_v9 = vpop.eup %4311 }
0x3cd0   :  { %3307 = vrot.lane.b32.xlu2 %v4312_v9, %s4572_s12 }
0x3cd1   :  { %v4314_v41 = vpop.eup %4313 }
0x3cd2   :  { %v3288_v16 = vadd.f32 1.0, %v4314_v41 }
0x3cd4   :  { %4315 = vrcp.f32 %v3288_v16  ;;  %v3300_v15 = vand.u32 2147483648, %v3288_v16  ;;  %vm3294_vm7 = vweird.f32 %v3288_v16  ;;  %v3298_v60 = vand.u32 2147483647, %v3288_v16 }
0x3cd6   :  { %v3301_v8 = vor.u32 1.1754944e-38, %v3300_v15  ;;  %vm3299_vm9 = vcmp.eq.f32.partialorder %v3298_v60, 8.507059e+37 }
0x3cda   :  { %v4316_v4 = vpop.eup %4315 }
0x3cdb   :  { %v3290_v39 = vmul.f32 %v4316_v4, %v3288_v16  ;;  %vm3295_vm2 = vweird.f32 %v4316_v4 }
0x3cdc   :  { %vm3296_vm8 = vmor %vm3294_vm7, %vm3295_vm2  ;;  %vm6336_vm7 = vcmp.eq.s32.totalorder %v5490_v12, 1 }
0x3cdd   :  { %v3291_v5 = vsub.f32 1.0, %v3290_v39  ;;  %vm6335_vm2 = vmmov %vm6334_vm10 }
0x3cdf   :  { %v3292_v61 = vmul.f32 %v4316_v4, %v3291_v5 }
0x3ce1   :  { %v3293_v62 = vadd.f32 %v4316_v4, %v3292_v61 }
0x3ce3   :  { %v3297_v59 = vsel %vm3296_vm8, %v4316_v4, %v3293_v62 }
0x3ce4   :  { %v3302_v6 = vsel %vm3299_vm9, %v3301_v8, %v3297_v59 }
0x3ce5   :  { %v3305_v31 = vmul.f32 %v3302_v6, %v3236_v20 }
0x3d2a   :  { %v3308_v24 = vpop.permute.xlu2 %3307 }
0x3d2b   :  { %v3310_v26 = vmul.f32 %v3308_v24, %v3302_v6 }
0x3d2d   :  { %3312 = vrot.lane.b32.xlu0 %v3310_v26, %s4572_s12 }
0x3d9f   :  { %v3313_v33 = vpop.permute.xlu0 %3312 }
0x3da0   :  { %v3315_v25 = vadd.f32 %v3313_v33, %v3305_v31 }
0x3da2   :  { %4317 = vtanh.f32 %v3315_v25  ;;  %v3323_v39 = vsel %vm6335_vm2, %v3315_v25, %v3236_v20 }
0x3da8   :  { %v4318_v63 = vpop.eup %4317 }
0x3da9   :  { %3318 = vrot.lane.b32.xlu1 %v4318_v63, %s4572_s12 }
0x3e1b   :  { %v3319_v21 = vpop.permute.xlu1 %3318 }
0x3e1c   :  { %v3321_v54 = vmul.f32 %v3319_v21, %v3302_v6 }
0x3e1e   :  { %v6082_v13 = vsel %vm6334_vm10, %v3321_v54, %v6063_v22 }
0x3e1f   :  { %3338 = vrot.lane.b32.xlu0 %v6082_v13, %s4574_s5  ;;  %3335 = vrot.lane.b32.xlu2 %v6082_v13, %s4575_s27 }
0x3e79   :  { %v3336_v27 = vpop.permute.xlu2 %3335 }
0x3e91   :  { %v3339_v42 = vpop.permute.xlu0 %3338 }
0x3e92   :  { %v3341_v48 = vsel %vm1096_vm12, %v3336_v27, %v3339_v42 }
0x3e93   :  { %v3342_v19 = vsel %vm5149_vm14, %v3341_v48, 0.0 }
0x3e94   :  { %3969 = vmatmul.msk.f32.vlgmr.msrb.gmra.mxu2 %vm1021_vm15, %v3342_v19 }
0x3f17   :  { %v3366_v46 = vpop.f32.mrf.mxu2 }
0x3f18   :  { %v3367_v3 = vadd.f32 %v3366_v46, %v5829_v29 }
0x3f1a   :  { %4319 = vtanh.f32 %v3367_v3  ;;  %v3970_v52 = vmul.f32 -1.442695, %v3367_v3 }
0x3f1c   :  { %4321 = vpow2.f32 %v3970_v52 }
0x3f20   :  { %v4320_v58 = vpop.eup %4319 }
0x3f21   :  { %3391 = vrot.lane.b32.xlu1 %v4320_v58, %s4572_s12 }
0x3f22   :  { %v4322_v43 = vpop.eup %4321 }
0x3f23   :  { %v3372_v36 = vadd.f32 1.0, %v4322_v43 }
0x3f25   :  { %4323 = vrcp.f32 %v3372_v36  ;;  %v3384_v11 = vand.u32 2147483648, %v3372_v36  ;;  %vm3378_vm6 = vweird.f32 %v3372_v36  ;;  %v3382_v9 = vand.u32 2147483647, %v3372_v36 }
0x3f27   :  { %v3385_v17 = vor.u32 1.1754944e-38, %v3384_v11  ;;  %vm3383_vm5 = vcmp.eq.f32.partialorder %v3382_v9, 8.507059e+37 }
0x3f2b   :  { %v4324_v50 = vpop.eup %4323 }
0x3f2c   :  { %v3374_v51 = vmul.f32 %v4324_v50, %v3372_v36  ;;  %vm3379_vm13 = vweird.f32 %v4324_v50 }
0x3f2d   :  { %vm3380_vm0 = vmor %vm3378_vm6, %vm3379_vm13  ;;  %vm6338_vm6 = vcmp.eq.s32.totalorder %v5517_v55, 1 }
0x3f2e   :  { %v3375_v40 = vsub.f32 1.0, %v3374_v51  ;;  %vm6337_vm13 = vmmov %vm6336_vm7 }
0x3f30   :  { %v3376_v28 = vmul.f32 %v4324_v50, %v3375_v40 }
0x3f32   :  { %v3377_v1 = vadd.f32 %v4324_v50, %v3376_v28 }
0x3f34   :  { %v3381_v29 = vsel %vm3380_vm0, %v4324_v50, %v3377_v1 }
0x3f35   :  { %v3386_v16 = vsel %vm3383_vm5, %v3385_v17, %v3381_v29 }
0x3f36   :  { %v3389_v5 = vmul.f32 %v3386_v16, %v3323_v39 }
0x3f93   :  { %v3392_v41 = vpop.permute.xlu1 %3391 }
0x3f94   :  { %v3394_v4 = vmul.f32 %v3392_v41, %v3386_v16 }
0x3f96   :  { %3396 = vrot.lane.b32.xlu2 %v3394_v4, %s4572_s12 }
0x3ff0   :  { %v3397_v61 = vpop.permute.xlu2 %3396 }
0x3ff1   :  { %v3399_v62 = vadd.f32 %v3397_v61, %v3389_v5 }
0x3ff3   :  { %4325 = vtanh.f32 %v3399_v62  ;;  %v3407_v50 = vsel %vm6337_vm13, %v3399_v62, %v3323_v39 }
0x3ff9   :  { %v4326_v15 = vpop.eup %4325 }
0x3ffa   :  { %3402 = vrot.lane.b32.xlu0 %v4326_v15, %s4572_s12 }
0x406c   :  { %v3403_v60 = vpop.permute.xlu0 %3402 }
0x406d   :  { %v3405_v59 = vmul.f32 %v3403_v60, %v3386_v16 }
0x406f   :  { %v6101_v8 = vsel %vm6336_vm7, %v3405_v59, %v6082_v13 }
0x4070   :  { %3422 = vrot.lane.b32.xlu2 %v6101_v8, %s4574_s5  ;;  %3419 = vrot.lane.b32.xlu1 %v6101_v8, %s4575_s27 }
0x40ca   :  { %v3423_v14 = vpop.permute.xlu2 %3422 }
0x40e2   :  { %v3420_v24 = vpop.permute.xlu1 %3419 }
0x40e3   :  { %v3425_v6 = vsel %vm1096_vm12, %v3420_v24, %v3423_v14 }
0x40e4   :  { %v3426_v26 = vsel %vm5149_vm14, %v3425_v6, 0.0 }
0x40e5   :  { %3971 = vmatmul.msk.f32.vlgmr.msrb.gmra.mxu3 %vm1021_vm15, %v3426_v26 }
0x4168   :  { %v3452_v20 = vpop.f32.mrf.mxu3 }
0x4169   :  { %v3453_v31 = vadd.f32 %v3452_v20, %v5832_v37 }
0x416b   :  { %4327 = vtanh.f32 %v3453_v31  ;;  %v3972_v25 = vmul.f32 -1.442695, %v3453_v31 }
0x416d   :  { %4329 = vpow2.f32 %v3972_v25 }
0x4171   :  { %v4328_v33 = vpop.eup %4327 }
0x4172   :  { %3477 = vrot.lane.b32.xlu0 %v4328_v33, %s4572_s12 }
0x4173   :  { %v4330_v63 = vpop.eup %4329 }
0x4174   :  { %v3458_v21 = vadd.f32 1.0, %v4330_v63 }
0x4176   :  { %4331 = vrcp.f32 %v3458_v21  ;;  %v3470_v46 = vand.u32 2147483648, %v3458_v21  ;;  %vm3464_vm9 = vweird.f32 %v3458_v21  ;;  %v3468_v3 = vand.u32 2147483647, %v3458_v21 }
0x4178   :  { %v3471_v58 = vor.u32 1.1754944e-38, %v3470_v46  ;;  %vm3469_vm10 = vcmp.eq.f32.partialorder %v3468_v3, 8.507059e+37 }
0x417c   :  { %v4332_v54 = vpop.eup %4331 }
0x417d   :  { %v3460_v27 = vmul.f32 %v4332_v54, %v3458_v21  ;;  %vm3465_vm8 = vweird.f32 %v4332_v54 }
0x417e   :  { %vm3466_vm3 = vmor %vm3464_vm9, %vm3465_vm8  ;;  %vm6340_vm9 = vcmp.eq.s32.totalorder %v5544_v44, 1 }
0x417f   :  { %v3461_v42 = vsub.f32 1.0, %v3460_v27  ;;  %vm6339_vm8 = vmmov %vm6338_vm6 }
0x4181   :  { %v3462_v48 = vmul.f32 %v4332_v54, %v3461_v42 }
0x4183   :  { %v3463_v19 = vadd.f32 %v4332_v54, %v3462_v48 }
0x4185   :  { %v3467_v37 = vsel %vm3466_vm3, %v4332_v54, %v3463_v19 }
0x4186   :  { %v3472_v43 = vsel %vm3469_vm10, %v3471_v58, %v3467_v37 }
0x4187   :  { %v3475_v51 = vmul.f32 %v3472_v43, %v3407_v50 }
0x41e4   :  { %v3478_v52 = vpop.permute.xlu0 %3477 }
0x41e5   :  { %v3480_v36 = vmul.f32 %v3478_v52, %v3472_v43 }
0x41e7   :  { %3482 = vrot.lane.b32.xlu1 %v3480_v36, %s4572_s12 }
0x4259   :  { %v3483_v40 = vpop.permute.xlu1 %3482 }
0x425a   :  { %v3485_v28 = vadd.f32 %v3483_v40, %v3475_v51 }
0x425c   :  { %4333 = vtanh.f32 %v3485_v28  ;;  %v3493_v21 = vsel %vm6339_vm8, %v3485_v28, %v3407_v50 }
0x4262   :  { %v4334_v1 = vpop.eup %4333 }
0x4263   :  { %3488 = vrot.lane.b32.xlu2 %v4334_v1, %s4572_s12 }
0x42bd   :  { %v3489_v11 = vpop.permute.xlu2 %3488 }
0x42be   :  { %v3491_v9 = vmul.f32 %v3489_v11, %v3472_v43 }
0x42c0   :  { %v6120_v29 = vsel %vm6338_vm6, %v3491_v9, %v6101_v8 }
0x42c1   :  { %3508 = vrot.lane.b32.xlu1 %v6120_v29, %s4574_s5  ;;  %3505 = vrot.lane.b32.xlu0 %v6120_v29, %s4575_s27 }
0x4333   :  { %v3509_v12 = vpop.permute.xlu1 %3508  ;;  %v3506_v17 = vpop.permute.xlu0 %3505 }
0x4334   :  { %v3511_v41 = vsel %vm1096_vm12, %v3506_v17, %v3509_v12 }
0x4335   :  { %v3512_v16 = vsel %vm5149_vm14, %v3511_v41, 0.0 }
0x4336   :  { %3973 = vmatmul.msk.f32.vlgmr.msrb.gmra.mxu0 %vm1021_vm15, %v3512_v16 }
0x43b3   :  { %v3537_v4 = vpop.f32.mrf.mxu0 }
0x43b4   :  { %v3538_v39 = vadd.f32 %v3537_v4, %v5838_v10 }
0x43b6   :  { %4335 = vtanh.f32 %v3538_v39  ;;  %v3974_v61 = vmul.f32 -1.442695, %v3538_v39 }
0x43b8   :  { %4337 = vpow2.f32 %v3974_v61 }
0x43bc   :  { %v4336_v5 = vpop.eup %4335 }
0x43bd   :  { %3562 = vrot.lane.b32.xlu2 %v4336_v5, %s4572_s12 }
0x43be   :  { %v4338_v62 = vpop.eup %4337 }
0x43bf   :  { %v3543_v15 = vadd.f32 1.0, %v4338_v62 }
0x43c1   :  { %4339 = vrcp.f32 %v3543_v15  ;;  %v3555_v26 = vand.u32 2147483648, %v3543_v15  ;;  %vm3549_vm5 = vweird.f32 %v3543_v15  ;;  %v3553_v20 = vand.u32 2147483647, %v3543_v15 }
0x43c3   :  { %v3556_v31 = vor.u32 1.1754944e-38, %v3555_v26  ;;  %vm3554_vm7 = vcmp.eq.f32.partialorder %v3553_v20, 8.507059e+37 }
0x43c7   :  { %v4340_v60 = vpop.eup %4339 }
0x43c8   :  { %v3545_v59 = vmul.f32 %v4340_v60, %v3543_v15  ;;  %vm3550_vm0 = vweird.f32 %v4340_v60 }
0x43c9   :  { %vm3551_vm2 = vmor %vm3549_vm5, %vm3550_vm0 }
0x43ca   :  { %v3546_v14 = vsub.f32 1.0, %v3545_v59  ;;  %vm6341_vm0 = vmmov %vm6340_vm9 }
0x43cc   :  { %v3547_v24 = vmul.f32 %v4340_v60, %v3546_v14 }
0x43ce   :  { %v3548_v6 = vadd.f32 %v4340_v60, %v3547_v24 }
0x43d0   :  { %v3552_v10 = vsel %vm3551_vm2, %v4340_v60, %v3548_v6 }
0x43d1   :  { %v3557_v25 = vsel %vm3554_vm7, %v3556_v31, %v3552_v10 }
0x43d2   :  { %v3560_v54 = vmul.f32 %v3557_v25, %v3493_v21 }
0x4417   :  { %v3563_v33 = vpop.permute.xlu2 %3562 }
0x4418   :  { %v3565_v63 = vmul.f32 %v3563_v33, %v3557_v25 }
0x441a   :  { %3567 = vrot.lane.b32.xlu0 %v3565_v63, %s4572_s12 }
0x448c   :  { %v3568_v27 = vpop.permute.xlu0 %3567 }
0x448d   :  { %v3570_v42 = vadd.f32 %v3568_v27, %v3560_v54 }
0x448f   :  { %4341 = vtanh.f32 %v3570_v42  ;;  %v3578_v62 = vsel %vm6341_vm0, %v3570_v42, %v3493_v21 }
0x4495   :  { %v4342_v48 = vpop.eup %4341 }
0x4496   :  { %3573 = vrot.lane.b32.xlu1 %v4342_v48, %s4572_s12 }
0x4508   :  { %v3574_v19 = vpop.permute.xlu1 %3573 }
0x4509   :  { %v3576_v46 = vmul.f32 %v3574_v19, %v3557_v25 }
0x450b   :  { %v6139_v3 = vsel %vm6340_vm9, %v3576_v46, %v6120_v29 }
0x450c   :  { %3593 = vrot.lane.b32.xlu0 %v6139_v3, %s4574_s5  ;;  %3590 = vrot.lane.b32.xlu2 %v6139_v3, %s4575_s27 }
0x4566   :  { %v3591_v55 = vpop.permute.xlu2 %3590 }
0x457e   :  { %v3594_v37 = vpop.permute.xlu0 %3593 }
0x457f   :  { %v3596_v58 = vsel %vm1096_vm12, %v3591_v55, %v3594_v37 }
0x4580   :  { %v3597_v52 = vsel %vm5149_vm14, %v3596_v58, 0.0 }
0x4581   :  { %3975 = vmatmul.msk.f32.vlgmr.msrb.gmra.mxu1 %vm1021_vm15, %v3597_v52 }
0x45fe   :  { %v3624_v43 = vpop.f32.mrf.mxu1 }
0x45ff   :  { %v3625_v36 = vadd.f32 %v3624_v43, %v5846_v57 }
0x4601   :  { %4343 = vtanh.f32 %v3625_v36  ;;  %v3976_v51 = vmul.f32 -1.442695, %v3625_v36 }
0x4603   :  { %4345 = vpow2.f32 %v3976_v51 }
0x4607   :  { %v4344_v50 = vpop.eup %4343 }
0x4608   :  { %3649 = vrot.lane.b32.xlu1 %v4344_v50, %s4572_s12 }
0x4609   :  { %v4346_v40 = vpop.eup %4345 }
0x460a   :  { %v3630_v28 = vadd.f32 1.0, %v4346_v40 }
0x460c   :  { %4347 = vrcp.f32 %v3630_v28  ;;  %v3642_v41 = vand.u32 2147483648, %v3630_v28  ;;  %vm3636_vm10 = vweird.f32 %v3630_v28  ;;  %v3640_v16 = vand.u32 2147483647, %v3630_v28 }
0x460e   :  { %v3643_v4 = vor.u32 1.1754944e-38, %v3642_v41  ;;  %vm3641_vm6 = vcmp.eq.f32.partialorder %v3640_v16, 8.507059e+37 }
0x4612   :  { %v4348_v1 = vpop.eup %4347 }
0x4613   :  { %v3632_v11 = vmul.f32 %v4348_v1, %v3630_v28  ;;  %vm3637_vm3 = vweird.f32 %v4348_v1 }
0x4614   :  { %vm3638_vm13 = vmor %vm3636_vm10, %vm3637_vm3 }
0x4615   :  { %v3633_v9 = vsub.f32 1.0, %v3632_v11 }
0x4617   :  { %v3634_v12 = vmul.f32 %v4348_v1, %v3633_v9 }
0x4619   :  { %v3635_v17 = vadd.f32 %v4348_v1, %v3634_v12 }
0x461b   :  { %v3639_v57 = vsel %vm3638_vm13, %v4348_v1, %v3635_v17  ;;  %v4378_v17 = vld [vmem:[%s6319_s26] sm:$0x3] }
0x461c   :  { %v3644_v5 = vsel %vm3641_vm6, %v3643_v4, %v3639_v57  ;;  %v6183_v41 = vadd.s32 4294967295, %v4378_v17  ;;  %v2730_v57 = vrot.slane %v5912_v35, 2  ;;  %v2816_v4 = vrot.slane %v5939_v53, 2 }
0x461d   :  { %v3647_v15 = vmul.f32 %v3644_v5, %v3578_v62 }
0x461e   :  { %vm978_vm9 = vcmp.eq.s32.totalorder %v6183_v41, 10  ;;  %vm963_vm3 = vcmp.eq.s32.totalorder %v6183_v41, 15  ;;  %vm984_vm10 = vcmp.eq.s32.totalorder %v6183_v41, 8  ;;  %vm993_vm13 = vcmp.eq.s32.totalorder %v6183_v41, 5 }
0x461f   :  { %vm1002_vm6 = vcmp.eq.s32.totalorder %v6183_v41, 2 }
0x467a   :  { %v3650_v39 = vpop.permute.xlu1 %3649 }
0x467b   :  { %v3652_v61 = vmul.f32 %v3650_v39, %v3644_v5  ;;  %v2982_v39 = vsel %vm978_vm9, 1, %v4567_v2  ;;  %vm990_vm9 = vcmp.eq.s32.totalorder %v6183_v41, 6 }
0x467d   :  { %3654 = vrot.lane.b32.xlu2 %v3652_v61, %s4572_s12 }
0x46d7   :  { %v3655_v60 = vpop.permute.xlu2 %3654 }
0x46d8   :  { %v3657_v59 = vadd.f32 %v3655_v60, %v3647_v15 }
0x46da   :  { %4349 = vtanh.f32 %v3657_v59  ;;  %v6173_v51 = vsel %vm2135_vm11, %v3657_v59, %v3578_v62 }
0x46e0   :  { %v4350_v14 = vpop.eup %4349 }
0x46e1   :  { %3660 = vrot.lane.b32.xlu0 %v4350_v14, %s4572_s12  ;;  %v2646_v14 = vrot.slane %v5885_v30, 2  ;;  %v3152_v30 = vsel %vm984_vm10, 1, %v4567_v2  ;;  %vm987_vm10 = vcmp.eq.s32.totalorder %v6183_v41, 7 }
0x4753   :  { %v3661_v24 = vpop.permute.xlu0 %3660 }
0x4754   :  { %v3663_v6 = vmul.f32 %v3661_v24, %v3644_v5  ;;  %v3072_v5 = vrot.slane %v6020_v0, 2  ;;  %v2553_v0 = vsel %vm963_vm3, 1, %v4567_v2  ;;  %v2988_v24 = vrot.slane %v5993_v23, 2 }
0x4755   :  { %vm999_vm3 = vcmp.eq.s32.totalorder %v6183_v41, 3 }
0x4756   :  { %v6158_v26 = vsel %vm2135_vm11, %v3663_v6, %v6139_v3  ;;  %vm966_vm11 = vcmp.eq.s32.totalorder %v6183_v41, 14 }
0x4757   :  { %3680 = vrot.lane.b32.xlu2 %v6158_v26, %s4574_s5  ;;  %3677 = vrot.lane.b32.xlu1 %v6158_v26, %s4575_s27  ;;  %v2640_v16 = vsel %vm966_vm11, 1, %v4567_v2  ;;  %vm981_vm11 = vcmp.eq.s32.totalorder %v6183_v41, 9 }
0x47b1   :  { %v3681_v44 = vpop.permute.xlu2 %3680 }
0x47c9   :  { %v3678_v20 = vpop.permute.xlu1 %3677 }
0x47ca   :  { %v3683_v10 = vsel %vm1096_vm12, %v3678_v20, %v3681_v44  ;;  %v3243_v44 = vrot.slane %v6063_v22, 2  ;;  %v3666_v22 = vsel %vm1002_vm6, 1, %v4567_v2 }
0x47cb   :  { %v3684_v31 = vsel %vm5149_vm14, %v3683_v10, 0.0 }
0x47cc   :  { %3977 = vmatmul.msk.f32.vlgmr.msra.gmra.mxu2 %vm1021_vm15, %v3684_v31  ;;  %v3408_v31 = vsel %vm993_vm13, 1, %v4567_v2 }
0x484f   :  { %v3708_v33 = vpop.f32.mrf.mxu2 }
0x4850   :  { %v3709_v25 = vadd.f32 %v3708_v33, %v5849_v45  ;;  %v3500_v33 = vrot.slane %v6120_v29, 2 }
0x4852   :  { %4351 = vtanh.f32 %v3709_v25  ;;  %v3978_v21 = vmul.f32 -1.442695, %v3709_v25 }
0x4854   :  { %4353 = vpow2.f32 %v3978_v21 }
0x4858   :  { %v4352_v63 = vpop.eup %4351 }
0x4859   :  { %3733 = vrot.lane.b32.xlu0 %v4352_v63, %s4572_s12 }
0x485a   :  { %v4354_v54 = vpop.eup %4353 }
0x485b   :  { %v3714_v27 = vadd.f32 1.0, %v4354_v54 }
0x485d   :  { %4355 = vrcp.f32 %v3714_v27  ;;  %v3726_v37 = vand.u32 2147483648, %v3714_v27  ;;  %vm3720_vm2 = vweird.f32 %v3714_v27  ;;  %v3724_v58 = vand.u32 2147483647, %v3714_v27 }
0x485f   :  { %v3727_v52 = vor.u32 1.1754944e-38, %v3726_v37  ;;  %vm3725_vm8 = vcmp.eq.f32.partialorder %v3724_v58, 8.507059e+37  ;;  %v2559_v58 = vrot.slane %v5859_v34, 2  ;;  %v3324_v34 = vsel %vm990_vm9, 1, %v4567_v2 }
0x4863   :  { %v4356_v42 = vpop.eup %4355 }
0x4864   :  { %v3716_v48 = vmul.f32 %v4356_v42, %v3714_v27  ;;  %vm3721_vm5 = vweird.f32 %v4356_v42 }
0x4865   :  { %vm3722_vm7 = vmor %vm3720_vm2, %vm3721_vm5 }
0x4866   :  { %v3717_v19 = vsub.f32 1.0, %v3716_v48 }
0x4868   :  { %v3718_v46 = vmul.f32 %v4356_v42, %v3717_v19 }
0x486a   :  { %v3719_v55 = vadd.f32 %v4356_v42, %v3718_v46 }
0x486c   :  { %v3723_v45 = vsel %vm3722_vm7, %v4356_v42, %v3719_v55 }
0x486d   :  { %v3728_v36 = vsel %vm3725_vm8, %v3727_v52, %v3723_v45  ;;  %vm969_vm8 = vcmp.eq.s32.totalorder %v6183_v41, 13  ;;  %v2901_v52 = vrot.slane %v5966_v56, 2  ;;  %v3579_v56 = vsel %vm999_vm3, 1, %v4567_v2 }
0x486e   :  { %v3731_v40 = vmul.f32 %v3728_v36, %v6173_v51  ;;  %v2724_v45 = vsel %vm969_vm8, 1, %v4567_v2 }
0x48cb   :  { %v3734_v43 = vpop.permute.xlu0 %3733 }
0x48cc   :  { %v3736_v50 = vmul.f32 %v3734_v43, %v3728_v36  ;;  %v3066_v43 = vsel %vm981_vm11, 1, %v4567_v2 }
0x48ce   :  { %3738 = vrot.lane.b32.xlu1 %v3736_v50, %s4572_s12  ;;  %v3414_v50 = vrot.slane %v6101_v8, 2 }
0x4940   :  { %v3739_v28 = vpop.permute.xlu1 %3738 }
0x4941   :  { %v6176_v1 = vadd.f32 %v3739_v28, %v3731_v40  ;;  %v3672_v40 = vrot.slane %v6158_v26, 2 }
0x4943   :  { %4357 = vtanh.f32 %v6176_v1 }
0x4949   :  { %v4358_v11 = vpop.eup %4357 }
0x494a   :  { %3744 = vrot.lane.b32.xlu2 %v4358_v11, %s4572_s12 }
0x49a4   :  { %v3745_v9 = vpop.permute.xlu2 %3744 }
0x49a5   :  { %v3747_v12 = vmul.f32 %v3745_v9, %v3728_v36  ;;  %v3158_v36 = vrot.slane %v6044_v18, 2  ;;  %v3749_v9 = vsel %vm2214_vm4, %v6176_v1, %v6173_v51  ;;  %v3237_v51 = vsel %vm987_vm10, 1, %v4567_v2 }
0x49a7   :  { %v6188_v47 = vsel %vm2214_vm4, %v3747_v12, %v6158_v26 }
0x49a8   :  { %3764 = vrot.lane.b32.xlu1 %v6188_v47, %s4574_s5  ;;  %3761 = vrot.lane.b32.xlu0 %v6188_v47, %s4575_s27  ;;  %v3756_v48 = vrot.slane %v6188_v47, 2 }
0x49b0   :  { %2642 = vperm.xlu1 %4030, %v2640_v16  }
0x49b8   :  { %2731 = vrot.lane.b32.xlu1 %v2730_v57, %s4575_s27 }
0x49c0   :  { %2817 = vrot.lane.b32.xlu1 %v2816_v4, %s4575_s27 }
0x49c8   :  { %2984 = vperm.xlu1 %4030, %v2982_v39  }
0x49d0   :  { %3073 = vrot.lane.b32.xlu1 %v3072_v5, %s4575_s27 }
0x4a1a   :  { %v3765_v61 = vpop.permute.xlu1 %3764  ;;  %v3762_v62 = vpop.permute.xlu0 %3761 }
0x4a1b   :  { %v3767_v15 = vsel %vm1096_vm12, %v3762_v62, %v3765_v61 }
0x4a1c   :  { %v3768_v35 = vsel %vm5149_vm14, %v3767_v15, 0.0  ;;  %vm972_vm14 = vcmp.eq.s32.totalorder %v6183_v41, 12 }
0x4a1d   :  { %3979 = vmatmul.msk.f32.vlgmr.msra.gmra.mxu3 %vm1021_vm15, %v3768_v35  ;;  %v2810_v38 = vsel %vm972_vm14, 1, %v4567_v2  ;;  %vm975_vm15 = vcmp.eq.s32.totalorder %v6183_v41, 11 }
0x4a22   :  { %v2643_v28 = vpop.permute.xlu1 %2642 }
0x4a23   :  { %vm2644_vm14 = vcmp.eq.s32.totalorder %v2643_v28, 1 }
0x4a2a   :  { %v2732_v16 = vpop.permute.xlu1 %2731 }
0x4a32   :  { %v2818_v61 = vpop.permute.xlu1 %2817 }
0x4a3a   :  { %v2985_v15 = vpop.permute.xlu1 %2984 }
0x4a3b   :  { %vm2986_vm13 = vcmp.eq.s32.totalorder %v2985_v15, 1 }
0x4aa0   :  { %v3794_v53 = vpop.f32.mrf.mxu3 }
0x4aa1   :  { %v3795_v60 = vadd.f32 %v3794_v53, %v5852_v49  ;;  %v2895_v49 = vsel %vm975_vm15, 1, %v4567_v2 }
0x4aa3   :  { %4359 = vtanh.f32 %v3795_v60  ;;  %v3980_v6 = vmul.f32 -1.442695, %v3795_v60  ;;  %v3330_v60 = vrot.slane %v6082_v13, 2 }
0x4aa5   :  { %4361 = vpow2.f32 %v3980_v6  ;;  %v3074_v6 = vpop.permute.xlu1 %3073 }
0x4aa9   :  { %v4360_v59 = vpop.eup %4359 }
0x4aaa   :  { %3819 = vrot.lane.b32.xlu2 %v4360_v59, %s4572_s12 }
0x4aab   :  { %v4362_v20 = vpop.eup %4361 }
0x4aac   :  { %v3800_v10 = vadd.f32 1.0, %v4362_v20 }
0x4aae   :  { %4363 = vrcp.f32 %v3800_v10  ;;  %v3812_v27 = vand.u32 2147483648, %v3800_v10  ;;  %vm3806_vm5 = vweird.f32 %v3800_v10  ;;  %v3810_v42 = vand.u32 2147483647, %v3800_v10 }
0x4ab0   :  { %v3813_v29 = vor.u32 1.1754944e-38, %v3812_v27  ;;  %vm3811_vm7 = vcmp.eq.f32.partialorder %v3810_v42, 8.507059e+37 }
0x4ab2   :  { %2555 = vperm.xlu2 %4029, %v2553_v0  }
0x4ab4   :  { %v4364_v23 = vpop.eup %4363 }
0x4ab5   :  { %v3802_v25 = vmul.f32 %v4364_v23, %v3800_v10  ;;  %vm3807_vm0 = vweird.f32 %v4364_v23 }
0x4ab6   :  { %vm3808_vm2 = vmor %vm3806_vm5, %vm3807_vm0  ;;  %vm996_vm5 = vcmp.eq.s32.totalorder %v6183_v41, 4 }
0x4ab7   :  { %v3803_v63 = vsub.f32 1.0, %v3802_v25 }
0x4ab9   :  { %v3804_v21 = vmul.f32 %v4364_v23, %v3803_v63 }
0x4aba   :  { %2647 = vrot.lane.b32.xlu2 %v2646_v14, %s4575_s27 }
0x4abb   :  { %v3805_v54 = vadd.f32 %v4364_v23, %v3804_v21 }
0x4abd   :  { %v3809_v19 = vsel %vm3808_vm2, %v4364_v23, %v3805_v54  ;;  %vm1008_vm2 = vcmp.eq.s32.totalorder %v6183_v41, 0 }
0x4abe   :  { %v6232_v55 = vsel %vm3811_vm7, %v3813_v29, %v3809_v19  ;;  %vm1005_vm7 = vcmp.eq.s32.totalorder %v6183_v41, 1 }
0x4abf   :  { %v3817_v8 = vmul.f32 %v6232_v55, %v3749_v9  ;;  %v3750_v13 = vsel %vm1005_vm7, 1, %v4567_v2 }
0x4ac2   :  { %2812 = vperm.xlu2 %4029, %v2810_v38   ;;  %v3494_v38 = vsel %vm996_vm5, 1, %v4567_v2 }
0x4aca   :  { %2897 = vperm.xlu2 %4029, %v2895_v49   ;;  %v3835_v49 = vsel %vm1008_vm2, 1, %v4567_v2 }
0x4ad2   :  { %2989 = vrot.lane.b32.xlu2 %v2988_v24, %s4575_s27  ;;  %v3585_v24 = vrot.slane %v6139_v3, 2 }
0x4ada   :  { %3154 = vperm.xlu2 %4029, %v3152_v30  }
0x4ae2   :  { %3244 = vrot.lane.b32.xlu2 %v3243_v44, %s4575_s27 }
0x4aea   :  { %3410 = vperm.xlu2 %4029, %v3408_v31  }
0x4af2   :  { %3501 = vrot.lane.b32.xlu2 %v3500_v33, %s4575_s27 }
0x4afa   :  { %3668 = vperm.xlu2 %4029, %v3666_v22  }
0x4b02   :  { %3757 = vrot.lane.b32.xlu2 %v3756_v48, %s4575_s27 }
0x4b04   :  { %v3820_v46 = vpop.permute.xlu2 %3819 }
0x4b05   :  { %v3822_v37 = vmul.f32 %v3820_v46, %v6232_v55 }
0x4b07   :  { %3824 = vrot.lane.b32.xlu0 %v3822_v37, %s4572_s12 }
0x4b0c   :  { %v2556_v18 = vpop.permute.xlu2 %2555 }
0x4b0d   :  { %vm2557_vm15 = vcmp.eq.s32.totalorder %v2556_v18, 1 }
0x4b0f   :  { %2560 = vrot.lane.b32.xlu0 %v2559_v58, %s4575_s27 }
0x4b14   :  { %v2648_v11 = vpop.permute.xlu2 %2647 }
0x4b17   :  { %2726 = vperm.xlu0 %4031, %v2724_v45  }
0x4b1c   :  { %v2813_v57 = vpop.permute.xlu2 %2812 }
0x4b1d   :  { %vm2814_vm6 = vcmp.eq.s32.totalorder %v2813_v57, 1 }
0x4b1f   :  { %2902 = vrot.lane.b32.xlu0 %v2901_v52, %s4575_s27 }
0x4b24   :  { %v2898_v7 = vpop.permute.xlu2 %2897 }
0x4b25   :  { %vm2899_vm0 = vcmp.eq.s32.totalorder %v2898_v7, 1 }
0x4b27   :  { %3068 = vperm.xlu0 %4031, %v3066_v43  }
0x4b2c   :  { %v2990_v59 = vpop.permute.xlu2 %2989 }
0x4b2f   :  { %3159 = vrot.lane.b32.xlu0 %v3158_v36, %s4575_s27 }
0x4b34   :  { %v3155_v31 = vpop.permute.xlu2 %3154 }
0x4b35   :  { %vm3156_vm11 = vcmp.eq.s32.totalorder %v3155_v31, 1 }
0x4b37   :  { %3326 = vperm.xlu0 %4031, %v3324_v34  }
0x4b3c   :  { %v3245_v33 = vpop.permute.xlu2 %3244 }
0x4b3f   :  { %3415 = vrot.lane.b32.xlu0 %v3414_v50, %s4575_s27 }
0x4b44   :  { %v3411_v63 = vpop.permute.xlu2 %3410 }
0x4b47   :  { %3581 = vperm.xlu0 %4031, %v3579_v56  }
0x4b4c   :  { %v3502_v54 = vpop.permute.xlu2 %3501 }
0x4b4f   :  { %3673 = vrot.lane.b32.xlu0 %v3672_v40, %s4575_s27  ;;  %v4037_v40 = vld [vmem:[#allocation13] ss:$0 sm:$0xff] }
0x4b57   :  { %3837 = vperm.xlu0 %4031, %v3835_v49  }
0x4b79   :  { %v3825_v12 = vpop.permute.xlu0 %3824 }
0x4b7a   :  { %v3827_v17 = vadd.f32 %v3825_v12, %v3817_v8  ;;  %v4038_v12 = vld [vmem:[#allocation2] ss:$0 sm:$0xff] }
0x4b7c   :  { %4365 = vtanh.f32 %v3827_v17 }
0x4b81   :  { %v2561_v26 = vpop.permute.xlu0 %2560 }
0x4b82   :  { %v4366_v4 = vpop.eup %4365  ;;  %v2563_v39 = vsel %vm2557_vm15, %v2561_v26, 0.0 }
0x4b83   :  { %v2650_v5 = vsel %vm2644_vm14, %v2648_v11, %v2563_v39  ;;  %3830 = vrot.lane.b32.xlu1 %v4366_v4, %s4572_s12  ;;  %vm3412_vm14 = vcmp.eq.s32.totalorder %v3411_v63, 1 }
0x4b89   :  { %v2727_v1 = vpop.permute.xlu0 %2726 }
0x4b8a   :  { %vm2728_vm4 = vcmp.eq.s32.totalorder %v2727_v1, 1 }
0x4b8b   :  { %3239 = vperm.xlu1 %4030, %v3237_v51   ;;  %v2734_v62 = vsel %vm2728_vm4, %v2732_v16, %v2650_v5 }
0x4b8c   :  { %v2820_v35 = vsel %vm2814_vm6, %v2818_v61, %v2734_v62  ;;  %vm3859_vm6 = vcmask 517120  }
0x4b91   :  { %v2903_v53 = vpop.permute.xlu0 %2902 }
0x4b92   :  { %v2905_v0 = vsel %vm2899_vm0, %v2903_v53, %v2820_v35  ;;  %vm3868_vm0 = vcmask 1024  }
0x4b93   :  { %v2992_v14 = vsel %vm2986_vm13, %v2990_v59, %v2905_v0  ;;  %3331 = vrot.lane.b32.xlu1 %v3330_v60, %s4575_s27 }
0x4b99   :  { %v3069_v3 = vpop.permute.xlu0 %3068 }
0x4b9a   :  { %vm3070_vm8 = vcmp.eq.s32.totalorder %v3069_v3, 1 }
0x4b9b   :  { %3496 = vperm.xlu1 %4030, %v3494_v38   ;;  %v3076_v32 = vsel %vm3070_vm8, %v3074_v6, %v2992_v14 }
0x4ba1   :  { %v3160_v23 = vpop.permute.xlu0 %3159 }
0x4ba2   :  { %v3162_v48 = vsel %vm3156_vm11, %v3160_v23, %v3076_v32 }
0x4ba3   :  { %3586 = vrot.lane.b32.xlu1 %v3585_v24, %s4575_s27 }
0x4ba9   :  { %v3327_v2 = vpop.permute.xlu0 %3326 }
0x4baa   :  { %vm3328_vm9 = vcmp.eq.s32.totalorder %v3327_v2, 1 }
0x4bab   :  { %3752 = vperm.xlu1 %4030, %v3750_v13  }
0x4bb1   :  { %v3416_v22 = vpop.permute.xlu0 %3415 }
0x4bb9   :  { %v3582_v27 = vpop.permute.xlu0 %3581 }
0x4bba   :  { %vm3583_vm15 = vcmp.eq.s32.totalorder %v3582_v27, 1 }
0x4bc1   :  { %v3674_v19 = vpop.permute.xlu0 %3673 }
0x4bc9   :  { %v3838_v52 = vpop.permute.xlu0 %3837 }
0x4bca   :  { %vm3839_vm13 = vcmp.eq.s32.totalorder %v3838_v52, 1 }
0x4bf5   :  { %v3831_v30 = vpop.permute.xlu1 %3830 }
0x4bf6   :  { %v3833_v44 = vmul.f32 %v3831_v30, %v6232_v55 }
0x4bf8   :  { %v3834_v20 = vsel %vm2295_vm1, %v3833_v44, %v6188_v47  ;;  %v3669_v47 = vpop.permute.xlu2 %3668 }
0x4bf9   :  { %v3841_v10 = vrot.slane %v3834_v20, 2  ;;  %3846 = vrot.lane.b32.xlu2 %v3834_v20, %s4575_s27  ;;  %vm3670_vm4 = vcmp.eq.s32.totalorder %v3669_v47, 1 }
0x4bfb   :  { %3842 = vrot.lane.b32.xlu1 %v3841_v10, %s4575_s27 }
0x4bfd   :  { %v3240_v41 = vpop.permute.xlu1 %3239 }
0x4bfe   :  { %vm3241_vm1 = vcmp.eq.s32.totalorder %v3240_v41, 1 }
0x4bff   :  { %v3247_v29 = vsel %vm3241_vm1, %v3245_v33, %v3162_v48 }
0x4c00   :  { %v3758_v43 = vpop.permute.xlu2 %3757 }
0x4c05   :  { %v3332_v25 = vpop.permute.xlu1 %3331 }
0x4c06   :  { %v3334_v46 = vsel %vm3328_vm9, %v3332_v25, %v3247_v29 }
0x4c07   :  { %v3418_v37 = vsel %vm3412_vm14, %v3416_v22, %v3334_v46 }
0x4c0d   :  { %v3497_v21 = vpop.permute.xlu1 %3496 }
0x4c0e   :  { %vm3498_vm3 = vcmp.eq.s32.totalorder %v3497_v21, 1 }
0x4c0f   :  { %v3504_v58 = vsel %vm3498_vm3, %v3502_v54, %v3418_v37 }
0x4c15   :  { %v3587_v42 = vpop.permute.xlu1 %3586 }
0x4c16   :  { %v3589_v45 = vsel %vm3583_vm15, %v3587_v42, %v3504_v58 }
0x4c17   :  { %v3676_v36 = vsel %vm3670_vm4, %v3674_v19, %v3589_v45 }
0x4c1d   :  { %v3753_v55 = vpop.permute.xlu1 %3752 }
0x4c1e   :  { %vm3754_vm10 = vcmp.eq.s32.totalorder %v3753_v55, 1 }
0x4c1f   :  { %v3760_v34 = vsel %vm3754_vm10, %v3758_v43, %v3676_v36 }
0x4c53   :  { %v3847_v18 = vpop.permute.xlu2 %3846 }
0x4c6d   :  { %v3843_v50 = vpop.permute.xlu1 %3842 }
0x4c6e   :  { %v3845_v56 = vsel %vm3839_vm13, %v3843_v50, %v3760_v34 }
0x4c6f   :  { %3850 = vrot.lane.b32.xlu0 %v3845_v56, %s4572_s12 }
0x4ce1   :  { %v3851_v28 = vpop.permute.xlu0 %3850 }
0x4ce2   :  { %v3853_v11 = vsel %vm1096_vm12, %v3847_v18, %v3851_v28 }
0x4ce3   :  { %v3858_v9 = vmul.f32 %v4037_v40, %v3853_v11 }
0x4ce5   :  { %v3860_v8 = vsel %vm3859_vm6, %v3858_v9, 0.0 }
0x4ce6   :  { %3861 = vadd.xlane.f32.xlu1 %v3860_v8 }
0x4d59   :  { %v3862_v17 = vpop.xlane.xlu1 %3861 }
0x4d5a   :  { %v3867_v16 = vadd.f32 %v4038_v12, %v3862_v17 }
0x4d5c   :  { %3869 = vst.msk [vmem:[%s6301_s18] sm:$0x3] %vm3868_vm0, %v3867_v16 }
0x4d5d   :  { %3874 = vsyncpa [#allocation4], 1 }
0x4d5e   :  { %3875 = vsyncpa [#allocation6], 1 }
0x4d5f   :  { %3876 = vsyncpa [#allocation9], 1 }
0x4d60   :  { %3877 = vsyncpa [#allocation12], 1 }

</bundles_post_ra>
